<compile_context>
chip_gen: v5e
topology: v5e:2x2
jax: 0.10.0
libtpu: 0.0.40
codegen_flags: <defaults>
</compile_context>

<pallas_src>
import functools

import jax
import jax.numpy as jnp
from jax.experimental import pallas as pl
from jax.experimental.pallas import tpu as pltpu

ACTIVATION = "relu"
WITH_VG = True
WITH_BN = True
BN_EPS = 1e-5
LANE = 128          # lane width; every narrow feature dim is zero-padded up to this
OUT_PAD = 128       # lane-dense output slab width; real logits are the first 10 columns


def _pad_dim(n):
    return ((n + LANE - 1) // LANE) * LANE


# ---------------------------------------------------------------------------
# Kernel
# ---------------------------------------------------------------------------
def _act(h, name):
    if name == "sigmoid":
        return jax.nn.sigmoid(h)
    if name == "relu":
        return jnp.maximum(h, 0.0)
    return jnp.tanh(h)


def make_mlp_kernel(op_seq, activation):
    """op_seq: static tuple of 'lin' / 'bn' / 'vg' / 'out' tags, 2 param refs per op.

    Kernel ref order: (x_ref, *param_refs, out_ref).  Parameters use constant
    index_maps so they are DMA'd once and stay VMEM-resident across batch tiles.
    """

    def kernel(*refs):
        x_ref = refs[0]
        out_ref = refs[-1]
        prefs = refs[1:-1]

        h = x_ref[...]  # (TB, 3072) f32 straight from HBM; cast to bf16 at each matmul
        idx = 0
        for op in op_seq:
            a_ref, b_ref = prefs[idx], prefs[idx + 1]
            idx += 2
            if op in ("lin", "out"):
                # bf16 operands -> MXU, f32 accumulation; bias + activation in f32.
                h = jnp.dot(h.astype(jnp.bfloat16), a_ref[...],
                            preferred_element_type=jnp.float32) + b_ref[...]
                if op == "lin":
                    h = _act(h, activation)
            elif op == "bn":
                # inference-mode BatchNorm folded to per-feature scale/shift;
                # activation applied again afterwards, exactly as in the PyTorch forward.
                h = _act(h * a_ref[...] + b_ref[...], activation)
            else:  # "vg": stacked (n, 128, 128) lane-padded layer chain
                for l in range(a_ref.shape[0]):
                    h = jnp.dot(h.astype(jnp.bfloat16), a_ref[l],
                                preferred_element_type=jnp.float32) + b_ref[l]
                    h = _act(h, activation)
        out_ref[...] = h.astype(out_ref.dtype)

    return kernel


# ---------------------------------------------------------------------------
# Parameter construction (deterministic, mirrors nn.Linear / BatchNorm1d shapes,
# zero-padded to 128 lanes on every narrow feature dimension)
# ---------------------------------------------------------------------------
def build_network(key, activation=ACTIVATION, with_vg=WITH_VG, with_bn=WITH_BN):
    op_seq = []
    params = []  # list of (arr, arr) pairs in forward order

    def init_w(din, dout):
        nonlocal key
        key, kw = jax.random.split(key)
        if activation == "relu":
            std = (2.0 / din) ** 0.5            # kaiming_normal_
        else:
            std = (2.0 / (din + dout)) ** 0.5   # xavier_normal_
        # PyTorch weight is (out, in); store its transpose (in, out) for h @ W.
        w = std * jax.random.normal(kw, (din, dout))
        # Lane-pad: padded input ROWS are zero (kill padded columns of h), padded output
        # COLUMNS are zero (padded h columns are exactly 0 pre-activation).
        w = jnp.pad(w, ((0, _pad_dim(din) - din), (0, _pad_dim(dout) - dout)))
        return w.astype(jnp.bfloat16)

    def linear(din, dout):
        op_seq.append("lin")
        params.append((init_w(din, dout), jnp.zeros((1, _pad_dim(dout)), jnp.float32)))

    def bn(c):
        # Inference-mode BatchNorm1d, fresh-module defaults:
        # gamma=1, beta=0, running_mean=0, running_var=1  ->  scale/shift fold.
        cp = _pad_dim(c)
        gamma = jnp.ones((1, c), jnp.float32)
        beta = jnp.zeros((1, c), jnp.float32)
        r_mean = jnp.zeros((1, c), jnp.float32)
        r_var = jnp.ones((1, c), jnp.float32)
        scale = gamma * jax.lax.rsqrt(r_var + BN_EPS)
        shift = beta - r_mean * scale
        scale = jnp.pad(scale, ((0, 0), (0, cp - c)), constant_values=1.0)
        shift = jnp.pad(shift, ((0, 0), (0, cp - c)))
        op_seq.append("bn")
        params.append((scale, shift))

    def vg_stack(n, c):
        ws = jnp.stack([init_w(c, c) for _ in range(n)])      # (n, 128, 128) bf16
        bs = jnp.zeros((n, 1, _pad_dim(c)), jnp.float32)
        op_seq.append("vg")
        params.append((ws, bs))

    def out_layer(din, dout):
        op_seq.append("out")
        params.append((init_w(din, dout), jnp.zeros((1, _pad_dim(dout)), jnp.float32)))

    # Forward sequence of CIFAR10_NN (activation='relu', with_vg=True, with_bn=True)
    linear(32 * 32 * 3, 512)
    linear(512, 256)
    linear(256, 128)
    if with_vg and with_bn:
        bn(128)
    linear(128, 64)
    if with_vg and with_bn:
        bn(64)
    linear(64, 32)
    if with_vg and with_bn:
        bn(32)
    linear(32, 16)
    if with_vg:
        vg_stack(10, 16)        # fcLayervg1 ... fcLayervg10
    if with_vg and with_bn:
        bn(16)
    out_layer(16, 10)           # fcoLayer, no activation

    return tuple(op_seq), params


# ---------------------------------------------------------------------------
# Wrapper
# ---------------------------------------------------------------------------
def _pick_tile(B, block_b):
    """Sublane/packing-aligned batch tile: >=2 tiles when possible (v7x megacore),
    preferring a tile that divides B (avoids a wrapper-side jnp.pad copy)."""
    tb = max(16, (min(block_b, B) // 16) * 16)
    if B >= 32 and B // tb < 2:
        tb = max(16, (B // 2 // 16) * 16)
    cand = tb
    while cand >= 16 and B % cand != 0:
        cand -= 16
    if cand >= 16 and B % cand == 0:
        tb = cand
    return tb


@functools.partial(jax.jit, static_argnames=("op_seq", "activation", "block_b"))
def cifar10_nn_forward(x_nchw, flat_params, op_seq, activation=ACTIVATION, block_b=1024):
    B = x_nchw.shape[0]
    # Keep f32 here (reshape is free); the f32->bf16 cast happens inside the kernel so the
    # input takes exactly one HBM read and no extra bf16 copy is materialized.
    x = x_nchw.reshape(B, -1)

    tb = _pick_tile(B, block_b)
    n_tiles = pl.cdiv(B, tb)
    Bp = n_tiles * tb
    if Bp != B:
        x = jnp.pad(x, ((0, Bp - B), (0, 0)))   # fallback only (ragged batch size)
    D = x.shape[1]

    # Parameters: full-array blocks with constant index_map -> DMA once, VMEM-resident.
    param_specs = [
        pl.BlockSpec(p.shape, lambda i, nd=p.ndim: (0,) * nd) for p in flat_params
    ]

    grid_spec = pltpu.PrefetchScalarGridSpec(
        num_scalar_prefetch=0,
        grid=(n_tiles,),
        in_specs=[pl.BlockSpec((tb, D), lambda i: (i, 0))] + param_specs,
        out_specs=pl.BlockSpec((tb, OUT_PAD), lambda i: (i, 0)),
    )

    out = pl.pallas_call(
        make_mlp_kernel(op_seq, activation),
        # bf16 output slab: halves writeback traffic; real logits are columns [:10].
        out_shape=jax.ShapeDtypeStruct((Bp, OUT_PAD), jnp.bfloat16),
        grid_spec=grid_spec,
        compiler_params=pltpu.CompilerParams(
            dimension_semantics=("parallel",),   # batch tiles independent (eval-mode BN)
            # 48 MiB is safe on v7x (64 MiB physical); on v6e/v5e raise to ~96 MiB and use
            # block_b=2048 for extra step-overhead amortization.
            vmem_limit_bytes=48 * 1024 * 1024,
        ),
    )(x, *flat_params)

    return out[:B, :10].astype(jnp.float32)


# Pure-JAX reference (same bf16-operand / f32-accumulate math, same padded params,
# same bf16 output rounding) for correctness check.
def reference_forward(x_nchw, flat_params, op_seq, activation=ACTIVATION):
    B = x_nchw.shape[0]
    h = x_nchw.reshape(B, -1)
    idx = 0
    for op in op_seq:
        a, b = flat_params[idx], flat_params[idx + 1]
        idx += 2
        if op in ("lin", "out"):
            h = jnp.dot(h.astype(jnp.bfloat16), a, preferred_element_type=jnp.float32) + b
            if op == "lin":
                h = _act(h, activation)
        elif op == "bn":
            h = _act(h * a + b, activation)
        else:
            for l in range(a.shape[0]):
                h = jnp.dot(h.astype(jnp.bfloat16), a[l],
                            preferred_element_type=jnp.float32) + b[l]
                h = _act(h, activation)
    h = h.astype(jnp.bfloat16).astype(jnp.float32)   # mirror the kernel's bf16 output slab
    return h[:, :10]


if __name__ == "__main__":
    key = jax.random.PRNGKey(0)
    k_param, k_x = jax.random.split(key)

    op_seq, params = build_network(k_param, ACTIVATION, WITH_VG, WITH_BN)
    flat_params = tuple(arr for pair in params for arr in pair)

    # Small demo batch (flatten requires 3x32x32 = 3072 features).  block_b=32 gives a
    # 2-tile batch grid (exercises the pipeline and the v7x two-core path) with no padding.
    B = 64
    x = jax.random.normal(k_x, (B, 3, 32, 32), dtype=jnp.float32)

    out = cifar10_nn_forward(x, flat_params, op_seq, ACTIVATION, block_b=32)
    out = jax.block_until_ready(out)

    ref = reference_forward(x, flat_params, op_seq, ACTIVATION)
    assert out.shape == (B, 10)
    assert jnp.allclose(out, ref, atol=2e-2, rtol=2e-2), "mismatch vs JAX reference"

    print("KERNEL_OK")
</pallas_src>

<mosaic_0001>
module attributes {stable_mosaic.version = 11 : i64} {
  func.func @kernel(%arg0: i32, %arg1: memref<32x3072xf32, #tpu.memory_space<vmem>>, %arg2: memref<3072x512xbf16, #tpu.memory_space<vmem>>, %arg3: memref<1x512xf32, #tpu.memory_space<vmem>>, %arg4: memref<512x256xbf16, #tpu.memory_space<vmem>>, %arg5: memref<1x256xf32, #tpu.memory_space<vmem>>, %arg6: memref<256x128xbf16, #tpu.memory_space<vmem>>, %arg7: memref<1x128xf32, #tpu.memory_space<vmem>>, %arg8: memref<1x128xf32, #tpu.memory_space<vmem>>, %arg9: memref<1x128xf32, #tpu.memory_space<vmem>>, %arg10: memref<128x128xbf16, #tpu.memory_space<vmem>>, %arg11: memref<1x128xf32, #tpu.memory_space<vmem>>, %arg12: memref<1x128xf32, #tpu.memory_space<vmem>>, %arg13: memref<1x128xf32, #tpu.memory_space<vmem>>, %arg14: memref<128x128xbf16, #tpu.memory_space<vmem>>, %arg15: memref<1x128xf32, #tpu.memory_space<vmem>>, %arg16: memref<1x128xf32, #tpu.memory_space<vmem>>, %arg17: memref<1x128xf32, #tpu.memory_space<vmem>>, %arg18: memref<128x128xbf16, #tpu.memory_space<vmem>>, %arg19: memref<1x128xf32, #tpu.memory_space<vmem>>, %arg20: memref<10x128x128xbf16, #tpu.memory_space<vmem>>, %arg21: memref<10x1x128xf32, #tpu.memory_space<vmem>>, %arg22: memref<1x128xf32, #tpu.memory_space<vmem>>, %arg23: memref<1x128xf32, #tpu.memory_space<vmem>>, %arg24: memref<128x128xbf16, #tpu.memory_space<vmem>>, %arg25: memref<1x128xf32, #tpu.memory_space<vmem>>, %arg26: memref<32x128xbf16, #tpu.memory_space<vmem>>) attributes {dimension_semantics = [#tpu.dimension_semantics<parallel>], iteration_bounds = array<i64: 2>, scalar_prefetch = 0 : i64, scratch_operands = 0 : i64, tpu.core_type = #tpu.core_type<tc>, window_params = [{transform_indices = @transform_0, window_bounds = array<i64: 32, 3072>}, {pipeline_mode = #tpu.pipeline_mode<synchronous>, transform_indices = @transform_1, window_bounds = array<i64: 3072, 512>}, {pipeline_mode = #tpu.pipeline_mode<synchronous>, transform_indices = @transform_2, window_bounds = array<i64: 1, 512>}, {pipeline_mode = #tpu.pipeline_mode<synchronous>, transform_indices = @transform_3, window_bounds = array<i64: 512, 256>}, {pipeline_mode = #tpu.pipeline_mode<synchronous>, transform_indices = @transform_4, window_bounds = array<i64: 1, 256>}, {pipeline_mode = #tpu.pipeline_mode<synchronous>, transform_indices = @transform_5, window_bounds = array<i64: 256, 128>}, {pipeline_mode = #tpu.pipeline_mode<synchronous>, transform_indices = @transform_6, window_bounds = array<i64: 1, 128>}, {pipeline_mode = #tpu.pipeline_mode<synchronous>, transform_indices = @transform_7, window_bounds = array<i64: 1, 128>}, {pipeline_mode = #tpu.pipeline_mode<synchronous>, transform_indices = @transform_8, window_bounds = array<i64: 1, 128>}, {pipeline_mode = #tpu.pipeline_mode<synchronous>, transform_indices = @transform_9, window_bounds = array<i64: 128, 128>}, {pipeline_mode = #tpu.pipeline_mode<synchronous>, transform_indices = @transform_10, window_bounds = array<i64: 1, 128>}, {pipeline_mode = #tpu.pipeline_mode<synchronous>, transform_indices = @transform_11, window_bounds = array<i64: 1, 128>}, {pipeline_mode = #tpu.pipeline_mode<synchronous>, transform_indices = @transform_12, window_bounds = array<i64: 1, 128>}, {pipeline_mode = #tpu.pipeline_mode<synchronous>, transform_indices = @transform_13, window_bounds = array<i64: 128, 128>}, {pipeline_mode = #tpu.pipeline_mode<synchronous>, transform_indices = @transform_14, window_bounds = array<i64: 1, 128>}, {pipeline_mode = #tpu.pipeline_mode<synchronous>, transform_indices = @transform_15, window_bounds = array<i64: 1, 128>}, {pipeline_mode = #tpu.pipeline_mode<synchronous>, transform_indices = @transform_16, window_bounds = array<i64: 1, 128>}, {pipeline_mode = #tpu.pipeline_mode<synchronous>, transform_indices = @transform_17, window_bounds = array<i64: 128, 128>}, {pipeline_mode = #tpu.pipeline_mode<synchronous>, transform_indices = @transform_18, window_bounds = array<i64: 1, 128>}, {pipeline_mode = #tpu.pipeline_mode<synchronous>, transform_indices = @transform_19, window_bounds = array<i64: 10, 128, 128>}, {pipeline_mode = #tpu.pipeline_mode<synchronous>, transform_indices = @transform_20, window_bounds = array<i64: 10, 1, 128>}, {pipeline_mode = #tpu.pipeline_mode<synchronous>, transform_indices = @transform_21, window_bounds = array<i64: 1, 128>}, {pipeline_mode = #tpu.pipeline_mode<synchronous>, transform_indices = @transform_22, window_bounds = array<i64: 1, 128>}, {pipeline_mode = #tpu.pipeline_mode<synchronous>, transform_indices = @transform_23, window_bounds = array<i64: 128, 128>}, {pipeline_mode = #tpu.pipeline_mode<synchronous>, transform_indices = @transform_24, window_bounds = array<i64: 1, 128>}, {transform_indices = @transform_25, window_bounds = array<i64: 32, 128>}]} {
    %c0 = arith.constant 0 : index
    %c0_0 = arith.constant 0 : index
    %0 = vector.load %arg1[%c0, %c0_0] : memref<32x3072xf32, #tpu.memory_space<vmem>>, vector<32x3072xf32>
    %1 = arith.truncf %0 : vector<32x3072xf32> to vector<32x3072xbf16>
    %c0_1 = arith.constant 0 : index
    %c0_2 = arith.constant 0 : index
    %2 = vector.load %arg2[%c0_1, %c0_2] : memref<3072x512xbf16, #tpu.memory_space<vmem>>, vector<3072x512xbf16>
    %cst = arith.constant dense<0.000000e+00> : vector<32x512xf32>
    %3 = tpu.matmul %1, %2, %cst {dimension_numbers = #tpu.dot_dimension_numbers<[1], [0], [0], [1], [0, 0, 1, 1], [], []>} : vector<32x3072xbf16>, vector<3072x512xbf16>, vector<32x512xf32> -> vector<32x512xf32>
    %c0_3 = arith.constant 0 : index
    %c0_4 = arith.constant 0 : index
    %4 = vector.load %arg3[%c0_3, %c0_4] : memref<1x512xf32, #tpu.memory_space<vmem>>, vector<1x512xf32>
    %5 = vector.broadcast %4 : vector<1x512xf32> to vector<32x512xf32>
    %6 = arith.addf %3, %5 : vector<32x512xf32>
    %cst_5 = arith.constant 0.000000e+00 : f32
    %7 = vector.broadcast %cst_5 : f32 to vector<32x512xf32>
    %8 = arith.maximumf %6, %7 : vector<32x512xf32>
    %9 = arith.truncf %8 : vector<32x512xf32> to vector<32x512xbf16>
    %c0_6 = arith.constant 0 : index
    %c0_7 = arith.constant 0 : index
    %10 = vector.load %arg4[%c0_6, %c0_7] : memref<512x256xbf16, #tpu.memory_space<vmem>>, vector<512x256xbf16>
    %cst_8 = arith.constant dense<0.000000e+00> : vector<32x256xf32>
    %11 = tpu.matmul %9, %10, %cst_8 {dimension_numbers = #tpu.dot_dimension_numbers<[1], [0], [0], [1], [0, 0, 1, 1], [], []>} : vector<32x512xbf16>, vector<512x256xbf16>, vector<32x256xf32> -> vector<32x256xf32>
    %c0_9 = arith.constant 0 : index
    %c0_10 = arith.constant 0 : index
    %12 = vector.load %arg5[%c0_9, %c0_10] : memref<1x256xf32, #tpu.memory_space<vmem>>, vector<1x256xf32>
    %13 = vector.broadcast %12 : vector<1x256xf32> to vector<32x256xf32>
    %14 = arith.addf %11, %13 : vector<32x256xf32>
    %cst_11 = arith.constant 0.000000e+00 : f32
    %15 = vector.broadcast %cst_11 : f32 to vector<32x256xf32>
    %16 = arith.maximumf %14, %15 : vector<32x256xf32>
    %17 = arith.truncf %16 : vector<32x256xf32> to vector<32x256xbf16>
    %c0_12 = arith.constant 0 : index
    %c0_13 = arith.constant 0 : index
    %18 = vector.load %arg6[%c0_12, %c0_13] : memref<256x128xbf16, #tpu.memory_space<vmem>>, vector<256x128xbf16>
    %cst_14 = arith.constant dense<0.000000e+00> : vector<32x128xf32>
    %19 = tpu.matmul %17, %18, %cst_14 {dimension_numbers = #tpu.dot_dimension_numbers<[1], [0], [0], [1], [0, 0, 1, 1], [], []>} : vector<32x256xbf16>, vector<256x128xbf16>, vector<32x128xf32> -> vector<32x128xf32>
    %c0_15 = arith.constant 0 : index
    %c0_16 = arith.constant 0 : index
    %20 = vector.load %arg7[%c0_15, %c0_16] : memref<1x128xf32, #tpu.memory_space<vmem>>, vector<1x128xf32>
    %21 = vector.broadcast %20 : vector<1x128xf32> to vector<32x128xf32>
    %22 = arith.addf %19, %21 : vector<32x128xf32>
    %cst_17 = arith.constant 0.000000e+00 : f32
    %23 = vector.broadcast %cst_17 : f32 to vector<32x128xf32>
    %24 = arith.maximumf %22, %23 : vector<32x128xf32>
    %c0_18 = arith.constant 0 : index
    %c0_19 = arith.constant 0 : index
    %25 = vector.load %arg8[%c0_18, %c0_19] : memref<1x128xf32, #tpu.memory_space<vmem>>, vector<1x128xf32>
    %26 = vector.broadcast %25 : vector<1x128xf32> to vector<32x128xf32>
    %27 = arith.mulf %24, %26 : vector<32x128xf32>
    %c0_20 = arith.constant 0 : index
    %c0_21 = arith.constant 0 : index
    %28 = vector.load %arg9[%c0_20, %c0_21] : memref<1x128xf32, #tpu.memory_space<vmem>>, vector<1x128xf32>
    %29 = vector.broadcast %28 : vector<1x128xf32> to vector<32x128xf32>
    %30 = arith.addf %27, %29 : vector<32x128xf32>
    %cst_22 = arith.constant 0.000000e+00 : f32
    %31 = vector.broadcast %cst_22 : f32 to vector<32x128xf32>
    %32 = arith.maximumf %30, %31 : vector<32x128xf32>
    %33 = arith.truncf %32 : vector<32x128xf32> to vector<32x128xbf16>
    %c0_23 = arith.constant 0 : index
    %c0_24 = arith.constant 0 : index
    %34 = vector.load %arg10[%c0_23, %c0_24] : memref<128x128xbf16, #tpu.memory_space<vmem>>, vector<128x128xbf16>
    %cst_25 = arith.constant dense<0.000000e+00> : vector<32x128xf32>
    %35 = tpu.matmul %33, %34, %cst_25 {dimension_numbers = #tpu.dot_dimension_numbers<[1], [0], [0], [1], [0, 0, 1, 1], [], []>} : vector<32x128xbf16>, vector<128x128xbf16>, vector<32x128xf32> -> vector<32x128xf32>
    %c0_26 = arith.constant 0 : index
    %c0_27 = arith.constant 0 : index
    %36 = vector.load %arg11[%c0_26, %c0_27] : memref<1x128xf32, #tpu.memory_space<vmem>>, vector<1x128xf32>
    %37 = vector.broadcast %36 : vector<1x128xf32> to vector<32x128xf32>
    %38 = arith.addf %35, %37 : vector<32x128xf32>
    %cst_28 = arith.constant 0.000000e+00 : f32
    %39 = vector.broadcast %cst_28 : f32 to vector<32x128xf32>
    %40 = arith.maximumf %38, %39 : vector<32x128xf32>
    %c0_29 = arith.constant 0 : index
    %c0_30 = arith.constant 0 : index
    %41 = vector.load %arg12[%c0_29, %c0_30] : memref<1x128xf32, #tpu.memory_space<vmem>>, vector<1x128xf32>
    %42 = vector.broadcast %41 : vector<1x128xf32> to vector<32x128xf32>
    %43 = arith.mulf %40, %42 : vector<32x128xf32>
    %c0_31 = arith.constant 0 : index
    %c0_32 = arith.constant 0 : index
    %44 = vector.load %arg13[%c0_31, %c0_32] : memref<1x128xf32, #tpu.memory_space<vmem>>, vector<1x128xf32>
    %45 = vector.broadcast %44 : vector<1x128xf32> to vector<32x128xf32>
    %46 = arith.addf %43, %45 : vector<32x128xf32>
    %cst_33 = arith.constant 0.000000e+00 : f32
    %47 = vector.broadcast %cst_33 : f32 to vector<32x128xf32>
    %48 = arith.maximumf %46, %47 : vector<32x128xf32>
    %49 = arith.truncf %48 : vector<32x128xf32> to vector<32x128xbf16>
    %c0_34 = arith.constant 0 : index
    %c0_35 = arith.constant 0 : index
    %50 = vector.load %arg14[%c0_34, %c0_35] : memref<128x128xbf16, #tpu.memory_space<vmem>>, vector<128x128xbf16>
    %cst_36 = arith.constant dense<0.000000e+00> : vector<32x128xf32>
    %51 = tpu.matmul %49, %50, %cst_36 {dimension_numbers = #tpu.dot_dimension_numbers<[1], [0], [0], [1], [0, 0, 1, 1], [], []>} : vector<32x128xbf16>, vector<128x128xbf16>, vector<32x128xf32> -> vector<32x128xf32>
    %c0_37 = arith.constant 0 : index
    %c0_38 = arith.constant 0 : index
    %52 = vector.load %arg15[%c0_37, %c0_38] : memref<1x128xf32, #tpu.memory_space<vmem>>, vector<1x128xf32>
    %53 = vector.broadcast %52 : vector<1x128xf32> to vector<32x128xf32>
    %54 = arith.addf %51, %53 : vector<32x128xf32>
    %cst_39 = arith.constant 0.000000e+00 : f32
    %55 = vector.broadcast %cst_39 : f32 to vector<32x128xf32>
    %56 = arith.maximumf %54, %55 : vector<32x128xf32>
    %c0_40 = arith.constant 0 : index
    %c0_41 = arith.constant 0 : index
    %57 = vector.load %arg16[%c0_40, %c0_41] : memref<1x128xf32, #tpu.memory_space<vmem>>, vector<1x128xf32>
    %58 = vector.broadcast %57 : vector<1x128xf32> to vector<32x128xf32>
    %59 = arith.mulf %56, %58 : vector<32x128xf32>
    %c0_42 = arith.constant 0 : index
    %c0_43 = arith.constant 0 : index
    %60 = vector.load %arg17[%c0_42, %c0_43] : memref<1x128xf32, #tpu.memory_space<vmem>>, vector<1x128xf32>
    %61 = vector.broadcast %60 : vector<1x128xf32> to vector<32x128xf32>
    %62 = arith.addf %59, %61 : vector<32x128xf32>
    %cst_44 = arith.constant 0.000000e+00 : f32
    %63 = vector.broadcast %cst_44 : f32 to vector<32x128xf32>
    %64 = arith.maximumf %62, %63 : vector<32x128xf32>
    %65 = arith.truncf %64 : vector<32x128xf32> to vector<32x128xbf16>
    %c0_45 = arith.constant 0 : index
    %c0_46 = arith.constant 0 : index
    %66 = vector.load %arg18[%c0_45, %c0_46] : memref<128x128xbf16, #tpu.memory_space<vmem>>, vector<128x128xbf16>
    %cst_47 = arith.constant dense<0.000000e+00> : vector<32x128xf32>
    %67 = tpu.matmul %65, %66, %cst_47 {dimension_numbers = #tpu.dot_dimension_numbers<[1], [0], [0], [1], [0, 0, 1, 1], [], []>} : vector<32x128xbf16>, vector<128x128xbf16>, vector<32x128xf32> -> vector<32x128xf32>
    %c0_48 = arith.constant 0 : index
    %c0_49 = arith.constant 0 : index
    %68 = vector.load %arg19[%c0_48, %c0_49] : memref<1x128xf32, #tpu.memory_space<vmem>>, vector<1x128xf32>
    %69 = vector.broadcast %68 : vector<1x128xf32> to vector<32x128xf32>
    %70 = arith.addf %67, %69 : vector<32x128xf32>
    %cst_50 = arith.constant 0.000000e+00 : f32
    %71 = vector.broadcast %cst_50 : f32 to vector<32x128xf32>
    %72 = arith.maximumf %70, %71 : vector<32x128xf32>
    %73 = arith.truncf %72 : vector<32x128xf32> to vector<32x128xbf16>
    %c0_51 = arith.constant 0 : index
    %c0_52 = arith.constant 0 : index
    %c0_53 = arith.constant 0 : index
    %74 = vector.load %arg20[%c0_51, %c0_52, %c0_53] : memref<10x128x128xbf16, #tpu.memory_space<vmem>>, vector<1x128x128xbf16>
    %75 = vector.shape_cast %74 : vector<1x128x128xbf16> to vector<128x128xbf16>
    %cst_54 = arith.constant dense<0.000000e+00> : vector<32x128xf32>
    %76 = tpu.matmul %73, %75, %cst_54 {dimension_numbers = #tpu.dot_dimension_numbers<[1], [0], [0], [1], [0, 0, 1, 1], [], []>} : vector<32x128xbf16>, vector<128x128xbf16>, vector<32x128xf32> -> vector<32x128xf32>
    %c0_55 = arith.constant 0 : index
    %c0_56 = arith.constant 0 : index
    %c0_57 = arith.constant 0 : index
    %77 = vector.load %arg21[%c0_55, %c0_56, %c0_57] : memref<10x1x128xf32, #tpu.memory_space<vmem>>, vector<1x1x128xf32>
    %78 = vector.shape_cast %77 : vector<1x1x128xf32> to vector<1x128xf32>
    %79 = vector.broadcast %78 : vector<1x128xf32> to vector<32x128xf32>
    %80 = arith.addf %76, %79 : vector<32x128xf32>
    %cst_58 = arith.constant 0.000000e+00 : f32
    %81 = vector.broadcast %cst_58 : f32 to vector<32x128xf32>
    %82 = arith.maximumf %80, %81 : vector<32x128xf32>
    %83 = arith.truncf %82 : vector<32x128xf32> to vector<32x128xbf16>
    %c1 = arith.constant 1 : index
    %c0_59 = arith.constant 0 : index
    %c0_60 = arith.constant 0 : index
    %84 = vector.load %arg20[%c1, %c0_59, %c0_60] : memref<10x128x128xbf16, #tpu.memory_space<vmem>>, vector<1x128x128xbf16>
    %85 = vector.shape_cast %84 : vector<1x128x128xbf16> to vector<128x128xbf16>
    %cst_61 = arith.constant dense<0.000000e+00> : vector<32x128xf32>
    %86 = tpu.matmul %83, %85, %cst_61 {dimension_numbers = #tpu.dot_dimension_numbers<[1], [0], [0], [1], [0, 0, 1, 1], [], []>} : vector<32x128xbf16>, vector<128x128xbf16>, vector<32x128xf32> -> vector<32x128xf32>
    %c1_62 = arith.constant 1 : index
    %c0_63 = arith.constant 0 : index
    %c0_64 = arith.constant 0 : index
    %87 = vector.load %arg21[%c1_62, %c0_63, %c0_64] : memref<10x1x128xf32, #tpu.memory_space<vmem>>, vector<1x1x128xf32>
    %88 = vector.shape_cast %87 : vector<1x1x128xf32> to vector<1x128xf32>
    %89 = vector.broadcast %88 : vector<1x128xf32> to vector<32x128xf32>
    %90 = arith.addf %86, %89 : vector<32x128xf32>
    %cst_65 = arith.constant 0.000000e+00 : f32
    %91 = vector.broadcast %cst_65 : f32 to vector<32x128xf32>
    %92 = arith.maximumf %90, %91 : vector<32x128xf32>
    %93 = arith.truncf %92 : vector<32x128xf32> to vector<32x128xbf16>
    %c2 = arith.constant 2 : index
    %c0_66 = arith.constant 0 : index
    %c0_67 = arith.constant 0 : index
    %94 = vector.load %arg20[%c2, %c0_66, %c0_67] : memref<10x128x128xbf16, #tpu.memory_space<vmem>>, vector<1x128x128xbf16>
    %95 = vector.shape_cast %94 : vector<1x128x128xbf16> to vector<128x128xbf16>
    %cst_68 = arith.constant dense<0.000000e+00> : vector<32x128xf32>
    %96 = tpu.matmul %93, %95, %cst_68 {dimension_numbers = #tpu.dot_dimension_numbers<[1], [0], [0], [1], [0, 0, 1, 1], [], []>} : vector<32x128xbf16>, vector<128x128xbf16>, vector<32x128xf32> -> vector<32x128xf32>
    %c2_69 = arith.constant 2 : index
    %c0_70 = arith.constant 0 : index
    %c0_71 = arith.constant 0 : index
    %97 = vector.load %arg21[%c2_69, %c0_70, %c0_71] : memref<10x1x128xf32, #tpu.memory_space<vmem>>, vector<1x1x128xf32>
    %98 = vector.shape_cast %97 : vector<1x1x128xf32> to vector<1x128xf32>
    %99 = vector.broadcast %98 : vector<1x128xf32> to vector<32x128xf32>
    %100 = arith.addf %96, %99 : vector<32x128xf32>
    %cst_72 = arith.constant 0.000000e+00 : f32
    %101 = vector.broadcast %cst_72 : f32 to vector<32x128xf32>
    %102 = arith.maximumf %100, %101 : vector<32x128xf32>
    %103 = arith.truncf %102 : vector<32x128xf32> to vector<32x128xbf16>
    %c3 = arith.constant 3 : index
    %c0_73 = arith.constant 0 : index
    %c0_74 = arith.constant 0 : index
    %104 = vector.load %arg20[%c3, %c0_73, %c0_74] : memref<10x128x128xbf16, #tpu.memory_space<vmem>>, vector<1x128x128xbf16>
    %105 = vector.shape_cast %104 : vector<1x128x128xbf16> to vector<128x128xbf16>
    %cst_75 = arith.constant dense<0.000000e+00> : vector<32x128xf32>
    %106 = tpu.matmul %103, %105, %cst_75 {dimension_numbers = #tpu.dot_dimension_numbers<[1], [0], [0], [1], [0, 0, 1, 1], [], []>} : vector<32x128xbf16>, vector<128x128xbf16>, vector<32x128xf32> -> vector<32x128xf32>
    %c3_76 = arith.constant 3 : index
    %c0_77 = arith.constant 0 : index
    %c0_78 = arith.constant 0 : index
    %107 = vector.load %arg21[%c3_76, %c0_77, %c0_78] : memref<10x1x128xf32, #tpu.memory_space<vmem>>, vector<1x1x128xf32>
    %108 = vector.shape_cast %107 : vector<1x1x128xf32> to vector<1x128xf32>
    %109 = vector.broadcast %108 : vector<1x128xf32> to vector<32x128xf32>
    %110 = arith.addf %106, %109 : vector<32x128xf32>
    %cst_79 = arith.constant 0.000000e+00 : f32
    %111 = vector.broadcast %cst_79 : f32 to vector<32x128xf32>
    %112 = arith.maximumf %110, %111 : vector<32x128xf32>
    %113 = arith.truncf %112 : vector<32x128xf32> to vector<32x128xbf16>
    %c4 = arith.constant 4 : index
    %c0_80 = arith.constant 0 : index
    %c0_81 = arith.constant 0 : index
    %114 = vector.load %arg20[%c4, %c0_80, %c0_81] : memref<10x128x128xbf16, #tpu.memory_space<vmem>>, vector<1x128x128xbf16>
    %115 = vector.shape_cast %114 : vector<1x128x128xbf16> to vector<128x128xbf16>
    %cst_82 = arith.constant dense<0.000000e+00> : vector<32x128xf32>
    %116 = tpu.matmul %113, %115, %cst_82 {dimension_numbers = #tpu.dot_dimension_numbers<[1], [0], [0], [1], [0, 0, 1, 1], [], []>} : vector<32x128xbf16>, vector<128x128xbf16>, vector<32x128xf32> -> vector<32x128xf32>
    %c4_83 = arith.constant 4 : index
    %c0_84 = arith.constant 0 : index
    %c0_85 = arith.constant 0 : index
    %117 = vector.load %arg21[%c4_83, %c0_84, %c0_85] : memref<10x1x128xf32, #tpu.memory_space<vmem>>, vector<1x1x128xf32>
    %118 = vector.shape_cast %117 : vector<1x1x128xf32> to vector<1x128xf32>
    %119 = vector.broadcast %118 : vector<1x128xf32> to vector<32x128xf32>
    %120 = arith.addf %116, %119 : vector<32x128xf32>
    %cst_86 = arith.constant 0.000000e+00 : f32
    %121 = vector.broadcast %cst_86 : f32 to vector<32x128xf32>
    %122 = arith.maximumf %120, %121 : vector<32x128xf32>
    %123 = arith.truncf %122 : vector<32x128xf32> to vector<32x128xbf16>
    %c5 = arith.constant 5 : index
    %c0_87 = arith.constant 0 : index
    %c0_88 = arith.constant 0 : index
    %124 = vector.load %arg20[%c5, %c0_87, %c0_88] : memref<10x128x128xbf16, #tpu.memory_space<vmem>>, vector<1x128x128xbf16>
    %125 = vector.shape_cast %124 : vector<1x128x128xbf16> to vector<128x128xbf16>
    %cst_89 = arith.constant dense<0.000000e+00> : vector<32x128xf32>
    %126 = tpu.matmul %123, %125, %cst_89 {dimension_numbers = #tpu.dot_dimension_numbers<[1], [0], [0], [1], [0, 0, 1, 1], [], []>} : vector<32x128xbf16>, vector<128x128xbf16>, vector<32x128xf32> -> vector<32x128xf32>
    %c5_90 = arith.constant 5 : index
    %c0_91 = arith.constant 0 : index
    %c0_92 = arith.constant 0 : index
    %127 = vector.load %arg21[%c5_90, %c0_91, %c0_92] : memref<10x1x128xf32, #tpu.memory_space<vmem>>, vector<1x1x128xf32>
    %128 = vector.shape_cast %127 : vector<1x1x128xf32> to vector<1x128xf32>
    %129 = vector.broadcast %128 : vector<1x128xf32> to vector<32x128xf32>
    %130 = arith.addf %126, %129 : vector<32x128xf32>
    %cst_93 = arith.constant 0.000000e+00 : f32
    %131 = vector.broadcast %cst_93 : f32 to vector<32x128xf32>
    %132 = arith.maximumf %130, %131 : vector<32x128xf32>
    %133 = arith.truncf %132 : vector<32x128xf32> to vector<32x128xbf16>
    %c6 = arith.constant 6 : index
    %c0_94 = arith.constant 0 : index
    %c0_95 = arith.constant 0 : index
    %134 = vector.load %arg20[%c6, %c0_94, %c0_95] : memref<10x128x128xbf16, #tpu.memory_space<vmem>>, vector<1x128x128xbf16>
    %135 = vector.shape_cast %134 : vector<1x128x128xbf16> to vector<128x128xbf16>
    %cst_96 = arith.constant dense<0.000000e+00> : vector<32x128xf32>
    %136 = tpu.matmul %133, %135, %cst_96 {dimension_numbers = #tpu.dot_dimension_numbers<[1], [0], [0], [1], [0, 0, 1, 1], [], []>} : vector<32x128xbf16>, vector<128x128xbf16>, vector<32x128xf32> -> vector<32x128xf32>
    %c6_97 = arith.constant 6 : index
    %c0_98 = arith.constant 0 : index
    %c0_99 = arith.constant 0 : index
    %137 = vector.load %arg21[%c6_97, %c0_98, %c0_99] : memref<10x1x128xf32, #tpu.memory_space<vmem>>, vector<1x1x128xf32>
    %138 = vector.shape_cast %137 : vector<1x1x128xf32> to vector<1x128xf32>
    %139 = vector.broadcast %138 : vector<1x128xf32> to vector<32x128xf32>
    %140 = arith.addf %136, %139 : vector<32x128xf32>
    %cst_100 = arith.constant 0.000000e+00 : f32
    %141 = vector.broadcast %cst_100 : f32 to vector<32x128xf32>
    %142 = arith.maximumf %140, %141 : vector<32x128xf32>
    %143 = arith.truncf %142 : vector<32x128xf32> to vector<32x128xbf16>
    %c7 = arith.constant 7 : index
    %c0_101 = arith.constant 0 : index
    %c0_102 = arith.constant 0 : index
    %144 = vector.load %arg20[%c7, %c0_101, %c0_102] : memref<10x128x128xbf16, #tpu.memory_space<vmem>>, vector<1x128x128xbf16>
    %145 = vector.shape_cast %144 : vector<1x128x128xbf16> to vector<128x128xbf16>
    %cst_103 = arith.constant dense<0.000000e+00> : vector<32x128xf32>
    %146 = tpu.matmul %143, %145, %cst_103 {dimension_numbers = #tpu.dot_dimension_numbers<[1], [0], [0], [1], [0, 0, 1, 1], [], []>} : vector<32x128xbf16>, vector<128x128xbf16>, vector<32x128xf32> -> vector<32x128xf32>
    %c7_104 = arith.constant 7 : index
    %c0_105 = arith.constant 0 : index
    %c0_106 = arith.constant 0 : index
    %147 = vector.load %arg21[%c7_104, %c0_105, %c0_106] : memref<10x1x128xf32, #tpu.memory_space<vmem>>, vector<1x1x128xf32>
    %148 = vector.shape_cast %147 : vector<1x1x128xf32> to vector<1x128xf32>
    %149 = vector.broadcast %148 : vector<1x128xf32> to vector<32x128xf32>
    %150 = arith.addf %146, %149 : vector<32x128xf32>
    %cst_107 = arith.constant 0.000000e+00 : f32
    %151 = vector.broadcast %cst_107 : f32 to vector<32x128xf32>
    %152 = arith.maximumf %150, %151 : vector<32x128xf32>
    %153 = arith.truncf %152 : vector<32x128xf32> to vector<32x128xbf16>
    %c8 = arith.constant 8 : index
    %c0_108 = arith.constant 0 : index
    %c0_109 = arith.constant 0 : index
    %154 = vector.load %arg20[%c8, %c0_108, %c0_109] : memref<10x128x128xbf16, #tpu.memory_space<vmem>>, vector<1x128x128xbf16>
    %155 = vector.shape_cast %154 : vector<1x128x128xbf16> to vector<128x128xbf16>
    %cst_110 = arith.constant dense<0.000000e+00> : vector<32x128xf32>
    %156 = tpu.matmul %153, %155, %cst_110 {dimension_numbers = #tpu.dot_dimension_numbers<[1], [0], [0], [1], [0, 0, 1, 1], [], []>} : vector<32x128xbf16>, vector<128x128xbf16>, vector<32x128xf32> -> vector<32x128xf32>
    %c8_111 = arith.constant 8 : index
    %c0_112 = arith.constant 0 : index
    %c0_113 = arith.constant 0 : index
    %157 = vector.load %arg21[%c8_111, %c0_112, %c0_113] : memref<10x1x128xf32, #tpu.memory_space<vmem>>, vector<1x1x128xf32>
    %158 = vector.shape_cast %157 : vector<1x1x128xf32> to vector<1x128xf32>
    %159 = vector.broadcast %158 : vector<1x128xf32> to vector<32x128xf32>
    %160 = arith.addf %156, %159 : vector<32x128xf32>
    %cst_114 = arith.constant 0.000000e+00 : f32
    %161 = vector.broadcast %cst_114 : f32 to vector<32x128xf32>
    %162 = arith.maximumf %160, %161 : vector<32x128xf32>
    %163 = arith.truncf %162 : vector<32x128xf32> to vector<32x128xbf16>
    %c9 = arith.constant 9 : index
    %c0_115 = arith.constant 0 : index
    %c0_116 = arith.constant 0 : index
    %164 = vector.load %arg20[%c9, %c0_115, %c0_116] : memref<10x128x128xbf16, #tpu.memory_space<vmem>>, vector<1x128x128xbf16>
    %165 = vector.shape_cast %164 : vector<1x128x128xbf16> to vector<128x128xbf16>
    %cst_117 = arith.constant dense<0.000000e+00> : vector<32x128xf32>
    %166 = tpu.matmul %163, %165, %cst_117 {dimension_numbers = #tpu.dot_dimension_numbers<[1], [0], [0], [1], [0, 0, 1, 1], [], []>} : vector<32x128xbf16>, vector<128x128xbf16>, vector<32x128xf32> -> vector<32x128xf32>
    %c9_118 = arith.constant 9 : index
    %c0_119 = arith.constant 0 : index
    %c0_120 = arith.constant 0 : index
    %167 = vector.load %arg21[%c9_118, %c0_119, %c0_120] : memref<10x1x128xf32, #tpu.memory_space<vmem>>, vector<1x1x128xf32>
    %168 = vector.shape_cast %167 : vector<1x1x128xf32> to vector<1x128xf32>
    %169 = vector.broadcast %168 : vector<1x128xf32> to vector<32x128xf32>
    %170 = arith.addf %166, %169 : vector<32x128xf32>
    %cst_121 = arith.constant 0.000000e+00 : f32
    %171 = vector.broadcast %cst_121 : f32 to vector<32x128xf32>
    %172 = arith.maximumf %170, %171 : vector<32x128xf32>
    %c0_122 = arith.constant 0 : index
    %c0_123 = arith.constant 0 : index
    %173 = vector.load %arg22[%c0_122, %c0_123] : memref<1x128xf32, #tpu.memory_space<vmem>>, vector<1x128xf32>
    %174 = vector.broadcast %173 : vector<1x128xf32> to vector<32x128xf32>
    %175 = arith.mulf %172, %174 : vector<32x128xf32>
    %c0_124 = arith.constant 0 : index
    %c0_125 = arith.constant 0 : index
    %176 = vector.load %arg23[%c0_124, %c0_125] : memref<1x128xf32, #tpu.memory_space<vmem>>, vector<1x128xf32>
    %177 = vector.broadcast %176 : vector<1x128xf32> to vector<32x128xf32>
    %178 = arith.addf %175, %177 : vector<32x128xf32>
    %cst_126 = arith.constant 0.000000e+00 : f32
    %179 = vector.broadcast %cst_126 : f32 to vector<32x128xf32>
    %180 = arith.maximumf %178, %179 : vector<32x128xf32>
    %181 = arith.truncf %180 : vector<32x128xf32> to vector<32x128xbf16>
    %c0_127 = arith.constant 0 : index
    %c0_128 = arith.constant 0 : index
    %182 = vector.load %arg24[%c0_127, %c0_128] : memref<128x128xbf16, #tpu.memory_space<vmem>>, vector<128x128xbf16>
    %cst_129 = arith.constant dense<0.000000e+00> : vector<32x128xf32>
    %183 = tpu.matmul %181, %182, %cst_129 {dimension_numbers = #tpu.dot_dimension_numbers<[1], [0], [0], [1], [0, 0, 1, 1], [], []>} : vector<32x128xbf16>, vector<128x128xbf16>, vector<32x128xf32> -> vector<32x128xf32>
    %c0_130 = arith.constant 0 : index
    %c0_131 = arith.constant 0 : index
    %184 = vector.load %arg25[%c0_130, %c0_131] : memref<1x128xf32, #tpu.memory_space<vmem>>, vector<1x128xf32>
    %185 = vector.broadcast %184 : vector<1x128xf32> to vector<32x128xf32>
    %186 = arith.addf %183, %185 : vector<32x128xf32>
    %187 = arith.truncf %186 : vector<32x128xf32> to vector<32x128xbf16>
    %c0_132 = arith.constant 0 : index
    %c0_133 = arith.constant 0 : index
    %188 = vector.load %arg26[%c0_132, %c0_133] : memref<32x128xbf16, #tpu.memory_space<vmem>>, vector<32x128xbf16>
    tpu.vector_store %arg26[%c0_132, %c0_133], %187 {strides = array<i32>} : memref<32x128xbf16, #tpu.memory_space<vmem>>, vector<32x128xbf16>,
    return
  }
  func.func @transform_0(%arg0: i32) -> (i32, i32) {
    %c0_i32 = arith.constant 0 : i32
    %c0_i32_0 = arith.constant 0 : i32
    return %arg0, %c0_i32 : i32, i32
  }
  func.func @transform_1(%arg0: i32) -> (i32, i32) {
    %c0_i32 = arith.constant 0 : i32
    %c0_i32_0 = arith.constant 0 : i32
    %c0_i32_1 = arith.constant 0 : i32
    return %c0_i32, %c0_i32_0 : i32, i32
  }
  func.func @transform_2(%arg0: i32) -> (i32, i32) {
    %c0_i32 = arith.constant 0 : i32
    %c0_i32_0 = arith.constant 0 : i32
    %c0_i32_1 = arith.constant 0 : i32
    return %c0_i32, %c0_i32_0 : i32, i32
  }
  func.func @transform_3(%arg0: i32) -> (i32, i32) {
    %c0_i32 = arith.constant 0 : i32
    %c0_i32_0 = arith.constant 0 : i32
    %c0_i32_1 = arith.constant 0 : i32
    return %c0_i32, %c0_i32_0 : i32, i32
  }
  func.func @transform_4(%arg0: i32) -> (i32, i32) {
    %c0_i32 = arith.constant 0 : i32
    %c0_i32_0 = arith.constant 0 : i32
    %c0_i32_1 = arith.constant 0 : i32
    return %c0_i32, %c0_i32_0 : i32, i32
  }
  func.func @transform_5(%arg0: i32) -> (i32, i32) {
    %c0_i32 = arith.constant 0 : i32
    %c0_i32_0 = arith.constant 0 : i32
    %c0_i32_1 = arith.constant 0 : i32
    return %c0_i32, %c0_i32_0 : i32, i32
  }
  func.func @transform_6(%arg0: i32) -> (i32, i32) {
    %c0_i32 = arith.constant 0 : i32
    %c0_i32_0 = arith.constant 0 : i32
    %c0_i32_1 = arith.constant 0 : i32
    return %c0_i32, %c0_i32_0 : i32, i32
  }
  func.func @transform_7(%arg0: i32) -> (i32, i32) {
    %c0_i32 = arith.constant 0 : i32
    %c0_i32_0 = arith.constant 0 : i32
    %c0_i32_1 = arith.constant 0 : i32
    return %c0_i32, %c0_i32_0 : i32, i32
  }
  func.func @transform_8(%arg0: i32) -> (i32, i32) {
    %c0_i32 = arith.constant 0 : i32
    %c0_i32_0 = arith.constant 0 : i32
    %c0_i32_1 = arith.constant 0 : i32
    return %c0_i32, %c0_i32_0 : i32, i32
  }
  func.func @transform_9(%arg0: i32) -> (i32, i32) {
    %c0_i32 = arith.constant 0 : i32
    %c0_i32_0 = arith.constant 0 : i32
    %c0_i32_1 = arith.constant 0 : i32
    return %c0_i32, %c0_i32_0 : i32, i32
  }
  func.func @transform_10(%arg0: i32) -> (i32, i32) {
    %c0_i32 = arith.constant 0 : i32
    %c0_i32_0 = arith.constant 0 : i32
    %c0_i32_1 = arith.constant 0 : i32
    return %c0_i32, %c0_i32_0 : i32, i32
  }
  func.func @transform_11(%arg0: i32) -> (i32, i32) {
    %c0_i32 = arith.constant 0 : i32
    %c0_i32_0 = arith.constant 0 : i32
    %c0_i32_1 = arith.constant 0 : i32
    return %c0_i32, %c0_i32_0 : i32, i32
  }
  func.func @transform_12(%arg0: i32) -> (i32, i32) {
    %c0_i32 = arith.constant 0 : i32
    %c0_i32_0 = arith.constant 0 : i32
    %c0_i32_1 = arith.constant 0 : i32
    return %c0_i32, %c0_i32_0 : i32, i32
  }
  func.func @transform_13(%arg0: i32) -> (i32, i32) {
    %c0_i32 = arith.constant 0 : i32
    %c0_i32_0 = arith.constant 0 : i32
    %c0_i32_1 = arith.constant 0 : i32
    return %c0_i32, %c0_i32_0 : i32, i32
  }
  func.func @transform_14(%arg0: i32) -> (i32, i32) {
    %c0_i32 = arith.constant 0 : i32
    %c0_i32_0 = arith.constant 0 : i32
    %c0_i32_1 = arith.constant 0 : i32
    return %c0_i32, %c0_i32_0 : i32, i32
  }
  func.func @transform_15(%arg0: i32) -> (i32, i32) {
    %c0_i32 = arith.constant 0 : i32
    %c0_i32_0 = arith.constant 0 : i32
    %c0_i32_1 = arith.constant 0 : i32
    return %c0_i32, %c0_i32_0 : i32, i32
  }
  func.func @transform_16(%arg0: i32) -> (i32, i32) {
    %c0_i32 = arith.constant 0 : i32
    %c0_i32_0 = arith.constant 0 : i32
    %c0_i32_1 = arith.constant 0 : i32
    return %c0_i32, %c0_i32_0 : i32, i32
  }
  func.func @transform_17(%arg0: i32) -> (i32, i32) {
    %c0_i32 = arith.constant 0 : i32
    %c0_i32_0 = arith.constant 0 : i32
    %c0_i32_1 = arith.constant 0 : i32
    return %c0_i32, %c0_i32_0 : i32, i32
  }
  func.func @transform_18(%arg0: i32) -> (i32, i32) {
    %c0_i32 = arith.constant 0 : i32
    %c0_i32_0 = arith.constant 0 : i32
    %c0_i32_1 = arith.constant 0 : i32
    return %c0_i32, %c0_i32_0 : i32, i32
  }
  func.func @transform_19(%arg0: i32) -> (i32, i32, i32) {
    %c0_i32 = arith.constant 0 : i32
    %c0_i32_0 = arith.constant 0 : i32
    %c0_i32_1 = arith.constant 0 : i32
    %c0_i32_2 = arith.constant 0 : i32
    return %c0_i32, %c0_i32_0, %c0_i32_1 : i32, i32, i32
  }
  func.func @transform_20(%arg0: i32) -> (i32, i32, i32) {
    %c0_i32 = arith.constant 0 : i32
    %c0_i32_0 = arith.constant 0 : i32
    %c0_i32_1 = arith.constant 0 : i32
    %c0_i32_2 = arith.constant 0 : i32
    return %c0_i32, %c0_i32_0, %c0_i32_1 : i32, i32, i32
  }
  func.func @transform_21(%arg0: i32) -> (i32, i32) {
    %c0_i32 = arith.constant 0 : i32
    %c0_i32_0 = arith.constant 0 : i32
    %c0_i32_1 = arith.constant 0 : i32
    return %c0_i32, %c0_i32_0 : i32, i32
  }
  func.func @transform_22(%arg0: i32) -> (i32, i32) {
    %c0_i32 = arith.constant 0 : i32
    %c0_i32_0 = arith.constant 0 : i32
    %c0_i32_1 = arith.constant 0 : i32
    return %c0_i32, %c0_i32_0 : i32, i32
  }
  func.func @transform_23(%arg0: i32) -> (i32, i32) {
    %c0_i32 = arith.constant 0 : i32
    %c0_i32_0 = arith.constant 0 : i32
    %c0_i32_1 = arith.constant 0 : i32
    return %c0_i32, %c0_i32_0 : i32, i32
  }
  func.func @transform_24(%arg0: i32) -> (i32, i32) {
    %c0_i32 = arith.constant 0 : i32
    %c0_i32_0 = arith.constant 0 : i32
    %c0_i32_1 = arith.constant 0 : i32
    return %c0_i32, %c0_i32_0 : i32, i32
  }
  func.func @transform_25(%arg0: i32) -> (i32, i32) {
    %c0_i32 = arith.constant 0 : i32
    %c0_i32_0 = arith.constant 0 : i32
    return %arg0, %c0_i32 : i32, i32
  }
}

</mosaic_0001>

<bundles_post_ra>
// kernel: cifar10_nn_forward.1
= control target key start
LH: loop header
LB: loop body
LE: loop exit
PB: predicated region body
PF: predicated region fallthrough
CT: control target
= control target key end

     0   :  { %s17138_s0 = inlined_call_operand.vmem [shape: f32[64,3072], index: 0, kind: input, shape index: {}]   ;;  %s17139_s1 = inlined_call_operand.hbm [shape: bf16[3072,512], index: 1, kind: input, shape index: {}]   ;;  %s17140_s2 = inlined_call_operand.hbm [shape: f32[1,512], index: 2, kind: input, shape index: {}]   ;;  %s17141_s3 = inlined_call_operand.hbm [shape: bf16[512,256], index: 3, kind: input, shape index: {}]   ;;  %s17142_s4 = inlined_call_operand.hbm [shape: f32[1,256], index: 4, kind: input, shape index: {}]   ;;  %s17143_s5 = inlined_call_operand.hbm [shape: bf16[256,128], index: 5, kind: input, shape index: {}]   ;;  %s17144_s6 = inlined_call_operand.hbm [shape: f32[1,128], index: 6, kind: input, shape index: {}]   ;;  %s17145_s7 = inlined_call_operand.hbm [shape: f32[1,128], index: 7, kind: input, shape index: {}]   ;;  %s17146_s8 = inlined_call_operand.hbm [shape: f32[1,128], index: 8, kind: input, shape index: {}]   ;;  %s17147_s9 = inlined_call_operand.hbm [shape: bf16[128,128], index: 9, kind: input, shape index: {}]   ;;  %s17148_s10 = inlined_call_operand.hbm [shape: f32[1,128], index: 10, kind: input, shape index: {}]   ;;  %s17149_s11 = inlined_call_operand.hbm [shape: f32[1,128], index: 11, kind: input, shape index: {}]   ;;  %s17150_s12 = inlined_call_operand.hbm [shape: f32[1,128], index: 12, kind: input, shape index: {}]   ;;  %s17151_s13 = inlined_call_operand.hbm [shape: bf16[128,128], index: 13, kind: input, shape index: {}]   ;;  %s17152_s14 = inlined_call_operand.hbm [shape: f32[1,128], index: 14, kind: input, shape index: {}]   ;;  %s17153_s15 = inlined_call_operand.hbm [shape: f32[1,128], index: 15, kind: input, shape index: {}]   ;;  %s17154_s16 = inlined_call_operand.hbm [shape: f32[1,128], index: 16, kind: input, shape index: {}]   ;;  %s17155_s17 = inlined_call_operand.hbm [shape: bf16[128,128], index: 17, kind: input, shape index: {}]   ;;  %s17156_s18 = inlined_call_operand.hbm [shape: f32[1,128], index: 18, kind: input, shape index: {}]   ;;  %s17157_s19 = inlined_call_operand.hbm [shape: bf16[10,128,128], index: 19, kind: input, shape index: {}]   ;;  %s17158_s20 = inlined_call_operand.hbm [shape: f32[10,1,128], index: 20, kind: input, shape index: {}]   ;;  %s17159_s21 = inlined_call_operand.hbm [shape: f32[1,128], index: 21, kind: input, shape index: {}]   ;;  %s17160_s22 = inlined_call_operand.hbm [shape: f32[1,128], index: 22, kind: input, shape index: {}]   ;;  %s17161_s23 = inlined_call_operand.hbm [shape: bf16[128,128], index: 23, kind: input, shape index: {}]   ;;  %s17162_s24 = inlined_call_operand.hbm [shape: f32[1,128], index: 24, kind: input, shape index: {}]   ;;  %s17163_s25 = inlined_call_operand.vmem [shape: bf16[64,128], index: 25, kind: output, shape index: {}]  }
   0x1   :  { %17214 = sst [smem:[#allocation79_spill]] %s17138_s0 }
   0x2   :  { %17215 = sst [smem:[#allocation80_spill]] %s17139_s1 }
   0x3   :  { %17216 = sst [smem:[#allocation81_spill]] %s17140_s2 }
   0x4   :  { %17217 = sst [smem:[#allocation82_spill]] %s17141_s3 }
   0x5   :  { %17218 = sst [smem:[#allocation83_spill]] %s17142_s4 }
   0x6   :  { %17219 = sst [smem:[#allocation84_spill]] %s17143_s5 }
   0x7   :  { %17220 = sst [smem:[#allocation85_spill]] %s17144_s6 }
   0x8   :  { %17221 = sst [smem:[#allocation86_spill]] %s17145_s7 }
   0x9   :  { %17222 = sst [smem:[#allocation87_spill]] %s17146_s8 }
   0xa   :  { %17223 = sst [smem:[#allocation88_spill]] %s17147_s9 }
   0xb   :  { %17224 = sst [smem:[#allocation89_spill]] %s17148_s10 }
   0xc   :  { %17225 = sst [smem:[#allocation90_spill]] %s17150_s12 }
   0xd   :  { %17226 = sst [smem:[#allocation91_spill]] %s17163_s25 }
   0xe   :  { %30 = vsyncpa [#allocation3], 0 }
   0xf   :  { %31 = vsyncpa [#allocation5], 0 }
  0x10   :  { %32 = vsyncpa [#allocation8], 0 }
  0x11   :  { %33 = vsyncpa [#allocation11], 0 }
  0x12   :  { %34 = vsyncpa [#allocation14], 0 }
  0x13   :  { %35 = vsyncpa [#allocation17], 0 }
  0x14   :  { %36 = vsyncpa [#allocation20], 0 }
  0x15   :  { %37 = vsyncpa [#allocation23], 0 }
  0x16   :  { %38 = vsyncpa [#allocation26], 0 }
  0x17   :  { %39 = vsyncpa [#allocation29], 0 }
  0x18   :  { %40 = vsyncpa [#allocation32], 0 }
  0x19   :  { %41 = vsyncpa [#allocation35], 0 }
  0x1a   :  { %42 = vsyncpa [#allocation38], 0  ;;  %s16140_s29 = smov 0  }
  0x1b LB: > { %17227 = sst [smem:[#allocation52_spill]] %s15977_s29  ;;  %s16146_s2 = sadd.s32 4294967295, %s15977_s29   ;;  %s15977_s29 = sphi %s16140_s29, %s48_s29  }
  0x1c   : > { %p10169_p0 = scmp.ge.s32.totalorder %s15977_s29, 1  ;;  %p609_p1 = scmp.lt.s32.totalorder %s15977_s29, 3 }
  0x1e   : > { %p16150_p2 = pnand %p10169_p0, %p609_p1 }
  0x1f   : > { %p15134_p3 = scmp.eq.s32.totalorder (!%p16150_p2), %s16146_s2, 0  ;;  %s17230_s3 = sld [smem:[#allocation81_spill]] (!%p16150_p2) }
  0x20   : > { %s17228_s6 = scalar_select %p16150_p2, 1, 0 }
  0x21   : > { %613 = sbr.rel (%p16150_p2) target bundleno = 103 (0x67), region = 12  ;;  %s15979_s1 = smov (!%p16150_p2), [#allocation4]  }
  0x22   : > { %17229 = sst [smem:[#allocation53_spill]] %s17228_s6  ;;  %s637_s8 = sshll.u32 (!%p16150_p2), %s15979_s1, 4  ;;  %s638_s8 = int_to_ptr.vmem [resolvable:$true] %s637_s8 }
  0x23   : > { %s17231_s28 = sld [smem:[#allocation83_spill]] (!%p16150_p2)  ;;  %s15980_s6 = smov (!%p16150_p2), [#allocation7]  }
  0x24   : > { %s17232_s29 = sld [smem:[#allocation85_spill]] (!%p16150_p2)  ;;  %s663_s30 = sshll.u32 (!%p16150_p2), %s15980_s6, 4  ;;  %s664_s30 = int_to_ptr.vmem [resolvable:$true] %s663_s30 }
  0x25   : > { %s635_s26 = sshll.u32 (!%p16150_p2), %s17230_s3, 4  ;;  %s15981_s7 = smov (!%p16150_p2), [#allocation10]   ;;  %s636_s26 = int_to_ptr.hbm [resolvable:$true] %s635_s26 }
  0x26   : > { %15041 = dma.hbm_to_vmem [thread:$0]  (%p15134_p3), %s636_s26, 64, %s638_s8, [#allocation5]  }
  0x27   : > { %s689_s3 = sshll.u32 %s15981_s7, 4  ;;  %s17233_s4 = sld [smem:[#allocation87_spill]]  ;;  %s690_s3 = int_to_ptr.vmem [resolvable:$true] %s689_s3 }
  0x28   : > { %s17234_s10 = sld [smem:[#allocation89_spill]]  ;;  %s15982_s6 = smov [#allocation13]  }
  0x29   : > { %s661_s9 = sshll.u32 %s17231_s28, 4  ;;  %s713_s5 = sshll.u32 %s15982_s6, 4  ;;  %s662_s9 = int_to_ptr.hbm [resolvable:$true] %s661_s9  ;;  %s714_s5 = int_to_ptr.vmem [resolvable:$true] %s713_s5 }
  0x2a   : > { %s687_s25 = sshll.u32 %s17232_s29, 4  ;;  %s17235_s12 = sld [smem:[#allocation90_spill]]  ;;  %s688_s25 = int_to_ptr.hbm [resolvable:$true] %s687_s25 }
  0x2b   : > { %15045 = dma.hbm_to_vmem [thread:$0]  (%p15134_p3), %s662_s9, 32, %s664_s30, [#allocation8]  }
  0x2c   : > { %15049 = dma.hbm_to_vmem [thread:$0]  (%p15134_p3), %s688_s25, 16, %s690_s3, [#allocation11]  }
  0x2d   : > { %s711_s28 = sshll.u32 %s17233_s4, 4  ;;  %s15983_s9 = smov [#allocation16]   ;;  %s712_s28 = int_to_ptr.hbm [resolvable:$true] %s711_s28 }
  0x2e   : > { %s737_s8 = sshll.u32 %s17234_s10, 4  ;;  %s739_s0 = sshll.u32 %s15983_s9, 4  ;;  %s738_s8 = int_to_ptr.hbm [resolvable:$true] %s737_s8  ;;  %s740_s0 = int_to_ptr.vmem [resolvable:$true] %s739_s0 }
  0x2f   : > { %15053 = dma.hbm_to_vmem [thread:$0]  (%p15134_p3), %s712_s28, 16, %s714_s5, [#allocation14]  }
  0x30   : > { %s761_s1 = sshll.u32 %s17235_s12, 4  ;;  %s787_s27 = sshll.u32 %s17152_s14, 4  ;;  %s762_s1 = int_to_ptr.hbm [resolvable:$true] %s761_s1  ;;  %s788_s27 = int_to_ptr.hbm [resolvable:$true] %s787_s27 }
  0x31   : > { %15057 = dma.hbm_to_vmem [thread:$0]  (%p15134_p3), %s738_s8, 16, %s740_s0, [#allocation17]  }
  0x32   : > { %s15984_s4 = smov [#allocation19]   ;;  %s15985_s28 = smov [#allocation22]  }
  0x33   : > { %s763_s26 = sshll.u32 %s15984_s4, 4  ;;  %s789_s29 = sshll.u32 %s15985_s28, 4  ;;  %s764_s26 = int_to_ptr.vmem [resolvable:$true] %s763_s26  ;;  %s790_s29 = int_to_ptr.vmem [resolvable:$true] %s789_s29 }
  0x34   : > { %15061 = dma.hbm_to_vmem [thread:$0]  (%p15134_p3), %s762_s1, 16, %s764_s26, [#allocation20]  }
  0x35   : > { %s811_s9 = sshll.u32 %s17154_s16, 4  ;;  %s837_s30 = sshll.u32 %s17156_s18, 4  ;;  %s812_s9 = int_to_ptr.hbm [resolvable:$true] %s811_s9  ;;  %s838_s30 = int_to_ptr.hbm [resolvable:$true] %s837_s30 }
  0x36   : > { %15065 = dma.hbm_to_vmem [thread:$0]  (%p15134_p3), %s788_s27, 16, %s790_s29, [#allocation23]  }
  0x37   : > { %s15986_s7 = smov [#allocation25]   ;;  %s15987_s1 = smov [#allocation28]  }
  0x38   : > { %s813_s25 = sshll.u32 %s15986_s7, 4  ;;  %s839_s3 = sshll.u32 %s15987_s1, 4  ;;  %s814_s25 = int_to_ptr.vmem [resolvable:$true] %s813_s25  ;;  %s840_s3 = int_to_ptr.vmem [resolvable:$true] %s839_s3 }
  0x39   : > { %15069 = dma.hbm_to_vmem [thread:$0]  (%p15134_p3), %s812_s9, 16, %s814_s25, [#allocation26]  }
  0x3a   : > { %s862_s28 = sshll.u32 %s17158_s20, 4  ;;  %s15988_s27 = smov [#allocation31]   ;;  %s863_s28 = int_to_ptr.hbm [resolvable:$true] %s862_s28 }
  0x3b   : > { %15073 = dma.hbm_to_vmem [thread:$0]  (%p15134_p3), %s838_s30, 16, %s840_s3, [#allocation29]  }
  0x3c   : > { %s864_s29 = sshll.u32 %s15988_s27, 4  ;;  %s889_s8 = sshll.u32 %s17160_s22, 4  ;;  %s865_s29 = int_to_ptr.vmem [resolvable:$true] %s864_s29  ;;  %s890_s8 = int_to_ptr.hbm [resolvable:$true] %s889_s8 }
  0x3d   : > { %s15989_s9 = smov 16   ;;  %s15990_s0 = smov 1  }
  0x3e   : > { %15077 = dma.hbm_to_vmem [thread:$0]  (%p15134_p3), %s863_s28, 160, %s865_s29, [#allocation32], %s15989_s9, %s15989_s9, %s15990_s0  }
  0x3f   : > { %s15991_s7 = smov [#allocation34]   ;;  %s17236_s30 = sld [smem:[#allocation80_spill]] }
  0x40   : > { %s891_s25 = sshll.u32 %s15991_s7, 4  ;;  %s15992_s26 = smov [#allocation2]   ;;  %s892_s25 = int_to_ptr.vmem [resolvable:$true] %s891_s25 }
  0x41   : > { %15081 = dma.hbm_to_vmem [thread:$0]  (%p15134_p3), %s890_s8, 16, %s892_s25, [#allocation35]  }
  0x42   : > { %s622_s27 = sshll.u32 %s15992_s26, 4  ;;  %s17237_s10 = sld [smem:[#allocation82_spill]]  ;;  %s623_s27 = int_to_ptr.vmem [resolvable:$true] %s622_s27 }
  0x43   : > { %s15993_s28 = smov 256   ;;  %s15994_s29 = smov [#allocation6]  }
  0x44   : > { %s648_s0 = sshll.u32 %s15994_s29, 4  ;;  %s15995_s7 = smov 128   ;;  %s649_s0 = int_to_ptr.vmem [resolvable:$true] %s648_s0 }
  0x45   : > { %s620_s3 = sshll.u32 %s17236_s30, 4  ;;  %s15996_s1 = smov 8   ;;  %s621_s3 = int_to_ptr.hbm [resolvable:$true] %s620_s3 }
  0x46   : > { %15039 = dma.hbm_to_vmem [thread:$0]  (%p15134_p3), %s621_s3, 98304, %s623_s27, [#allocation3], %s15993_s28, %s15993_s28, %s15989_s9  }
  0x47   : > { %s17238_s4 = sld [smem:[#allocation84_spill]]  ;;  %s15997_s26 = smov [#allocation9]  }
  0x48   : > { %s646_s12 = sshll.u32 %s17237_s10, 4  ;;  %s674_s10 = sshll.u32 %s15997_s26, 4  ;;  %s647_s12 = int_to_ptr.hbm [resolvable:$true] %s646_s12  ;;  %s675_s10 = int_to_ptr.vmem [resolvable:$true] %s674_s10 }
  0x49   : > { %15043 = dma.hbm_to_vmem [thread:$0]  (%p15134_p3), %s647_s12, 8192, %s649_s0, [#allocation5], %s15995_s7, %s15995_s7, %s15996_s1  }
  0x4a   : > { %s17239_s3 = sld [smem:[#allocation86_spill]]  ;;  %s15998_s5 = smov 64  }
  0x4b   : > { %s15999_s28 = smov 4   ;;  %s16000_s12 = smov [#allocation12]  }
  0x4c   : > { %s701_s29 = sshll.u32 %s16000_s12, 4  ;;  %s17240_s1 = sld [smem:[#allocation88_spill]]  ;;  %s702_s29 = int_to_ptr.vmem [resolvable:$true] %s701_s29 }
  0x4d   : > { %s672_s30 = sshll.u32 %s17238_s4, 4  ;;  %s749_s26 = sshll.u32 %s17149_s11, 4  ;;  %s673_s30 = int_to_ptr.hbm [resolvable:$true] %s672_s30  ;;  %s750_s26 = int_to_ptr.hbm [resolvable:$true] %s749_s26 }
  0x4e   : > { %15047 = dma.hbm_to_vmem [thread:$0]  (%p15134_p3), %s673_s30, 2048, %s675_s10, [#allocation8], %s15998_s5, %s15998_s5, %s15999_s28  }
  0x4f   : > { %s16001_s6 = smov [#allocation15]   ;;  %s16002_s30 = smov [#allocation18]  }
  0x50   : > { %s699_s27 = sshll.u32 %s17239_s3, 4  ;;  %s724_s9 = sshll.u32 %s16001_s6, 4  ;;  %s700_s27 = int_to_ptr.hbm [resolvable:$true] %s699_s27  ;;  %s725_s9 = int_to_ptr.vmem [resolvable:$true] %s724_s9 }
  0x51   : > { %15051 = dma.hbm_to_vmem [thread:$0]  (%p15134_p3), %s700_s27, 16, %s702_s29, [#allocation11]  }
  0x52   : > { %s722_s8 = sshll.u32 %s17240_s1, 4  ;;  %s751_s10 = sshll.u32 %s16002_s30, 4  ;;  %s723_s8 = int_to_ptr.hbm [resolvable:$true] %s722_s8  ;;  %s752_s10 = int_to_ptr.vmem [resolvable:$true] %s751_s10 }
  0x53   : > { %15055 = dma.hbm_to_vmem [thread:$0]  (%p15134_p3), %s723_s8, 1024, %s725_s9, [#allocation14], %s15998_s5, %s15998_s5, %s15999_s28  }
  0x54   : > { %s772_s27 = sshll.u32 %s17151_s13, 4  ;;  %s799_s7 = sshll.u32 %s17153_s15, 4  ;;  %s773_s27 = int_to_ptr.hbm [resolvable:$true] %s772_s27  ;;  %s800_s7 = int_to_ptr.hbm [resolvable:$true] %s799_s7 }
  0x55   : > { %15059 = dma.hbm_to_vmem [thread:$0]  (%p15134_p3), %s750_s26, 16, %s752_s10, [#allocation17]  }
  0x56   : > { %s16003_s1 = smov [#allocation21]   ;;  %s16004_s8 = smov [#allocation24]  }
  0x57   : > { %s774_s25 = sshll.u32 %s16003_s1, 4  ;;  %s801_s4 = sshll.u32 %s16004_s8, 4  ;;  %s775_s25 = int_to_ptr.vmem [resolvable:$true] %s774_s25  ;;  %s802_s4 = int_to_ptr.vmem [resolvable:$true] %s801_s4 }
  0x58   : > { %15063 = dma.hbm_to_vmem [thread:$0]  (%p15134_p3), %s773_s27, 1024, %s775_s25, [#allocation20], %s15998_s5, %s15998_s5, %s15999_s28  }
  0x59   : > { %s822_s26 = sshll.u32 %s17155_s17, 4  ;;  %s848_s3 = sshll.u32 %s17157_s19, 4  ;;  %s823_s26 = int_to_ptr.hbm [resolvable:$true] %s822_s26  ;;  %s849_s3 = int_to_ptr.hbm [resolvable:$true] %s848_s3 }
  0x5a   : > { %15067 = dma.hbm_to_vmem [thread:$0]  (%p15134_p3), %s800_s7, 16, %s802_s4, [#allocation23]  }
  0x5b   : > { %s16005_s12 = smov [#allocation27]   ;;  %s16006_s27 = smov [#allocation30]  }
  0x5c   : > { %s824_s29 = sshll.u32 %s16005_s12, 4  ;;  %s850_s0 = sshll.u32 %s16006_s27, 4  ;;  %s825_s29 = int_to_ptr.vmem [resolvable:$true] %s824_s29  ;;  %s851_s0 = int_to_ptr.vmem [resolvable:$true] %s850_s0 }
  0x5d   : > { %15071 = dma.hbm_to_vmem [thread:$0]  (%p15134_p3), %s823_s26, 1024, %s825_s29, [#allocation26], %s15998_s5, %s15998_s5, %s15999_s28  }
  0x5e   : > { %s877_s7 = sshll.u32 %s17159_s21, 4  ;;  %s900_s6 = sshll.u32 %s17161_s23, 4  ;;  %s878_s7 = int_to_ptr.hbm [resolvable:$true] %s877_s7  ;;  %s901_s6 = int_to_ptr.hbm [resolvable:$true] %s900_s6 }
  0x5f   : > { %15075 = dma.hbm_to_vmem [thread:$0]  (%p15134_p3), %s849_s3, 10240, %s851_s0, [#allocation29], %s15998_s5, %s15998_s5, %s15999_s28  }
  0x60   : > { %s16007_s9 = smov [#allocation33]   ;;  %s16008_s30 = smov [#allocation36]  }
  0x61   : > { %s879_s26 = sshll.u32 %s16007_s9, 4  ;;  %s902_s10 = sshll.u32 %s16008_s30, 4  ;;  %s880_s26 = int_to_ptr.vmem [resolvable:$true] %s879_s26  ;;  %s903_s10 = int_to_ptr.vmem [resolvable:$true] %s902_s10 }
  0x62   : > { %15079 = dma.hbm_to_vmem [thread:$0]  (%p15134_p3), %s878_s7, 16, %s880_s26, [#allocation32]  }
  0x63   : > { %s915_s27 = sshll.u32 %s17162_s24, 4  ;;  %s16009_s3 = smov [#allocation37]   ;;  %s916_s27 = int_to_ptr.hbm [resolvable:$true] %s915_s27 }
  0x64   : > { %15083 = dma.hbm_to_vmem [thread:$0]  (%p15134_p3), %s901_s6, 1024, %s903_s10, [#allocation35], %s15998_s5, %s15998_s5, %s15999_s28  }
  0x65   : > { %s917_s0 = sshll.u32 %s16009_s3, 4  ;;  %s918_s0 = int_to_ptr.vmem [resolvable:$true] %s917_s0 }
  0x66   : > { %15085 = dma.hbm_to_vmem [thread:$0]  (%p15134_p3), %s916_s27, 16, %s918_s0, [#allocation38]  }
  0x67 PF: > { %940 = sbr.rel (%p16150_p2) target bundleno = 3460 (0xd84), region = 120 }
  0x6c   : > { %p15158_p4 = scmp.eq.s32.totalorder %s16146_s2, 0 }
  0x6e   : > { %15924 = dma.done.wait (%p15158_p4), [#allocation3], 98304  }
  0x6f   : > { %15926 = vsyncadd (%p15158_p4), [#allocation3], 4294868992 }
  0x70   : > { %15928 = dma.done.wait (%p15158_p4), [#allocation5], 8256  }
  0x71   : > { %15930 = vsyncadd (%p15158_p4), [#allocation5], 4294959040 }
  0x72   : > { %15932 = dma.done.wait (%p15158_p4), [#allocation8], 2080  }
  0x73   : > { %15934 = vsyncadd (%p15158_p4), [#allocation8], 4294965216 }
  0x74   : > { %15936 = dma.done.wait (%p15158_p4), [#allocation11], 32  }
  0x75   : > { %15938 = vsyncadd (%p15158_p4), [#allocation11], 4294967264 }
  0x76   : > { %15940 = dma.done.wait (%p15158_p4), [#allocation14], 1040  }
  0x77   : > { %15942 = vsyncadd (%p15158_p4), [#allocation14], 4294966256 }
  0x78   : > { %15944 = dma.done.wait (%p15158_p4), [#allocation17], 32  }
  0x79   : > { %15946 = vsyncadd (%p15158_p4), [#allocation17], 4294967264 }
  0x7a   : > { %15948 = dma.done.wait (%p15158_p4), [#allocation20], 1040  }
  0x7b   : > { %15950 = vsyncadd (%p15158_p4), [#allocation20], 4294966256 }
  0x7c   : > { %15952 = dma.done.wait (%p15158_p4), [#allocation23], 32  }
  0x7d   : > { %15954 = vsyncadd (%p15158_p4), [#allocation23], 4294967264 }
  0x7e   : > { %15956 = dma.done.wait (%p15158_p4), [#allocation26], 1040  }
  0x7f   : > { %15958 = vsyncadd (%p15158_p4), [#allocation26], 4294966256 }
  0x80   : > { %15960 = dma.done.wait (%p15158_p4), [#allocation29], 10256  }
  0x81   : > { %15962 = vsyncadd (%p15158_p4), [#allocation29], 4294957040 }
  0x82   : > { %15964 = dma.done.wait (%p15158_p4), [#allocation32], 176  }
  0x83   : > { %15966 = vsyncadd (%p15158_p4), [#allocation32], 4294967120 }
  0x84   : > { %15968 = dma.done.wait (%p15158_p4), [#allocation35], 1040  }
  0x85   : > { %15970 = vsyncadd (%p15158_p4), [#allocation35], 4294966256 }
  0x86   : > { %15972 = dma.done.wait (%p15158_p4), [#allocation38], 16  }
  0x87   : > { %15974 = vsyncadd (%p15158_p4), [#allocation38], 4294967280  ;;  %s10220_s5 = sshll.u32 %s16146_s2, 2  ;;  %v10338_v0 = vld [vmem:[#allocation2 + $0xe0] sm:$0xf]  ;;  %s17243_s8 = sld [smem:[#allocation79_spill]] }
  0x88   : > { %v14096_v1 = vld [vmem:[#allocation2 + $0xec] sm:$0xf0]  ;;  %v10466_v2 = vld [vmem:[#allocation2 + $0x1e0] sm:$0xf]  ;;  %p16353_p5 = scmp.lt.s32.totalorder %s10220_s5, 7  ;;  %s17337_s30 = sld [smem:[#allocation91_spill]] }
  0x89   : > { %v10339_v3 = vor.u32 %v14096_v1, %v10338_v0  ;;  %v14128_v4 = vld [vmem:[#allocation2 + $0x1ec] sm:$0xf0]  ;;  %v10594_v5 = vld [vmem:[#allocation2 + $0x2e0] sm:$0xf] }
  0x8a   : > { %v14160_v6 = vld [vmem:[#allocation2 + $0x2ec] sm:$0xf0]  ;;  %v10467_v7 = vor.u32 %v14128_v4, %v10466_v2  ;;  %v10722_v9 = vld [vmem:[#allocation2 + $0x3e0] sm:$0xf]  ;;  %s17340_s5 = smov (!%p16353_p5, %s10220_s5), 7 }
  0x8b   : > { %v10595_v8 = vor.u32 %v14160_v6, %v10594_v5  ;;  %v14192_v10 = vld [vmem:[#allocation2 + $0x3ec] sm:$0xf0]  ;;  %v10322_v11 = vld [vmem:[#allocation2 + $0xc0] sm:$0xf]  ;;  %5900 = vmatpush.bf16.msra.mxu0 %v10339_v3  ;;  %s15037_s2 = smul.u32 192, %s17340_s5  ;;  %s10223_s6 = sshll.u32 %s17340_s5, 2 }
  0x8c   : > { %v10723_v12 = vor.u32 %v14192_v10, %v10722_v9  ;;  %v14092_v13 = vld [vmem:[#allocation2 + $0xcc] sm:$0xf0]  ;;  %v10450_v14 = vld [vmem:[#allocation2 + $0x1c0] sm:$0xf]  ;;  %5919 = vmatpush.bf16.msra.mxu1 %v10467_v7 }
  0x8d   : > { %v14124_v15 = vld [vmem:[#allocation2 + $0x1cc] sm:$0xf0]  ;;  %5938 = vmatpush.bf16.msra.mxu2 %v10595_v8  ;;  %v10323_v16 = vor.u32 %v14092_v13, %v10322_v11  ;;  %v10578_v18 = vld [vmem:[#allocation2 + $0x2c0] sm:$0xf]  ;;  %s16367_s4 = scalar_lea.vmem %s17243_s8, %s15037_s2 }
  0x8e   : > { %v10451_v17 = vor.u32 %v14124_v15, %v10450_v14  ;;  %v14156_v19 = vld [vmem:[#allocation2 + $0x2cc] sm:$0xf0]  ;;  %v10706_v20 = vld [vmem:[#allocation2 + $0x3c0] sm:$0xf]  ;;  %5957 = vmatpush.bf16.msra.mxu3 %v10723_v12  ;;  %s1136_s10 = scalar_lea.vmem %s17337_s30, %s10223_s6 }
  0x8f   : > { %v10579_v21 = vor.u32 %v14156_v19, %v10578_v18  ;;  %v14188_v22 = vld [vmem:[#allocation2 + $0x3cc] sm:$0xf0]  ;;  %v10306_v23 = vld [vmem:[#allocation2 + $0xa0] sm:$0xf]  ;;  %5901 = vmatpush.bf16.msra.mxu0 %v10323_v16 }
  0x90   : > { %v14088_v24 = vld [vmem:[#allocation2 + $0xac] sm:$0xf0]  ;;  %v10707_v25 = vor.u32 %v14188_v22, %v10706_v20  ;;  %v10434_v26 = vld [vmem:[#allocation2 + $0x1a0] sm:$0xf]  ;;  %5920 = vmatpush.bf16.msra.mxu1 %v10451_v17 }
  0x91   : > { %v14120_v27 = vld [vmem:[#allocation2 + $0x1ac] sm:$0xf0]  ;;  %v10562_v28 = vld [vmem:[#allocation2 + $0x2a0] sm:$0xf]  ;;  %v10307_v29 = vor.u32 %v14088_v24, %v10306_v23  ;;  %5939 = vmatpush.bf16.msra.mxu2 %v10579_v21 }
  0x92   : > { %v14152_v30 = vld [vmem:[#allocation2 + $0x2ac] sm:$0xf0]  ;;  %v10690_v31 = vld [vmem:[#allocation2 + $0x3a0] sm:$0xf]  ;;  %v10435_v33 = vor.u32 %v14120_v27, %v10434_v26  ;;  %5958 = vmatpush.bf16.msra.mxu3 %v10707_v25 }
  0x93   : > { %v14184_v32 = vld [vmem:[#allocation2 + $0x3ac] sm:$0xf0]  ;;  %v10563_v34 = vor.u32 %v14152_v30, %v10562_v28  ;;  %v10290_v35 = vld [vmem:[#allocation2 + $0x80] sm:$0xf]  ;;  %5902 = vmatpush.bf16.msra.mxu0 %v10307_v29  ;;  %v1139_v30 = vld [vmem:[%s16367_s4 + $0x8] sm:$0xff] }
  0x94   : > { %v14084_v36 = vld [vmem:[#allocation2 + $0x8c] sm:$0xf0]  ;;  %v10418_v37 = vld [vmem:[#allocation2 + $0x180] sm:$0xf]  ;;  %v10691_v38 = vor.u32 %v14184_v32, %v10690_v31  ;;  %5921 = vmatpush.bf16.msra.mxu1 %v10435_v33  ;;  %v1163_v31 = vld [vmem:[%s16367_s4 + $0xc8] sm:$0xff] }
  0x95   : > { %v14116_v39 = vld [vmem:[#allocation2 + $0x18c] sm:$0xf0]  ;;  %v10546_v40 = vld [vmem:[#allocation2 + $0x280] sm:$0xf]  ;;  %v10291_v44 = vor.u32 %v14084_v36, %v10290_v35  ;;  %5940 = vmatpush.bf16.msra.mxu2 %v10563_v34 }
  0x96   : > { %v14148_v41 = vld [vmem:[#allocation2 + $0x28c] sm:$0xf0]  ;;  %v10674_v42 = vld [vmem:[#allocation2 + $0x380] sm:$0xf]  ;;  %v10419_v45 = vor.u32 %v14116_v39, %v10418_v37  ;;  %5959 = vmatpush.bf16.msra.mxu3 %v10691_v38 }
  0x97   : > { %v14180_v43 = vld [vmem:[#allocation2 + $0x38c] sm:$0xf0]  ;;  %v10547_v46 = vor.u32 %v14148_v41, %v10546_v40  ;;  %v10274_v47 = vld [vmem:[#allocation2 + $0x60] sm:$0xf]  ;;  %5903 = vmatpush.bf16.msra.mxu0 %v10291_v44  ;;  %v1141_v41 = vld [vmem:[%s16367_s4 + $0x18] sm:$0xff] }
  0x98   : > { %v14080_v48 = vld [vmem:[#allocation2 + $0x6c] sm:$0xf0]  ;;  %v10402_v49 = vld [vmem:[#allocation2 + $0x160] sm:$0xf]  ;;  %v10675_v50 = vor.u32 %v14180_v43, %v10674_v42  ;;  %5922 = vmatpush.bf16.msra.mxu1 %v10419_v45  ;;  %v1165_v42 = vld [vmem:[%s16367_s4 + $0xd8] sm:$0xff] }
  0x99   : > { %v14112_v51 = vld [vmem:[#allocation2 + $0x16c] sm:$0xf0]  ;;  %v10530_v52 = vld [vmem:[#allocation2 + $0x260] sm:$0xf]  ;;  %v10275_v56 = vor.u32 %v14080_v48, %v10274_v47  ;;  %5941 = vmatpush.bf16.msra.mxu2 %v10547_v46 }
  0x9a   : > { %v14144_v53 = vld [vmem:[#allocation2 + $0x26c] sm:$0xf0]  ;;  %v10658_v54 = vld [vmem:[#allocation2 + $0x360] sm:$0xf]  ;;  %v10403_v57 = vor.u32 %v14112_v51, %v10402_v49  ;;  %5960 = vmatpush.bf16.msra.mxu3 %v10675_v50 }
  0x9b   : > { %v14176_v55 = vld [vmem:[#allocation2 + $0x36c] sm:$0xf0]  ;;  %v10531_v58 = vor.u32 %v14144_v53, %v10530_v52  ;;  %v10258_v59 = vld [vmem:[#allocation2 + $0x40] sm:$0xf]  ;;  %5904 = vmatpush.bf16.msra.mxu0 %v10275_v56  ;;  %v16379_v53 = vpack.c.bf16 %v1163_v31, %v1139_v30 }
  0x9c   : > { %v14076_v60 = vld [vmem:[#allocation2 + $0x4c] sm:$0xf0]  ;;  %v10386_v61 = vld [vmem:[#allocation2 + $0x140] sm:$0xf]  ;;  %v10659_v62 = vor.u32 %v14176_v55, %v10658_v54  ;;  %5923 = vmatpush.bf16.msra.mxu1 %v10403_v57  ;;  %v16383_v57 = vpack.c.bf16 %v1165_v42, %v1141_v41 }
  0x9d   : > { %v14108_v63 = vld [vmem:[#allocation2 + $0x14c] sm:$0xf0]  ;;  %v10514_v0 = vld [vmem:[#allocation2 + $0x240] sm:$0xf]  ;;  %v10259_v4 = vor.u32 %v14076_v60, %v10258_v59  ;;  %5942 = vmatpush.bf16.msra.mxu2 %v10531_v58 }
  0x9e   : > { %v14140_v1 = vld [vmem:[#allocation2 + $0x24c] sm:$0xf0]  ;;  %v10642_v2 = vld [vmem:[#allocation2 + $0x340] sm:$0xf]  ;;  %v10387_v5 = vor.u32 %v14108_v63, %v10386_v61  ;;  %5961 = vmatpush.bf16.msra.mxu3 %v10659_v62 }
  0x9f   : > { %v14172_v3 = vld [vmem:[#allocation2 + $0x34c] sm:$0xf0]  ;;  %v10515_v6 = vor.u32 %v14140_v1, %v10514_v0  ;;  %v10242_v7 = vld [vmem:[#allocation2 + $0x20] sm:$0xf]  ;;  %5905 = vmatpush.bf16.msra.mxu0 %v10259_v4 }
  0xa0   : > { %v14072_v8 = vld [vmem:[#allocation2 + $0x2c] sm:$0xf0]  ;;  %v10370_v9 = vld [vmem:[#allocation2 + $0x120] sm:$0xf]  ;;  %v10643_v10 = vor.u32 %v14172_v3, %v10642_v2  ;;  %5924 = vmatpush.bf16.msra.mxu1 %v10387_v5 }
  0xa1   : > { %v14104_v11 = vld [vmem:[#allocation2 + $0x12c] sm:$0xf0]  ;;  %v10498_v12 = vld [vmem:[#allocation2 + $0x220] sm:$0xf]  ;;  %v10243_v17 = vor.u32 %v14072_v8, %v10242_v7  ;;  %5943 = vmatpush.bf16.msra.mxu2 %v10515_v6 }
  0xa2   : > { %v14136_v13 = vld [vmem:[#allocation2 + $0x22c] sm:$0xf0]  ;;  %v10626_v14 = vld [vmem:[#allocation2 + $0x320] sm:$0xf]  ;;  %v10371_v21 = vor.u32 %v14104_v11, %v10370_v9  ;;  %5962 = vmatpush.bf16.msra.mxu3 %v10643_v10 }
  0xa3   : > { %v14168_v15 = vld [vmem:[#allocation2 + $0x32c] sm:$0xf0]  ;;  %v10226_v16 = vld [vmem:[#allocation2] sm:$0xf]  ;;  %v10499_v22 = vor.u32 %v14136_v13, %v10498_v12  ;;  %5906 = vmatpush.bf16.msra.mxu0 %v10243_v17 }
  0xa4   : > { %v14068_v18 = vld [vmem:[#allocation2 + $0xc] sm:$0xf0]  ;;  %v10354_v19 = vld [vmem:[#allocation2 + $0x100] sm:$0xf]  ;;  %v10627_v26 = vor.u32 %v14168_v15, %v10626_v14  ;;  %5925 = vmatpush.bf16.msra.mxu1 %v10371_v21 }
  0xa5   : > { %v14100_v20 = vld [vmem:[#allocation2 + $0x10c] sm:$0xf0]  ;;  %v10482_v23 = vld [vmem:[#allocation2 + $0x200] sm:$0xf]  ;;  %v10227_v34 = vor.u32 %v14068_v18, %v10226_v16  ;;  %5944 = vmatpush.bf16.msra.mxu2 %v10499_v22 }
  0xa6   : > { %v14132_v24 = vld [vmem:[#allocation2 + $0x20c] sm:$0xf0]  ;;  %v10610_v25 = vld [vmem:[#allocation2 + $0x300] sm:$0xf]  ;;  %v10355_v38 = vor.u32 %v14100_v20, %v10354_v19  ;;  %5963 = vmatpush.bf16.msra.mxu3 %v10627_v26 }
  0xa7   : > { %v14164_v27 = vld [vmem:[#allocation2 + $0x30c] sm:$0xf0]  ;;  %v1138_v28 = vld [vmem:[%s16367_s4] sm:$0xff]  ;;  %v10483_v39 = vor.u32 %v14132_v24, %v10482_v23  ;;  %5907 = vmatpush.bf16.msra.mxu0 %v10227_v34 }
  0xa8   : > { %v1162_v29 = vld [vmem:[%s16367_s4 + $0xc0] sm:$0xff]  ;;  %v14288_v33 = vld [vmem:[#allocation2 + $0x6ec] sm:$0xf0]  ;;  %v10611_v43 = vor.u32 %v14164_v27, %v10610_v25  ;;  %5926 = vmatpush.bf16.msra.mxu1 %v10355_v38  ;;  %v1213_v38 = vld [vmem:[%s16367_s4 + $0x258] sm:$0xff] }
  0xa9   : > { %v11106_v32 = vld [vmem:[#allocation2 + $0x6e0] sm:$0xf]  ;;  %v1140_v35 = vld [vmem:[%s16367_s4 + $0x10] sm:$0xff]  ;;  %v16377_v48 = vpack.c.bf16 %v1162_v29, %v1138_v28  ;;  %5945 = vmatpush.bf16.msra.mxu2 %v10483_v39  ;;  %v1187_v28 = vld [vmem:[%s16367_s4 + $0x188] sm:$0xff] }
  0xaa   : > { %v10978_v36 = vld [vmem:[#allocation2 + $0x5e0] sm:$0xf]  ;;  %v14256_v37 = vld [vmem:[#allocation2 + $0x5ec] sm:$0xf0]  ;;  %v11107_v44 = vor.u32 %v14288_v33, %v11106_v32  ;;  %5964 = vmatpush.bf16.msra.mxu3 %v10611_v43  ;;  %v1211_v29 = vld [vmem:[%s16367_s4 + $0x248] sm:$0xff] }
  0xab   : > { %v1164_v40 = vld [vmem:[%s16367_s4 + $0xd0] sm:$0xff]  ;;  %v10850_v45 = vld [vmem:[#allocation2 + $0x4e0] sm:$0xf]  ;;  %v10979_v49 = vor.u32 %v14256_v37, %v10978_v36  ;;  %5908 = vmatmul.bf16.vlgmr.msra.gmra.mxu0 %v16377_v48  ;;  %5927 = vmatmul.bf16.vlgmr.msra.gmra.mxu1 %v16379_v53  ;;  %v1189_v37 = vld [vmem:[%s16367_s4 + $0x198] sm:$0xff] }
  0xac   : > { %v14224_v46 = vld [vmem:[#allocation2 + $0x4ec] sm:$0xf0]  ;;  %v11234_v47 = vld [vmem:[#allocation2 + $0x7e0] sm:$0xf]  ;;  %v16381_v54 = vpack.c.bf16 %v1164_v40, %v1140_v35 }
  0xad   : > { %v14320_v50 = vld [vmem:[#allocation2 + $0x7ec] sm:$0xf0]  ;;  %v11090_v51 = vld [vmem:[#allocation2 + $0x6c0] sm:$0xf]  ;;  %v10851_v58 = vor.u32 %v14224_v46, %v10850_v45  ;;  %6014 = vmatpush.bf16.msrb.mxu2 %v11107_v44  ;;  %5995 = vmatpush.bf16.msrb.mxu1 %v10979_v49 }
  0xae   : > { %v14284_v52 = vld [vmem:[#allocation2 + $0x6cc] sm:$0xf0]  ;;  %v10962_v55 = vld [vmem:[#allocation2 + $0x5c0] sm:$0xf]  ;;  %v11235_v59 = vor.u32 %v14320_v50, %v11234_v47  ;;  %5946 = vmatmul.bf16.vlgmr.msra.gmra.mxu2 %v16381_v54  ;;  %5965 = vmatmul.bf16.vlgmr.msra.gmra.mxu3 %v16383_v57  ;;  %v16399_v50 = vpack.c.bf16 %v1211_v29, %v1187_v28 }
  0xaf   : > { %v14252_v56 = vld [vmem:[#allocation2 + $0x5cc] sm:$0xf0]  ;;  %v11091_v60 = vor.u32 %v14284_v52, %v11090_v51  ;;  %v10834_v61 = vld [vmem:[#allocation2 + $0x4c0] sm:$0xf]  ;;  %5976 = vmatpush.bf16.msrb.mxu0 %v10851_v58 }
  0xb0   : > { %v14220_v62 = vld [vmem:[#allocation2 + $0x4cc] sm:$0xf0]  ;;  %v11218_v63 = vld [vmem:[#allocation2 + $0x7c0] sm:$0xf]  ;;  %v10963_v0 = vor.u32 %v14252_v56, %v10962_v55  ;;  %6033 = vmatpush.bf16.msrb.mxu3 %v11235_v59  ;;  %v16403_v56 = vpack.c.bf16 %v1213_v38, %v1189_v37 }
  0xb1   : > { %v14316_v1 = vld [vmem:[#allocation2 + $0x7cc] sm:$0xf0]  ;;  %v11074_v2 = vld [vmem:[#allocation2 + $0x6a0] sm:$0xf]  ;;  %v10835_v6 = vor.u32 %v14220_v62, %v10834_v61  ;;  %6015 = vmatpush.bf16.msrb.mxu2 %v11091_v60 }
  0xb2   : > { %v14280_v3 = vld [vmem:[#allocation2 + $0x6ac] sm:$0xf0]  ;;  %v10946_v4 = vld [vmem:[#allocation2 + $0x5a0] sm:$0xf]  ;;  %v11219_v7 = vor.u32 %v14316_v1, %v11218_v63  ;;  %5996 = vmatpush.bf16.msrb.mxu1 %v10963_v0 }
  0xb3   : > { %v14248_v5 = vld [vmem:[#allocation2 + $0x5ac] sm:$0xf0]  ;;  %v11075_v8 = vor.u32 %v14280_v3, %v11074_v2  ;;  %v10818_v9 = vld [vmem:[#allocation2 + $0x4a0] sm:$0xf]  ;;  %5977 = vmatpush.bf16.msrb.mxu0 %v10835_v6 }
  0xb4   : > { %v14216_v10 = vld [vmem:[#allocation2 + $0x4ac] sm:$0xf0]  ;;  %v11202_v11 = vld [vmem:[#allocation2 + $0x7a0] sm:$0xf]  ;;  %v10947_v12 = vor.u32 %v14248_v5, %v10946_v4  ;;  %6034 = vmatpush.bf16.msrb.mxu3 %v11219_v7 }
  0xb5   : > { %v14312_v13 = vld [vmem:[#allocation2 + $0x7ac] sm:$0xf0]  ;;  %v11058_v14 = vld [vmem:[#allocation2 + $0x680] sm:$0xf]  ;;  %v10819_v18 = vor.u32 %v14216_v10, %v10818_v9  ;;  %6016 = vmatpush.bf16.msrb.mxu2 %v11075_v8 }
  0xb6   : > { %v14276_v15 = vld [vmem:[#allocation2 + $0x68c] sm:$0xf0]  ;;  %v10930_v16 = vld [vmem:[#allocation2 + $0x580] sm:$0xf]  ;;  %v11203_v22 = vor.u32 %v14312_v13, %v11202_v11  ;;  %5997 = vmatpush.bf16.msrb.mxu1 %v10947_v12 }
  0xb7   : > { %v14244_v17 = vld [vmem:[#allocation2 + $0x58c] sm:$0xf0]  ;;  %v10802_v19 = vld [vmem:[#allocation2 + $0x480] sm:$0xf]  ;;  %v11059_v23 = vor.u32 %v14276_v15, %v11058_v14  ;;  %5978 = vmatpush.bf16.msrb.mxu0 %v10819_v18 }
  0xb8   : > { %v14212_v20 = vld [vmem:[#allocation2 + $0x48c] sm:$0xf0]  ;;  %v11186_v21 = vld [vmem:[#allocation2 + $0x780] sm:$0xf]  ;;  %v10931_v27 = vor.u32 %v14244_v17, %v10930_v16  ;;  %6035 = vmatpush.bf16.msrb.mxu3 %v11203_v22 }
  0xb9   : > { %v14308_v24 = vld [vmem:[#allocation2 + $0x78c] sm:$0xf0]  ;;  %v1186_v25 = vld [vmem:[%s16367_s4 + $0x180] sm:$0xff]  ;;  %v10803_v35 = vor.u32 %v14212_v20, %v10802_v19  ;;  %6017 = vmatpush.bf16.msrb.mxu2 %v11059_v23 }
  0xba   : > { %v1210_v26 = vld [vmem:[%s16367_s4 + $0x240] sm:$0xff]  ;;  %v14272_v31 = vld [vmem:[#allocation2 + $0x66c] sm:$0xf0]  ;;  %v11187_v39 = vor.u32 %v14308_v24, %v11186_v21  ;;  %5998 = vmatpush.bf16.msrb.mxu1 %v10931_v27 }
  0xbb   : > { %v11042_v30 = vld [vmem:[#allocation2 + $0x660] sm:$0xf]  ;;  %v1188_v32 = vld [vmem:[%s16367_s4 + $0x190] sm:$0xff]  ;;  %v16397_v44 = vpack.c.bf16 %v1210_v26, %v1186_v25  ;;  %5979 = vmatpush.bf16.msrb.mxu0 %v10803_v35  ;;  %5932 = vmatmul.bf16.gmra.mxu1 %v16399_v50 }
  0xbc   : > { %v10914_v33 = vld [vmem:[#allocation2 + $0x560] sm:$0xf]  ;;  %v14240_v34 = vld [vmem:[#allocation2 + $0x56c] sm:$0xf0]  ;;  %v11043_v40 = vor.u32 %v14272_v31, %v11042_v30  ;;  %6036 = vmatpush.bf16.msrb.mxu3 %v11187_v39 }
  0xbd   : > { %v1212_v36 = vld [vmem:[%s16367_s4 + $0x250] sm:$0xff]  ;;  %v10786_v41 = vld [vmem:[#allocation2 + $0x460] sm:$0xf]  ;;  %v10915_v45 = vor.u32 %v14240_v34, %v10914_v33  ;;  %5913 = vmatmul.bf16.gmra.mxu0 %v16397_v44  ;;  %v1167_v33 = vld [vmem:[%s16367_s4 + $0xe8] sm:$0xff] }
  0xbe   : > { %v14208_v42 = vld [vmem:[#allocation2 + $0x46c] sm:$0xf0]  ;;  %v11170_v43 = vld [vmem:[#allocation2 + $0x760] sm:$0xf]  ;;  %v16401_v51 = vpack.c.bf16 %v1212_v36, %v1188_v32  ;;  %6018 = vmatpush.bf16.msrb.mxu2 %v11043_v40  ;;  %5970 = vmatmul.bf16.gmra.mxu3 %v16403_v56  ;;  %v1143_v32 = vld [vmem:[%s16367_s4 + $0x28] sm:$0xff] }
  0xbf   : > { %v14304_v46 = vld [vmem:[#allocation2 + $0x76c] sm:$0xf0]  ;;  %v11026_v47 = vld [vmem:[#allocation2 + $0x640] sm:$0xf]  ;;  %v10787_v58 = vor.u32 %v14208_v42, %v10786_v41  ;;  %5999 = vmatpush.bf16.msrb.mxu1 %v10915_v45 }
  0xc0   : > { %v14268_v49 = vld [vmem:[#allocation2 + $0x64c] sm:$0xf0]  ;;  %v10898_v52 = vld [vmem:[#allocation2 + $0x540] sm:$0xf]  ;;  %v11171_v59 = vor.u32 %v14304_v46, %v11170_v43  ;;  %5951 = vmatmul.bf16.gmra.mxu2 %v16401_v51  ;;  %v1145_v46 = vld [vmem:[%s16367_s4 + $0x38] sm:$0xff] }
  0xc1   : > { %v14236_v55 = vld [vmem:[#allocation2 + $0x54c] sm:$0xf0]  ;;  %v11027_v60 = vor.u32 %v14268_v49, %v11026_v47  ;;  %v10770_v61 = vld [vmem:[#allocation2 + $0x440] sm:$0xf]  ;;  %5980 = vmatpush.bf16.msrb.mxu0 %v10787_v58  ;;  %v1169_v49 = vld [vmem:[%s16367_s4 + $0xf8] sm:$0xff] }
  0xc2   : > { %v14204_v62 = vld [vmem:[#allocation2 + $0x44c] sm:$0xf0]  ;;  %v11154_v63 = vld [vmem:[#allocation2 + $0x740] sm:$0xf]  ;;  %v10899_v0 = vor.u32 %v14236_v55, %v10898_v52  ;;  %6037 = vmatpush.bf16.msrb.mxu3 %v11171_v59 }
  0xc3   : > { %v14300_v1 = vld [vmem:[#allocation2 + $0x74c] sm:$0xf0]  ;;  %v11010_v2 = vld [vmem:[#allocation2 + $0x620] sm:$0xf]  ;;  %v10771_v6 = vor.u32 %v14204_v62, %v10770_v61  ;;  %6019 = vmatpush.bf16.msrb.mxu2 %v11027_v60 }
  0xc4   : > { %v14264_v3 = vld [vmem:[#allocation2 + $0x62c] sm:$0xf0]  ;;  %v10882_v4 = vld [vmem:[#allocation2 + $0x520] sm:$0xf]  ;;  %v11155_v8 = vor.u32 %v14300_v1, %v11154_v63  ;;  %6000 = vmatpush.bf16.msrb.mxu1 %v10899_v0  ;;  %v16419_v1 = vpack.c.bf16 %v1167_v33, %v1143_v32 }
  0xc5   : > { %v14232_v5 = vld [vmem:[#allocation2 + $0x52c] sm:$0xf0]  ;;  %v10754_v7 = vld [vmem:[#allocation2 + $0x420] sm:$0xf]  ;;  %v11011_v9 = vor.u32 %v14264_v3, %v11010_v2  ;;  %5981 = vmatpush.bf16.msrb.mxu0 %v10771_v6  ;;  %v16423_v6 = vpack.c.bf16 %v1169_v49, %v1145_v46 }
  0xc6   : > { %v14200_v10 = vld [vmem:[#allocation2 + $0x42c] sm:$0xf0]  ;;  %v11138_v11 = vld [vmem:[#allocation2 + $0x720] sm:$0xf]  ;;  %v10883_v13 = vor.u32 %v14232_v5, %v10882_v4  ;;  %6038 = vmatpush.bf16.msrb.mxu3 %v11155_v8 }
  0xc7   : > { %v14296_v12 = vld [vmem:[#allocation2 + $0x72c] sm:$0xf0]  ;;  %v10994_v14 = vld [vmem:[#allocation2 + $0x600] sm:$0xf]  ;;  %v10755_v20 = vor.u32 %v14200_v10, %v10754_v7  ;;  %6020 = vmatpush.bf16.msrb.mxu2 %v11011_v9 }
  0xc8   : > { %v14260_v15 = vld [vmem:[#allocation2 + $0x60c] sm:$0xf0]  ;;  %v10866_v16 = vld [vmem:[#allocation2 + $0x500] sm:$0xf]  ;;  %v11139_v24 = vor.u32 %v14296_v12, %v11138_v11  ;;  %6001 = vmatpush.bf16.msrb.mxu1 %v10883_v13 }
  0xc9   : > { %v14228_v17 = vld [vmem:[#allocation2 + $0x50c] sm:$0xf0]  ;;  %v11618_v18 = vld [vmem:[#allocation2 + $0xae0] sm:$0xf]  ;;  %v10995_v25 = vor.u32 %v14260_v15, %v10994_v14  ;;  %5982 = vmatpush.bf16.msrb.mxu0 %v10755_v20 }
  0xca   : > { %v14416_v19 = vld [vmem:[#allocation2 + $0xaec] sm:$0xf0]  ;;  %v10738_v21 = vld [vmem:[#allocation2 + $0x400] sm:$0xf]  ;;  %v10867_v29 = vor.u32 %v14228_v17, %v10866_v16  ;;  %6039 = vmatpush.bf16.msrb.mxu3 %v11139_v24 }
  0xcb   : > { %v11490_v22 = vld [vmem:[#allocation2 + $0x9e0] sm:$0xf]  ;;  %v14384_v23 = vld [vmem:[#allocation2 + $0x9ec] sm:$0xf0]  ;;  %v11619_v34 = vor.u32 %v14416_v19, %v11618_v18  ;;  %6021 = vmatpush.bf16.msrb.mxu2 %v10995_v25 }
  0xcc   : > { %v14196_v26 = vld [vmem:[#allocation2 + $0x40c] sm:$0xf0]  ;;  %v11122_v27 = vld [vmem:[#allocation2 + $0x700] sm:$0xf]  ;;  %v11491_v38 = vor.u32 %v14384_v23, %v11490_v22  ;;  %6002 = vmatpush.bf16.msrb.mxu1 %v10867_v29 }
  0xcd   : > { %v14292_v28 = vld [vmem:[#allocation2 + $0x70c] sm:$0xf0]  ;;  %v1142_v30 = vld [vmem:[%s16367_s4 + $0x20] sm:$0xff]  ;;  %v10739_v42 = vor.u32 %v14196_v26, %v10738_v21 }
  0xce   : > { %v1166_v31 = vld [vmem:[%s16367_s4 + $0xe0] sm:$0xff]  ;;  %v14352_v36 = vld [vmem:[#allocation2 + $0x8ec] sm:$0xf0]  ;;  %v11123_v47 = vor.u32 %v14292_v28, %v11122_v27 }
  0xcf   : > { %v11362_v35 = vld [vmem:[#allocation2 + $0x8e0] sm:$0xf]  ;;  %v14448_v39 = vld [vmem:[#allocation2 + $0xbec] sm:$0xf0]  ;;  %6090 = vmatpush.bf16.msra.mxu2 %v11619_v34  ;;  %v16417_v0 = vpack.c.bf16 %v1166_v31, %v1142_v30  ;;  %5983 = vmatpush.bf16.msrb.mxu0 %v10739_v42 }
  0xd0   : > { %v11746_v37 = vld [vmem:[#allocation2 + $0xbe0] sm:$0xf]  ;;  %v14412_v41 = vld [vmem:[#allocation2 + $0xacc] sm:$0xf0]  ;;  %v11363_v52 = vor.u32 %v14352_v36, %v11362_v35  ;;  %6071 = vmatpush.bf16.msra.mxu1 %v11491_v38  ;;  %6040 = vmatpush.bf16.msrb.mxu3 %v11123_v47  ;;  %v1191_v38 = vld [vmem:[%s16367_s4 + $0x1a8] sm:$0xff] }
  0xd1   : > { %v11602_v40 = vld [vmem:[#allocation2 + $0xac0] sm:$0xf]  ;;  %v1144_v43 = vld [vmem:[%s16367_s4 + $0x30] sm:$0xff]  ;;  %v11747_v59 = vor.u32 %v14448_v39, %v11746_v37  ;;  %6003 = vmatmul.bf16.vlgmr.msrb.gmra.mxu1 %v16419_v1  ;;  %v1215_v39 = vld [vmem:[%s16367_s4 + $0x268] sm:$0xff] }
  0xd2   : > { %v1168_v45 = vld [vmem:[%s16367_s4 + $0xf0] sm:$0xff]  ;;  %v11346_v55 = vld [vmem:[#allocation2 + $0x8c0] sm:$0xf]  ;;  %v11603_v60 = vor.u32 %v14412_v41, %v11602_v40  ;;  %5984 = vmatmul.bf16.vlgmr.msrb.gmra.mxu0 %v16417_v0 }
  0xd3   : > { %v14348_v58 = vld [vmem:[#allocation2 + $0x8cc] sm:$0xf0]  ;;  %v11474_v61 = vld [vmem:[#allocation2 + $0x9c0] sm:$0xf]  ;;  %v16421_v5 = vpack.c.bf16 %v1168_v45, %v1144_v43  ;;  %6052 = vmatpush.bf16.msra.mxu0 %v11363_v52  ;;  %6041 = vmatmul.bf16.vlgmr.msrb.gmra.mxu3 %v16423_v6 }
  0xd4   : > { %v14380_v62 = vld [vmem:[#allocation2 + $0x9cc] sm:$0xf0]  ;;  %v11730_v63 = vld [vmem:[#allocation2 + $0xbc0] sm:$0xf]  ;;  %v11347_v7 = vor.u32 %v14348_v58, %v11346_v55  ;;  %6109 = vmatpush.bf16.msra.mxu3 %v11747_v59  ;;  %6091 = vmatpush.bf16.msra.mxu2 %v11603_v60  ;;  %v1193_v55 = vld [vmem:[%s16367_s4 + $0x1b8] sm:$0xff] }
  0xd5   : > { %v14444_v2 = vld [vmem:[#allocation2 + $0xbcc] sm:$0xf0]  ;;  %v11586_v3 = vld [vmem:[#allocation2 + $0xaa0] sm:$0xf]  ;;  %v11475_v8 = vor.u32 %v14380_v62, %v11474_v61  ;;  %6022 = vmatmul.bf16.vlgmr.msrb.gmra.mxu2 %v16421_v5  ;;  %v1217_v58 = vld [vmem:[%s16367_s4 + $0x278] sm:$0xff] }
  0xd6   : > { %v14408_v4 = vld [vmem:[#allocation2 + $0xaac] sm:$0xf0]  ;;  %v11330_v9 = vld [vmem:[#allocation2 + $0x8a0] sm:$0xf]  ;;  %v11731_v11 = vor.u32 %v14444_v2, %v11730_v63 }
  0xd7   : > { %v14344_v10 = vld [vmem:[#allocation2 + $0x8ac] sm:$0xf0]  ;;  %v11587_v12 = vor.u32 %v14408_v4, %v11586_v3  ;;  %v11458_v13 = vld [vmem:[#allocation2 + $0x9a0] sm:$0xf]  ;;  %6053 = vmatpush.bf16.msra.mxu0 %v11347_v7  ;;  %6072 = vmatpush.bf16.msra.mxu1 %v11475_v8 }
  0xd8   : > { %v14376_v14 = vld [vmem:[#allocation2 + $0x9ac] sm:$0xf0]  ;;  %v11714_v15 = vld [vmem:[#allocation2 + $0xba0] sm:$0xf]  ;;  %v11331_v19 = vor.u32 %v14344_v10, %v11330_v9  ;;  %6110 = vmatpush.bf16.msra.mxu3 %v11731_v11  ;;  %v16439_v9 = vpack.c.bf16 %v1215_v39, %v1191_v38 }
  0xd9   : > { %v14440_v16 = vld [vmem:[#allocation2 + $0xbac] sm:$0xf0]  ;;  %v11570_v17 = vld [vmem:[#allocation2 + $0xa80] sm:$0xf]  ;;  %v11459_v20 = vor.u32 %v14376_v14, %v11458_v13  ;;  %6092 = vmatpush.bf16.msra.mxu2 %v11587_v12  ;;  %v16443_v14 = vpack.c.bf16 %v1217_v58, %v1193_v55 }
  0xda   : > { %v14404_v18 = vld [vmem:[#allocation2 + $0xa8c] sm:$0xf0]  ;;  %v11314_v21 = vld [vmem:[#allocation2 + $0x880] sm:$0xf]  ;;  %v11715_v23 = vor.u32 %v14440_v16, %v11714_v15 }
  0xdb   : > { %v14340_v22 = vld [vmem:[#allocation2 + $0x88c] sm:$0xf0]  ;;  %v11571_v24 = vor.u32 %v14404_v18, %v11570_v17  ;;  %v11442_v25 = vld [vmem:[#allocation2 + $0x980] sm:$0xf]  ;;  %6054 = vmatpush.bf16.msra.mxu0 %v11331_v19  ;;  %6073 = vmatpush.bf16.msra.mxu1 %v11459_v20 }
  0xdc   : > { %v14372_v26 = vld [vmem:[#allocation2 + $0x98c] sm:$0xf0]  ;;  %v11698_v27 = vld [vmem:[#allocation2 + $0xb80] sm:$0xf]  ;;  %v11315_v31 = vor.u32 %v14340_v22, %v11314_v21  ;;  %6111 = vmatpush.bf16.msra.mxu3 %v11715_v23 }
  0xdd   : > { %v14436_v28 = vld [vmem:[#allocation2 + $0xb8c] sm:$0xf0]  ;;  %v11554_v29 = vld [vmem:[#allocation2 + $0xa60] sm:$0xf]  ;;  %v11443_v32 = vor.u32 %v14372_v26, %v11442_v25  ;;  %6093 = vmatpush.bf16.msra.mxu2 %v11571_v24 }
  0xde   : > { %v14400_v30 = vld [vmem:[#allocation2 + $0xa6c] sm:$0xf0]  ;;  %v11298_v33 = vld [vmem:[#allocation2 + $0x860] sm:$0xf]  ;;  %v11699_v35 = vor.u32 %v14436_v28, %v11698_v27 }
  0xdf   : > { %v14336_v34 = vld [vmem:[#allocation2 + $0x86c] sm:$0xf0]  ;;  %v1190_v36 = vld [vmem:[%s16367_s4 + $0x1a0] sm:$0xff]  ;;  %v11555_v40 = vor.u32 %v14400_v30, %v11554_v29  ;;  %6055 = vmatpush.bf16.msra.mxu0 %v11315_v31  ;;  %6074 = vmatpush.bf16.msra.mxu1 %v11443_v32 }
  0xe0   : > { %v1214_v37 = vld [vmem:[%s16367_s4 + $0x260] sm:$0xff]  ;;  %v14368_v42 = vld [vmem:[#allocation2 + $0x96c] sm:$0xf0]  ;;  %v11299_v59 = vor.u32 %v14336_v34, %v11298_v33  ;;  %6112 = vmatpush.bf16.msra.mxu3 %v11699_v35 }
  0xe1   : > { %v11426_v41 = vld [vmem:[#allocation2 + $0x960] sm:$0xf]  ;;  %v14432_v45 = vld [vmem:[#allocation2 + $0xb6c] sm:$0xf0]  ;;  %6094 = vmatpush.bf16.msra.mxu2 %v11555_v40  ;;  %v16437_v8 = vpack.c.bf16 %v1214_v37, %v1190_v36  ;;  %6008 = vmatmul.bf16.gmra.mxu1 %v16439_v9 }
  0xe2   : > { %v11682_v43 = vld [vmem:[#allocation2 + $0xb60] sm:$0xf]  ;;  %v14396_v47 = vld [vmem:[#allocation2 + $0xa4c] sm:$0xf0]  ;;  %v11427_v60 = vor.u32 %v14368_v42, %v11426_v41 }
  0xe3   : > { %v11538_v46 = vld [vmem:[#allocation2 + $0xa40] sm:$0xf]  ;;  %v1192_v49 = vld [vmem:[%s16367_s4 + $0x1b0] sm:$0xff]  ;;  %v11683_v63 = vor.u32 %v14432_v45, %v11682_v43  ;;  %6056 = vmatpush.bf16.msra.mxu0 %v11299_v59  ;;  %6046 = vmatmul.bf16.gmra.mxu3 %v16443_v14 }
  0xe4   : > { %v1216_v52 = vld [vmem:[%s16367_s4 + $0x270] sm:$0xff]  ;;  %v11282_v61 = vld [vmem:[#allocation2 + $0x840] sm:$0xf]  ;;  %v11539_v2 = vor.u32 %v14396_v47, %v11538_v46  ;;  %6075 = vmatpush.bf16.msra.mxu1 %v11427_v60  ;;  %5989 = vmatmul.bf16.gmra.mxu0 %v16437_v8 }
  0xe5   : > { %v14332_v62 = vld [vmem:[#allocation2 + $0x84c] sm:$0xf0]  ;;  %v11410_v3 = vld [vmem:[#allocation2 + $0x940] sm:$0xf]  ;;  %v16441_v13 = vpack.c.bf16 %v1216_v52, %v1192_v49  ;;  %6113 = vmatpush.bf16.msra.mxu3 %v11683_v63  ;;  %v1171_v63 = vld [vmem:[%s16367_s4 + $0x108] sm:$0xff] }
  0xe6   : > { %v14364_v4 = vld [vmem:[#allocation2 + $0x94c] sm:$0xf0]  ;;  %v11666_v7 = vld [vmem:[#allocation2 + $0xb40] sm:$0xf]  ;;  %v11283_v15 = vor.u32 %v14332_v62, %v11282_v61  ;;  %6095 = vmatpush.bf16.msra.mxu2 %v11539_v2  ;;  %v1147_v61 = vld [vmem:[%s16367_s4 + $0x48] sm:$0xff] }
  0xe7   : > { %v14428_v10 = vld [vmem:[#allocation2 + $0xb4c] sm:$0xf0]  ;;  %v11522_v11 = vld [vmem:[#allocation2 + $0xa20] sm:$0xf]  ;;  %v11411_v16 = vor.u32 %v14364_v4, %v11410_v3  ;;  %6027 = vmatmul.bf16.gmra.mxu2 %v16441_v13 }
  0xe8   : > { %v14392_v12 = vld [vmem:[#allocation2 + $0xa2c] sm:$0xf0]  ;;  %v11266_v17 = vld [vmem:[#allocation2 + $0x820] sm:$0xf]  ;;  %v11667_v19 = vor.u32 %v14428_v10, %v11666_v7  ;;  %6057 = vmatpush.bf16.msra.mxu0 %v11283_v15 }
  0xe9   : > { %v14328_v18 = vld [vmem:[#allocation2 + $0x82c] sm:$0xf0]  ;;  %v11523_v20 = vor.u32 %v14392_v12, %v11522_v11  ;;  %v11394_v21 = vld [vmem:[#allocation2 + $0x920] sm:$0xf]  ;;  %6076 = vmatpush.bf16.msra.mxu1 %v11411_v16  ;;  %v1149_v12 = vld [vmem:[%s16367_s4 + $0x58] sm:$0xff] }
  0xea   : > { %v14360_v22 = vld [vmem:[#allocation2 + $0x92c] sm:$0xf0]  ;;  %v11650_v23 = vld [vmem:[#allocation2 + $0xb20] sm:$0xf]  ;;  %v11267_v29 = vor.u32 %v14328_v18, %v11266_v17  ;;  %6114 = vmatpush.bf16.msra.mxu3 %v11667_v19  ;;  %v1173_v16 = vld [vmem:[%s16367_s4 + $0x118] sm:$0xff] }
  0xeb   : > { %v14424_v24 = vld [vmem:[#allocation2 + $0xb2c] sm:$0xf0]  ;;  %v11506_v25 = vld [vmem:[#allocation2 + $0xa00] sm:$0xf]  ;;  %v11395_v30 = vor.u32 %v14360_v22, %v11394_v21  ;;  %6096 = vmatpush.bf16.msra.mxu2 %v11523_v20 }
  0xec   : > { %v14388_v26 = vld [vmem:[#allocation2 + $0xa0c] sm:$0xf0]  ;;  %v12130_v27 = vld [vmem:[#allocation2 + $0xee0] sm:$0xf]  ;;  %v11651_v34 = vor.u32 %v14424_v24, %v11650_v23  ;;  %6058 = vmatpush.bf16.msra.mxu0 %v11267_v29  ;;  %v16459_v24 = vpack.c.bf16 %v1171_v63, %v1147_v61  ;;  %v16463_v29 = vpack.c.bf16 %v1173_v16, %v1149_v12 }
  0xed   : > { %v14544_v28 = vld [vmem:[#allocation2 + $0xeec] sm:$0xf0]  ;;  %v11250_v31 = vld [vmem:[#allocation2 + $0x800] sm:$0xf]  ;;  %v11507_v35 = vor.u32 %v14388_v26, %v11506_v25  ;;  %6077 = vmatpush.bf16.msra.mxu1 %v11395_v30 }
  0xee   : > { %v14324_v32 = vld [vmem:[#allocation2 + $0x80c] sm:$0xf0]  ;;  %v11378_v33 = vld [vmem:[#allocation2 + $0x900] sm:$0xf]  ;;  %v12131_v39 = vor.u32 %v14544_v28, %v12130_v27  ;;  %6115 = vmatpush.bf16.msra.mxu3 %v11651_v34 }
  0xef   : > { %v14356_v36 = vld [vmem:[#allocation2 + $0x90c] sm:$0xf0]  ;;  %v11634_v37 = vld [vmem:[#allocation2 + $0xb00] sm:$0xf]  ;;  %v11251_v47 = vor.u32 %v14324_v32, %v11250_v31  ;;  %6097 = vmatpush.bf16.msra.mxu2 %v11507_v35 }
  0xf0   : > { %v14420_v38 = vld [vmem:[#allocation2 + $0xb0c] sm:$0xf0]  ;;  %v11874_v40 = vld [vmem:[#allocation2 + $0xce0] sm:$0xf]  ;;  %v11379_v49 = vor.u32 %v14356_v36, %v11378_v33 }
  0xf1   : > { %v14480_v41 = vld [vmem:[#allocation2 + $0xcec] sm:$0xf0]  ;;  %v12002_v42 = vld [vmem:[#allocation2 + $0xde0] sm:$0xf]  ;;  %v11635_v58 = vor.u32 %v14420_v38, %v11634_v37  ;;  %6059 = vmatpush.bf16.msra.mxu0 %v11251_v47 }
  0xf2   : > { %v14512_v43 = vld [vmem:[#allocation2 + $0xdec] sm:$0xf0]  ;;  %v12258_v45 = vld [vmem:[#allocation2 + $0xfe0] sm:$0xf]  ;;  %v11875_v62 = vor.u32 %v14480_v41, %v11874_v40  ;;  %6078 = vmatpush.bf16.msra.mxu1 %v11379_v49 }
  0xf3   : > { %v14576_v46 = vld [vmem:[#allocation2 + $0xfec] sm:$0xf0]  ;;  %v12114_v52 = vld [vmem:[#allocation2 + $0xec0] sm:$0xf]  ;;  %6166 = vmatpush.bf16.msrb.mxu2 %v12131_v39  ;;  %v12003_v2 = vor.u32 %v14512_v43, %v12002_v42  ;;  %6116 = vmatpush.bf16.msra.mxu3 %v11635_v58 }
  0xf4   : > { %v14540_v55 = vld [vmem:[#allocation2 + $0xecc] sm:$0xf0]  ;;  %v1146_v59 = vld [vmem:[%s16367_s4 + $0x40] sm:$0xff]  ;;  %v12259_v3 = vor.u32 %v14576_v46, %v12258_v45 }
  0xf5   : > { %v1170_v60 = vld [vmem:[%s16367_s4 + $0x100] sm:$0xff]  ;;  %v14476_v7 = vld [vmem:[#allocation2 + $0xccc] sm:$0xf0]  ;;  %v12115_v15 = vor.u32 %v14540_v55, %v12114_v52  ;;  %6128 = vmatpush.bf16.msrb.mxu0 %v11875_v62  ;;  %6079 = vmatmul.bf16.vlgmr.msra.gmra.mxu1 %v16459_v24 }
  0xf6   : > { %v11858_v4 = vld [vmem:[#allocation2 + $0xcc0] sm:$0xf]  ;;  %v1148_v10 = vld [vmem:[%s16367_s4 + $0x50] sm:$0xff]  ;;  %v16457_v23 = vpack.c.bf16 %v1170_v60, %v1146_v59  ;;  %6147 = vmatpush.bf16.msrb.mxu1 %v12003_v2  ;;  %6117 = vmatmul.bf16.vlgmr.msra.gmra.mxu3 %v16463_v29 }
  0xf7   : > { %v1172_v11 = vld [vmem:[%s16367_s4 + $0x110] sm:$0xff]  ;;  %v11986_v17 = vld [vmem:[#allocation2 + $0xdc0] sm:$0xf]  ;;  %v11859_v19 = vor.u32 %v14476_v7, %v11858_v4  ;;  %6185 = vmatpush.bf16.msrb.mxu3 %v12259_v3  ;;  %6167 = vmatpush.bf16.msrb.mxu2 %v12115_v15 }
  0xf8   : > { %v14508_v18 = vld [vmem:[#allocation2 + $0xdcc] sm:$0xf0]  ;;  %v12242_v20 = vld [vmem:[#allocation2 + $0xfc0] sm:$0xf]  ;;  %v16461_v28 = vpack.c.bf16 %v1172_v11, %v1148_v10  ;;  %6060 = vmatmul.bf16.vlgmr.msra.gmra.mxu0 %v16457_v23  ;;  %v1195_v10 = vld [vmem:[%s16367_s4 + $0x1c8] sm:$0xff] }
  0xf9   : > { %v14572_v21 = vld [vmem:[#allocation2 + $0xfcc] sm:$0xf0]  ;;  %v12098_v22 = vld [vmem:[#allocation2 + $0xea0] sm:$0xf]  ;;  %v11987_v30 = vor.u32 %v14508_v18, %v11986_v17  ;;  %6129 = vmatpush.bf16.msrb.mxu0 %v11859_v19  ;;  %v1219_v11 = vld [vmem:[%s16367_s4 + $0x288] sm:$0xff] }
  0xfa   : > { %v14536_v25 = vld [vmem:[#allocation2 + $0xeac] sm:$0xf0]  ;;  %v11842_v26 = vld [vmem:[#allocation2 + $0xca0] sm:$0xf]  ;;  %v12243_v31 = vor.u32 %v14572_v21, %v12242_v20  ;;  %6098 = vmatmul.bf16.vlgmr.msra.gmra.mxu2 %v16461_v28 }
  0xfb   : > { %v14472_v27 = vld [vmem:[#allocation2 + $0xcac] sm:$0xf0]  ;;  %v11970_v32 = vld [vmem:[#allocation2 + $0xda0] sm:$0xf]  ;;  %v12099_v34 = vor.u32 %v14536_v25, %v12098_v22  ;;  %6148 = vmatpush.bf16.msrb.mxu1 %v11987_v30 }
  0xfc   : > { %v14504_v33 = vld [vmem:[#allocation2 + $0xdac] sm:$0xf0]  ;;  %v11843_v35 = vor.u32 %v14472_v27, %v11842_v26  ;;  %v12226_v36 = vld [vmem:[#allocation2 + $0xfa0] sm:$0xf]  ;;  %6186 = vmatpush.bf16.msrb.mxu3 %v12243_v31  ;;  %v1197_v26 = vld [vmem:[%s16367_s4 + $0x1d8] sm:$0xff] }
  0xfd   : > { %v14568_v37 = vld [vmem:[#allocation2 + $0xfac] sm:$0xf0]  ;;  %v12082_v38 = vld [vmem:[#allocation2 + $0xe80] sm:$0xf]  ;;  %v11971_v42 = vor.u32 %v14504_v33, %v11970_v32  ;;  %6168 = vmatpush.bf16.msrb.mxu2 %v12099_v34  ;;  %v1221_v27 = vld [vmem:[%s16367_s4 + $0x298] sm:$0xff] }
  0xfe   : > { %v14532_v39 = vld [vmem:[#allocation2 + $0xe8c] sm:$0xf0]  ;;  %v11826_v40 = vld [vmem:[#allocation2 + $0xc80] sm:$0xf]  ;;  %v12227_v43 = vor.u32 %v14568_v37, %v12226_v36  ;;  %6130 = vmatpush.bf16.msrb.mxu0 %v11843_v35 }
  0xff   : > { %v14468_v41 = vld [vmem:[#allocation2 + $0xc8c] sm:$0xf0]  ;;  %v11954_v45 = vld [vmem:[#allocation2 + $0xd80] sm:$0xf]  ;;  %v12083_v47 = vor.u32 %v14532_v39, %v12082_v38  ;;  %6149 = vmatpush.bf16.msrb.mxu1 %v11971_v42 }
 0x100   : > { %v14500_v46 = vld [vmem:[#allocation2 + $0xd8c] sm:$0xf0]  ;;  %v11827_v49 = vor.u32 %v14468_v41, %v11826_v40  ;;  %v12210_v52 = vld [vmem:[#allocation2 + $0xf80] sm:$0xf]  ;;  %6187 = vmatpush.bf16.msrb.mxu3 %v12227_v43  ;;  %v16479_v40 = vpack.c.bf16 %v1219_v11, %v1195_v10 }
 0x101   : > { %v14564_v55 = vld [vmem:[#allocation2 + $0xf8c] sm:$0xf0]  ;;  %v12066_v58 = vld [vmem:[#allocation2 + $0xe60] sm:$0xf]  ;;  %v11955_v62 = vor.u32 %v14500_v46, %v11954_v45  ;;  %6169 = vmatpush.bf16.msrb.mxu2 %v12083_v47  ;;  %v16483_v46 = vpack.c.bf16 %v1221_v27, %v1197_v26 }
 0x102   : > { %v14528_v59 = vld [vmem:[#allocation2 + $0xe6c] sm:$0xf0]  ;;  %v11810_v60 = vld [vmem:[#allocation2 + $0xc60] sm:$0xf]  ;;  %v12211_v63 = vor.u32 %v14564_v55, %v12210_v52  ;;  %6131 = vmatpush.bf16.msrb.mxu0 %v11827_v49 }
 0x103   : > { %v14464_v61 = vld [vmem:[#allocation2 + $0xc6c] sm:$0xf0]  ;;  %v11938_v2 = vld [vmem:[#allocation2 + $0xd60] sm:$0xf]  ;;  %v12067_v12 = vor.u32 %v14528_v59, %v12066_v58  ;;  %6150 = vmatpush.bf16.msrb.mxu1 %v11955_v62 }
 0x104   : > { %v14496_v3 = vld [vmem:[#allocation2 + $0xd6c] sm:$0xf0]  ;;  %v1194_v4 = vld [vmem:[%s16367_s4 + $0x1c0] sm:$0xff]  ;;  %v11811_v15 = vor.u32 %v14464_v61, %v11810_v60  ;;  %6188 = vmatpush.bf16.msrb.mxu3 %v12211_v63 }
 0x105   : > { %v1218_v7 = vld [vmem:[%s16367_s4 + $0x280] sm:$0xff]  ;;  %v14560_v17 = vld [vmem:[#allocation2 + $0xf6c] sm:$0xf0]  ;;  %v11939_v30 = vor.u32 %v14496_v3, %v11938_v2  ;;  %6170 = vmatpush.bf16.msrb.mxu2 %v12067_v12  ;;  %6084 = vmatmul.bf16.gmra.mxu1 %v16479_v40 }
 0x106   : > { %v12194_v16 = vld [vmem:[#allocation2 + $0xf60] sm:$0xf]  ;;  %v14524_v19 = vld [vmem:[#allocation2 + $0xe4c] sm:$0xf0]  ;;  %6132 = vmatpush.bf16.msrb.mxu0 %v11811_v15  ;;  %v16477_v39 = vpack.c.bf16 %v1218_v7, %v1194_v4  ;;  %6122 = vmatmul.bf16.gmra.mxu3 %v16483_v46 }
 0x107   : > { %v12050_v18 = vld [vmem:[#allocation2 + $0xe40] sm:$0xf]  ;;  %v14460_v21 = vld [vmem:[#allocation2 + $0xc4c] sm:$0xf0]  ;;  %v12195_v31 = vor.u32 %v14560_v17, %v12194_v16  ;;  %6151 = vmatpush.bf16.msrb.mxu1 %v11939_v30 }
 0x108   : > { %v11794_v20 = vld [vmem:[#allocation2 + $0xc40] sm:$0xf]  ;;  %v1196_v22 = vld [vmem:[%s16367_s4 + $0x1d0] sm:$0xff]  ;;  %v12051_v34 = vor.u32 %v14524_v19, %v12050_v18  ;;  %6065 = vmatmul.bf16.gmra.mxu0 %v16477_v39 }
 0x109   : > { %v1220_v25 = vld [vmem:[%s16367_s4 + $0x290] sm:$0xff]  ;;  %v11922_v32 = vld [vmem:[#allocation2 + $0xd40] sm:$0xf]  ;;  %v11795_v35 = vor.u32 %v14460_v21, %v11794_v20  ;;  %6189 = vmatpush.bf16.msrb.mxu3 %v12195_v31 }
 0x10a   : > { %v14492_v33 = vld [vmem:[#allocation2 + $0xd4c] sm:$0xf0]  ;;  %v12178_v36 = vld [vmem:[#allocation2 + $0xf40] sm:$0xf]  ;;  %v16481_v45 = vpack.c.bf16 %v1220_v25, %v1196_v22  ;;  %6171 = vmatpush.bf16.msrb.mxu2 %v12051_v34 }
 0x10b   : > { %v14556_v37 = vld [vmem:[#allocation2 + $0xf4c] sm:$0xf0]  ;;  %v12034_v38 = vld [vmem:[#allocation2 + $0xe20] sm:$0xf]  ;;  %v11923_v47 = vor.u32 %v14492_v33, %v11922_v32  ;;  %6133 = vmatpush.bf16.msrb.mxu0 %v11795_v35 }
 0x10c   : > { %v14520_v41 = vld [vmem:[#allocation2 + $0xe2c] sm:$0xf0]  ;;  %v11778_v42 = vld [vmem:[#allocation2 + $0xc20] sm:$0xf]  ;;  %v12179_v49 = vor.u32 %v14556_v37, %v12178_v36  ;;  %6103 = vmatmul.bf16.gmra.mxu2 %v16481_v45 }
 0x10d   : > { %v14456_v43 = vld [vmem:[#allocation2 + $0xc2c] sm:$0xf0]  ;;  %v11906_v52 = vld [vmem:[#allocation2 + $0xd20] sm:$0xf]  ;;  %v12035_v59 = vor.u32 %v14520_v41, %v12034_v38  ;;  %6152 = vmatpush.bf16.msrb.mxu1 %v11923_v47 }
 0x10e   : > { %v14488_v55 = vld [vmem:[#allocation2 + $0xd2c] sm:$0xf0]  ;;  %v12162_v58 = vld [vmem:[#allocation2 + $0xf20] sm:$0xf]  ;;  %v11779_v60 = vor.u32 %v14456_v43, %v11778_v42  ;;  %6190 = vmatpush.bf16.msrb.mxu3 %v12179_v49  ;;  %v1151_v42 = vld [vmem:[%s16367_s4 + $0x68] sm:$0xff] }
 0x10f   : > { %v14552_v61 = vld [vmem:[#allocation2 + $0xf2c] sm:$0xf0]  ;;  %v12018_v62 = vld [vmem:[#allocation2 + $0xe00] sm:$0xf]  ;;  %v11907_v12 = vor.u32 %v14488_v55, %v11906_v52  ;;  %6172 = vmatpush.bf16.msrb.mxu2 %v12035_v59  ;;  %v1175_v43 = vld [vmem:[%s16367_s4 + $0x128] sm:$0xff] }
 0x110   : > { %v14516_v63 = vld [vmem:[#allocation2 + $0xe0c] sm:$0xf0]  ;;  %v11762_v2 = vld [vmem:[#allocation2 + $0xc00] sm:$0xf]  ;;  %v12163_v15 = vor.u32 %v14552_v61, %v12162_v58  ;;  %6134 = vmatpush.bf16.msrb.mxu0 %v11779_v60 }
 0x111   : > { %v14452_v3 = vld [vmem:[#allocation2 + $0xc0c] sm:$0xf0]  ;;  %v12642_v4 = vld [vmem:[#allocation2 + $0x12e0] sm:$0xf]  ;;  %v12019_v19 = vor.u32 %v14516_v63, %v12018_v62  ;;  %6153 = vmatpush.bf16.msrb.mxu1 %v11907_v12 }
 0x112   : > { %v14672_v7 = vld [vmem:[#allocation2 + $0x12ec] sm:$0xf0]  ;;  %v12386_v10 = vld [vmem:[#allocation2 + $0x10e0] sm:$0xf]  ;;  %v11763_v20 = vor.u32 %v14452_v3, %v11762_v2  ;;  %6191 = vmatpush.bf16.msrb.mxu3 %v12163_v15  ;;  %v1153_v2 = vld [vmem:[%s16367_s4 + $0x78] sm:$0xff] }
 0x113   : > { %v14608_v11 = vld [vmem:[#allocation2 + $0x10ec] sm:$0xf0]  ;;  %v11890_v16 = vld [vmem:[#allocation2 + $0xd00] sm:$0xf]  ;;  %v12643_v26 = vor.u32 %v14672_v7, %v12642_v4  ;;  %6173 = vmatpush.bf16.msrb.mxu2 %v12019_v19  ;;  %v1177_v3 = vld [vmem:[%s16367_s4 + $0x138] sm:$0xff] }
 0x114   : > { %v14484_v17 = vld [vmem:[#allocation2 + $0xd0c] sm:$0xf0]  ;;  %v12146_v18 = vld [vmem:[#allocation2 + $0xf00] sm:$0xf]  ;;  %v12387_v27 = vor.u32 %v14608_v11, %v12386_v10  ;;  %6135 = vmatpush.bf16.msrb.mxu0 %v11763_v20 }
 0x115   : > { %v14548_v21 = vld [vmem:[#allocation2 + $0xf0c] sm:$0xf0]  ;;  %v12514_v22 = vld [vmem:[#allocation2 + $0x11e0] sm:$0xf]  ;;  %v11891_v36 = vor.u32 %v14484_v17, %v11890_v16 }
 0x116   : > { %v14640_v25 = vld [vmem:[#allocation2 + $0x11ec] sm:$0xf0]  ;;  %v12770_v30 = vld [vmem:[#allocation2 + $0x13e0] sm:$0xf]  ;;  %v12147_v37 = vor.u32 %v14548_v21, %v12146_v18  ;;  %v16499_v18 = vpack.c.bf16 %v1175_v43, %v1151_v42 }
 0x117   : > { %v14704_v31 = vld [vmem:[#allocation2 + $0x13ec] sm:$0xf0]  ;;  %v12626_v32 = vld [vmem:[#allocation2 + $0x12c0] sm:$0xf]  ;;  %v12515_v47 = vor.u32 %v14640_v25, %v12514_v22  ;;  %6242 = vmatpush.bf16.msra.mxu2 %v12643_v26  ;;  %6154 = vmatpush.bf16.msrb.mxu1 %v11891_v36  ;;  %v16503_v25 = vpack.c.bf16 %v1177_v3, %v1153_v2 }
 0x118   : > { %v14668_v33 = vld [vmem:[#allocation2 + $0x12cc] sm:$0xf0]  ;;  %v12370_v34 = vld [vmem:[#allocation2 + $0x10c0] sm:$0xf]  ;;  %v12771_v49 = vor.u32 %v14704_v31, %v12770_v30  ;;  %6204 = vmatpush.bf16.msra.mxu0 %v12387_v27  ;;  %6192 = vmatpush.bf16.msrb.mxu3 %v12147_v37 }
 0x119   : > { %v14604_v35 = vld [vmem:[#allocation2 + $0x10cc] sm:$0xf0]  ;;  %v1150_v38 = vld [vmem:[%s16367_s4 + $0x60] sm:$0xff]  ;;  %v12627_v55 = vor.u32 %v14668_v33, %v12626_v32  ;;  %17245 = vst [vmem:[#allocation55_spill] sm:$0xff] %v16503_v25 }
 0x11a   : > { %v1174_v41 = vld [vmem:[%s16367_s4 + $0x120] sm:$0xff]  ;;  %v12371_v58 = vor.u32 %v14604_v35, %v12370_v34  ;;  %v14636_v59 = vld [vmem:[#allocation2 + $0x11cc] sm:$0xf0]  ;;  %6155 = vmatmul.bf16.vlgmr.msrb.gmra.mxu1 %v16499_v18 }
 0x11b   : > { %v12498_v52 = vld [vmem:[#allocation2 + $0x11c0] sm:$0xf]  ;;  %v14700_v61 = vld [vmem:[#allocation2 + $0x13cc] sm:$0xf0]  ;;  %6223 = vmatpush.bf16.msra.mxu1 %v12515_v47  ;;  %v16497_v17 = vpack.c.bf16 %v1174_v41, %v1150_v38  ;;  %6243 = vmatpush.bf16.msra.mxu2 %v12627_v55 }
 0x11c   : > { %v12754_v60 = vld [vmem:[#allocation2 + $0x13c0] sm:$0xf]  ;;  %v1152_v62 = vld [vmem:[%s16367_s4 + $0x70] sm:$0xff]  ;;  %6261 = vmatpush.bf16.msra.mxu3 %v12771_v49  ;;  %v12499_v10 = vor.u32 %v14636_v59, %v12498_v52  ;;  %6205 = vmatpush.bf16.msra.mxu0 %v12371_v58 }
 0x11d   : > { %v1176_v63 = vld [vmem:[%s16367_s4 + $0x130] sm:$0xff]  ;;  %v12610_v4 = vld [vmem:[#allocation2 + $0x12a0] sm:$0xf]  ;;  %v12755_v11 = vor.u32 %v14700_v61, %v12754_v60  ;;  %6136 = vmatmul.bf16.vlgmr.msrb.gmra.mxu0 %v16497_v17  ;;  %6193 = vmatmul.bf16.vlgmr.msrb.gmra.mxu3 %v16503_v25 }
 0x11e   : > { %v14664_v7 = vld [vmem:[#allocation2 + $0x12ac] sm:$0xf0]  ;;  %v12354_v12 = vld [vmem:[#allocation2 + $0x10a0] sm:$0xf]  ;;  %v16501_v22 = vpack.c.bf16 %v1176_v63, %v1152_v62 }
 0x11f   : > { %v14600_v15 = vld [vmem:[#allocation2 + $0x10ac] sm:$0xf0]  ;;  %v12482_v16 = vld [vmem:[#allocation2 + $0x11a0] sm:$0xf]  ;;  %v12611_v26 = vor.u32 %v14664_v7, %v12610_v4  ;;  %6224 = vmatpush.bf16.msra.mxu1 %v12499_v10 }
 0x120   : > { %v14632_v19 = vld [vmem:[#allocation2 + $0x11ac] sm:$0xf0]  ;;  %v12738_v20 = vld [vmem:[#allocation2 + $0x13a0] sm:$0xf]  ;;  %17244 = vst [vmem:[#allocation54_spill] sm:$0xff] %v16501_v22  ;;  %v12355_v27 = vor.u32 %v14600_v15, %v12354_v12  ;;  %6262 = vmatpush.bf16.msra.mxu3 %v12755_v11  ;;  %6174 = vmatmul.bf16.vlgmr.msrb.gmra.mxu2 %v16501_v22  ;;  %v1199_v12 = vld [vmem:[%s16367_s4 + $0x1e8] sm:$0xff] }
 0x121   : > { %v14696_v21 = vld [vmem:[#allocation2 + $0x13ac] sm:$0xf0]  ;;  %v12594_v30 = vld [vmem:[#allocation2 + $0x1280] sm:$0xf]  ;;  %v12483_v32 = vor.u32 %v14632_v19, %v12482_v16  ;;  %6244 = vmatpush.bf16.msra.mxu2 %v12611_v26  ;;  %v1223_v15 = vld [vmem:[%s16367_s4 + $0x2a8] sm:$0xff] }
 0x122   : > { %v14660_v31 = vld [vmem:[#allocation2 + $0x128c] sm:$0xf0]  ;;  %v12739_v33 = vor.u32 %v14696_v21, %v12738_v20  ;;  %v12338_v34 = vld [vmem:[#allocation2 + $0x1080] sm:$0xf]  ;;  %6206 = vmatpush.bf16.msra.mxu0 %v12355_v27 }
 0x123   : > { %v14596_v35 = vld [vmem:[#allocation2 + $0x108c] sm:$0xf0]  ;;  %v12466_v36 = vld [vmem:[#allocation2 + $0x1180] sm:$0xf]  ;;  %v12595_v42 = vor.u32 %v14660_v31, %v12594_v30  ;;  %6225 = vmatpush.bf16.msra.mxu1 %v12483_v32  ;;  %v1201_v31 = vld [vmem:[%s16367_s4 + $0x1f8] sm:$0xff] }
 0x124   : > { %v14628_v37 = vld [vmem:[#allocation2 + $0x118c] sm:$0xf0]  ;;  %v12722_v38 = vld [vmem:[#allocation2 + $0x1380] sm:$0xf]  ;;  %v12339_v43 = vor.u32 %v14596_v35, %v12338_v34  ;;  %6263 = vmatpush.bf16.msra.mxu3 %v12739_v33  ;;  %v1225_v32 = vld [vmem:[%s16367_s4 + $0x2b8] sm:$0xff] }
 0x125   : > { %v14692_v41 = vld [vmem:[#allocation2 + $0x138c] sm:$0xf0]  ;;  %v12578_v47 = vld [vmem:[#allocation2 + $0x1260] sm:$0xf]  ;;  %v12467_v52 = vor.u32 %v14628_v37, %v12466_v36  ;;  %6245 = vmatpush.bf16.msra.mxu2 %v12595_v42 }
 0x126   : > { %v14656_v49 = vld [vmem:[#allocation2 + $0x126c] sm:$0xf0]  ;;  %v12723_v55 = vor.u32 %v14692_v41, %v12722_v38  ;;  %v12322_v58 = vld [vmem:[#allocation2 + $0x1060] sm:$0xf]  ;;  %6207 = vmatpush.bf16.msra.mxu0 %v12339_v43 }
 0x127   : > { %v14592_v59 = vld [vmem:[#allocation2 + $0x106c] sm:$0xf0]  ;;  %v12450_v60 = vld [vmem:[#allocation2 + $0x1160] sm:$0xf]  ;;  %v12579_v4 = vor.u32 %v14656_v49, %v12578_v47  ;;  %6226 = vmatpush.bf16.msra.mxu1 %v12467_v52 }
 0x128   : > { %v14624_v61 = vld [vmem:[#allocation2 + $0x116c] sm:$0xf0]  ;;  %v12706_v62 = vld [vmem:[#allocation2 + $0x1360] sm:$0xf]  ;;  %v12323_v7 = vor.u32 %v14592_v59, %v12322_v58  ;;  %6264 = vmatpush.bf16.msra.mxu3 %v12723_v55  ;;  %v16519_v58 = vpack.c.bf16 %v1223_v15, %v1199_v12 }
 0x129   : > { %v14688_v63 = vld [vmem:[#allocation2 + $0x136c] sm:$0xf0]  ;;  %v12562_v2 = vld [vmem:[#allocation2 + $0x1240] sm:$0xf]  ;;  %v12451_v16 = vor.u32 %v14624_v61, %v12450_v60  ;;  %6246 = vmatpush.bf16.msra.mxu2 %v12579_v4 }
 0x12a   : > { %v14652_v3 = vld [vmem:[#allocation2 + $0x124c] sm:$0xf0]  ;;  %v1198_v10 = vld [vmem:[%s16367_s4 + $0x1e0] sm:$0xff]  ;;  %v12707_v19 = vor.u32 %v14688_v63, %v12706_v62  ;;  %6208 = vmatpush.bf16.msra.mxu0 %v12323_v7  ;;  %17247 = vst [vmem:[#allocation57_spill] sm:$0xff] %v16519_v58  ;;  %v16523_v63 = vpack.c.bf16 %v1225_v32, %v1201_v31  ;;  %6160 = vmatmul.bf16.gmra.mxu1 %v16519_v58 }
 0x12b   : > { %v1222_v11 = vld [vmem:[%s16367_s4 + $0x2a0] sm:$0xff]  ;;  %v14588_v21 = vld [vmem:[#allocation2 + $0x104c] sm:$0xf0]  ;;  %v12563_v38 = vor.u32 %v14652_v3, %v12562_v2  ;;  %6227 = vmatpush.bf16.msra.mxu1 %v12451_v16 }
 0x12c   : > { %v12306_v20 = vld [vmem:[#allocation2 + $0x1040] sm:$0xf]  ;;  %v1200_v27 = vld [vmem:[%s16367_s4 + $0x1f0] sm:$0xff]  ;;  %6265 = vmatpush.bf16.msra.mxu3 %v12707_v19  ;;  %v16517_v55 = vpack.c.bf16 %v1222_v11, %v1198_v10  ;;  %17249 = vst [vmem:[#allocation59_spill] sm:$0xff] %v16523_v63 }
 0x12d   : > { %v12434_v26 = vld [vmem:[#allocation2 + $0x1140] sm:$0xf]  ;;  %v1224_v30 = vld [vmem:[%s16367_s4 + $0x2b0] sm:$0xff]  ;;  %v12307_v41 = vor.u32 %v14588_v21, %v12306_v20  ;;  %6247 = vmatpush.bf16.msra.mxu2 %v12563_v38  ;;  %6198 = vmatmul.bf16.gmra.mxu3 %v16523_v63 }
 0x12e   : > { %v14620_v33 = vld [vmem:[#allocation2 + $0x114c] sm:$0xf0]  ;;  %v12690_v34 = vld [vmem:[#allocation2 + $0x1340] sm:$0xf]  ;;  %17246 = vst [vmem:[#allocation56_spill] sm:$0xff] %v16517_v55  ;;  %v16521_v62 = vpack.c.bf16 %v1224_v30, %v1200_v27  ;;  %6141 = vmatmul.bf16.gmra.mxu0 %v16517_v55 }
 0x12f   : > { %v14684_v35 = vld [vmem:[#allocation2 + $0x134c] sm:$0xf0]  ;;  %v12546_v36 = vld [vmem:[#allocation2 + $0x1220] sm:$0xf]  ;;  %v12435_v42 = vor.u32 %v14620_v33, %v12434_v26  ;;  %6209 = vmatpush.bf16.msra.mxu0 %v12307_v41 }
 0x130   : > { %v14648_v37 = vld [vmem:[#allocation2 + $0x122c] sm:$0xf0]  ;;  %v12691_v43 = vor.u32 %v14684_v35, %v12690_v34  ;;  %v12290_v47 = vld [vmem:[#allocation2 + $0x1020] sm:$0xf]  ;;  %17248 = vst [vmem:[#allocation58_spill] sm:$0xff] %v16521_v62  ;;  %6179 = vmatmul.bf16.gmra.mxu2 %v16521_v62 }
 0x131   : > { %v14584_v49 = vld [vmem:[#allocation2 + $0x102c] sm:$0xf0]  ;;  %v12418_v52 = vld [vmem:[#allocation2 + $0x1120] sm:$0xf]  ;;  %v12547_v3 = vor.u32 %v14648_v37, %v12546_v36  ;;  %6228 = vmatpush.bf16.msra.mxu1 %v12435_v42 }
 0x132   : > { %v14616_v59 = vld [vmem:[#allocation2 + $0x112c] sm:$0xf0]  ;;  %v12674_v60 = vld [vmem:[#allocation2 + $0x1320] sm:$0xf]  ;;  %v12291_v4 = vor.u32 %v14584_v49, %v12290_v47  ;;  %6266 = vmatpush.bf16.msra.mxu3 %v12691_v43 }
 0x133   : > { %v14680_v61 = vld [vmem:[#allocation2 + $0x132c] sm:$0xf0]  ;;  %v12530_v2 = vld [vmem:[#allocation2 + $0x1200] sm:$0xf]  ;;  %v12419_v10 = vor.u32 %v14616_v59, %v12418_v52  ;;  %6248 = vmatpush.bf16.msra.mxu2 %v12547_v3 }
 0x134   : > { %v14644_v7 = vld [vmem:[#allocation2 + $0x120c] sm:$0xf0]  ;;  %v12274_v16 = vld [vmem:[#allocation2 + $0x1000] sm:$0xf]  ;;  %v12675_v11 = vor.u32 %v14680_v61, %v12674_v60  ;;  %6210 = vmatpush.bf16.msra.mxu0 %v12291_v4 }
 0x135   : > { %v14580_v19 = vld [vmem:[#allocation2 + $0x100c] sm:$0xf0]  ;;  %v12402_v12 = vld [vmem:[#allocation2 + $0x1100] sm:$0xf]  ;;  %v12531_v33 = vor.u32 %v14644_v7, %v12530_v2  ;;  %6229 = vmatpush.bf16.msra.mxu1 %v12419_v10 }
 0x136   : > { %v14612_v15 = vld [vmem:[#allocation2 + $0x110c] sm:$0xf0]  ;;  %v12658_v20 = vld [vmem:[#allocation2 + $0x1300] sm:$0xf]  ;;  %v12275_v34 = vor.u32 %v14580_v19, %v12274_v16  ;;  %6267 = vmatpush.bf16.msra.mxu3 %v12675_v11  ;;  %v1155_v11 = vld [vmem:[%s16367_s4 + $0x88] sm:$0xff] }
 0x137   : > { %v14676_v21 = vld [vmem:[#allocation2 + $0x130c] sm:$0xf0]  ;;  %v13154_v26 = vld [vmem:[#allocation2 + $0x16e0] sm:$0xf]  ;;  %v12403_v41 = vor.u32 %v14612_v15, %v12402_v12  ;;  %6249 = vmatpush.bf16.msra.mxu2 %v12531_v33  ;;  %v1179_v12 = vld [vmem:[%s16367_s4 + $0x148] sm:$0xff] }
 0x138   : > { %v14800_v27 = vld [vmem:[#allocation2 + $0x16ec] sm:$0xf0]  ;;  %v12898_v30 = vld [vmem:[#allocation2 + $0x14e0] sm:$0xf]  ;;  %v12659_v42 = vor.u32 %v14676_v21, %v12658_v20  ;;  %6211 = vmatpush.bf16.msra.mxu0 %v12275_v34  ;;  %v16541_v63 = vpack.c.bf16 %v1179_v12, %v1155_v11 }
 0x139   : > { %v14736_v31 = vld [vmem:[#allocation2 + $0x14ec] sm:$0xf0]  ;;  %v13026_v32 = vld [vmem:[#allocation2 + $0x15e0] sm:$0xf]  ;;  %v13155_v49 = vor.u32 %v14800_v27, %v13154_v26  ;;  %6230 = vmatpush.bf16.msra.mxu1 %v12403_v41  ;;  %v1157_v26 = vld [vmem:[%s16367_s4 + $0x98] sm:$0xff] }
 0x13a   : > { %v14768_v35 = vld [vmem:[#allocation2 + $0x15ec] sm:$0xf0]  ;;  %v13282_v36 = vld [vmem:[#allocation2 + $0x17e0] sm:$0xf]  ;;  %v12899_v52 = vor.u32 %v14736_v31, %v12898_v30  ;;  %6268 = vmatpush.bf16.msra.mxu3 %v12659_v42  ;;  %v1181_v27 = vld [vmem:[%s16367_s4 + $0x158] sm:$0xff]  ;;  %v5909_v42 = vpop.f32.mrf.mxu0  ;;  %17251 = vst [vmem:[#allocation61_spill] sm:$0xff] %v16541_v63 }
 0x13b   : > { %v14832_v37 = vld [vmem:[#allocation2 + $0x17ec] sm:$0xf0]  ;;  %v2050_v38 = vld [vmem:[#allocation4] sm:$0xf]  ;;  %v13027_v2 = vor.u32 %v14768_v35, %v13026_v32  ;;  %6318 = vmatpush.bf16.msrb.mxu2 %v13155_v49 }
 0x13c   : > { %v13138_v43 = vld [vmem:[#allocation2 + $0x16c0] sm:$0xf]  ;;  %v14796_v47 = vld [vmem:[#allocation2 + $0x16cc] sm:$0xf0]  ;;  %v13283_v3 = vor.u32 %v14832_v37, %v13282_v36  ;;  %v16533_v15 = vperm.slane %v2050_v38, 0  ;;  %6280 = vmatpush.bf16.msrb.mxu0 %v12899_v52  ;;  %6231 = vmatmul.bf16.vlgmr.msra.gmra.mxu1 %v16541_v63 }
 0x13d   : > { %v12882_v59 = vld [vmem:[#allocation2 + $0x14c0] sm:$0xf]  ;;  %v14732_v60 = vld [vmem:[#allocation2 + $0x14cc] sm:$0xf0]  ;;  %v13139_v30 = vor.u32 %v14796_v47, %v13138_v43  ;;  %6299 = vmatpush.bf16.msrb.mxu1 %v13027_v2 }
 0x13e   : > { %v13010_v61 = vld [vmem:[#allocation2 + $0x15c0] sm:$0xf]  ;;  %v14764_v4 = vld [vmem:[#allocation2 + $0x15cc] sm:$0xf0]  ;;  %v12883_v31 = vor.u32 %v14732_v60, %v12882_v59  ;;  %6337 = vmatpush.bf16.msrb.mxu3 %v13283_v3  ;;  %v5910_v47 = vadd.f32 %v5909_v42, %v16533_v15  ;;  %v5928_v59 = vpop.f32.mrf.mxu1 }
 0x13f   : > { %v13266_v7 = vld [vmem:[#allocation2 + $0x17c0] sm:$0xf]  ;;  %v14828_v16 = vld [vmem:[#allocation2 + $0x17cc] sm:$0xf0]  ;;  %v13011_v32 = vor.u32 %v14764_v4, %v13010_v61  ;;  %6319 = vmatpush.bf16.msrb.mxu2 %v13139_v30  ;;  %v16546_v61 = vpack.c.bf16 %v1181_v27, %v1157_v26 }
 0x140   : > { %v1154_v19 = vld [vmem:[%s16367_s4 + $0x80] sm:$0xff]  ;;  %v1156_v20 = vld [vmem:[%s16367_s4 + $0x90] sm:$0xff]  ;;  %v13267_v33 = vor.u32 %v14828_v16, %v13266_v7  ;;  %6281 = vmatpush.bf16.msrb.mxu0 %v12883_v31  ;;  %v5929_v16 = vadd.f32 %v5928_v59, %v5910_v47 }
 0x141   : > { %v1178_v10 = vld [vmem:[%s16367_s4 + $0x140] sm:$0xff]  ;;  %v1180_v21 = vld [vmem:[%s16367_s4 + $0x150] sm:$0xff]  ;;  %17253 = vst [vmem:[#allocation63_spill] sm:$0xff] %v16546_v61  ;;  %6300 = vmatpush.bf16.msrb.mxu1 %v13011_v32  ;;  %6269 = vmatmul.bf16.vlgmr.msra.gmra.mxu3 %v16546_v61 }
 0x142   : > { %v13122_v34 = vld [vmem:[#allocation2 + $0x16a0] sm:$0xf]  ;;  %v14792_v35 = vld [vmem:[#allocation2 + $0x16ac] sm:$0xf0]  ;;  %v16539_v38 = vpack.c.bf16 %v1178_v10, %v1154_v19  ;;  %v16544_v60 = vpack.c.bf16 %v1180_v21, %v1156_v20  ;;  %6338 = vmatpush.bf16.msrb.mxu3 %v13267_v33 }
 0x143   : > { %v12866_v36 = vld [vmem:[#allocation2 + $0x14a0] sm:$0xf]  ;;  %v14728_v37 = vld [vmem:[#allocation2 + $0x14ac] sm:$0xf0]  ;;  %v13123_v2 = vor.u32 %v14792_v35, %v13122_v34  ;;  %v5947_v34 = vpop.f32.mrf.mxu2 }
 0x144   : > { %v12994_v41 = vld [vmem:[#allocation2 + $0x15a0] sm:$0xf]  ;;  %17250 = vst [vmem:[#allocation60_spill] sm:$0xff] %v16539_v38  ;;  %v14760_v49 = vld [vmem:[#allocation2 + $0x15ac] sm:$0xf0]  ;;  %v12867_v3 = vor.u32 %v14728_v37, %v12866_v36  ;;  %6212 = vmatmul.bf16.vlgmr.msra.gmra.mxu0 %v16539_v38  ;;  %6250 = vmatmul.bf16.vlgmr.msra.gmra.mxu2 %v16544_v60 }
 0x145   : > { %v13250_v52 = vld [vmem:[#allocation2 + $0x17a0] sm:$0xf]  ;;  %v14824_v43 = vld [vmem:[#allocation2 + $0x17ac] sm:$0xf0]  ;;  %17252 = vst [vmem:[#allocation62_spill] sm:$0xff] %v16544_v60  ;;  %v12995_v19 = vor.u32 %v14760_v49, %v12994_v41  ;;  %6320 = vmatpush.bf16.msrb.mxu2 %v13123_v2  ;;  %v5948_v49 = vadd.f32 %v5947_v34, %v5929_v16 }
 0x146   : > { %v13106_v4 = vld [vmem:[#allocation2 + $0x1680] sm:$0xf]  ;;  %v14788_v7 = vld [vmem:[#allocation2 + $0x168c] sm:$0xf0]  ;;  %v13251_v10 = vor.u32 %v14824_v43, %v13250_v52  ;;  %6282 = vmatpush.bf16.msrb.mxu0 %v12867_v3  ;;  %v5966_v52 = vpop.f32.mrf.mxu3  ;;  %v5911_v43 = vpop.f32.mrf.mxu0 }
 0x147   : > { %v12850_v11 = vld [vmem:[#allocation2 + $0x1480] sm:$0xf]  ;;  %v14724_v12 = vld [vmem:[#allocation2 + $0x148c] sm:$0xf0]  ;;  %v13107_v27 = vor.u32 %v14788_v7, %v13106_v4  ;;  %6301 = vmatpush.bf16.msrb.mxu1 %v12995_v19  ;;  %v5912_v3 = vadd.f32 %v5911_v43, %v16533_v15  ;;  %v5930_v4 = vpop.f32.mrf.mxu1 }
 0x148   : > { %v12978_v30 = vld [vmem:[#allocation2 + $0x1580] sm:$0xf]  ;;  %v14756_v20 = vld [vmem:[#allocation2 + $0x158c] sm:$0xf0]  ;;  %v12851_v31 = vor.u32 %v14724_v12, %v12850_v11  ;;  %6339 = vmatpush.bf16.msrb.mxu3 %v13251_v10  ;;  %v16553_v10 = vadd.f32 %v5966_v52, %v5948_v49 }
 0x149   : > { %v13234_v21 = vld [vmem:[#allocation2 + $0x1780] sm:$0xf]  ;;  %v14820_v26 = vld [vmem:[#allocation2 + $0x178c] sm:$0xf0]  ;;  %v12979_v35 = vor.u32 %v14756_v20, %v12978_v30  ;;  %6321 = vmatpush.bf16.msrb.mxu2 %v13107_v27  ;;  %v5931_v12 = vadd.f32 %v5930_v4, %v5912_v3 }
 0x14a   : > { %v13090_v32 = vld [vmem:[#allocation2 + $0x1660] sm:$0xf]  ;;  %v14784_v33 = vld [vmem:[#allocation2 + $0x166c] sm:$0xf0]  ;;  %v13235_v36 = vor.u32 %v14820_v26, %v13234_v21  ;;  %6283 = vmatpush.bf16.msrb.mxu0 %v12851_v31  ;;  %v1203_v21 = vld [vmem:[%s16367_s4 + $0x208] sm:$0xff] }
 0x14b   : > { %v12834_v37 = vld [vmem:[#allocation2 + $0x1460] sm:$0xf]  ;;  %v14720_v41 = vld [vmem:[#allocation2 + $0x146c] sm:$0xf0]  ;;  %v13091_v16 = vor.u32 %v14784_v33, %v13090_v32  ;;  %6302 = vmatpush.bf16.msrb.mxu1 %v12979_v35  ;;  %v1227_v26 = vld [vmem:[%s16367_s4 + $0x2c8] sm:$0xff]  ;;  %v5949_v4 = vpop.f32.mrf.mxu2 }
 0x14c   : > { %v12962_v42 = vld [vmem:[#allocation2 + $0x1560] sm:$0xf]  ;;  %v14752_v47 = vld [vmem:[#allocation2 + $0x156c] sm:$0xf0]  ;;  %v12835_v11 = vor.u32 %v14720_v41, %v12834_v37  ;;  %6340 = vmatpush.bf16.msrb.mxu3 %v13235_v36  ;;  %v1205_v31 = vld [vmem:[%s16367_s4 + $0x218] sm:$0xff]  ;;  %v5950_v62 = vadd.f32 %v5949_v4, %v5931_v12  ;;  %v16565_v22 = vpack.c.bf16 %v1227_v26, %v1203_v21 }
 0x14d   : > { %v13218_v59 = vld [vmem:[#allocation2 + $0x1760] sm:$0xf]  ;;  %v14816_v2 = vld [vmem:[#allocation2 + $0x176c] sm:$0xf0]  ;;  %v12963_v34 = vor.u32 %v14752_v47, %v12962_v42  ;;  %v1229_v37 = vld [vmem:[%s16367_s4 + $0x2d8] sm:$0xff]  ;;  %6322 = vmatpush.bf16.msrb.mxu2 %v13091_v16 }
 0x14e   : > { %v13074_v7 = vld [vmem:[#allocation2 + $0x1640] sm:$0xf]  ;;  %v14780_v19 = vld [vmem:[#allocation2 + $0x164c] sm:$0xf0]  ;;  %v13219_v43 = vor.u32 %v14816_v2, %v13218_v59  ;;  %6284 = vmatpush.bf16.msrb.mxu0 %v12835_v11  ;;  %v5968_v58 = vpop.f32.mrf.mxu3  ;;  %v5914_v55 = vpop.f32.mrf.mxu0  ;;  %17255 = vst [vmem:[#allocation65_spill] sm:$0xff] %v16565_v22  ;;  %6236 = vmatmul.bf16.gmra.mxu1 %v16565_v22 }
 0x14f   : > { %v1202_v30 = vld [vmem:[%s16367_s4 + $0x200] sm:$0xff]  ;;  %v14716_v49 = vld [vmem:[#allocation2 + $0x144c] sm:$0xf0]  ;;  %v13075_v35 = vor.u32 %v14780_v19, %v13074_v7  ;;  %6303 = vmatpush.bf16.msrb.mxu1 %v12963_v34  ;;  %v5933_v19 = vpop.f32.mrf.mxu1 }
 0x150   : > { %v1226_v20 = vld [vmem:[%s16367_s4 + $0x2c0] sm:$0xff]  ;;  %v1204_v27 = vld [vmem:[%s16367_s4 + $0x210] sm:$0xff]  ;;  %6341 = vmatpush.bf16.msrb.mxu3 %v13219_v43 }
 0x151   : > { %v12818_v61 = vld [vmem:[#allocation2 + $0x1440] sm:$0xf]  ;;  %v1228_v60 = vld [vmem:[%s16367_s4 + $0x2d0] sm:$0xff]  ;;  %v16563_v25 = vpack.c.bf16 %v1226_v20, %v1202_v30  ;;  %6323 = vmatpush.bf16.msrb.mxu2 %v13075_v35  ;;  %v14126_v35 = vld [vmem:[#allocation2 + $0x1e4] sm:$0xf] }
 0x152   : > { %v12946_v52 = vld [vmem:[#allocation2 + $0x1540] sm:$0xf]  ;;  %v14748_v63 = vld [vmem:[#allocation2 + $0x154c] sm:$0xf0]  ;;  %v12819_v36 = vor.u32 %v14716_v49, %v12818_v61  ;;  %v5915_v61 = vadd.f32 %v5914_v55, %v16533_v15  ;;  %v16568_v34 = vpack.c.bf16 %v1228_v60, %v1204_v27  ;;  %v16572_v49 = vadd.f32 %v5968_v58, %v5950_v62  ;;  %v14158_v62 = vld [vmem:[#allocation2 + $0x2e4] sm:$0xf] }
 0x153   : > { %v13202_v32 = vld [vmem:[#allocation2 + $0x1740] sm:$0xf]  ;;  %v14812_v33 = vld [vmem:[#allocation2 + $0x174c] sm:$0xf0]  ;;  %v12947_v42 = vor.u32 %v14748_v63, %v12946_v52  ;;  %17254 = vst [vmem:[#allocation64_spill] sm:$0xff] %v16563_v25  ;;  %v16570_v63 = vpack.c.bf16 %v1229_v37, %v1205_v31 }
 0x154   : > { %v13058_v41 = vld [vmem:[#allocation2 + $0x1620] sm:$0xf]  ;;  %v14776_v3 = vld [vmem:[#allocation2 + $0x162c] sm:$0xf0]  ;;  %v13203_v47 = vor.u32 %v14812_v33, %v13202_v32  ;;  %17256 = vst [vmem:[#allocation66_spill] sm:$0xff] %v16568_v34  ;;  %6285 = vmatpush.bf16.msrb.mxu0 %v12819_v36  ;;  %v5934_v52 = vadd.f32 %v5933_v19, %v5915_v61  ;;  %6255 = vmatmul.bf16.gmra.mxu2 %v16568_v34 }
 0x155   : > { %v12802_v59 = vld [vmem:[#allocation2 + $0x1420] sm:$0xf]  ;;  %v14712_v2 = vld [vmem:[#allocation2 + $0x142c] sm:$0xf0]  ;;  %17257 = vst [vmem:[#allocation67_spill] sm:$0xff] %v16570_v63  ;;  %v13059_v12 = vor.u32 %v14776_v3, %v13058_v41  ;;  %6304 = vmatpush.bf16.msrb.mxu1 %v12947_v42  ;;  %6217 = vmatmul.bf16.gmra.mxu0 %v16563_v25 }
 0x156   : > { %v12930_v38 = vld [vmem:[#allocation2 + $0x1520] sm:$0xf]  ;;  %v14744_v16 = vld [vmem:[#allocation2 + $0x152c] sm:$0xf0]  ;;  %v12803_v30 = vor.u32 %v14712_v2, %v12802_v59  ;;  %6342 = vmatpush.bf16.msrb.mxu3 %v13203_v47  ;;  %v10596_v31 = vld [vmem:[#allocation2 + $0x2f0] sm:$0xf0]  ;;  %v5952_v47 = vpop.f32.mrf.mxu2 }
 0x157   : > { %v13186_v11 = vld [vmem:[#allocation2 + $0x1720] sm:$0xf]  ;;  %v14808_v7 = vld [vmem:[#allocation2 + $0x172c] sm:$0xf0]  ;;  %v12931_v32 = vor.u32 %v14744_v16, %v12930_v38  ;;  %6274 = vmatmul.bf16.gmra.mxu3 %v16570_v63  ;;  %v14094_v37 = vld [vmem:[#allocation2 + $0xe4] sm:$0xf]  ;;  %6324 = vmatpush.bf16.msrb.mxu2 %v13059_v12  ;;  %v5953_v16 = vadd.f32 %v5952_v47, %v5934_v52  ;;  %v10599_v61 = vor.u32 %v14158_v62, %v10596_v31 }
 0x158   : > { %v13042_v43 = vld [vmem:[#allocation2 + $0x1600] sm:$0xf]  ;;  %v14772_v20 = vld [vmem:[#allocation2 + $0x160c] sm:$0xf0]  ;;  %v13187_v55 = vor.u32 %v14808_v7, %v13186_v11  ;;  %v10340_v41 = vld [vmem:[#allocation2 + $0xf0] sm:$0xf0]  ;;  %6286 = vmatpush.bf16.msrb.mxu0 %v12803_v30  ;;  %v5971_v11 = vpop.f32.mrf.mxu3  ;;  %v5916_v7 = vpop.f32.mrf.mxu0 }
 0x159   : > { %v12786_v21 = vld [vmem:[#allocation2 + $0x1400] sm:$0xf]  ;;  %v14708_v26 = vld [vmem:[#allocation2 + $0x140c] sm:$0xf0]  ;;  %v13043_v38 = vor.u32 %v14772_v20, %v13042_v43  ;;  %v10468_v3 = vld [vmem:[#allocation2 + $0x1f0] sm:$0xf0]  ;;  %6305 = vmatpush.bf16.msrb.mxu1 %v12931_v32  ;;  %v10343_v19 = vor.u32 %v14094_v37, %v10340_v41  ;;  %v5917_v12 = vadd.f32 %v5916_v7, %v16533_v15  ;;  %v5935_v43 = vpop.f32.mrf.mxu1 }
 0x15a   : > { %v12914_v33 = vld [vmem:[#allocation2 + $0x1500] sm:$0xf]  ;;  %v14740_v60 = vld [vmem:[#allocation2 + $0x150c] sm:$0xf0]  ;;  %v12787_v36 = vor.u32 %v14708_v26, %v12786_v21  ;;  %v14190_v4 = vld [vmem:[#allocation2 + $0x3e4] sm:$0xf]  ;;  %6343 = vmatpush.bf16.msrb.mxu3 %v13187_v55  ;;  %v10471_v30 = vor.u32 %v14126_v35, %v10468_v3  ;;  %v16579_v55 = vadd.f32 %v5971_v11, %v5953_v16 }
 0x15b   : > { %v13170_v27 = vld [vmem:[#allocation2 + $0x1700] sm:$0xf]  ;;  %v14804_v58 = vld [vmem:[#allocation2 + $0x170c] sm:$0xf0]  ;;  %v10724_v42 = vld [vmem:[#allocation2 + $0x3f0] sm:$0xf0]  ;;  %v12915_v59 = vor.u32 %v14740_v60, %v12914_v33  ;;  %6325 = vmatpush.bf16.msrb.mxu2 %v13043_v38  ;;  %v5936_v60 = vadd.f32 %v5935_v43, %v5917_v12 }
 0x15c   : > { %v13171_v2 = vor.u32 %v14804_v58, %v13170_v27  ;;  %v14154_v63 = vld [vmem:[#allocation2 + $0x2c4] sm:$0xf]  ;;  %v10580_v34 = vld [vmem:[#allocation2 + $0x2d0] sm:$0xf0]  ;;  %v10727_v20 = vor.u32 %v14190_v4, %v10724_v42  ;;  %6287 = vmatpush.bf16.msrb.mxu0 %v12787_v36  ;;  %v1159_v62 = vld [vmem:[%s16367_s4 + $0xa8] sm:$0xff] }
 0x15d   : > { %v14090_v21 = vld [vmem:[#allocation2 + $0xc4] sm:$0xf]  ;;  %v10324_v26 = vld [vmem:[#allocation2 + $0xd0] sm:$0xf0]  ;;  %6306 = vmatpush.bf16.msrb.mxu1 %v12915_v59  ;;  %v1183_v31 = vld [vmem:[%s16367_s4 + $0x168] sm:$0xff]  ;;  %v10583_v37 = vor.u32 %v14154_v63, %v10580_v34 }
 0x15e   : > { %v14122_v32 = vld [vmem:[#allocation2 + $0x1c4] sm:$0xf]  ;;  %v10452_v52 = vld [vmem:[#allocation2 + $0x1d0] sm:$0xf0]  ;;  %6344 = vmatpush.bf16.msrb.mxu3 %v13171_v2  ;;  %v10327_v41 = vor.u32 %v14090_v21, %v10324_v26  ;;  %v1161_v36 = vld [vmem:[%s16367_s4 + $0xb8] sm:$0xff]  ;;  %v5954_v2 = vpop.f32.mrf.mxu2  ;;  %v16591_v34 = vpack.c.bf16 %v1183_v31, %v1159_v62 }
 0x15f   : > { %v14186_v33 = vld [vmem:[#allocation2 + $0x3c4] sm:$0xf]  ;;  %v10708_v15 = vld [vmem:[#allocation2 + $0x3d0] sm:$0xf0]  ;;  %6394 = vmatpush.bf16.msra.mxu2 %v10599_v61  ;;  %v10455_v3 = vor.u32 %v14122_v32, %v10452_v52  ;;  %v1185_v42 = vld [vmem:[%s16367_s4 + $0x178] sm:$0xff]  ;;  %v5955_v12 = vadd.f32 %v5954_v2, %v5936_v60 }
 0x160   : > { %v1158_v27 = vld [vmem:[%s16367_s4 + $0xa0] sm:$0xff]  ;;  %6356 = vmatpush.bf16.msra.mxu0 %v10343_v19  ;;  %v1160_v35 = vld [vmem:[%s16367_s4 + $0xb0] sm:$0xff]  ;;  %v10711_v4 = vor.u32 %v14186_v33, %v10708_v15  ;;  %v5973_v43 = vpop.f32.mrf.mxu3  ;;  %17259 = vst [vmem:[#allocation69_spill] sm:$0xff] %v16591_v34  ;;  %v16595_v32 = vpack.c.bf16 %v1185_v42, %v1161_v36  ;;  %6307 = vmatmul.bf16.vlgmr.msrb.gmra.mxu1 %v16591_v34 }
 0x161   : > { %v1182_v58 = vld [vmem:[%s16367_s4 + $0x160] sm:$0xff]  ;;  %v1184_v38 = vld [vmem:[%s16367_s4 + $0x170] sm:$0xff]  ;;  %6375 = vmatpush.bf16.msra.mxu1 %v10471_v30  ;;  %v6004_v21 = vpop.f32.mrf.mxu1  ;;  %v16597_v52 = vadd.f32 %v5973_v43, %v5955_v12 }
 0x162   : > { %6413 = vmatpush.bf16.msra.mxu3 %v10727_v20  ;;  %v14150_v47 = vld [vmem:[#allocation2 + $0x2a4] sm:$0xf]  ;;  %v10564_v59 = vld [vmem:[#allocation2 + $0x2b0] sm:$0xf0]  ;;  %v16589_v61 = vpack.c.bf16 %v1182_v58, %v1158_v27  ;;  %v5985_v20 = vpop.f32.mrf.mxu0  ;;  %v16593_v26 = vpack.c.bf16 %v1184_v38, %v1160_v35  ;;  %17261 = vst [vmem:[#allocation71_spill] sm:$0xff] %v16595_v32 }
 0x163   : > { %v14086_v16 = vld [vmem:[#allocation2 + $0xa4] sm:$0xf]  ;;  %v10308_v11 = vld [vmem:[#allocation2 + $0xb0] sm:$0xf0]  ;;  %6395 = vmatpush.bf16.msra.mxu2 %v10583_v37  ;;  %v5986_v33 = vadd.f32 %v5985_v20, %v16553_v10  ;;  %v10567_v15 = vor.u32 %v14150_v47, %v10564_v59 }
 0x164   : > { %v14118_v7 = vld [vmem:[#allocation2 + $0x1a4] sm:$0xf]  ;;  %17258 = vst [vmem:[#allocation68_spill] sm:$0xff] %v16589_v61  ;;  %6357 = vmatpush.bf16.msra.mxu0 %v10327_v41  ;;  %v10436_v63 = vld [vmem:[#allocation2 + $0x1b0] sm:$0xf0]  ;;  %v10311_v60 = vor.u32 %v14086_v16, %v10308_v11  ;;  %6326 = vmatmul.bf16.vlgmr.msrb.gmra.mxu2 %v16593_v26 }
 0x165   : > { %v14182_v19 = vld [vmem:[#allocation2 + $0x3a4] sm:$0xf]  ;;  %v10692_v30 = vld [vmem:[#allocation2 + $0x3b0] sm:$0xf0]  ;;  %17260 = vst [vmem:[#allocation70_spill] sm:$0xff] %v16593_v26  ;;  %6376 = vmatpush.bf16.msra.mxu1 %v10455_v3  ;;  %v10439_v62 = vor.u32 %v14118_v7, %v10436_v63  ;;  %v6005_v22 = vadd.f32 %v6004_v21, %v5986_v33  ;;  %6288 = vmatmul.bf16.vlgmr.msrb.gmra.mxu0 %v16589_v61 }
 0x166   : > { %6414 = vmatpush.bf16.msra.mxu3 %v10711_v4  ;;  %v14146_v27 = vld [vmem:[#allocation2 + $0x284] sm:$0xf]  ;;  %v10548_v58 = vld [vmem:[#allocation2 + $0x290] sm:$0xf0]  ;;  %v10695_v31 = vor.u32 %v14182_v19, %v10692_v30  ;;  %v6023_v12 = vpop.f32.mrf.mxu2 }
 0x167   : > { %v14082_v37 = vld [vmem:[#allocation2 + $0x84] sm:$0xf]  ;;  %v10292_v41 = vld [vmem:[#allocation2 + $0x90] sm:$0xf0]  ;;  %6345 = vmatmul.bf16.vlgmr.msrb.gmra.mxu3 %v16595_v32  ;;  %6396 = vmatpush.bf16.msra.mxu2 %v10567_v15  ;;  %v10551_v10 = vor.u32 %v14146_v27, %v10548_v58  ;;  %v6024_v20 = vadd.f32 %v6023_v12, %v6005_v22 }
 0x168   : > { %v14114_v2 = vld [vmem:[#allocation2 + $0x184] sm:$0xf]  ;;  %v10420_v35 = vld [vmem:[#allocation2 + $0x190] sm:$0xf0]  ;;  %6358 = vmatpush.bf16.msra.mxu0 %v10311_v60  ;;  %v10295_v3 = vor.u32 %v14082_v37, %v10292_v41  ;;  %v6042_v43 = vpop.f32.mrf.mxu3  ;;  %v1207_v41 = vld [vmem:[%s16367_s4 + $0x228] sm:$0xff] }
 0x169   : > { %v14178_v38 = vld [vmem:[#allocation2 + $0x384] sm:$0xf]  ;;  %v10676_v36 = vld [vmem:[#allocation2 + $0x390] sm:$0xf0]  ;;  %6377 = vmatpush.bf16.msra.mxu1 %v10439_v62  ;;  %v10423_v47 = vor.u32 %v14114_v2, %v10420_v35  ;;  %v6006_v33 = vpop.f32.mrf.mxu1  ;;  %v1231_v2 = vld [vmem:[%s16367_s4 + $0x2e8] sm:$0xff] }
 0x16a   : > { %v14142_v4 = vld [vmem:[#allocation2 + $0x264] sm:$0xf]  ;;  %v10532_v42 = vld [vmem:[#allocation2 + $0x270] sm:$0xf0]  ;;  %6415 = vmatpush.bf16.msra.mxu3 %v10695_v31  ;;  %v10679_v59 = vor.u32 %v14178_v38, %v10676_v36  ;;  %v5987_v21 = vpop.f32.mrf.mxu0  ;;  %v16605_v31 = vadd.f32 %v6042_v43, %v6024_v20  ;;  %v1233_v43 = vld [vmem:[%s16367_s4 + $0x2f8] sm:$0xff]  ;;  %v16617_v61 = vpack.c.bf16 %v1231_v2, %v1207_v41 }
 0x16b   : > { %v14078_v16 = vld [vmem:[#allocation2 + $0x64] sm:$0xf]  ;;  %v10276_v11 = vld [vmem:[#allocation2 + $0x70] sm:$0xf0]  ;;  %v5988_v15 = vadd.f32 %v5987_v21, %v16572_v49  ;;  %6397 = vmatpush.bf16.msra.mxu2 %v10551_v10  ;;  %v10535_v60 = vor.u32 %v14142_v4, %v10532_v42 }
 0x16c   : > { %v14110_v7 = vld [vmem:[#allocation2 + $0x164] sm:$0xf]  ;;  %v10404_v63 = vld [vmem:[#allocation2 + $0x170] sm:$0xf0]  ;;  %6359 = vmatpush.bf16.msra.mxu0 %v10295_v3  ;;  %v10279_v27 = vor.u32 %v14078_v16, %v10276_v11  ;;  %17263 = vst [vmem:[#allocation73_spill] sm:$0xff] %v16617_v61 }
 0x16d   : > { %v14174_v19 = vld [vmem:[#allocation2 + $0x364] sm:$0xf]  ;;  %v10660_v30 = vld [vmem:[#allocation2 + $0x370] sm:$0xf0]  ;;  %6378 = vmatpush.bf16.msra.mxu1 %v10423_v47  ;;  %v10407_v35 = vor.u32 %v14110_v7, %v10404_v63  ;;  %v6007_v3 = vadd.f32 %v6006_v33, %v5988_v15  ;;  %v1209_v47 = vld [vmem:[%s16367_s4 + $0x238] sm:$0xff] }
 0x16e   : > { %v14138_v58 = vld [vmem:[#allocation2 + $0x244] sm:$0xf]  ;;  %v10516_v62 = vld [vmem:[#allocation2 + $0x250] sm:$0xf0]  ;;  %6416 = vmatpush.bf16.msra.mxu3 %v10679_v59  ;;  %v10663_v49 = vor.u32 %v14174_v19, %v10660_v30  ;;  %v6025_v15 = vpop.f32.mrf.mxu2 }
 0x16f   : > { %v1206_v37 = vld [vmem:[%s16367_s4 + $0x220] sm:$0xff]  ;;  %v10260_v36 = vld [vmem:[#allocation2 + $0x50] sm:$0xf0]  ;;  %6398 = vmatpush.bf16.msra.mxu2 %v10535_v60  ;;  %v10519_v59 = vor.u32 %v14138_v58, %v10516_v62  ;;  %v6026_v58 = vadd.f32 %v6025_v15, %v6007_v3 }
 0x170   : > { %v1230_v22 = vld [vmem:[%s16367_s4 + $0x2e0] sm:$0xff]  ;;  %v10388_v4 = vld [vmem:[#allocation2 + $0x150] sm:$0xf0]  ;;  %6360 = vmatpush.bf16.msra.mxu0 %v10279_v27  ;;  %v6044_v26 = vpop.f32.mrf.mxu3  ;;  %6312 = vmatmul.bf16.gmra.mxu1 %v16617_v61 }
 0x171   : > { %v14074_v38 = vld [vmem:[#allocation2 + $0x44] sm:$0xf]  ;;  %v10644_v16 = vld [vmem:[#allocation2 + $0x350] sm:$0xf0]  ;;  %6379 = vmatpush.bf16.msra.mxu1 %v10407_v35  ;;  %v16615_v34 = vpack.c.bf16 %v1230_v22, %v1206_v37  ;;  %v16621_v35 = vpack.c.bf16 %v1233_v43, %v1209_v47 }
 0x172   : > { %v14106_v10 = vld [vmem:[#allocation2 + $0x144] sm:$0xf]  ;;  %v1208_v11 = vld [vmem:[%s16367_s4 + $0x230] sm:$0xff]  ;;  %v10263_v20 = vor.u32 %v14074_v38, %v10260_v36  ;;  %6417 = vmatpush.bf16.msra.mxu3 %v10663_v49  ;;  %v5990_v62 = vpop.f32.mrf.mxu0  ;;  %v6009_v38 = vpop.f32.mrf.mxu1 }
 0x173   : > { %v14170_v42 = vld [vmem:[#allocation2 + $0x344] sm:$0xf]  ;;  %v1232_v12 = vld [vmem:[%s16367_s4 + $0x2f0] sm:$0xff]  ;;  %v10391_v7 = vor.u32 %v14106_v10, %v10388_v4  ;;  %17262 = vst [vmem:[#allocation72_spill] sm:$0xff] %v16615_v34  ;;  %v5991_v10 = vadd.f32 %v5990_v62, %v16579_v55  ;;  %6399 = vmatpush.bf16.msra.mxu2 %v10519_v59 }
 0x174   : > { %v14134_v21 = vld [vmem:[#allocation2 + $0x224] sm:$0xf]  ;;  %v10500_v32 = vld [vmem:[#allocation2 + $0x230] sm:$0xf0]  ;;  %v10647_v63 = vor.u32 %v14170_v42, %v10644_v16  ;;  %v16619_v36 = vpack.c.bf16 %v1232_v12, %v1208_v11  ;;  %17265 = vst [vmem:[#allocation75_spill] sm:$0xff] %v16621_v35  ;;  %6361 = vmatpush.bf16.msra.mxu0 %v10263_v20  ;;  %v16624_v42 = vadd.f32 %v6044_v26, %v6026_v58 }
 0x175   : > { %v14070_v19 = vld [vmem:[#allocation2 + $0x24] sm:$0xf]  ;;  %v10244_v30 = vld [vmem:[#allocation2 + $0x30] sm:$0xf0]  ;;  %v10503_v4 = vor.u32 %v14134_v21, %v10500_v32  ;;  %6380 = vmatpush.bf16.msra.mxu1 %v10391_v7  ;;  %v6010_v43 = vadd.f32 %v6009_v38, %v5991_v10  ;;  %6293 = vmatmul.bf16.gmra.mxu0 %v16615_v34 }
 0x176   : > { %v14102_v33 = vld [vmem:[#allocation2 + $0x124] sm:$0xf]  ;;  %v10372_v25 = vld [vmem:[#allocation2 + $0x130] sm:$0xf0]  ;;  %17264 = vst [vmem:[#allocation74_spill] sm:$0xff] %v16619_v36  ;;  %v10247_v37 = vor.u32 %v14070_v19, %v10244_v30  ;;  %6418 = vmatpush.bf16.msra.mxu3 %v10647_v63  ;;  %6331 = vmatmul.bf16.gmra.mxu2 %v16619_v36 }
 0x177   : > { %v14166_v60 = vld [vmem:[#allocation2 + $0x324] sm:$0xf]  ;;  %v10628_v27 = vld [vmem:[#allocation2 + $0x330] sm:$0xf0]  ;;  %v10375_v3 = vor.u32 %v14102_v33, %v10372_v25  ;;  %6350 = vmatmul.bf16.gmra.mxu3 %v16621_v35  ;;  %6400 = vmatpush.bf16.msra.mxu2 %v10503_v4 }
 0x178   : > { %v14130_v49 = vld [vmem:[#allocation2 + $0x204] sm:$0xf]  ;;  %v10484_v22 = vld [vmem:[#allocation2 + $0x210] sm:$0xf0]  ;;  %v10631_v16 = vor.u32 %v14166_v60, %v10628_v27  ;;  %6362 = vmatpush.bf16.msra.mxu0 %v10247_v37  ;;  %v6028_v60 = vpop.f32.mrf.mxu2  ;;  %v6047_v27 = vpop.f32.mrf.mxu3 }
 0x179   : > { %v14066_v41 = vld [vmem:[#allocation2 + $0x4] sm:$0xf]  ;;  %v10228_v2 = vld [vmem:[#allocation2 + $0x10] sm:$0xf0]  ;;  %v10487_v25 = vor.u32 %v14130_v49, %v10484_v22  ;;  %6381 = vmatpush.bf16.msra.mxu1 %v10375_v3  ;;  %v6029_v35 = vadd.f32 %v6028_v60, %v6010_v43 }
 0x17a   : > { %v14098_v11 = vld [vmem:[#allocation2 + $0x104] sm:$0xf]  ;;  %v10356_v12 = vld [vmem:[#allocation2 + $0x110] sm:$0xf0]  ;;  %v10231_v7 = vor.u32 %v14066_v41, %v10228_v2  ;;  %6419 = vmatpush.bf16.msra.mxu3 %v10631_v16  ;;  %v5992_v36 = vpop.f32.mrf.mxu0  ;;  %v6011_v61 = vpop.f32.mrf.mxu1 }
 0x17b   : > { %v14162_v47 = vld [vmem:[#allocation2 + $0x304] sm:$0xf]  ;;  %v10612_v55 = vld [vmem:[#allocation2 + $0x310] sm:$0xf0]  ;;  %v10359_v33 = vor.u32 %v14098_v11, %v10356_v12  ;;  %v5993_v2 = vadd.f32 %v5992_v36, %v16597_v52  ;;  %6401 = vmatpush.bf16.msra.mxu2 %v10487_v25  ;;  %v16631_v12 = vadd.f32 %v6047_v27, %v6029_v35 }
 0x17c   : > { %v14286_v32 = vld [vmem:[#allocation2 + $0x6e4] sm:$0xf]  ;;  %v11108_v59 = vld [vmem:[#allocation2 + $0x6f0] sm:$0xf0]  ;;  %v10615_v15 = vor.u32 %v14162_v47, %v10612_v55  ;;  %6363 = vmatpush.bf16.msra.mxu0 %v10231_v7 }
 0x17d   : > { %v14222_v26 = vld [vmem:[#allocation2 + $0x4e4] sm:$0xf]  ;;  %v10852_v20 = vld [vmem:[#allocation2 + $0x4f0] sm:$0xf0]  ;;  %v11111_v58 = vor.u32 %v14286_v32, %v11108_v59  ;;  %6382 = vmatpush.bf16.msra.mxu1 %v10359_v33  ;;  %v6012_v47 = vadd.f32 %v6011_v61, %v5993_v2 }
 0x17e   : > { %v14254_v21 = vld [vmem:[#allocation2 + $0x5e4] sm:$0xf]  ;;  %v10980_v63 = vld [vmem:[#allocation2 + $0x5f0] sm:$0xf0]  ;;  %v10855_v62 = vor.u32 %v14222_v26, %v10852_v20  ;;  %6420 = vmatpush.bf16.msra.mxu3 %v10615_v15 }
 0x17f   : > { %v14318_v19 = vld [vmem:[#allocation2 + $0x7e4] sm:$0xf]  ;;  %v11236_v30 = vld [vmem:[#allocation2 + $0x7f0] sm:$0xf0]  ;;  %v10983_v4 = vor.u32 %v14254_v21, %v10980_v63  ;;  %6470 = vmatpush.bf16.msrb.mxu2 %v11111_v58 }
 0x180   : > { %v14282_v38 = vld [vmem:[#allocation2 + $0x6c4] sm:$0xf]  ;;  %v11092_v10 = vld [vmem:[#allocation2 + $0x6d0] sm:$0xf0]  ;;  %v11239_v37 = vor.u32 %v14318_v19, %v11236_v30  ;;  %6432 = vmatpush.bf16.msrb.mxu0 %v10855_v62  ;;  %v6030_v25 = vpop.f32.mrf.mxu2  ;;  %v6049_v7 = vpop.f32.mrf.mxu3  ;;  %6383 = vmatmul.bf16.vlgmr.msra.gmra.mxu1 %v16379_v53 }
 0x181   : > { %v14218_v49 = vld [vmem:[#allocation2 + $0x4c4] sm:$0xf]  ;;  %v10836_v22 = vld [vmem:[#allocation2 + $0x4d0] sm:$0xf0]  ;;  %v11095_v43 = vor.u32 %v14282_v38, %v11092_v10  ;;  %6451 = vmatpush.bf16.msrb.mxu1 %v10983_v4  ;;  %v6031_v19 = vadd.f32 %v6030_v25, %v6012_v47 }
 0x182   : > { %v14250_v41 = vld [vmem:[#allocation2 + $0x5c4] sm:$0xf]  ;;  %v10964_v3 = vld [vmem:[#allocation2 + $0x5d0] sm:$0xf0]  ;;  %v10839_v55 = vor.u32 %v14218_v49, %v10836_v22  ;;  %6489 = vmatpush.bf16.msrb.mxu3 %v11239_v37  ;;  %v6061_v30 = vpop.f32.mrf.mxu0  ;;  %v6080_v33 = vpop.f32.mrf.mxu1 }
 0x183   : > { %v14314_v16 = vld [vmem:[#allocation2 + $0x7c4] sm:$0xf]  ;;  %v11220_v11 = vld [vmem:[#allocation2 + $0x7d0] sm:$0xf0]  ;;  %v10967_v32 = vor.u32 %v14250_v41, %v10964_v3  ;;  %6471 = vmatpush.bf16.msrb.mxu2 %v11095_v43  ;;  %v6062_v15 = vadd.f32 %v6061_v30, %v16605_v31  ;;  %v16634_v38 = vadd.f32 %v6049_v7, %v6031_v19 }
 0x184   : > { %v11223_v59 = vor.u32 %v14314_v16, %v11220_v11  ;;  %v14278_v26 = vld [vmem:[#allocation2 + $0x6a4] sm:$0xf]  ;;  %v11076_v52 = vld [vmem:[#allocation2 + $0x6b0] sm:$0xf0]  ;;  %6433 = vmatpush.bf16.msrb.mxu0 %v10839_v55 }
 0x185   : > { %v14214_v36 = vld [vmem:[#allocation2 + $0x4a4] sm:$0xf]  ;;  %v10820_v20 = vld [vmem:[#allocation2 + $0x4b0] sm:$0xf0]  ;;  %6452 = vmatpush.bf16.msrb.mxu1 %v10967_v32  ;;  %v11079_v60 = vor.u32 %v14278_v26, %v11076_v52  ;;  %v6081_v41 = vadd.f32 %v6080_v33, %v6062_v15  ;;  %6364 = vmatmul.bf16.vlgmr.msra.gmra.mxu0 %v16377_v48 }
 0x186   : > { %v14246_v21 = vld [vmem:[#allocation2 + $0x5a4] sm:$0xf]  ;;  %v10948_v35 = vld [vmem:[#allocation2 + $0x5b0] sm:$0xf0]  ;;  %6490 = vmatpush.bf16.msrb.mxu3 %v11223_v59  ;;  %v10823_v27 = vor.u32 %v14214_v36, %v10820_v20  ;;  %6402 = vmatmul.bf16.vlgmr.msra.gmra.mxu2 %v16381_v54 }
 0x187   : > { %v14310_v63 = vld [vmem:[#allocation2 + $0x7a4] sm:$0xf]  ;;  %v11204_v61 = vld [vmem:[#allocation2 + $0x7b0] sm:$0xf0]  ;;  %v10951_v10 = vor.u32 %v14246_v21, %v10948_v35  ;;  %6421 = vmatmul.bf16.vlgmr.msra.gmra.mxu3 %v16383_v57  ;;  %6472 = vmatpush.bf16.msrb.mxu2 %v11079_v60 }
 0x188   : > { %v14274_v58 = vld [vmem:[#allocation2 + $0x684] sm:$0xf]  ;;  %v11060_v62 = vld [vmem:[#allocation2 + $0x690] sm:$0xf0]  ;;  %v11207_v4 = vor.u32 %v14310_v63, %v11204_v61  ;;  %6434 = vmatpush.bf16.msrb.mxu0 %v10823_v27  ;;  %v6099_v36 = vpop.f32.mrf.mxu2  ;;  %v6118_v20 = vpop.f32.mrf.mxu3 }
 0x189   : > { %v14210_v37 = vld [vmem:[#allocation2 + $0x484] sm:$0xf]  ;;  %v10804_v49 = vld [vmem:[#allocation2 + $0x490] sm:$0xf0]  ;;  %v11063_v31 = vor.u32 %v14274_v58, %v11060_v62  ;;  %6453 = vmatpush.bf16.msrb.mxu1 %v10951_v10  ;;  %v6100_v35 = vadd.f32 %v6099_v36, %v6081_v41 }
 0x18a   : > { %v14242_v22 = vld [vmem:[#allocation2 + $0x584] sm:$0xf]  ;;  %v10932_v2 = vld [vmem:[#allocation2 + $0x590] sm:$0xf0]  ;;  %v10807_v11 = vor.u32 %v14210_v37, %v10804_v49  ;;  %6491 = vmatpush.bf16.msrb.mxu3 %v11207_v4  ;;  %v6063_v63 = vpop.f32.mrf.mxu0  ;;  %v6082_v61 = vpop.f32.mrf.mxu1 }
 0x18b   : > { %v14306_v3 = vld [vmem:[#allocation2 + $0x784] sm:$0xf]  ;;  %v11188_v16 = vld [vmem:[#allocation2 + $0x790] sm:$0xf0]  ;;  %v10935_v55 = vor.u32 %v14242_v22, %v10932_v2  ;;  %v6064_v19 = vadd.f32 %v6063_v63, %v16624_v42  ;;  %6473 = vmatpush.bf16.msrb.mxu2 %v11063_v31  ;;  %v16641_v27 = vadd.f32 %v6118_v20, %v6100_v35 }
 0x18c   : > { %v14270_v47 = vld [vmem:[#allocation2 + $0x664] sm:$0xf]  ;;  %v11044_v43 = vld [vmem:[#allocation2 + $0x670] sm:$0xf0]  ;;  %v11191_v32 = vor.u32 %v14306_v3, %v11188_v16  ;;  %6435 = vmatpush.bf16.msrb.mxu0 %v10807_v11 }
 0x18d   : > { %v14206_v59 = vld [vmem:[#allocation2 + $0x464] sm:$0xf]  ;;  %v10788_v26 = vld [vmem:[#allocation2 + $0x470] sm:$0xf0]  ;;  %v11047_v30 = vor.u32 %v14270_v47, %v11044_v43  ;;  %6454 = vmatpush.bf16.msrb.mxu1 %v10935_v55  ;;  %v6083_v49 = vadd.f32 %v6082_v61, %v6064_v19 }
 0x18e   : > { %v14238_v52 = vld [vmem:[#allocation2 + $0x564] sm:$0xf]  ;;  %v10916_v21 = vld [vmem:[#allocation2 + $0x570] sm:$0xf0]  ;;  %v10791_v33 = vor.u32 %v14206_v59, %v10788_v26  ;;  %6492 = vmatpush.bf16.msrb.mxu3 %v11191_v32 }
 0x18f   : > { %v14302_v25 = vld [vmem:[#allocation2 + $0x764] sm:$0xf]  ;;  %v11172_v7 = vld [vmem:[#allocation2 + $0x770] sm:$0xf0]  ;;  %v10919_v58 = vor.u32 %v14238_v52, %v10916_v21  ;;  %6474 = vmatpush.bf16.msrb.mxu2 %v11047_v30 }
 0x190   : > { %v14266_v15 = vld [vmem:[#allocation2 + $0x644] sm:$0xf]  ;;  %v11028_v60 = vld [vmem:[#allocation2 + $0x650] sm:$0xf0]  ;;  %v11175_v62 = vor.u32 %v14302_v25, %v11172_v7  ;;  %6436 = vmatpush.bf16.msrb.mxu0 %v10791_v33  ;;  %v6101_v59 = vpop.f32.mrf.mxu2  ;;  %v6120_v26 = vpop.f32.mrf.mxu3  ;;  %6388 = vmatmul.bf16.gmra.mxu1 %v16399_v50 }
 0x191   : > { %v14202_v10 = vld [vmem:[#allocation2 + $0x444] sm:$0xf]  ;;  %v10772_v4 = vld [vmem:[#allocation2 + $0x450] sm:$0xf0]  ;;  %v11031_v42 = vor.u32 %v14266_v15, %v11028_v60  ;;  %6455 = vmatpush.bf16.msrb.mxu1 %v10919_v58  ;;  %v6102_v21 = vadd.f32 %v6101_v59, %v6083_v49 }
 0x192   : > { %v14234_v37 = vld [vmem:[#allocation2 + $0x544] sm:$0xf]  ;;  %v10900_v22 = vld [vmem:[#allocation2 + $0x550] sm:$0xf0]  ;;  %v10775_v3 = vor.u32 %v14202_v10, %v10772_v4  ;;  %6493 = vmatpush.bf16.msrb.mxu3 %v11175_v62  ;;  %v6066_v25 = vpop.f32.mrf.mxu0  ;;  %v6085_v7 = vpop.f32.mrf.mxu1 }
 0x193   : > { %v14298_v41 = vld [vmem:[#allocation2 + $0x744] sm:$0xf]  ;;  %v11156_v2 = vld [vmem:[#allocation2 + $0x750] sm:$0xf0]  ;;  %v10903_v11 = vor.u32 %v14234_v37, %v10900_v22  ;;  %v6067_v63 = vadd.f32 %v6066_v25, %v16631_v12  ;;  %6475 = vmatpush.bf16.msrb.mxu2 %v11031_v42  ;;  %v16644_v60 = vadd.f32 %v6120_v26, %v6102_v21 }
 0x194   : > { %v14262_v16 = vld [vmem:[#allocation2 + $0x624] sm:$0xf]  ;;  %v11012_v31 = vld [vmem:[#allocation2 + $0x630] sm:$0xf0]  ;;  %v11159_v47 = vor.u32 %v14298_v41, %v11156_v2  ;;  %6437 = vmatpush.bf16.msrb.mxu0 %v10775_v3 }
 0x195   : > { %v14198_v43 = vld [vmem:[#allocation2 + $0x424] sm:$0xf]  ;;  %v10756_v55 = vld [vmem:[#allocation2 + $0x430] sm:$0xf0]  ;;  %v11015_v61 = vor.u32 %v14262_v16, %v11012_v31  ;;  %6456 = vmatpush.bf16.msrb.mxu1 %v10903_v11  ;;  %v6086_v49 = vadd.f32 %v6085_v7, %v6067_v63  ;;  %6369 = vmatmul.bf16.gmra.mxu0 %v16397_v44 }
 0x196   : > { %v14230_v32 = vld [vmem:[#allocation2 + $0x524] sm:$0xf]  ;;  %v10884_v52 = vld [vmem:[#allocation2 + $0x530] sm:$0xf0]  ;;  %v10759_v19 = vor.u32 %v14198_v43, %v10756_v55  ;;  %6494 = vmatpush.bf16.msrb.mxu3 %v11159_v47  ;;  %6407 = vmatmul.bf16.gmra.mxu2 %v16401_v51 }
 0x197   : > { %v14294_v36 = vld [vmem:[#allocation2 + $0x724] sm:$0xf]  ;;  %v11140_v20 = vld [vmem:[#allocation2 + $0x730] sm:$0xf0]  ;;  %v10887_v58 = vor.u32 %v14230_v32, %v10884_v52  ;;  %6426 = vmatmul.bf16.gmra.mxu3 %v16403_v56  ;;  %6476 = vmatpush.bf16.msrb.mxu2 %v11015_v61 }
 0x198   : > { %v14258_v35 = vld [vmem:[#allocation2 + $0x604] sm:$0xf]  ;;  %v10996_v30 = vld [vmem:[#allocation2 + $0x610] sm:$0xf0]  ;;  %v11143_v62 = vor.u32 %v14294_v36, %v11140_v20  ;;  %6438 = vmatpush.bf16.msrb.mxu0 %v10759_v19  ;;  %v6104_v59 = vpop.f32.mrf.mxu2  ;;  %v6123_v26 = vpop.f32.mrf.mxu3 }
 0x199   : > { %v14194_v33 = vld [vmem:[#allocation2 + $0x404] sm:$0xf]  ;;  %v10740_v15 = vld [vmem:[#allocation2 + $0x410] sm:$0xf0]  ;;  %v10999_v16 = vor.u32 %v14258_v35, %v10996_v30  ;;  %6457 = vmatpush.bf16.msrb.mxu1 %v10887_v58  ;;  %v6105_v25 = vadd.f32 %v6104_v59, %v6086_v49 }
 0x19a   : > { %v14226_v10 = vld [vmem:[#allocation2 + $0x504] sm:$0xf]  ;;  %v10868_v4 = vld [vmem:[#allocation2 + $0x510] sm:$0xf0]  ;;  %v10743_v31 = vor.u32 %v14194_v33, %v10740_v15  ;;  %6495 = vmatpush.bf16.msrb.mxu3 %v11143_v62  ;;  %v6068_v7 = vpop.f32.mrf.mxu0  ;;  %v6087_v63 = vpop.f32.mrf.mxu1 }
 0x19b   : > { %v14290_v37 = vld [vmem:[#allocation2 + $0x704] sm:$0xf]  ;;  %v11124_v12 = vld [vmem:[#allocation2 + $0x710] sm:$0xf0]  ;;  %v10871_v55 = vor.u32 %v14226_v10, %v10868_v4  ;;  %v6069_v15 = vadd.f32 %v6068_v7, %v16634_v38  ;;  %6477 = vmatpush.bf16.msrb.mxu2 %v10999_v16  ;;  %v16651_v4 = vadd.f32 %v6123_v26, %v6105_v25 }
 0x19c   : > { %v14414_v22 = vld [vmem:[#allocation2 + $0xae4] sm:$0xf]  ;;  %v11620_v41 = vld [vmem:[#allocation2 + $0xaf0] sm:$0xf0]  ;;  %v11127_v32 = vor.u32 %v14290_v37, %v11124_v12  ;;  %6439 = vmatpush.bf16.msrb.mxu0 %v10743_v31 }
 0x19d   : > { %v14350_v2 = vld [vmem:[#allocation2 + $0x8e4] sm:$0xf]  ;;  %v11364_v42 = vld [vmem:[#allocation2 + $0x8f0] sm:$0xf0]  ;;  %v11623_v52 = vor.u32 %v14414_v22, %v11620_v41  ;;  %6458 = vmatpush.bf16.msrb.mxu1 %v10871_v55  ;;  %v6088_v37 = vadd.f32 %v6087_v63, %v6069_v15 }
 0x19e   : > { %v14382_v3 = vld [vmem:[#allocation2 + $0x9e4] sm:$0xf]  ;;  %v11492_v11 = vld [vmem:[#allocation2 + $0x9f0] sm:$0xf0]  ;;  %v11367_v36 = vor.u32 %v14350_v2, %v11364_v42  ;;  %6496 = vmatpush.bf16.msrb.mxu3 %v11127_v32 }
 0x19f   : > { %v14446_v47 = vld [vmem:[#allocation2 + $0xbe4] sm:$0xf]  ;;  %v11748_v43 = vld [vmem:[#allocation2 + $0xbf0] sm:$0xf0]  ;;  %v11495_v61 = vor.u32 %v14382_v3, %v11492_v11  ;;  %6546 = vmatpush.bf16.msra.mxu2 %v11623_v52 }
 0x1a0   : > { %v14410_v20 = vld [vmem:[#allocation2 + $0xac4] sm:$0xf]  ;;  %v11604_v21 = vld [vmem:[#allocation2 + $0xad0] sm:$0xf0]  ;;  %v11751_v19 = vor.u32 %v14446_v47, %v11748_v43  ;;  %6508 = vmatpush.bf16.msra.mxu0 %v11367_v36  ;;  %v6106_v31 = vpop.f32.mrf.mxu2  ;;  %v6125_v11 = vpop.f32.mrf.mxu3  ;;  %6459 = vmatmul.bf16.vlgmr.msrb.gmra.mxu1 %v16419_v1 }
 0x1a1   : > { %v14346_v35 = vld [vmem:[#allocation2 + $0x8c4] sm:$0xf]  ;;  %v11348_v30 = vld [vmem:[#allocation2 + $0x8d0] sm:$0xf0]  ;;  %v11607_v49 = vor.u32 %v14410_v20, %v11604_v21  ;;  %6527 = vmatpush.bf16.msra.mxu1 %v11495_v61  ;;  %v6107_v32 = vadd.f32 %v6106_v31, %v6088_v37 }
 0x1a2   : > { %v14378_v33 = vld [vmem:[#allocation2 + $0x9c4] sm:$0xf]  ;;  %v11476_v58 = vld [vmem:[#allocation2 + $0x9d0] sm:$0xf0]  ;;  %v11351_v12 = vor.u32 %v14346_v35, %v11348_v30  ;;  %6565 = vmatpush.bf16.msra.mxu3 %v11751_v19  ;;  %v6137_v59 = vpop.f32.mrf.mxu0  ;;  %v6156_v26 = vpop.f32.mrf.mxu1 }
 0x1a3   : > { %v14442_v62 = vld [vmem:[#allocation2 + $0xbc4] sm:$0xf]  ;;  %v11732_v10 = vld [vmem:[#allocation2 + $0xbd0] sm:$0xf0]  ;;  %v11479_v22 = vor.u32 %v14378_v33, %v11476_v58  ;;  %6547 = vmatpush.bf16.msra.mxu2 %v11607_v49  ;;  %v6138_v52 = vadd.f32 %v6137_v59, %v16641_v27  ;;  %v16654_v7 = vadd.f32 %v6125_v11, %v6107_v32 }
 0x1a4   : > { %v11735_v41 = vor.u32 %v14442_v62, %v11732_v10  ;;  %v14406_v2 = vld [vmem:[#allocation2 + $0xaa4] sm:$0xf]  ;;  %v11588_v38 = vld [vmem:[#allocation2 + $0xab0] sm:$0xf0]  ;;  %6509 = vmatpush.bf16.msra.mxu0 %v11351_v12 }
 0x1a5   : > { %v14342_v42 = vld [vmem:[#allocation2 + $0x8a4] sm:$0xf]  ;;  %v11332_v3 = vld [vmem:[#allocation2 + $0x8b0] sm:$0xf0]  ;;  %6528 = vmatpush.bf16.msra.mxu1 %v11479_v22  ;;  %v11591_v36 = vor.u32 %v14406_v2, %v11588_v38  ;;  %v6157_v33 = vadd.f32 %v6156_v26, %v6138_v52  ;;  %6440 = vmatmul.bf16.vlgmr.msrb.gmra.mxu0 %v16417_v0 }
 0x1a6   : > { %v14374_v16 = vld [vmem:[#allocation2 + $0x9a4] sm:$0xf]  ;;  %v11460_v47 = vld [vmem:[#allocation2 + $0x9b0] sm:$0xf0]  ;;  %6566 = vmatpush.bf16.msra.mxu3 %v11735_v41  ;;  %v11335_v20 = vor.u32 %v14342_v42, %v11332_v3  ;;  %6478 = vmatmul.bf16.vlgmr.msrb.gmra.mxu2 %v16421_v5 }
 0x1a7   : > { %v14438_v43 = vld [vmem:[#allocation2 + $0xba4] sm:$0xf]  ;;  %v11716_v55 = vld [vmem:[#allocation2 + $0xbb0] sm:$0xf0]  ;;  %v11463_v63 = vor.u32 %v14374_v16, %v11460_v47  ;;  %6497 = vmatmul.bf16.vlgmr.msrb.gmra.mxu3 %v16423_v6  ;;  %6548 = vmatpush.bf16.msra.mxu2 %v11591_v36 }
 0x1a8   : > { %v14402_v21 = vld [vmem:[#allocation2 + $0xa84] sm:$0xf]  ;;  %v11572_v25 = vld [vmem:[#allocation2 + $0xa90] sm:$0xf0]  ;;  %v11719_v61 = vor.u32 %v14438_v43, %v11716_v55  ;;  %6510 = vmatpush.bf16.msra.mxu0 %v11335_v20  ;;  %v6175_v42 = vpop.f32.mrf.mxu2  ;;  %v6194_v3 = vpop.f32.mrf.mxu3 }
 0x1a9   : > { %v14338_v19 = vld [vmem:[#allocation2 + $0x884] sm:$0xf]  ;;  %v11316_v35 = vld [vmem:[#allocation2 + $0x890] sm:$0xf0]  ;;  %v11575_v27 = vor.u32 %v14402_v21, %v11572_v25  ;;  %6529 = vmatpush.bf16.msra.mxu1 %v11463_v63  ;;  %v6176_v47 = vadd.f32 %v6175_v42, %v6157_v33 }
 0x1aa   : > { %v14370_v30 = vld [vmem:[#allocation2 + $0x984] sm:$0xf]  ;;  %v11444_v15 = vld [vmem:[#allocation2 + $0x990] sm:$0xf0]  ;;  %v11319_v10 = vor.u32 %v14338_v19, %v11316_v35  ;;  %6567 = vmatpush.bf16.msra.mxu3 %v11719_v61  ;;  %v6139_v43 = vpop.f32.mrf.mxu0  ;;  %v6158_v55 = vpop.f32.mrf.mxu1 }
 0x1ab   : > { %v14434_v58 = vld [vmem:[#allocation2 + $0xb84] sm:$0xf]  ;;  %v11700_v62 = vld [vmem:[#allocation2 + $0xb90] sm:$0xf0]  ;;  %v11447_v12 = vor.u32 %v14370_v30, %v11444_v15  ;;  %v6140_v32 = vadd.f32 %v6139_v43, %v16644_v60  ;;  %6549 = vmatpush.bf16.msra.mxu2 %v11575_v27  ;;  %v16661_v20 = vadd.f32 %v6194_v3, %v6176_v47 }
 0x1ac   : > { %v14398_v37 = vld [vmem:[#allocation2 + $0xa64] sm:$0xf]  ;;  %v11556_v49 = vld [vmem:[#allocation2 + $0xa70] sm:$0xf0]  ;;  %v11703_v22 = vor.u32 %v14434_v58, %v11700_v62  ;;  %6511 = vmatpush.bf16.msra.mxu0 %v11319_v10 }
 0x1ad   : > { %v14334_v41 = vld [vmem:[#allocation2 + $0x864] sm:$0xf]  ;;  %v11300_v2 = vld [vmem:[#allocation2 + $0x870] sm:$0xf0]  ;;  %v11559_v59 = vor.u32 %v14398_v37, %v11556_v49  ;;  %6530 = vmatpush.bf16.msra.mxu1 %v11447_v12  ;;  %v6159_v35 = vadd.f32 %v6158_v55, %v6140_v32 }
 0x1ae   : > { %v14366_v38 = vld [vmem:[#allocation2 + $0x964] sm:$0xf]  ;;  %v11428_v16 = vld [vmem:[#allocation2 + $0x970] sm:$0xf0]  ;;  %v11303_v26 = vor.u32 %v14334_v41, %v11300_v2  ;;  %6568 = vmatpush.bf16.msra.mxu3 %v11703_v22 }
 0x1af   : > { %v14430_v31 = vld [vmem:[#allocation2 + $0xb64] sm:$0xf]  ;;  %v11684_v11 = vld [vmem:[#allocation2 + $0xb70] sm:$0xf0]  ;;  %v11431_v21 = vor.u32 %v14366_v38, %v11428_v16  ;;  %6550 = vmatpush.bf16.msra.mxu2 %v11559_v59 }
 0x1b0   : > { %v14394_v52 = vld [vmem:[#allocation2 + $0xa44] sm:$0xf]  ;;  %v11540_v36 = vld [vmem:[#allocation2 + $0xa50] sm:$0xf0]  ;;  %v11687_v25 = vor.u32 %v14430_v31, %v11684_v11  ;;  %6512 = vmatpush.bf16.msra.mxu0 %v11303_v26  ;;  %v6177_v41 = vpop.f32.mrf.mxu2  ;;  %v6196_v2 = vpop.f32.mrf.mxu3  ;;  %6464 = vmatmul.bf16.gmra.mxu1 %v16439_v9 }
 0x1b1   : > { %v14330_v63 = vld [vmem:[#allocation2 + $0x844] sm:$0xf]  ;;  %v11284_v61 = vld [vmem:[#allocation2 + $0x850] sm:$0xf0]  ;;  %v11543_v60 = vor.u32 %v14394_v52, %v11540_v36  ;;  %6531 = vmatpush.bf16.msra.mxu1 %v11431_v21  ;;  %v6178_v16 = vadd.f32 %v6177_v41, %v6159_v35 }
 0x1b2   : > { %v14362_v19 = vld [vmem:[#allocation2 + $0x944] sm:$0xf]  ;;  %v11412_v30 = vld [vmem:[#allocation2 + $0x950] sm:$0xf0]  ;;  %v11287_v58 = vor.u32 %v14330_v63, %v11284_v61  ;;  %6569 = vmatpush.bf16.msra.mxu3 %v11687_v25  ;;  %v6142_v31 = vpop.f32.mrf.mxu0  ;;  %v6161_v11 = vpop.f32.mrf.mxu1 }
 0x1b3   : > { %v14426_v33 = vld [vmem:[#allocation2 + $0xb44] sm:$0xf]  ;;  %v11668_v15 = vld [vmem:[#allocation2 + $0xb50] sm:$0xf0]  ;;  %v11415_v10 = vor.u32 %v14362_v19, %v11412_v30  ;;  %v6143_v43 = vadd.f32 %v6142_v31, %v16651_v4  ;;  %6551 = vmatpush.bf16.msra.mxu2 %v11543_v60  ;;  %v16664_v36 = vadd.f32 %v6196_v2, %v6178_v16 }
 0x1b4   : > { %v14390_v62 = vld [vmem:[#allocation2 + $0xa24] sm:$0xf]  ;;  %v11524_v27 = vld [vmem:[#allocation2 + $0xa30] sm:$0xf0]  ;;  %v11671_v37 = vor.u32 %v14426_v33, %v11668_v15  ;;  %6513 = vmatpush.bf16.msra.mxu0 %v11287_v58 }
 0x1b5   : > { %v14326_v49 = vld [vmem:[#allocation2 + $0x824] sm:$0xf]  ;;  %v11268_v12 = vld [vmem:[#allocation2 + $0x830] sm:$0xf0]  ;;  %v11527_v55 = vor.u32 %v14390_v62, %v11524_v27  ;;  %6532 = vmatpush.bf16.msra.mxu1 %v11415_v10  ;;  %v6162_v35 = vadd.f32 %v6161_v11, %v6143_v43  ;;  %6445 = vmatmul.bf16.gmra.mxu0 %v16437_v8 }
 0x1b6   : > { %v14358_v22 = vld [vmem:[#allocation2 + $0x924] sm:$0xf]  ;;  %v11396_v38 = vld [vmem:[#allocation2 + $0x930] sm:$0xf0]  ;;  %v11271_v32 = vor.u32 %v14326_v49, %v11268_v12  ;;  %6570 = vmatpush.bf16.msra.mxu3 %v11671_v37  ;;  %6483 = vmatmul.bf16.gmra.mxu2 %v16441_v13 }
 0x1b7   : > { %v14422_v42 = vld [vmem:[#allocation2 + $0xb24] sm:$0xf]  ;;  %v11652_v3 = vld [vmem:[#allocation2 + $0xb30] sm:$0xf0]  ;;  %v11399_v21 = vor.u32 %v14358_v22, %v11396_v38  ;;  %6502 = vmatmul.bf16.gmra.mxu3 %v16443_v14  ;;  %6552 = vmatpush.bf16.msra.mxu2 %v11527_v55 }
 0x1b8   : > { %v14386_v47 = vld [vmem:[#allocation2 + $0xa04] sm:$0xf]  ;;  %v11508_v59 = vld [vmem:[#allocation2 + $0xa10] sm:$0xf0]  ;;  %v11655_v25 = vor.u32 %v14422_v42, %v11652_v3  ;;  %6514 = vmatpush.bf16.msra.mxu0 %v11271_v32  ;;  %v6180_v41 = vpop.f32.mrf.mxu2  ;;  %v6199_v2 = vpop.f32.mrf.mxu3 }
 0x1b9   : > { %v14322_v26 = vld [vmem:[#allocation2 + $0x804] sm:$0xf]  ;;  %v11252_v52 = vld [vmem:[#allocation2 + $0x810] sm:$0xf0]  ;;  %v11511_v62 = vor.u32 %v14386_v47, %v11508_v59  ;;  %6533 = vmatpush.bf16.msra.mxu1 %v11399_v21  ;;  %v6181_v31 = vadd.f32 %v6180_v41, %v6162_v35 }
 0x1ba   : > { %v14354_v63 = vld [vmem:[#allocation2 + $0x904] sm:$0xf]  ;;  %v11380_v61 = vld [vmem:[#allocation2 + $0x910] sm:$0xf0]  ;;  %v11255_v27 = vor.u32 %v14322_v26, %v11252_v52  ;;  %6571 = vmatpush.bf16.msra.mxu3 %v11655_v25  ;;  %v6144_v11 = vpop.f32.mrf.mxu0  ;;  %v6163_v43 = vpop.f32.mrf.mxu1 }
 0x1bb   : > { %v14418_v19 = vld [vmem:[#allocation2 + $0xb04] sm:$0xf]  ;;  %v11636_v4 = vld [vmem:[#allocation2 + $0xb10] sm:$0xf0]  ;;  %v11383_v12 = vor.u32 %v14354_v63, %v11380_v61  ;;  %v6145_v52 = vadd.f32 %v6144_v11, %v16654_v7  ;;  %6553 = vmatpush.bf16.msra.mxu2 %v11511_v62  ;;  %v16671_v61 = vadd.f32 %v6199_v2, %v6181_v31 }
 0x1bc   : > { %v14542_v30 = vld [vmem:[#allocation2 + $0xee4] sm:$0xf]  ;;  %v12132_v33 = vld [vmem:[#allocation2 + $0xef0] sm:$0xf0]  ;;  %v11639_v22 = vor.u32 %v14418_v19, %v11636_v4  ;;  %6515 = vmatpush.bf16.msra.mxu0 %v11255_v27 }
 0x1bd   : > { %v14478_v15 = vld [vmem:[#allocation2 + $0xce4] sm:$0xf]  ;;  %v11876_v60 = vld [vmem:[#allocation2 + $0xcf0] sm:$0xf0]  ;;  %v12135_v38 = vor.u32 %v14542_v30, %v12132_v33  ;;  %6534 = vmatpush.bf16.msra.mxu1 %v11383_v12  ;;  %v6164_v19 = vadd.f32 %v6163_v43, %v6145_v52 }
 0x1be   : > { %v14510_v58 = vld [vmem:[#allocation2 + $0xde4] sm:$0xf]  ;;  %v12004_v10 = vld [vmem:[#allocation2 + $0xdf0] sm:$0xf0]  ;;  %v11879_v42 = vor.u32 %v14478_v15, %v11876_v60  ;;  %6572 = vmatpush.bf16.msra.mxu3 %v11639_v22 }
 0x1bf   : > { %v14574_v37 = vld [vmem:[#allocation2 + $0xfe4] sm:$0xf]  ;;  %v12260_v49 = vld [vmem:[#allocation2 + $0xff0] sm:$0xf0]  ;;  %v12007_v55 = vor.u32 %v14510_v58, %v12004_v10  ;;  %6622 = vmatpush.bf16.msrb.mxu2 %v12135_v38 }
 0x1c0   : > { %v14538_v3 = vld [vmem:[#allocation2 + $0xec4] sm:$0xf]  ;;  %v12116_v16 = vld [vmem:[#allocation2 + $0xed0] sm:$0xf0]  ;;  %v12263_v32 = vor.u32 %v14574_v37, %v12260_v49  ;;  %6584 = vmatpush.bf16.msrb.mxu0 %v11879_v42  ;;  %v6182_v27 = vpop.f32.mrf.mxu2  ;;  %v6201_v10 = vpop.f32.mrf.mxu3  ;;  %6535 = vmatmul.bf16.vlgmr.msra.gmra.mxu1 %v16459_v24 }
 0x1c1   : > { %v14474_v47 = vld [vmem:[#allocation2 + $0xcc4] sm:$0xf]  ;;  %v11860_v59 = vld [vmem:[#allocation2 + $0xcd0] sm:$0xf0]  ;;  %v12119_v35 = vor.u32 %v14538_v3, %v12116_v16  ;;  %6603 = vmatpush.bf16.msrb.mxu1 %v12007_v55  ;;  %v6183_v22 = vadd.f32 %v6182_v27, %v6164_v19 }
 0x1c2   : > { %v14506_v26 = vld [vmem:[#allocation2 + $0xdc4] sm:$0xf]  ;;  %v11988_v21 = vld [vmem:[#allocation2 + $0xdd0] sm:$0xf0]  ;;  %v11863_v4 = vor.u32 %v14474_v47, %v11860_v59  ;;  %6641 = vmatpush.bf16.msrb.mxu3 %v12263_v32  ;;  %v6213_v41 = vpop.f32.mrf.mxu0  ;;  %v6232_v2 = vpop.f32.mrf.mxu1 }
 0x1c3   : > { %v14570_v25 = vld [vmem:[#allocation2 + $0xfc4] sm:$0xf]  ;;  %v12244_v63 = vld [vmem:[#allocation2 + $0xfd0] sm:$0xf0]  ;;  %v11991_v30 = vor.u32 %v14506_v26, %v11988_v21  ;;  %6623 = vmatpush.bf16.msrb.mxu2 %v12119_v35  ;;  %v6214_v38 = vadd.f32 %v6213_v41, %v16661_v20  ;;  %v16674_v11 = vadd.f32 %v6201_v10, %v6183_v22 }
 0x1c4   : > { %v12247_v33 = vor.u32 %v14570_v25, %v12244_v63  ;;  %v14534_v15 = vld [vmem:[#allocation2 + $0xea4] sm:$0xf]  ;;  %v12100_v7 = vld [vmem:[#allocation2 + $0xeb0] sm:$0xf0]  ;;  %6585 = vmatpush.bf16.msrb.mxu0 %v11863_v4 }
 0x1c5   : > { %v14470_v60 = vld [vmem:[#allocation2 + $0xca4] sm:$0xf]  ;;  %v11844_v58 = vld [vmem:[#allocation2 + $0xcb0] sm:$0xf0]  ;;  %6604 = vmatpush.bf16.msrb.mxu1 %v11991_v30  ;;  %v12103_v42 = vor.u32 %v14534_v15, %v12100_v7  ;;  %v6233_v26 = vadd.f32 %v6232_v2, %v6214_v38  ;;  %6516 = vmatmul.bf16.vlgmr.msra.gmra.mxu0 %v16457_v23 }
 0x1c6   : > { %v14502_v62 = vld [vmem:[#allocation2 + $0xda4] sm:$0xf]  ;;  %v11972_v37 = vld [vmem:[#allocation2 + $0xdb0] sm:$0xf0]  ;;  %6642 = vmatpush.bf16.msrb.mxu3 %v12247_v33  ;;  %v11847_v3 = vor.u32 %v14470_v60, %v11844_v58  ;;  %6554 = vmatmul.bf16.vlgmr.msra.gmra.mxu2 %v16461_v28 }
 0x1c7   : > { %v14566_v49 = vld [vmem:[#allocation2 + $0xfa4] sm:$0xf]  ;;  %v12228_v12 = vld [vmem:[#allocation2 + $0xfb0] sm:$0xf0]  ;;  %v11975_v43 = vor.u32 %v14502_v62, %v11972_v37  ;;  %6573 = vmatmul.bf16.vlgmr.msra.gmra.mxu3 %v16463_v29  ;;  %6624 = vmatpush.bf16.msrb.mxu2 %v12103_v42 }
 0x1c8   : > { %v14530_v16 = vld [vmem:[#allocation2 + $0xe84] sm:$0xf]  ;;  %v12084_v31 = vld [vmem:[#allocation2 + $0xe90] sm:$0xf0]  ;;  %v12231_v55 = vor.u32 %v14566_v49, %v12228_v12  ;;  %6586 = vmatpush.bf16.msrb.mxu0 %v11847_v3  ;;  %v6251_v60 = vpop.f32.mrf.mxu2  ;;  %v6270_v58 = vpop.f32.mrf.mxu3 }
 0x1c9   : > { %v14466_v32 = vld [vmem:[#allocation2 + $0xc84] sm:$0xf]  ;;  %v11828_v47 = vld [vmem:[#allocation2 + $0xc90] sm:$0xf0]  ;;  %v12087_v20 = vor.u32 %v14530_v16, %v12084_v31  ;;  %6605 = vmatpush.bf16.msrb.mxu1 %v11975_v43  ;;  %v6252_v37 = vadd.f32 %v6251_v60, %v6233_v26 }
 0x1ca   : > { %v14498_v59 = vld [vmem:[#allocation2 + $0xd84] sm:$0xf]  ;;  %v11956_v52 = vld [vmem:[#allocation2 + $0xd90] sm:$0xf0]  ;;  %v11831_v63 = vor.u32 %v14466_v32, %v11828_v47  ;;  %6643 = vmatpush.bf16.msrb.mxu3 %v12231_v55  ;;  %v6215_v49 = vpop.f32.mrf.mxu0  ;;  %v6234_v12 = vpop.f32.mrf.mxu1 }
 0x1cb   : > { %v14562_v21 = vld [vmem:[#allocation2 + $0xf84] sm:$0xf]  ;;  %v12212_v25 = vld [vmem:[#allocation2 + $0xf90] sm:$0xf0]  ;;  %v11959_v4 = vor.u32 %v14498_v59, %v11956_v52  ;;  %v6216_v22 = vadd.f32 %v6215_v49, %v16664_v36  ;;  %6625 = vmatpush.bf16.msrb.mxu2 %v12087_v20  ;;  %v16681_v3 = vadd.f32 %v6270_v58, %v6252_v37 }
 0x1cc   : > { %v14526_v19 = vld [vmem:[#allocation2 + $0xe64] sm:$0xf]  ;;  %v12068_v35 = vld [vmem:[#allocation2 + $0xe70] sm:$0xf0]  ;;  %v12215_v30 = vor.u32 %v14562_v21, %v12212_v25  ;;  %6587 = vmatpush.bf16.msrb.mxu0 %v11831_v63 }
 0x1cd   : > { %v14462_v33 = vld [vmem:[#allocation2 + $0xc64] sm:$0xf]  ;;  %v11812_v15 = vld [vmem:[#allocation2 + $0xc70] sm:$0xf0]  ;;  %v12071_v41 = vor.u32 %v14526_v19, %v12068_v35  ;;  %6606 = vmatpush.bf16.msrb.mxu1 %v11959_v4  ;;  %v6235_v47 = vadd.f32 %v6234_v12, %v6216_v22 }
 0x1ce   : > { %v14494_v7 = vld [vmem:[#allocation2 + $0xd64] sm:$0xf]  ;;  %v11940_v62 = vld [vmem:[#allocation2 + $0xd70] sm:$0xf0]  ;;  %v11815_v2 = vor.u32 %v14462_v33, %v11812_v15  ;;  %6644 = vmatpush.bf16.msrb.mxu3 %v12215_v30 }
 0x1cf   : > { %v14558_v27 = vld [vmem:[#allocation2 + $0xf64] sm:$0xf]  ;;  %v12196_v10 = vld [vmem:[#allocation2 + $0xf70] sm:$0xf0]  ;;  %v11943_v16 = vor.u32 %v14494_v7, %v11940_v62  ;;  %6626 = vmatpush.bf16.msrb.mxu2 %v12071_v41 }
 0x1d0   : > { %v14522_v38 = vld [vmem:[#allocation2 + $0xe44] sm:$0xf]  ;;  %v12052_v42 = vld [vmem:[#allocation2 + $0xe50] sm:$0xf0]  ;;  %v12199_v31 = vor.u32 %v14558_v27, %v12196_v10  ;;  %6588 = vmatpush.bf16.msrb.mxu0 %v11815_v2  ;;  %v6253_v33 = vpop.f32.mrf.mxu2  ;;  %v6272_v15 = vpop.f32.mrf.mxu3  ;;  %6540 = vmatmul.bf16.gmra.mxu1 %v16479_v40 }
 0x1d1   : > { %v14458_v43 = vld [vmem:[#allocation2 + $0xc44] sm:$0xf]  ;;  %v11796_v55 = vld [vmem:[#allocation2 + $0xc50] sm:$0xf0]  ;;  %v12055_v36 = vor.u32 %v14522_v38, %v12052_v42  ;;  %6607 = vmatpush.bf16.msrb.mxu1 %v11943_v16  ;;  %v6254_v62 = vadd.f32 %v6253_v33, %v6235_v47 }
 0x1d2   : > { %v14490_v32 = vld [vmem:[#allocation2 + $0xd44] sm:$0xf]  ;;  %v11924_v59 = vld [vmem:[#allocation2 + $0xd50] sm:$0xf0]  ;;  %v11799_v21 = vor.u32 %v14458_v43, %v11796_v55  ;;  %6645 = vmatpush.bf16.msrb.mxu3 %v12199_v31  ;;  %v6218_v27 = vpop.f32.mrf.mxu0  ;;  %v6237_v10 = vpop.f32.mrf.mxu1 }
 0x1d3   : > { %v14554_v26 = vld [vmem:[#allocation2 + $0xf44] sm:$0xf]  ;;  %v12180_v52 = vld [vmem:[#allocation2 + $0xf50] sm:$0xf0]  ;;  %v11927_v63 = vor.u32 %v14490_v32, %v11924_v59  ;;  %v6219_v49 = vadd.f32 %v6218_v27, %v16671_v61  ;;  %6627 = vmatpush.bf16.msrb.mxu2 %v12055_v36  ;;  %v16684_v42 = vadd.f32 %v6272_v15, %v6254_v62 }
 0x1d4   : > { %v14518_v25 = vld [vmem:[#allocation2 + $0xe24] sm:$0xf]  ;;  %v12036_v20 = vld [vmem:[#allocation2 + $0xe30] sm:$0xf0]  ;;  %v12183_v19 = vor.u32 %v14554_v26, %v12180_v52  ;;  %6589 = vmatpush.bf16.msrb.mxu0 %v11799_v21 }
 0x1d5   : > { %v14454_v35 = vld [vmem:[#allocation2 + $0xc24] sm:$0xf]  ;;  %v11780_v4 = vld [vmem:[#allocation2 + $0xc30] sm:$0xf0]  ;;  %v12039_v12 = vor.u32 %v14518_v25, %v12036_v20  ;;  %6608 = vmatpush.bf16.msrb.mxu1 %v11927_v63  ;;  %v6238_v47 = vadd.f32 %v6237_v10, %v6219_v49  ;;  %6521 = vmatmul.bf16.gmra.mxu0 %v16477_v39 }
 0x1d6   : > { %v14486_v30 = vld [vmem:[#allocation2 + $0xd24] sm:$0xf]  ;;  %v11908_v7 = vld [vmem:[#allocation2 + $0xd30] sm:$0xf0]  ;;  %v11783_v22 = vor.u32 %v14454_v35, %v11780_v4  ;;  %6646 = vmatpush.bf16.msrb.mxu3 %v12183_v19  ;;  %6559 = vmatmul.bf16.gmra.mxu2 %v16481_v45 }
 0x1d7   : > { %v14550_v60 = vld [vmem:[#allocation2 + $0xf24] sm:$0xf]  ;;  %v12164_v58 = vld [vmem:[#allocation2 + $0xf30] sm:$0xf0]  ;;  %v11911_v16 = vor.u32 %v14486_v30, %v11908_v7  ;;  %6578 = vmatmul.bf16.gmra.mxu3 %v16483_v46  ;;  %6628 = vmatpush.bf16.msrb.mxu2 %v12039_v12 }
 0x1d8   : > { %v14514_v37 = vld [vmem:[#allocation2 + $0xe04] sm:$0xf]  ;;  %v12020_v41 = vld [vmem:[#allocation2 + $0xe10] sm:$0xf0]  ;;  %v12167_v31 = vor.u32 %v14550_v60, %v12164_v58  ;;  %6590 = vmatpush.bf16.msrb.mxu0 %v11783_v22  ;;  %v6256_v33 = vpop.f32.mrf.mxu2 }
 0x1d9   : > { %v14450_v2 = vld [vmem:[#allocation2 + $0xc04] sm:$0xf]  ;;  %v11764_v38 = vld [vmem:[#allocation2 + $0xc10] sm:$0xf0]  ;;  %v12023_v25 = vor.u32 %v14514_v37, %v12020_v41  ;;  %6609 = vmatpush.bf16.msrb.mxu1 %v11911_v16  ;;  %v6257_v27 = vadd.f32 %v6256_v33, %v6238_v47 }
 0x1da   : > { %v14482_v43 = vld [vmem:[#allocation2 + $0xd04] sm:$0xf]  ;;  %v11892_v55 = vld [vmem:[#allocation2 + $0xd10] sm:$0xf0]  ;;  %v11767_v20 = vor.u32 %v14450_v2, %v11764_v38  ;;  %6647 = vmatpush.bf16.msrb.mxu3 %v12167_v31  ;;  %v6275_v15 = vpop.f32.mrf.mxu3  ;;  %v6220_v10 = vpop.f32.mrf.mxu0 }
 0x1db   : > { %v14546_v32 = vld [vmem:[#allocation2 + $0xf04] sm:$0xf]  ;;  %v12148_v61 = vld [vmem:[#allocation2 + $0xf10] sm:$0xf0]  ;;  %v11895_v4 = vor.u32 %v14482_v43, %v11892_v55  ;;  %v6239_v49 = vpop.f32.mrf.mxu1  ;;  %v6221_v38 = vadd.f32 %v6220_v10, %v16674_v11  ;;  %6629 = vmatpush.bf16.msrb.mxu2 %v12023_v25  ;;  %v16691_v55 = vadd.f32 %v6275_v15, %v6257_v27 }
 0x1dc   : > { %v14670_v59 = vld [vmem:[#allocation2 + $0x12e4] sm:$0xf]  ;;  %v12644_v26 = vld [vmem:[#allocation2 + $0x12f0] sm:$0xf0]  ;;  %v12151_v30 = vor.u32 %v14546_v32, %v12148_v61  ;;  %6591 = vmatpush.bf16.msrb.mxu0 %v11767_v20 }
 0x1dd   : > { %v14606_v52 = vld [vmem:[#allocation2 + $0x10e4] sm:$0xf]  ;;  %v12388_v36 = vld [vmem:[#allocation2 + $0x10f0] sm:$0xf0]  ;;  %v12647_v7 = vor.u32 %v14670_v59, %v12644_v26  ;;  %6610 = vmatpush.bf16.msrb.mxu1 %v11895_v4  ;;  %v6240_v32 = vadd.f32 %v6239_v49, %v6221_v38 }
 0x1de   : > { %v14638_v21 = vld [vmem:[#allocation2 + $0x11e4] sm:$0xf]  ;;  %v12516_v63 = vld [vmem:[#allocation2 + $0x11f0] sm:$0xf0]  ;;  %v12391_v60 = vor.u32 %v14606_v52, %v12388_v36  ;;  %6648 = vmatpush.bf16.msrb.mxu3 %v12151_v30 }
 0x1df   : > { %v14702_v19 = vld [vmem:[#allocation2 + $0x13e4] sm:$0xf]  ;;  %v12772_v35 = vld [vmem:[#allocation2 + $0x13f0] sm:$0xf0]  ;;  %v12519_v12 = vor.u32 %v14638_v21, %v12516_v63  ;;  %6698 = vmatpush.bf16.msra.mxu2 %v12647_v7 }
 0x1e0   : > { %v14666_v58 = vld [vmem:[#allocation2 + $0x12c4] sm:$0xf]  ;;  %v12628_v62 = vld [vmem:[#allocation2 + $0x12d0] sm:$0xf0]  ;;  %v12775_v22 = vor.u32 %v14702_v19, %v12772_v35  ;;  %6660 = vmatpush.bf16.msra.mxu0 %v12391_v60  ;;  %v6258_v20 = vpop.f32.mrf.mxu2  ;;  %6611 = vmatmul.bf16.vlgmr.msrb.gmra.mxu1 %v16499_v18 }
 0x1e1   : > { %v14602_v37 = vld [vmem:[#allocation2 + $0x10c4] sm:$0xf]  ;;  %v12372_v41 = vld [vmem:[#allocation2 + $0x10d0] sm:$0xf0]  ;;  %v12631_v47 = vor.u32 %v14666_v58, %v12628_v62  ;;  %6679 = vmatpush.bf16.msra.mxu1 %v12519_v12  ;;  %v6259_v30 = vadd.f32 %v6258_v20, %v6240_v32 }
 0x1e2   : > { %v14634_v2 = vld [vmem:[#allocation2 + $0x11c4] sm:$0xf]  ;;  %v12500_v16 = vld [vmem:[#allocation2 + $0x11d0] sm:$0xf0]  ;;  %v12375_v61 = vor.u32 %v14602_v37, %v12372_v41  ;;  %6717 = vmatpush.bf16.msra.mxu3 %v12775_v22  ;;  %v6277_v63 = vpop.f32.mrf.mxu3  ;;  %v6289_v33 = vpop.f32.mrf.mxu0 }
 0x1e3   : > { %v14698_v31 = vld [vmem:[#allocation2 + $0x13c4] sm:$0xf]  ;;  %v12756_v43 = vld [vmem:[#allocation2 + $0x13d0] sm:$0xf0]  ;;  %v12503_v59 = vor.u32 %v14634_v2, %v12500_v16  ;;  %6699 = vmatpush.bf16.msra.mxu2 %v12631_v47  ;;  %v6308_v15 = vpop.f32.mrf.mxu1  ;;  %v6290_v7 = vadd.f32 %v6289_v33, %v16681_v3  ;;  %v16694_v10 = vadd.f32 %v6277_v63, %v6259_v30  ;;  %v17266_v3 = vld [vmem:[#allocation54_spill] sm:$0xff] }
 0x1e4   : > { %v12759_v26 = vor.u32 %v14698_v31, %v12756_v43  ;;  %v14662_v52 = vld [vmem:[#allocation2 + $0x12a4] sm:$0xf]  ;;  %v12612_v11 = vld [vmem:[#allocation2 + $0x12b0] sm:$0xf0]  ;;  %6661 = vmatpush.bf16.msra.mxu0 %v12375_v61 }
 0x1e5   : > { %v14598_v36 = vld [vmem:[#allocation2 + $0x10a4] sm:$0xf]  ;;  %v12356_v21 = vld [vmem:[#allocation2 + $0x10b0] sm:$0xf0]  ;;  %6680 = vmatpush.bf16.msra.mxu1 %v12503_v59  ;;  %v12615_v60 = vor.u32 %v14662_v52, %v12612_v11  ;;  %v6309_v2 = vadd.f32 %v6308_v15, %v6290_v7  ;;  %6592 = vmatmul.bf16.vlgmr.msrb.gmra.mxu0 %v16497_v17 }
 0x1e6   : > { %v14630_v25 = vld [vmem:[#allocation2 + $0x11a4] sm:$0xf]  ;;  %v12484_v19 = vld [vmem:[#allocation2 + $0x11b0] sm:$0xf0]  ;;  %6718 = vmatpush.bf16.msra.mxu3 %v12759_v26  ;;  %v12359_v58 = vor.u32 %v14598_v36, %v12356_v21  ;;  %6630 = vmatmul.bf16.vlgmr.msrb.gmra.mxu2 %v17266_v3 }
 0x1e7   : > { %v14694_v35 = vld [vmem:[#allocation2 + $0x13a4] sm:$0xf]  ;;  %v12740_v4 = vld [vmem:[#allocation2 + $0x13b0] sm:$0xf0]  ;;  %v12487_v49 = vor.u32 %v14630_v25, %v12484_v19  ;;  %6700 = vmatpush.bf16.msra.mxu2 %v12615_v60 }
 0x1e8   : > { %v14658_v62 = vld [vmem:[#allocation2 + $0x1284] sm:$0xf]  ;;  %v12596_v27 = vld [vmem:[#allocation2 + $0x1290] sm:$0xf0]  ;;  %v12743_v12 = vor.u32 %v14694_v35, %v12740_v4  ;;  %6662 = vmatpush.bf16.msra.mxu0 %v12359_v58  ;;  %v6327_v25 = vpop.f32.mrf.mxu2 }
 0x1e9   : > { %v14594_v22 = vld [vmem:[#allocation2 + $0x1084] sm:$0xf]  ;;  %v12340_v37 = vld [vmem:[#allocation2 + $0x1090] sm:$0xf0]  ;;  %v12599_v32 = vor.u32 %v14658_v62, %v12596_v27  ;;  %6681 = vmatpush.bf16.msra.mxu1 %v12487_v49  ;;  %v6328_v4 = vadd.f32 %v6327_v25, %v6309_v2 }
 0x1ea   : > { %v14626_v41 = vld [vmem:[#allocation2 + $0x1184] sm:$0xf]  ;;  %v12468_v38 = vld [vmem:[#allocation2 + $0x1190] sm:$0xf0]  ;;  %v12343_v47 = vor.u32 %v14594_v22, %v12340_v37  ;;  %6719 = vmatpush.bf16.msra.mxu3 %v12743_v12  ;;  %v6346_v20 = vpop.f32.mrf.mxu3  ;;  %v6291_v30 = vpop.f32.mrf.mxu0 }
 0x1eb   : > { %v14690_v16 = vld [vmem:[#allocation2 + $0x1384] sm:$0xf]  ;;  %v12724_v31 = vld [vmem:[#allocation2 + $0x1390] sm:$0xf0]  ;;  %v12471_v26 = vor.u32 %v14626_v41, %v12468_v38  ;;  %v6310_v33 = vpop.f32.mrf.mxu1  ;;  %v6292_v15 = vadd.f32 %v6291_v30, %v16684_v42  ;;  %6701 = vmatpush.bf16.msra.mxu2 %v12599_v32  ;;  %v16701_v27 = vadd.f32 %v6346_v20, %v6328_v4 }
 0x1ec   : > { %v17267_v43 = vld [vmem:[#allocation55_spill] sm:$0xff]  ;;  %v14654_v61 = vld [vmem:[#allocation2 + $0x1264] sm:$0xf]  ;;  %v12727_v52 = vor.u32 %v14690_v16, %v12724_v31  ;;  %6663 = vmatpush.bf16.msra.mxu0 %v12343_v47 }
 0x1ed   : > { %6649 = vmatmul.bf16.vlgmr.msrb.gmra.mxu3 %v17267_v43  ;;  %v12580_v59 = vld [vmem:[#allocation2 + $0x1270] sm:$0xf0]  ;;  %v14590_v11 = vld [vmem:[#allocation2 + $0x1064] sm:$0xf]  ;;  %6682 = vmatpush.bf16.msra.mxu1 %v12471_v26  ;;  %v6311_v2 = vadd.f32 %v6310_v33, %v6292_v15 }
 0x1ee   : > { %v12324_v36 = vld [vmem:[#allocation2 + $0x1070] sm:$0xf0]  ;;  %v14622_v21 = vld [vmem:[#allocation2 + $0x1164] sm:$0xf]  ;;  %v12583_v7 = vor.u32 %v14654_v61, %v12580_v59  ;;  %6720 = vmatpush.bf16.msra.mxu3 %v12727_v52 }
 0x1ef   : > { %v12452_v63 = vld [vmem:[#allocation2 + $0x1170] sm:$0xf0]  ;;  %v14686_v19 = vld [vmem:[#allocation2 + $0x1364] sm:$0xf]  ;;  %v12327_v60 = vor.u32 %v14590_v11, %v12324_v36 }
 0x1f0   : > { %v12708_v35 = vld [vmem:[#allocation2 + $0x1370] sm:$0xf0]  ;;  %v14650_v58 = vld [vmem:[#allocation2 + $0x1244] sm:$0xf]  ;;  %v12455_v49 = vor.u32 %v14622_v21, %v12452_v63  ;;  %6702 = vmatpush.bf16.msra.mxu2 %v12583_v7  ;;  %v6329_v21 = vpop.f32.mrf.mxu2 }
 0x1f1   : > { %v12564_v62 = vld [vmem:[#allocation2 + $0x1250] sm:$0xf0]  ;;  %v12711_v12 = vor.u32 %v14686_v19, %v12708_v35  ;;  %v14586_v22 = vld [vmem:[#allocation2 + $0x1044] sm:$0xf]  ;;  %6664 = vmatpush.bf16.msra.mxu0 %v12327_v60  ;;  %v6330_v35 = vadd.f32 %v6329_v21, %v6311_v2  ;;  %v17268_v21 = vld [vmem:[#allocation56_spill] sm:$0xff] }
 0x1f2   : > { %v12308_v37 = vld [vmem:[#allocation2 + $0x1050] sm:$0xf0]  ;;  %v14618_v41 = vld [vmem:[#allocation2 + $0x1144] sm:$0xf]  ;;  %v12567_v42 = vor.u32 %v14650_v58, %v12564_v62  ;;  %6683 = vmatpush.bf16.msra.mxu1 %v12455_v49  ;;  %v6348_v25 = vpop.f32.mrf.mxu3  ;;  %v6294_v4 = vpop.f32.mrf.mxu0 }
 0x1f3   : > { %v12436_v38 = vld [vmem:[#allocation2 + $0x1150] sm:$0xf0]  ;;  %v14682_v16 = vld [vmem:[#allocation2 + $0x1344] sm:$0xf]  ;;  %v12311_v32 = vor.u32 %v14586_v22, %v12308_v37  ;;  %6721 = vmatpush.bf16.msra.mxu3 %v12711_v12  ;;  %v6313_v30 = vpop.f32.mrf.mxu1  ;;  %v6295_v7 = vadd.f32 %v6294_v4, %v16691_v55  ;;  %v6349_v22 = vadd.f32 %v6348_v25, %v6330_v35 }
 0x1f4   : > { %v12692_v31 = vld [vmem:[#allocation2 + $0x1350] sm:$0xf0]  ;;  %v14646_v47 = vld [vmem:[#allocation2 + $0x1224] sm:$0xf]  ;;  %v12439_v59 = vor.u32 %v14618_v41, %v12436_v38  ;;  %6703 = vmatpush.bf16.msra.mxu2 %v12567_v42 }
 0x1f5   : > { %v12548_v61 = vld [vmem:[#allocation2 + $0x1230] sm:$0xf0]  ;;  %v12695_v26 = vor.u32 %v14682_v16, %v12692_v31  ;;  %v14582_v52 = vld [vmem:[#allocation2 + $0x1024] sm:$0xf]  ;;  %6665 = vmatpush.bf16.msra.mxu0 %v12311_v32  ;;  %v6314_v31 = vadd.f32 %v6313_v30, %v6295_v7 }
 0x1f6   : > { %v12292_v11 = vld [vmem:[#allocation2 + $0x1030] sm:$0xf0]  ;;  %v14614_v36 = vld [vmem:[#allocation2 + $0x1124] sm:$0xf]  ;;  %v12551_v60 = vor.u32 %v14646_v47, %v12548_v61  ;;  %6684 = vmatpush.bf16.msra.mxu1 %v12439_v59  ;;  %6597 = vmatmul.bf16.gmra.mxu0 %v17268_v21  ;;  %v7724_v47 = vmax.f32 %v16701_v27, 0.0  ;;  %v7728_v61 = vmax.f32 %v6349_v22, 0.0 }
 0x1f7   : > { %v12420_v20 = vld [vmem:[#allocation2 + $0x1130] sm:$0xf0]  ;;  %v14678_v63 = vld [vmem:[#allocation2 + $0x1324] sm:$0xf]  ;;  %v12295_v58 = vor.u32 %v14582_v52, %v12292_v11  ;;  %6722 = vmatpush.bf16.msra.mxu3 %v12695_v26  ;;  %v17270_v52 = vld [vmem:[#allocation58_spill] sm:$0xff] }
 0x1f8   : > { %v12676_v19 = vld [vmem:[#allocation2 + $0x1330] sm:$0xf0]  ;;  %v14642_v33 = vld [vmem:[#allocation2 + $0x1204] sm:$0xf]  ;;  %v12423_v37 = vor.u32 %v14614_v36, %v12420_v20  ;;  %6635 = vmatmul.bf16.gmra.mxu2 %v17270_v52  ;;  %v16709_v35 = vpack.c.bf16 %v7728_v61, %v7724_v47 }
 0x1f9   : > { %v12532_v15 = vld [vmem:[#allocation2 + $0x1210] sm:$0xf0]  ;;  %v14578_v62 = vld [vmem:[#allocation2 + $0x1004] sm:$0xf]  ;;  %v12679_v41 = vor.u32 %v14678_v63, %v12676_v19  ;;  %6704 = vmatpush.bf16.msra.mxu2 %v12551_v60  ;;  %6666 = vmatpush.bf16.msra.mxu0 %v12295_v58  ;;  %v6332_v30 = vpop.f32.mrf.mxu2 }
 0x1fa   : > { %v12276_v49 = vld [vmem:[#allocation2 + $0x1010] sm:$0xf0]  ;;  %v14610_v12 = vld [vmem:[#allocation2 + $0x1104] sm:$0xf]  ;;  %v12535_v36 = vor.u32 %v14642_v33, %v12532_v15  ;;  %17272 = vst [vmem:[#allocation76_spill] sm:$0xff] %v16709_v35  ;;  %6685 = vmatpush.bf16.msra.mxu1 %v12423_v37  ;;  %v6351_v7 = vpop.f32.mrf.mxu3  ;;  %v6333_v21 = vadd.f32 %v6332_v30, %v6314_v31  ;;  %v6296_v60 = vpop.f32.mrf.mxu0  ;;  %v17278_v35 = vld [vmem:[#allocation64_spill] sm:$0xff] }
 0x1fb   : > { %v12404_v38 = vld [vmem:[#allocation2 + $0x1110] sm:$0xf0]  ;;  %v14674_v2 = vld [vmem:[#allocation2 + $0x1304] sm:$0xf]  ;;  %v12279_v25 = vor.u32 %v14578_v62, %v12276_v49  ;;  %6723 = vmatpush.bf16.msra.mxu3 %v12679_v41  ;;  %v6315_v58 = vpop.f32.mrf.mxu1  ;;  %v6297_v47 = vadd.f32 %v6296_v60, %v16694_v10 }
 0x1fc   : > { %v12660_v16 = vld [vmem:[#allocation2 + $0x1310] sm:$0xf0]  ;;  %v17269_v43 = vld [vmem:[#allocation57_spill] sm:$0xff]  ;;  %v12407_v4 = vor.u32 %v14610_v12, %v12404_v38  ;;  %v16712_v38 = vadd.f32 %v6351_v7, %v6333_v21 }
 0x1fd   : > { %6616 = vmatmul.bf16.gmra.mxu1 %v17269_v43  ;;  %v14798_v55 = vld [vmem:[#allocation2 + $0x16e4] sm:$0xf]  ;;  %v13156_v42 = vld [vmem:[#allocation2 + $0x16f0] sm:$0xf0]  ;;  %v12663_v27 = vor.u32 %v14674_v2, %v12660_v16  ;;  %6705 = vmatpush.bf16.msra.mxu2 %v12535_v36  ;;  %v6316_v2 = vadd.f32 %v6315_v58, %v6297_v47 }
 0x1fe   : > { %v14734_v32 = vld [vmem:[#allocation2 + $0x14e4] sm:$0xf]  ;;  %v17271_v59 = vld [vmem:[#allocation59_spill] sm:$0xff]  ;;  %v13159_v22 = vor.u32 %v14798_v55, %v13156_v42  ;;  %6667 = vmatpush.bf16.msra.mxu0 %v12279_v25  ;;  %6686 = vmatpush.bf16.msra.mxu1 %v12407_v4 }
 0x1ff   : > { %6654 = vmatmul.bf16.gmra.mxu3 %v17271_v59  ;;  %v12900_v26 = vld [vmem:[#allocation2 + $0x14f0] sm:$0xf0]  ;;  %v14766_v11 = vld [vmem:[#allocation2 + $0x15e4] sm:$0xf] }
 0x200   : > { %v13028_v20 = vld [vmem:[#allocation2 + $0x15f0] sm:$0xf0]  ;;  %v14830_v63 = vld [vmem:[#allocation2 + $0x17e4] sm:$0xf]  ;;  %v12903_v52 = vor.u32 %v14734_v32, %v12900_v26  ;;  %6724 = vmatpush.bf16.msra.mxu3 %v12663_v27  ;;  %v15244_v32 = vld [vmem:[#allocation4] sm:$0xf] }
 0x201   : > { %v13284_v19 = vld [vmem:[#allocation2 + $0x17f0] sm:$0xf0]  ;;  %v14794_v59 = vld [vmem:[#allocation2 + $0x16c4] sm:$0xf]  ;;  %v13031_v33 = vor.u32 %v14766_v11, %v13028_v20  ;;  %6774 = vmatpush.bf16.msrb.mxu2 %v13159_v22  ;;  %v16714_v10 = vperm.slane %v15244_v32, 1  ;;  %v6334_v25 = vpop.f32.mrf.mxu2 }
 0x202   : > { %v13140_v43 = vld [vmem:[#allocation2 + $0x16d0] sm:$0xf0]  ;;  %v13287_v15 = vor.u32 %v14830_v63, %v13284_v19  ;;  %v14730_v62 = vld [vmem:[#allocation2 + $0x14c4] sm:$0xf]  ;;  %6736 = vmatpush.bf16.msrb.mxu0 %v12903_v52  ;;  %v6353_v20 = vpop.f32.mrf.mxu3  ;;  %v6365_v19 = vpop.f32.mrf.mxu0 }
 0x203   : > { %v12884_v49 = vld [vmem:[#allocation2 + $0x14d0] sm:$0xf0]  ;;  %v14762_v3 = vld [vmem:[#allocation2 + $0x15c4] sm:$0xf]  ;;  %v13143_v16 = vor.u32 %v14794_v59, %v13140_v43  ;;  %6755 = vmatpush.bf16.msrb.mxu1 %v13031_v33  ;;  %v6335_v59 = vadd.f32 %v6334_v25, %v6316_v2  ;;  %v6384_v4 = vpop.f32.mrf.mxu1 }
 0x204   : > { %v13012_v12 = vld [vmem:[#allocation2 + $0x15d0] sm:$0xf0]  ;;  %v14826_v37 = vld [vmem:[#allocation2 + $0x17c4] sm:$0xf]  ;;  %v12887_v31 = vor.u32 %v14730_v62, %v12884_v49  ;;  %6793 = vmatpush.bf16.msrb.mxu3 %v13287_v15 }
 0x205   : > { %v13268_v41 = vld [vmem:[#allocation2 + $0x17d0] sm:$0xf0]  ;;  %v13015_v55 = vor.u32 %v14762_v3, %v13012_v12  ;;  %v14790_v61 = vld [vmem:[#allocation2 + $0x16a4] sm:$0xf]  ;;  %6775 = vmatpush.bf16.msrb.mxu2 %v13143_v16  ;;  %v6366_v3 = vadd.f32 %v6365_v19, %v16714_v10  ;;  %v6354_v60 = vadd.f32 %v6353_v20, %v6335_v59  ;;  %v17273_v12 = vld [vmem:[#allocation60_spill] sm:$0xff] }
 0x206   : > { %v13271_v42 = vor.u32 %v14826_v37, %v13268_v41  ;;  %v13124_v26 = vld [vmem:[#allocation2 + $0x16b0] sm:$0xf0]  ;;  %v14726_v11 = vld [vmem:[#allocation2 + $0x14a4] sm:$0xf]  ;;  %6737 = vmatpush.bf16.msrb.mxu0 %v12887_v31  ;;  %v7732_v31 = vmax.f32 %v16712_v38, 0.0 }
 0x207   : > { %v12868_v36 = vld [vmem:[#allocation2 + $0x14b0] sm:$0xf0]  ;;  %v14758_v21 = vld [vmem:[#allocation2 + $0x15a4] sm:$0xf]  ;;  %6756 = vmatpush.bf16.msrb.mxu1 %v13015_v55  ;;  %v13127_v27 = vor.u32 %v14790_v61, %v13124_v26  ;;  %v6385_v47 = vadd.f32 %v6384_v4, %v6366_v3  ;;  %6668 = vmatmul.bf16.vlgmr.msra.gmra.mxu0 %v17273_v12  ;;  %v7736_v55 = vmax.f32 %v6354_v60, 0.0 }
 0x208   : > { %v12996_v63 = vld [vmem:[#allocation2 + $0x15b0] sm:$0xf0]  ;;  %v14822_v52 = vld [vmem:[#allocation2 + $0x17a4] sm:$0xf]  ;;  %6794 = vmatpush.bf16.msrb.mxu3 %v13271_v42  ;;  %v12871_v30 = vor.u32 %v14726_v11, %v12868_v36  ;;  %v17275_v42 = vld [vmem:[#allocation62_spill] sm:$0xff] }
 0x209   : > { %v13252_v43 = vld [vmem:[#allocation2 + $0x17b0] sm:$0xf0]  ;;  %v14786_v7 = vld [vmem:[#allocation2 + $0x1684] sm:$0xf]  ;;  %v12999_v58 = vor.u32 %v14758_v21, %v12996_v63  ;;  %6706 = vmatmul.bf16.vlgmr.msra.gmra.mxu2 %v17275_v42  ;;  %v6403_v38 = vpop.f32.mrf.mxu2 }
 0x20a   : > { %v13108_v22 = vld [vmem:[#allocation2 + $0x1690] sm:$0xf0]  ;;  %v13255_v33 = vor.u32 %v14822_v52, %v13252_v43  ;;  %v14722_v15 = vld [vmem:[#allocation2 + $0x1484] sm:$0xf]  ;;  %6776 = vmatpush.bf16.msrb.mxu2 %v13127_v27  ;;  %6738 = vmatpush.bf16.msrb.mxu0 %v12871_v30  ;;  %v16722_v43 = vpack.c.bf16 %v7736_v55, %v7732_v31  ;;  %v6422_v59 = vpop.f32.mrf.mxu3  ;;  %v6404_v27 = vadd.f32 %v6403_v38, %v6385_v47  ;;  %v6367_v30 = vpop.f32.mrf.mxu0 }
 0x20b   : > { %v12852_v62 = vld [vmem:[#allocation2 + $0x1490] sm:$0xf0]  ;;  %v14754_v49 = vld [vmem:[#allocation2 + $0x1584] sm:$0xf]  ;;  %v13111_v61 = vor.u32 %v14786_v7, %v13108_v22  ;;  %6757 = vmatpush.bf16.msrb.mxu1 %v12999_v58  ;;  %v6386_v7 = vpop.f32.mrf.mxu1  ;;  %v6368_v22 = vadd.f32 %v6367_v30, %v16714_v10 }
 0x20c   : > { %v17274_v37 = vld [vmem:[#allocation61_spill] sm:$0xff]  ;;  %v12980_v41 = vld [vmem:[#allocation2 + $0x1590] sm:$0xf0]  ;;  %v12855_v26 = vor.u32 %v14722_v15, %v12852_v62  ;;  %6795 = vmatpush.bf16.msrb.mxu3 %v13255_v33  ;;  %17277 = vst [vmem:[#allocation77_spill] sm:$0xff] %v16722_v43  ;;  %v16725_v62 = vadd.f32 %v6422_v59, %v6404_v27 }
 0x20d   : > { %6687 = vmatmul.bf16.vlgmr.msra.gmra.mxu1 %v17274_v37  ;;  %v14818_v2 = vld [vmem:[#allocation2 + $0x1784] sm:$0xf]  ;;  %v13236_v16 = vld [vmem:[#allocation2 + $0x1790] sm:$0xf0]  ;;  %v12983_v21 = vor.u32 %v14754_v49, %v12980_v41  ;;  %v6387_v47 = vadd.f32 %v6386_v7, %v6368_v22 }
 0x20e   : > { %v17276_v32 = vld [vmem:[#allocation63_spill] sm:$0xff]  ;;  %v14782_v11 = vld [vmem:[#allocation2 + $0x1664] sm:$0xf]  ;;  %v13239_v25 = vor.u32 %v14818_v2, %v13236_v16  ;;  %6777 = vmatpush.bf16.msrb.mxu2 %v13111_v61  ;;  %6739 = vmatpush.bf16.msrb.mxu0 %v12855_v26 }
 0x20f   : > { %6725 = vmatmul.bf16.vlgmr.msra.gmra.mxu3 %v17276_v32  ;;  %v13092_v36 = vld [vmem:[#allocation2 + $0x1670] sm:$0xf0]  ;;  %v14718_v20 = vld [vmem:[#allocation2 + $0x1464] sm:$0xf]  ;;  %6758 = vmatpush.bf16.msrb.mxu1 %v12983_v21  ;;  %v10586_v32 = vld [vmem:[#allocation2 + $0x2c8] sm:$0xf] }
 0x210   : > { %v12836_v63 = vld [vmem:[#allocation2 + $0x1470] sm:$0xf0]  ;;  %v14750_v52 = vld [vmem:[#allocation2 + $0x1564] sm:$0xf]  ;;  %v13095_v60 = vor.u32 %v14782_v11, %v13092_v36  ;;  %6796 = vmatpush.bf16.msrb.mxu3 %v13239_v25 }
 0x211   : > { %v12964_v19 = vld [vmem:[#allocation2 + $0x1570] sm:$0xf0]  ;;  %v14814_v4 = vld [vmem:[#allocation2 + $0x1764] sm:$0xf]  ;;  %v12839_v58 = vor.u32 %v14718_v20, %v12836_v63  ;;  %v6405_v59 = vpop.f32.mrf.mxu2 }
 0x212   : > { %v13220_v3 = vld [vmem:[#allocation2 + $0x1770] sm:$0xf0]  ;;  %v14778_v33 = vld [vmem:[#allocation2 + $0x1644] sm:$0xf]  ;;  %v12967_v49 = vor.u32 %v14750_v52, %v12964_v19  ;;  %6778 = vmatpush.bf16.msrb.mxu2 %v13095_v60  ;;  %v6424_v19 = vpop.f32.mrf.mxu3  ;;  %v6406_v30 = vadd.f32 %v6405_v59, %v6387_v47  ;;  %v6370_v7 = vpop.f32.mrf.mxu0 }
 0x213   : > { %v13076_v15 = vld [vmem:[#allocation2 + $0x1650] sm:$0xf0]  ;;  %v13223_v41 = vor.u32 %v14814_v4, %v13220_v3  ;;  %v14714_v2 = vld [vmem:[#allocation2 + $0x1444] sm:$0xf]  ;;  %6740 = vmatpush.bf16.msrb.mxu0 %v12839_v58  ;;  %v6389_v22 = vpop.f32.mrf.mxu1  ;;  %v6371_v58 = vadd.f32 %v6370_v7, %v16714_v10 }
 0x214   : > { %v12820_v16 = vld [vmem:[#allocation2 + $0x1450] sm:$0xf0]  ;;  %v14746_v31 = vld [vmem:[#allocation2 + $0x1544] sm:$0xf]  ;;  %v13079_v61 = vor.u32 %v14778_v33, %v13076_v15  ;;  %6759 = vmatpush.bf16.msrb.mxu1 %v12967_v49 }
 0x215   : > { %v12948_v55 = vld [vmem:[#allocation2 + $0x1550] sm:$0xf0]  ;;  %v14810_v38 = vld [vmem:[#allocation2 + $0x1744] sm:$0xf]  ;;  %v12823_v26 = vor.u32 %v14714_v2, %v12820_v16  ;;  %6797 = vmatpush.bf16.msrb.mxu3 %v13223_v41  ;;  %v16728_v2 = vadd.f32 %v6424_v19, %v6406_v30  ;;  %v6390_v59 = vadd.f32 %v6389_v22, %v6371_v58 }
 0x216   : > { %v13204_v43 = vld [vmem:[#allocation2 + $0x1750] sm:$0xf0]  ;;  %v14774_v11 = vld [vmem:[#allocation2 + $0x1624] sm:$0xf]  ;;  %v12951_v20 = vor.u32 %v14746_v31, %v12948_v55  ;;  %6779 = vmatpush.bf16.msrb.mxu2 %v13079_v61 }
 0x217   : > { %v13060_v36 = vld [vmem:[#allocation2 + $0x1630] sm:$0xf0]  ;;  %v13207_v21 = vor.u32 %v14810_v38, %v13204_v43  ;;  %v14710_v25 = vld [vmem:[#allocation2 + $0x1424] sm:$0xf]  ;;  %6741 = vmatpush.bf16.msrb.mxu0 %v12823_v26  ;;  %v10602_v26 = vld [vmem:[#allocation2 + $0x2e8] sm:$0xf] }
 0x218   : > { %v12804_v63 = vld [vmem:[#allocation2 + $0x1430] sm:$0xf0]  ;;  %v14742_v52 = vld [vmem:[#allocation2 + $0x1524] sm:$0xf]  ;;  %v13063_v33 = vor.u32 %v14774_v11, %v13060_v36  ;;  %6760 = vmatpush.bf16.msrb.mxu1 %v12951_v20  ;;  %6673 = vmatmul.bf16.gmra.mxu0 %v17278_v35  ;;  %v14161_v11 = vld [vmem:[#allocation2 + $0x2f4] sm:$0xf0] }
 0x219   : > { %v12932_v4 = vld [vmem:[#allocation2 + $0x1530] sm:$0xf0]  ;;  %v14806_v3 = vld [vmem:[#allocation2 + $0x1724] sm:$0xf]  ;;  %v12807_v15 = vor.u32 %v14710_v25, %v12804_v63  ;;  %6798 = vmatpush.bf16.msrb.mxu3 %v13207_v21  ;;  %v17280_v36 = vld [vmem:[#allocation66_spill] sm:$0xff]  ;;  %v6408_v58 = vpop.f32.mrf.mxu2  ;;  %v10603_v35 = vor.u32 %v14161_v11, %v10602_v26 }
 0x21a   : > { %v13188_v27 = vld [vmem:[#allocation2 + $0x1730] sm:$0xf0]  ;;  %v14770_v60 = vld [vmem:[#allocation2 + $0x1604] sm:$0xf]  ;;  %v12935_v16 = vor.u32 %v14742_v52, %v12932_v4  ;;  %6711 = vmatmul.bf16.gmra.mxu2 %v17280_v36  ;;  %v10346_v63 = vld [vmem:[#allocation2 + $0xe8] sm:$0xf]  ;;  %v6409_v42 = vadd.f32 %v6408_v58, %v6390_v59  ;;  %v6372_v37 = vpop.f32.mrf.mxu0 }
 0x21b   : > { %v13044_v49 = vld [vmem:[#allocation2 + $0x1610] sm:$0xf0]  ;;  %v14706_v43 = vld [vmem:[#allocation2 + $0x1404] sm:$0xf]  ;;  %v13191_v31 = vor.u32 %v14806_v3, %v13188_v27  ;;  %v14097_v20 = vld [vmem:[#allocation2 + $0xf4] sm:$0xf0]  ;;  %6780 = vmatpush.bf16.msrb.mxu2 %v13063_v33  ;;  %6742 = vmatpush.bf16.msrb.mxu0 %v12807_v15  ;;  %v6391_v12 = vpop.f32.mrf.mxu1 }
 0x21c   : > { %v12788_v41 = vld [vmem:[#allocation2 + $0x1410] sm:$0xf0]  ;;  %v14738_v55 = vld [vmem:[#allocation2 + $0x1504] sm:$0xf]  ;;  %v10474_v21 = vld [vmem:[#allocation2 + $0x1e8] sm:$0xf]  ;;  %v13047_v52 = vor.u32 %v14770_v60, %v13044_v49  ;;  %6761 = vmatpush.bf16.msrb.mxu1 %v12935_v16  ;;  %v10347_v36 = vor.u32 %v14097_v20, %v10346_v63 }
 0x21d   : > { %v12916_v47 = vld [vmem:[#allocation2 + $0x1510] sm:$0xf0]  ;;  %v14802_v38 = vld [vmem:[#allocation2 + $0x1704] sm:$0xf]  ;;  %v12791_v19 = vor.u32 %v14706_v43, %v12788_v41  ;;  %v14129_v4 = vld [vmem:[#allocation2 + $0x1f4] sm:$0xf0]  ;;  %6799 = vmatpush.bf16.msrb.mxu3 %v13191_v31  ;;  %v6373_v41 = vadd.f32 %v6372_v37, %v16714_v10 }
 0x21e   : > { %v17279_v7 = vld [vmem:[#allocation65_spill] sm:$0xff]  ;;  %v13172_v61 = vld [vmem:[#allocation2 + $0x1710] sm:$0xf0]  ;;  %v14193_v27 = vld [vmem:[#allocation2 + $0x3f4] sm:$0xf0]  ;;  %v12919_v30 = vor.u32 %v14738_v55, %v12916_v47  ;;  %v10475_v33 = vor.u32 %v14129_v4, %v10474_v21 }
 0x21f   : > { %6692 = vmatmul.bf16.gmra.mxu1 %v17279_v7  ;;  %v17281_v25 = vld [vmem:[#allocation67_spill] sm:$0xff]  ;;  %v10730_v3 = vld [vmem:[#allocation2 + $0x3e8] sm:$0xf]  ;;  %v13175_v22 = vor.u32 %v14802_v38, %v13172_v61  ;;  %v6427_v7 = vpop.f32.mrf.mxu3  ;;  %6781 = vmatpush.bf16.msrb.mxu2 %v13047_v52  ;;  %v6392_v38 = vadd.f32 %v6391_v12, %v6373_v41  ;;  %v17282_v41 = vld [vmem:[#allocation68_spill] sm:$0xff] }
 0x220   : > { %6730 = vmatmul.bf16.gmra.mxu3 %v17281_v25  ;;  %v14157_v25 = vld [vmem:[#allocation2 + $0x2d4] sm:$0xf0]  ;;  %v10731_v15 = vor.u32 %v14193_v27, %v10730_v3  ;;  %v10330_v60 = vld [vmem:[#allocation2 + $0xc8] sm:$0xf]  ;;  %6743 = vmatpush.bf16.msrb.mxu0 %v12791_v19  ;;  %v16735_v47 = vadd.f32 %v6427_v7, %v6409_v42 }
 0x221   : > { %v14093_v49 = vld [vmem:[#allocation2 + $0xd4] sm:$0xf0]  ;;  %v10458_v43 = vld [vmem:[#allocation2 + $0x1c8] sm:$0xf]  ;;  %6762 = vmatpush.bf16.msrb.mxu1 %v12919_v30  ;;  %6800 = vmatpush.bf16.msrb.mxu3 %v13175_v22  ;;  %v10587_v59 = vor.u32 %v14157_v25, %v10586_v32  ;;  %v6410_v52 = vpop.f32.mrf.mxu2 }
 0x222   : > { %v14125_v16 = vld [vmem:[#allocation2 + $0x1d4] sm:$0xf0]  ;;  %v10714_v31 = vld [vmem:[#allocation2 + $0x3c8] sm:$0xf]  ;;  %v10331_v61 = vor.u32 %v14093_v49, %v10330_v60 }
 0x223   : > { %v14189_v55 = vld [vmem:[#allocation2 + $0x3d4] sm:$0xf0]  ;;  %6850 = vmatpush.bf16.msra.mxu2 %v10603_v35  ;;  %v10459_v26 = vor.u32 %v14125_v16, %v10458_v43  ;;  %v10570_v63 = vld [vmem:[#allocation2 + $0x2a8] sm:$0xf]  ;;  %v6411_v35 = vadd.f32 %v6410_v52, %v6392_v38  ;;  %v6460_v32 = vpop.f32.mrf.mxu1 }
 0x224   : > { %6812 = vmatpush.bf16.msra.mxu0 %v10347_v36  ;;  %v10715_v11 = vor.u32 %v14189_v55, %v10714_v31  ;;  %v14153_v10 = vld [vmem:[#allocation2 + $0x2b4] sm:$0xf0]  ;;  %v10314_v37 = vld [vmem:[#allocation2 + $0xa8] sm:$0xf]  ;;  %v6441_v36 = vpop.f32.mrf.mxu0 }
 0x225   : > { %6831 = vmatpush.bf16.msra.mxu1 %v10475_v33  ;;  %6869 = vmatpush.bf16.msra.mxu3 %v10731_v15  ;;  %v14089_v20 = vld [vmem:[#allocation2 + $0xb4] sm:$0xf0]  ;;  %v10442_v21 = vld [vmem:[#allocation2 + $0x1a8] sm:$0xf]  ;;  %v6442_v25 = vadd.f32 %v6441_v36, %v16725_v62  ;;  %v10571_v4 = vor.u32 %v14153_v10, %v10570_v63 }
 0x226   : > { %v14121_v42 = vld [vmem:[#allocation2 + $0x1b4] sm:$0xf0]  ;;  %v10698_v7 = vld [vmem:[#allocation2 + $0x3a8] sm:$0xf]  ;;  %v10315_v3 = vor.u32 %v14089_v20, %v10314_v37 }
 0x227   : > { %v6429_v19 = vpop.f32.mrf.mxu3  ;;  %6851 = vmatpush.bf16.msra.mxu2 %v10587_v59  ;;  %v14185_v12 = vld [vmem:[#allocation2 + $0x3b4] sm:$0xf0]  ;;  %v10554_v27 = vld [vmem:[#allocation2 + $0x288] sm:$0xf]  ;;  %v10443_v58 = vor.u32 %v14121_v42, %v10442_v21  ;;  %v6461_v43 = vadd.f32 %v6460_v32, %v6442_v25 }
 0x228   : > { %6813 = vmatpush.bf16.msra.mxu0 %v10331_v61  ;;  %v14149_v30 = vld [vmem:[#allocation2 + $0x294] sm:$0xf0]  ;;  %v16738_v22 = vadd.f32 %v6429_v19, %v6411_v35  ;;  %v10699_v33 = vor.u32 %v14185_v12, %v10698_v7  ;;  %v10298_v15 = vld [vmem:[#allocation2 + $0x88] sm:$0xf] }
 0x229   : > { %6832 = vmatpush.bf16.msra.mxu1 %v10459_v26  ;;  %6870 = vmatpush.bf16.msra.mxu3 %v10715_v11  ;;  %v14085_v60 = vld [vmem:[#allocation2 + $0x94] sm:$0xf0]  ;;  %v10426_v49 = vld [vmem:[#allocation2 + $0x188] sm:$0xf]  ;;  %v10555_v61 = vor.u32 %v14149_v30, %v10554_v27  ;;  %v6479_v19 = vpop.f32.mrf.mxu2 }
 0x22a   : > { %6744 = vmatmul.bf16.vlgmr.msrb.gmra.mxu0 %v17282_v41  ;;  %v17283_v16 = vld [vmem:[#allocation69_spill] sm:$0xff]  ;;  %v14117_v31 = vld [vmem:[#allocation2 + $0x194] sm:$0xf0]  ;;  %v17284_v62 = vld [vmem:[#allocation70_spill] sm:$0xff]  ;;  %v10299_v26 = vor.u32 %v14085_v60, %v10298_v15  ;;  %v6480_v36 = vadd.f32 %v6479_v19, %v6461_v43 }
 0x22b   : > { %v10682_v55 = vld [vmem:[#allocation2 + $0x388] sm:$0xf]  ;;  %v14181_v38 = vld [vmem:[#allocation2 + $0x394] sm:$0xf0]  ;;  %6782 = vmatmul.bf16.vlgmr.msrb.gmra.mxu2 %v17284_v62  ;;  %v10427_v10 = vor.u32 %v14117_v31, %v10426_v49  ;;  %v6462_v25 = vpop.f32.mrf.mxu1 }
 0x22c   : > { %v17285_v59 = vld [vmem:[#allocation71_spill] sm:$0xff]  ;;  %6852 = vmatpush.bf16.msra.mxu2 %v10571_v4  ;;  %6814 = vmatpush.bf16.msra.mxu0 %v10315_v3  ;;  %v10538_v11 = vld [vmem:[#allocation2 + $0x268] sm:$0xf]  ;;  %v10683_v37 = vor.u32 %v14181_v38, %v10682_v55  ;;  %v6443_v32 = vpop.f32.mrf.mxu0 }
 0x22d   : > { %v14145_v63 = vld [vmem:[#allocation2 + $0x274] sm:$0xf0]  ;;  %6833 = vmatpush.bf16.msra.mxu1 %v10443_v58  ;;  %6871 = vmatpush.bf16.msra.mxu3 %v10699_v33  ;;  %v10282_v20 = vld [vmem:[#allocation2 + $0x68] sm:$0xf]  ;;  %v6444_v4 = vadd.f32 %v6443_v32, %v16728_v2 }
 0x22e   : > { %v14081_v21 = vld [vmem:[#allocation2 + $0x74] sm:$0xf0]  ;;  %v10410_v52 = vld [vmem:[#allocation2 + $0x168] sm:$0xf]  ;;  %v10539_v3 = vor.u32 %v14145_v63, %v10538_v11 }
 0x22f   : > { %6763 = vmatmul.bf16.vlgmr.msrb.gmra.mxu1 %v17283_v16  ;;  %v6498_v42 = vpop.f32.mrf.mxu3  ;;  %v14113_v7 = vld [vmem:[#allocation2 + $0x174] sm:$0xf0]  ;;  %v10666_v12 = vld [vmem:[#allocation2 + $0x368] sm:$0xf]  ;;  %v10283_v27 = vor.u32 %v14081_v21, %v10282_v20  ;;  %v6463_v43 = vadd.f32 %v6462_v25, %v6444_v4 }
 0x230   : > { %6801 = vmatmul.bf16.vlgmr.msrb.gmra.mxu3 %v17285_v59  ;;  %v14177_v35 = vld [vmem:[#allocation2 + $0x374] sm:$0xf0]  ;;  %6853 = vmatpush.bf16.msra.mxu2 %v10555_v61  ;;  %v10522_v30 = vld [vmem:[#allocation2 + $0x248] sm:$0xf]  ;;  %v16745_v33 = vadd.f32 %v6498_v42, %v6480_v36  ;;  %v10411_v15 = vor.u32 %v14113_v7, %v10410_v52 }
 0x231   : > { %6815 = vmatpush.bf16.msra.mxu0 %v10299_v26  ;;  %v14141_v58 = vld [vmem:[#allocation2 + $0x254] sm:$0xf0]  ;;  %6834 = vmatpush.bf16.msra.mxu1 %v10427_v10  ;;  %v10667_v60 = vor.u32 %v14177_v35, %v10666_v12  ;;  %v10266_v49 = vld [vmem:[#allocation2 + $0x48] sm:$0xf]  ;;  %v6481_v52 = vpop.f32.mrf.mxu2 }
 0x232   : > { %6872 = vmatpush.bf16.msra.mxu3 %v10683_v37  ;;  %v14077_v31 = vld [vmem:[#allocation2 + $0x54] sm:$0xf0]  ;;  %v10394_v55 = vld [vmem:[#allocation2 + $0x148] sm:$0xf]  ;;  %v10523_v2 = vor.u32 %v14141_v58, %v10522_v30  ;;  %v6482_v36 = vadd.f32 %v6481_v52, %v6463_v43 }
 0x233   : > { %v14109_v38 = vld [vmem:[#allocation2 + $0x154] sm:$0xf0]  ;;  %v10650_v19 = vld [vmem:[#allocation2 + $0x348] sm:$0xf]  ;;  %v10267_v61 = vor.u32 %v14077_v31, %v10266_v49  ;;  %v6465_v25 = vpop.f32.mrf.mxu1 }
 0x234   : > { %v14173_v59 = vld [vmem:[#allocation2 + $0x354] sm:$0xf0]  ;;  %6854 = vmatpush.bf16.msra.mxu2 %v10539_v3  ;;  %v10506_v26 = vld [vmem:[#allocation2 + $0x228] sm:$0xf]  ;;  %v10395_v63 = vor.u32 %v14109_v38, %v10394_v55  ;;  %v6446_v32 = vpop.f32.mrf.mxu0 }
 0x235   : > { %6816 = vmatpush.bf16.msra.mxu0 %v10283_v27  ;;  %v14137_v11 = vld [vmem:[#allocation2 + $0x234] sm:$0xf0]  ;;  %6835 = vmatpush.bf16.msra.mxu1 %v10411_v15  ;;  %v10651_v10 = vor.u32 %v14173_v59, %v10650_v19  ;;  %v10250_v37 = vld [vmem:[#allocation2 + $0x28] sm:$0xf]  ;;  %v6447_v3 = vadd.f32 %v6446_v32, %v16735_v47 }
 0x236   : > { %6873 = vmatpush.bf16.msra.mxu3 %v10667_v60  ;;  %v14073_v20 = vld [vmem:[#allocation2 + $0x34] sm:$0xf0]  ;;  %v10378_v21 = vld [vmem:[#allocation2 + $0x128] sm:$0xf]  ;;  %v10507_v27 = vor.u32 %v14137_v11, %v10506_v26 }
 0x237   : > { %v6500_v42 = vpop.f32.mrf.mxu3  ;;  %v14105_v7 = vld [vmem:[#allocation2 + $0x134] sm:$0xf0]  ;;  %v10634_v12 = vld [vmem:[#allocation2 + $0x328] sm:$0xf]  ;;  %v10251_v30 = vor.u32 %v14073_v20, %v10250_v37  ;;  %v6466_v19 = vadd.f32 %v6465_v25, %v6447_v3 }
 0x238   : > { %v14169_v35 = vld [vmem:[#allocation2 + $0x334] sm:$0xf0]  ;;  %v10490_v4 = vld [vmem:[#allocation2 + $0x208] sm:$0xf]  ;;  %6855 = vmatpush.bf16.msra.mxu2 %v10523_v2  ;;  %v16748_v60 = vadd.f32 %v6500_v42, %v6482_v36  ;;  %v10379_v49 = vor.u32 %v14105_v7, %v10378_v21 }
 0x239   : > { %6817 = vmatpush.bf16.msra.mxu0 %v10267_v61  ;;  %v14133_v58 = vld [vmem:[#allocation2 + $0x214] sm:$0xf0]  ;;  %v10234_v59 = vld [vmem:[#allocation2 + $0x8] sm:$0xf]  ;;  %6836 = vmatpush.bf16.msra.mxu1 %v10395_v63  ;;  %v10635_v31 = vor.u32 %v14169_v35, %v10634_v12  ;;  %v6484_v32 = vpop.f32.mrf.mxu2 }
 0x23a   : > { %v14069_v15 = vld [vmem:[#allocation2 + $0x14] sm:$0xf0]  ;;  %6874 = vmatpush.bf16.msra.mxu3 %v10651_v10  ;;  %v10362_v55 = vld [vmem:[#allocation2 + $0x108] sm:$0xf]  ;;  %6749 = vmatmul.bf16.gmra.mxu0 %v16615_v34  ;;  %v10491_v21 = vor.u32 %v14133_v58, %v10490_v4  ;;  %v6485_v34 = vadd.f32 %v6484_v32, %v6466_v19 }
 0x23b   : > { %v14101_v43 = vld [vmem:[#allocation2 + $0x114] sm:$0xf0]  ;;  %v10618_v38 = vld [vmem:[#allocation2 + $0x308] sm:$0xf]  ;;  %v10235_v52 = vor.u32 %v14069_v15, %v10234_v59  ;;  %v6467_v16 = vpop.f32.mrf.mxu1 }
 0x23c   : > { %v17286_v47 = vld [vmem:[#allocation73_spill] sm:$0xff]  ;;  %v14165_v2 = vld [vmem:[#allocation2 + $0x314] sm:$0xf0]  ;;  %v17287_v11 = vld [vmem:[#allocation74_spill] sm:$0xff]  ;;  %6856 = vmatpush.bf16.msra.mxu2 %v10507_v27  ;;  %v10363_v35 = vor.u32 %v14101_v43, %v10362_v55  ;;  %v6448_v62 = vpop.f32.mrf.mxu0 }
 0x23d   : > { %v11114_v61 = vld [vmem:[#allocation2 + $0x6e8] sm:$0xf]  ;;  %v14289_v26 = vld [vmem:[#allocation2 + $0x6f4] sm:$0xf0]  ;;  %6787 = vmatmul.bf16.gmra.mxu2 %v17287_v11  ;;  %6818 = vmatpush.bf16.msra.mxu0 %v10251_v30  ;;  %v10619_v36 = vor.u32 %v14165_v2, %v10618_v38  ;;  %v6449_v15 = vadd.f32 %v6448_v62, %v16738_v22 }
 0x23e   : > { %v17288_v37 = vld [vmem:[#allocation75_spill] sm:$0xff]  ;;  %v10858_v20 = vld [vmem:[#allocation2 + $0x4e8] sm:$0xf]  ;;  %6837 = vmatpush.bf16.msra.mxu1 %v10379_v49  ;;  %6875 = vmatpush.bf16.msra.mxu3 %v10635_v31  ;;  %v11115_v3 = vor.u32 %v14289_v26, %v11114_v61 }
 0x23f   : > { %6768 = vmatmul.bf16.gmra.mxu1 %v17286_v47  ;;  %v14225_v63 = vld [vmem:[#allocation2 + $0x4f4] sm:$0xf0]  ;;  %v10986_v10 = vld [vmem:[#allocation2 + $0x5e8] sm:$0xf]  ;;  %v6503_v25 = vpop.f32.mrf.mxu3  ;;  %v6468_v38 = vadd.f32 %v6467_v16, %v6449_v15 }
 0x240   : > { %6806 = vmatmul.bf16.gmra.mxu3 %v17288_v37  ;;  %v14257_v42 = vld [vmem:[#allocation2 + $0x5f4] sm:$0xf0]  ;;  %v11242_v7 = vld [vmem:[#allocation2 + $0x7e8] sm:$0xf]  ;;  %v10859_v11 = vor.u32 %v14225_v63, %v10858_v20  ;;  %6857 = vmatpush.bf16.msra.mxu2 %v10491_v21  ;;  %v16755_v43 = vadd.f32 %v6503_v25, %v6485_v34 }
 0x241   : > { %v14321_v12 = vld [vmem:[#allocation2 + $0x7f4] sm:$0xf0]  ;;  %v11098_v47 = vld [vmem:[#allocation2 + $0x6c8] sm:$0xf]  ;;  %v10987_v27 = vor.u32 %v14257_v42, %v10986_v10  ;;  %6819 = vmatpush.bf16.msra.mxu0 %v10235_v52  ;;  %v6486_v21 = vpop.f32.mrf.mxu2 }
 0x242   : > { %v14285_v37 = vld [vmem:[#allocation2 + $0x6d4] sm:$0xf0]  ;;  %v11243_v30 = vor.u32 %v14321_v12, %v11242_v7  ;;  %v10842_v4 = vld [vmem:[#allocation2 + $0x4c8] sm:$0xf]  ;;  %6838 = vmatpush.bf16.msra.mxu1 %v10363_v35  ;;  %6876 = vmatpush.bf16.msra.mxu3 %v10619_v36  ;;  %v6487_v7 = vadd.f32 %v6486_v21, %v6468_v38 }
 0x243   : > { %v14221_v58 = vld [vmem:[#allocation2 + $0x4d4] sm:$0xf0]  ;;  %v10970_v59 = vld [vmem:[#allocation2 + $0x5c8] sm:$0xf]  ;;  %v11099_v19 = vor.u32 %v14285_v37, %v11098_v47  ;;  %v6536_v47 = vpop.f32.mrf.mxu1 }
 0x244   : > { %v14253_v49 = vld [vmem:[#allocation2 + $0x5d4] sm:$0xf0]  ;;  %v11226_v31 = vld [vmem:[#allocation2 + $0x7c8] sm:$0xf]  ;;  %6926 = vmatpush.bf16.msrb.mxu2 %v11115_v3  ;;  %v10843_v2 = vor.u32 %v14221_v58, %v10842_v4 }
 0x245   : > { %v14317_v55 = vld [vmem:[#allocation2 + $0x7d4] sm:$0xf0]  ;;  %6888 = vmatpush.bf16.msrb.mxu0 %v10859_v11  ;;  %v10971_v61 = vor.u32 %v14253_v49, %v10970_v59  ;;  %v11082_v20 = vld [vmem:[#allocation2 + $0x6a8] sm:$0xf]  ;;  %v6517_v11 = vpop.f32.mrf.mxu0 }
 0x246   : > { %6907 = vmatpush.bf16.msrb.mxu1 %v10987_v27  ;;  %6945 = vmatpush.bf16.msrb.mxu3 %v11243_v30  ;;  %v11227_v26 = vor.u32 %v14317_v55, %v11226_v31  ;;  %v14281_v22 = vld [vmem:[#allocation2 + $0x6b4] sm:$0xf0]  ;;  %v10826_v62 = vld [vmem:[#allocation2 + $0x4a8] sm:$0xf]  ;;  %v6518_v37 = vadd.f32 %v6517_v11, %v16745_v33 }
 0x247   : > { %v14217_v63 = vld [vmem:[#allocation2 + $0x4b4] sm:$0xf0]  ;;  %v10954_v10 = vld [vmem:[#allocation2 + $0x5a8] sm:$0xf]  ;;  %v6505_v52 = vpop.f32.mrf.mxu3  ;;  %v11083_v12 = vor.u32 %v14281_v22, %v11082_v20 }
 0x248   : > { %6927 = vmatpush.bf16.msrb.mxu2 %v11099_v19  ;;  %v14249_v34 = vld [vmem:[#allocation2 + $0x5b4] sm:$0xf0]  ;;  %v11210_v42 = vld [vmem:[#allocation2 + $0x7a8] sm:$0xf]  ;;  %v10827_v35 = vor.u32 %v14217_v63, %v10826_v62  ;;  %v16758_v25 = vadd.f32 %v6505_v52, %v6487_v7  ;;  %v6537_v59 = vadd.f32 %v6536_v47, %v6518_v37 }
 0x249   : > { %6889 = vmatpush.bf16.msrb.mxu0 %v10843_v2  ;;  %v14313_v16 = vld [vmem:[#allocation2 + $0x7b4] sm:$0xf0]  ;;  %v11066_v36 = vld [vmem:[#allocation2 + $0x688] sm:$0xf]  ;;  %v10955_v3 = vor.u32 %v14249_v34, %v10954_v10  ;;  %v6555_v62 = vpop.f32.mrf.mxu2 }
 0x24a   : > { %6908 = vmatpush.bf16.msrb.mxu1 %v10971_v61  ;;  %6946 = vmatpush.bf16.msrb.mxu3 %v11227_v26  ;;  %v14277_v32 = vld [vmem:[#allocation2 + $0x694] sm:$0xf0]  ;;  %v11211_v27 = vor.u32 %v14313_v16, %v11210_v42  ;;  %v10810_v30 = vld [vmem:[#allocation2 + $0x488] sm:$0xf]  ;;  %v6556_v34 = vadd.f32 %v6555_v62, %v6537_v59 }
 0x24b   : > { %v14213_v4 = vld [vmem:[#allocation2 + $0x494] sm:$0xf0]  ;;  %v10938_v58 = vld [vmem:[#allocation2 + $0x588] sm:$0xf]  ;;  %6820 = vmatmul.bf16.vlgmr.msra.gmra.mxu0 %v16377_v48  ;;  %v11067_v33 = vor.u32 %v14277_v32, %v11066_v36  ;;  %v6538_v16 = vpop.f32.mrf.mxu1 }
 0x24c   : > { %v14245_v15 = vld [vmem:[#allocation2 + $0x594] sm:$0xf0]  ;;  %v11194_v49 = vld [vmem:[#allocation2 + $0x788] sm:$0xf]  ;;  %6928 = vmatpush.bf16.msrb.mxu2 %v11083_v12  ;;  %v10811_v55 = vor.u32 %v14213_v4, %v10810_v30 }
 0x24d   : > { %v14309_v31 = vld [vmem:[#allocation2 + $0x794] sm:$0xf0]  ;;  %6858 = vmatmul.bf16.vlgmr.msra.gmra.mxu2 %v16381_v54  ;;  %6890 = vmatpush.bf16.msrb.mxu0 %v10827_v35  ;;  %v11050_v38 = vld [vmem:[#allocation2 + $0x668] sm:$0xf]  ;;  %v10939_v2 = vor.u32 %v14245_v15, %v10938_v58  ;;  %v6519_v42 = vpop.f32.mrf.mxu0 }
 0x24e   : > { %v14273_v19 = vld [vmem:[#allocation2 + $0x674] sm:$0xf0]  ;;  %6909 = vmatpush.bf16.msrb.mxu1 %v10955_v3  ;;  %6947 = vmatpush.bf16.msrb.mxu3 %v11211_v27  ;;  %v11195_v61 = vor.u32 %v14309_v31, %v11194_v49  ;;  %v10794_v26 = vld [vmem:[#allocation2 + $0x468] sm:$0xf]  ;;  %v6520_v7 = vadd.f32 %v6519_v42, %v16748_v60 }
 0x24f   : > { %6839 = vmatmul.bf16.vlgmr.msra.gmra.mxu1 %v16379_v53  ;;  %v14209_v20 = vld [vmem:[#allocation2 + $0x474] sm:$0xf0]  ;;  %v10922_v22 = vld [vmem:[#allocation2 + $0x568] sm:$0xf]  ;;  %v6574_v63 = vpop.f32.mrf.mxu3  ;;  %v11051_v11 = vor.u32 %v14273_v19, %v11050_v38 }
 0x250   : > { %6877 = vmatmul.bf16.vlgmr.msra.gmra.mxu3 %v16383_v57  ;;  %v14241_v10 = vld [vmem:[#allocation2 + $0x574] sm:$0xf0]  ;;  %v11178_v21 = vld [vmem:[#allocation2 + $0x768] sm:$0xf]  ;;  %6929 = vmatpush.bf16.msrb.mxu2 %v11067_v33  ;;  %v10795_v47 = vor.u32 %v14209_v20, %v10794_v26  ;;  %v16765_v35 = vadd.f32 %v6574_v63, %v6556_v34  ;;  %v6539_v4 = vadd.f32 %v6538_v16, %v6520_v7 }
 0x251   : > { %v14305_v52 = vld [vmem:[#allocation2 + $0x774] sm:$0xf0]  ;;  %6891 = vmatpush.bf16.msrb.mxu0 %v10811_v55  ;;  %v11034_v37 = vld [vmem:[#allocation2 + $0x648] sm:$0xf]  ;;  %v10923_v36 = vor.u32 %v14241_v10, %v10922_v22  ;;  %v6557_v26 = vpop.f32.mrf.mxu2 }
 0x252   : > { %v14269_v12 = vld [vmem:[#allocation2 + $0x654] sm:$0xf0]  ;;  %6910 = vmatpush.bf16.msrb.mxu1 %v10939_v2  ;;  %6948 = vmatpush.bf16.msrb.mxu3 %v11195_v61  ;;  %v11179_v32 = vor.u32 %v14305_v52, %v11178_v21  ;;  %v10778_v3 = vld [vmem:[#allocation2 + $0x448] sm:$0xf]  ;;  %v6558_v10 = vadd.f32 %v6557_v26, %v6539_v4 }
 0x253   : > { %v14205_v27 = vld [vmem:[#allocation2 + $0x454] sm:$0xf0]  ;;  %v10906_v30 = vld [vmem:[#allocation2 + $0x548] sm:$0xf]  ;;  %v11035_v60 = vor.u32 %v14269_v12, %v11034_v37  ;;  %v6541_v52 = vpop.f32.mrf.mxu1 }
 0x254   : > { %v14237_v58 = vld [vmem:[#allocation2 + $0x554] sm:$0xf0]  ;;  %v11162_v59 = vld [vmem:[#allocation2 + $0x748] sm:$0xf]  ;;  %6930 = vmatpush.bf16.msrb.mxu2 %v11051_v11  ;;  %v10779_v49 = vor.u32 %v14205_v27, %v10778_v3 }
 0x255   : > { %v14301_v15 = vld [vmem:[#allocation2 + $0x754] sm:$0xf0]  ;;  %6892 = vmatpush.bf16.msrb.mxu0 %v10795_v47  ;;  %v11018_v31 = vld [vmem:[#allocation2 + $0x628] sm:$0xf]  ;;  %v10907_v55 = vor.u32 %v14237_v58, %v10906_v30  ;;  %v6522_v21 = vpop.f32.mrf.mxu0 }
 0x256   : > { %v14265_v33 = vld [vmem:[#allocation2 + $0x634] sm:$0xf0]  ;;  %6911 = vmatpush.bf16.msrb.mxu1 %v10923_v36  ;;  %6949 = vmatpush.bf16.msrb.mxu3 %v11179_v32  ;;  %v11163_v38 = vor.u32 %v14301_v15, %v11162_v59  ;;  %v10762_v19 = vld [vmem:[#allocation2 + $0x428] sm:$0xf]  ;;  %v6523_v42 = vadd.f32 %v6522_v21, %v16755_v43 }
 0x257   : > { %v14201_v2 = vld [vmem:[#allocation2 + $0x434] sm:$0xf0]  ;;  %v10890_v61 = vld [vmem:[#allocation2 + $0x528] sm:$0xf]  ;;  %v6576_v20 = vpop.f32.mrf.mxu3  ;;  %v11019_v16 = vor.u32 %v14265_v33, %v11018_v31 }
 0x258   : > { %v14233_v22 = vld [vmem:[#allocation2 + $0x534] sm:$0xf0]  ;;  %v11146_v62 = vld [vmem:[#allocation2 + $0x728] sm:$0xf]  ;;  %6931 = vmatpush.bf16.msrb.mxu2 %v11035_v60  ;;  %v10763_v7 = vor.u32 %v14201_v2, %v10762_v19  ;;  %v16768_v12 = vadd.f32 %v6576_v20, %v6558_v10  ;;  %v6542_v4 = vadd.f32 %v6541_v52, %v6523_v42 }
 0x259   : > { %v14297_v63 = vld [vmem:[#allocation2 + $0x734] sm:$0xf0]  ;;  %v11002_v34 = vld [vmem:[#allocation2 + $0x608] sm:$0xf]  ;;  %6893 = vmatpush.bf16.msrb.mxu0 %v10779_v49  ;;  %v10891_v36 = vor.u32 %v14233_v22, %v10890_v61  ;;  %v6560_v26 = vpop.f32.mrf.mxu2 }
 0x25a   : > { %v14261_v11 = vld [vmem:[#allocation2 + $0x614] sm:$0xf0]  ;;  %v10746_v47 = vld [vmem:[#allocation2 + $0x408] sm:$0xf]  ;;  %6912 = vmatpush.bf16.msrb.mxu1 %v10907_v55  ;;  %6950 = vmatpush.bf16.msrb.mxu3 %v11163_v38  ;;  %v11147_v32 = vor.u32 %v14297_v63, %v11146_v62  ;;  %v6561_v21 = vadd.f32 %v6560_v26, %v6542_v4 }
 0x25b   : > { %v14197_v37 = vld [vmem:[#allocation2 + $0x414] sm:$0xf0]  ;;  %v10874_v3 = vld [vmem:[#allocation2 + $0x508] sm:$0xf]  ;;  %6825 = vmatmul.bf16.gmra.mxu0 %v16397_v44  ;;  %v11003_v31 = vor.u32 %v14261_v11, %v11002_v34  ;;  %v6543_v42 = vpop.f32.mrf.mxu1 }
 0x25c   : > { %v14229_v27 = vld [vmem:[#allocation2 + $0x514] sm:$0xf0]  ;;  %v11130_v30 = vld [vmem:[#allocation2 + $0x708] sm:$0xf]  ;;  %6932 = vmatpush.bf16.msrb.mxu2 %v11019_v16  ;;  %v10747_v33 = vor.u32 %v14197_v37, %v10746_v47 }
 0x25d   : > { %v14293_v43 = vld [vmem:[#allocation2 + $0x714] sm:$0xf0]  ;;  %v11626_v58 = vld [vmem:[#allocation2 + $0xae8] sm:$0xf]  ;;  %6863 = vmatmul.bf16.gmra.mxu2 %v16401_v51  ;;  %6894 = vmatpush.bf16.msrb.mxu0 %v10763_v7  ;;  %v10875_v2 = vor.u32 %v14229_v27, %v10874_v3  ;;  %v6524_v52 = vpop.f32.mrf.mxu0 }
 0x25e   : > { %v14417_v59 = vld [vmem:[#allocation2 + $0xaf4] sm:$0xf0]  ;;  %v11370_v15 = vld [vmem:[#allocation2 + $0x8e8] sm:$0xf]  ;;  %6913 = vmatpush.bf16.msrb.mxu1 %v10891_v36  ;;  %6951 = vmatpush.bf16.msrb.mxu3 %v11147_v32  ;;  %v11131_v61 = vor.u32 %v14293_v43, %v11130_v30  ;;  %v6525_v37 = vadd.f32 %v6524_v52, %v16758_v25 }
 0x25f   : > { %6844 = vmatmul.bf16.gmra.mxu1 %v16399_v50  ;;  %v14353_v60 = vld [vmem:[#allocation2 + $0x8f4] sm:$0xf0]  ;;  %v11498_v49 = vld [vmem:[#allocation2 + $0x9e8] sm:$0xf]  ;;  %v6579_v20 = vpop.f32.mrf.mxu3  ;;  %v11627_v22 = vor.u32 %v14417_v59, %v11626_v58 }
 0x260   : > { %6882 = vmatmul.bf16.gmra.mxu3 %v16403_v56  ;;  %v14385_v55 = vld [vmem:[#allocation2 + $0x9f4] sm:$0xf0]  ;;  %v11754_v38 = vld [vmem:[#allocation2 + $0xbe8] sm:$0xf]  ;;  %v11371_v62 = vor.u32 %v14353_v60, %v11370_v15  ;;  %6933 = vmatpush.bf16.msrb.mxu2 %v11003_v31  ;;  %v16775_v27 = vadd.f32 %v6579_v20, %v6561_v21  ;;  %v6544_v30 = vadd.f32 %v6543_v42, %v6525_v37 }
 0x261   : > { %v14449_v19 = vld [vmem:[#allocation2 + $0xbf4] sm:$0xf0]  ;;  %v11610_v63 = vld [vmem:[#allocation2 + $0xac8] sm:$0xf]  ;;  %v11499_v16 = vor.u32 %v14385_v55, %v11498_v49  ;;  %6895 = vmatpush.bf16.msrb.mxu0 %v10747_v33  ;;  %v6562_v33 = vpop.f32.mrf.mxu2 }
 0x262   : > { %v14413_v10 = vld [vmem:[#allocation2 + $0xad4] sm:$0xf0]  ;;  %v11755_v7 = vor.u32 %v14449_v19, %v11754_v38  ;;  %v11354_v34 = vld [vmem:[#allocation2 + $0x8c8] sm:$0xf]  ;;  %6914 = vmatpush.bf16.msrb.mxu1 %v10875_v2  ;;  %6952 = vmatpush.bf16.msrb.mxu3 %v11131_v61  ;;  %v6563_v61 = vadd.f32 %v6562_v33, %v6544_v30 }
 0x263   : > { %v14349_v11 = vld [vmem:[#allocation2 + $0x8d4] sm:$0xf0]  ;;  %v11482_v47 = vld [vmem:[#allocation2 + $0x9c8] sm:$0xf]  ;;  %v11611_v4 = vor.u32 %v14413_v10, %v11610_v63  ;;  %v6612_v20 = vpop.f32.mrf.mxu1 }
 0x264   : > { %v14381_v36 = vld [vmem:[#allocation2 + $0x9d4] sm:$0xf0]  ;;  %v11738_v32 = vld [vmem:[#allocation2 + $0xbc8] sm:$0xf]  ;;  %7002 = vmatpush.bf16.msra.mxu2 %v11627_v22  ;;  %v11355_v43 = vor.u32 %v14349_v11, %v11354_v34 }
 0x265   : > { %v14445_v3 = vld [vmem:[#allocation2 + $0xbd4] sm:$0xf0]  ;;  %6964 = vmatpush.bf16.msra.mxu0 %v11371_v62  ;;  %v11483_v58 = vor.u32 %v14381_v36, %v11482_v47  ;;  %v11594_v15 = vld [vmem:[#allocation2 + $0xaa8] sm:$0xf]  ;;  %v6593_v26 = vpop.f32.mrf.mxu0 }
 0x266   : > { %6983 = vmatpush.bf16.msra.mxu1 %v11499_v16  ;;  %7021 = vmatpush.bf16.msra.mxu3 %v11755_v7  ;;  %v11739_v59 = vor.u32 %v14445_v3, %v11738_v32  ;;  %v14409_v25 = vld [vmem:[#allocation2 + $0xab4] sm:$0xf0]  ;;  %v11338_v60 = vld [vmem:[#allocation2 + $0x8a8] sm:$0xf]  ;;  %v6594_v22 = vadd.f32 %v6593_v26, %v16765_v35 }
 0x267   : > { %v14345_v49 = vld [vmem:[#allocation2 + $0x8b4] sm:$0xf0]  ;;  %v11466_v31 = vld [vmem:[#allocation2 + $0x9a8] sm:$0xf]  ;;  %v6581_v55 = vpop.f32.mrf.mxu3  ;;  %v11595_v62 = vor.u32 %v14409_v25, %v11594_v15 }
 0x268   : > { %7003 = vmatpush.bf16.msra.mxu2 %v11611_v4  ;;  %v14377_v38 = vld [vmem:[#allocation2 + $0x9b4] sm:$0xf0]  ;;  %v11722_v19 = vld [vmem:[#allocation2 + $0xba8] sm:$0xf]  ;;  %v11339_v63 = vor.u32 %v14345_v49, %v11338_v60  ;;  %v16778_v52 = vadd.f32 %v6581_v55, %v6563_v61  ;;  %v6613_v47 = vadd.f32 %v6612_v20, %v6594_v22 }
 0x269   : > { %6965 = vmatpush.bf16.msra.mxu0 %v11355_v43  ;;  %v14441_v2 = vld [vmem:[#allocation2 + $0xbb4] sm:$0xf0]  ;;  %v11578_v10 = vld [vmem:[#allocation2 + $0xa88] sm:$0xf]  ;;  %v11467_v42 = vor.u32 %v14377_v38, %v11466_v31  ;;  %v6631_v60 = vpop.f32.mrf.mxu2 }
 0x26a   : > { %6984 = vmatpush.bf16.msra.mxu1 %v11483_v58  ;;  %7022 = vmatpush.bf16.msra.mxu3 %v11739_v59  ;;  %v14405_v21 = vld [vmem:[#allocation2 + $0xa94] sm:$0xf0]  ;;  %v11723_v16 = vor.u32 %v14441_v2, %v11722_v19  ;;  %v11322_v7 = vld [vmem:[#allocation2 + $0x888] sm:$0xf]  ;;  %v6632_v38 = vadd.f32 %v6631_v60, %v6613_v47 }
 0x26b   : > { %v14341_v34 = vld [vmem:[#allocation2 + $0x894] sm:$0xf0]  ;;  %v11450_v11 = vld [vmem:[#allocation2 + $0x988] sm:$0xf]  ;;  %6896 = vmatmul.bf16.vlgmr.msrb.gmra.mxu0 %v16417_v0  ;;  %v11579_v35 = vor.u32 %v14405_v21, %v11578_v10  ;;  %v6614_v2 = vpop.f32.mrf.mxu1 }
 0x26c   : > { %v14373_v37 = vld [vmem:[#allocation2 + $0x994] sm:$0xf0]  ;;  %v11706_v36 = vld [vmem:[#allocation2 + $0xb88] sm:$0xf]  ;;  %7004 = vmatpush.bf16.msra.mxu2 %v11595_v62  ;;  %v11323_v3 = vor.u32 %v14341_v34, %v11322_v7 }
 0x26d   : > { %v14437_v32 = vld [vmem:[#allocation2 + $0xb94] sm:$0xf0]  ;;  %6934 = vmatmul.bf16.vlgmr.msrb.gmra.mxu2 %v16421_v5  ;;  %6966 = vmatpush.bf16.msra.mxu0 %v11339_v63  ;;  %v11562_v30 = vld [vmem:[#allocation2 + $0xa68] sm:$0xf]  ;;  %v11451_v43 = vor.u32 %v14373_v37, %v11450_v11  ;;  %v6595_v19 = vpop.f32.mrf.mxu0 }
 0x26e   : > { %v14401_v4 = vld [vmem:[#allocation2 + $0xa74] sm:$0xf0]  ;;  %6985 = vmatpush.bf16.msra.mxu1 %v11467_v42  ;;  %7023 = vmatpush.bf16.msra.mxu3 %v11723_v16  ;;  %v11707_v58 = vor.u32 %v14437_v32, %v11706_v36  ;;  %v11306_v59 = vld [vmem:[#allocation2 + $0x868] sm:$0xf]  ;;  %v6596_v61 = vadd.f32 %v6595_v19, %v16768_v12 }
 0x26f   : > { %6915 = vmatmul.bf16.vlgmr.msrb.gmra.mxu1 %v16419_v1  ;;  %v14337_v15 = vld [vmem:[#allocation2 + $0x874] sm:$0xf0]  ;;  %v11434_v25 = vld [vmem:[#allocation2 + $0x968] sm:$0xf]  ;;  %v11563_v26 = vor.u32 %v14401_v4, %v11562_v30 }
 0x270   : > { %6953 = vmatmul.bf16.vlgmr.msrb.gmra.mxu3 %v16423_v6  ;;  %v6650_v49 = vpop.f32.mrf.mxu3  ;;  %v14369_v31 = vld [vmem:[#allocation2 + $0x974] sm:$0xf0]  ;;  %v11690_v33 = vld [vmem:[#allocation2 + $0xb68] sm:$0xf]  ;;  %7005 = vmatpush.bf16.msra.mxu2 %v11579_v35  ;;  %v11307_v20 = vor.u32 %v14337_v15, %v11306_v59  ;;  %v6615_v34 = vadd.f32 %v6614_v2, %v6596_v61 }
 0x271   : > { %v14433_v55 = vld [vmem:[#allocation2 + $0xb74] sm:$0xf0]  ;;  %6967 = vmatpush.bf16.msra.mxu0 %v11323_v3  ;;  %v11546_v22 = vld [vmem:[#allocation2 + $0xa48] sm:$0xf]  ;;  %v16785_v63 = vadd.f32 %v6650_v49, %v6632_v38  ;;  %v11435_v10 = vor.u32 %v14369_v31, %v11434_v25  ;;  %v6633_v59 = vpop.f32.mrf.mxu2 }
 0x272   : > { %v14397_v62 = vld [vmem:[#allocation2 + $0xa54] sm:$0xf0]  ;;  %6986 = vmatpush.bf16.msra.mxu1 %v11451_v43  ;;  %7024 = vmatpush.bf16.msra.mxu3 %v11707_v58  ;;  %v11691_v21 = vor.u32 %v14433_v55, %v11690_v33  ;;  %v11290_v42 = vld [vmem:[#allocation2 + $0x848] sm:$0xf]  ;;  %v6634_v31 = vadd.f32 %v6633_v59, %v6615_v34 }
 0x273   : > { %v14333_v16 = vld [vmem:[#allocation2 + $0x854] sm:$0xf0]  ;;  %v11418_v7 = vld [vmem:[#allocation2 + $0x948] sm:$0xf]  ;;  %v11547_v12 = vor.u32 %v14397_v62, %v11546_v22 }
 0x274   : > { %v14365_v11 = vld [vmem:[#allocation2 + $0x954] sm:$0xf0]  ;;  %v11674_v47 = vld [vmem:[#allocation2 + $0xb48] sm:$0xf]  ;;  %7006 = vmatpush.bf16.msra.mxu2 %v11563_v26  ;;  %v11291_v36 = vor.u32 %v14333_v16, %v11290_v42 }
 0x275   : > { %v14429_v37 = vld [vmem:[#allocation2 + $0xb54] sm:$0xf0]  ;;  %6968 = vmatpush.bf16.msra.mxu0 %v11307_v20  ;;  %v11530_v32 = vld [vmem:[#allocation2 + $0xa28] sm:$0xf]  ;;  %v11419_v3 = vor.u32 %v14365_v11, %v11418_v7  ;;  %v6598_v33 = vpop.f32.mrf.mxu0 }
 0x276   : > { %v14393_v35 = vld [vmem:[#allocation2 + $0xa34] sm:$0xf0]  ;;  %6987 = vmatpush.bf16.msra.mxu1 %v11435_v10  ;;  %7025 = vmatpush.bf16.msra.mxu3 %v11691_v21  ;;  %v11675_v30 = vor.u32 %v14429_v37, %v11674_v47  ;;  %v11274_v4 = vld [vmem:[#allocation2 + $0x828] sm:$0xf]  ;;  %v6599_v19 = vadd.f32 %v6598_v33, %v16775_v27 }
 0x277   : > { %v14329_v43 = vld [vmem:[#allocation2 + $0x834] sm:$0xf0]  ;;  %v11402_v58 = vld [vmem:[#allocation2 + $0x928] sm:$0xf]  ;;  %v11531_v2 = vor.u32 %v14393_v35, %v11530_v32 }
 0x278   : > { %v6652_v15 = vpop.f32.mrf.mxu3  ;;  %v14361_v25 = vld [vmem:[#allocation2 + $0x934] sm:$0xf0]  ;;  %v11658_v60 = vld [vmem:[#allocation2 + $0xb28] sm:$0xf]  ;;  %7007 = vmatpush.bf16.msra.mxu2 %v11547_v12  ;;  %v11275_v61 = vor.u32 %v14329_v43, %v11274_v4 }
 0x279   : > { %v14425_v49 = vld [vmem:[#allocation2 + $0xb34] sm:$0xf0]  ;;  %v11514_v38 = vld [vmem:[#allocation2 + $0xa08] sm:$0xf]  ;;  %6969 = vmatpush.bf16.msra.mxu0 %v11291_v36  ;;  %v16788_v62 = vadd.f32 %v6652_v15, %v6634_v31  ;;  %v11403_v10 = vor.u32 %v14361_v25, %v11402_v58 }
 0x27a   : > { %v6617_v55 = vpop.f32.mrf.mxu1  ;;  %v14389_v26 = vld [vmem:[#allocation2 + $0xa14] sm:$0xf0]  ;;  %v11258_v20 = vld [vmem:[#allocation2 + $0x808] sm:$0xf]  ;;  %6988 = vmatpush.bf16.msra.mxu1 %v11419_v3  ;;  %7026 = vmatpush.bf16.msra.mxu3 %v11675_v30  ;;  %v11659_v21 = vor.u32 %v14425_v49, %v11658_v60 }
 0x27b   : > { %v14325_v22 = vld [vmem:[#allocation2 + $0x814] sm:$0xf0]  ;;  %v11386_v42 = vld [vmem:[#allocation2 + $0x908] sm:$0xf]  ;;  %v6618_v34 = vadd.f32 %v6617_v55, %v6599_v19  ;;  %6901 = vmatmul.bf16.gmra.mxu0 %v16437_v8  ;;  %v11515_v32 = vor.u32 %v14389_v26, %v11514_v38  ;;  %v6636_v59 = vpop.f32.mrf.mxu2 }
 0x27c   : > { %v14357_v16 = vld [vmem:[#allocation2 + $0x914] sm:$0xf0]  ;;  %v11642_v7 = vld [vmem:[#allocation2 + $0xb08] sm:$0xf]  ;;  %7008 = vmatpush.bf16.msra.mxu2 %v11531_v2  ;;  %v11259_v35 = vor.u32 %v14325_v22, %v11258_v20 }
 0x27d   : > { %v14421_v27 = vld [vmem:[#allocation2 + $0xb14] sm:$0xf0]  ;;  %v12138_v11 = vld [vmem:[#allocation2 + $0xee8] sm:$0xf]  ;;  %6939 = vmatmul.bf16.gmra.mxu2 %v16441_v13  ;;  %6970 = vmatpush.bf16.msra.mxu0 %v11275_v61  ;;  %v11387_v43 = vor.u32 %v14357_v16, %v11386_v42  ;;  %v6637_v33 = vadd.f32 %v6636_v59, %v6618_v34  ;;  %v6600_v55 = vpop.f32.mrf.mxu0 }
 0x27e   : > { %v14545_v47 = vld [vmem:[#allocation2 + $0xef4] sm:$0xf0]  ;;  %v11882_v37 = vld [vmem:[#allocation2 + $0xce8] sm:$0xf]  ;;  %6989 = vmatpush.bf16.msra.mxu1 %v11403_v10  ;;  %7027 = vmatpush.bf16.msra.mxu3 %v11659_v21  ;;  %v11643_v58 = vor.u32 %v14421_v27, %v11642_v7  ;;  %v6601_v22 = vadd.f32 %v6600_v55, %v16778_v52 }
 0x27f   : > { %6920 = vmatmul.bf16.gmra.mxu1 %v16439_v9  ;;  %v14481_v12 = vld [vmem:[#allocation2 + $0xcf4] sm:$0xf0]  ;;  %v12010_v36 = vld [vmem:[#allocation2 + $0xde8] sm:$0xf]  ;;  %v12139_v25 = vor.u32 %v14545_v47, %v12138_v11 }
 0x280   : > { %6958 = vmatmul.bf16.gmra.mxu3 %v16443_v14  ;;  %v14513_v3 = vld [vmem:[#allocation2 + $0xdf4] sm:$0xf0]  ;;  %v12266_v30 = vld [vmem:[#allocation2 + $0xfe8] sm:$0xf]  ;;  %v11883_v60 = vor.u32 %v14481_v12, %v11882_v37  ;;  %7009 = vmatpush.bf16.msra.mxu2 %v11515_v32 }
 0x281   : > { %v14577_v4 = vld [vmem:[#allocation2 + $0xff4] sm:$0xf0]  ;;  %v12122_v49 = vld [vmem:[#allocation2 + $0xec8] sm:$0xf]  ;;  %v12011_v2 = vor.u32 %v14513_v3, %v12010_v36  ;;  %6971 = vmatpush.bf16.msra.mxu0 %v11259_v35 }
 0x282   : > { %v6655_v15 = vpop.f32.mrf.mxu3  ;;  %v14541_v31 = vld [vmem:[#allocation2 + $0xed4] sm:$0xf0]  ;;  %v6619_v19 = vpop.f32.mrf.mxu1  ;;  %v12267_v61 = vor.u32 %v14577_v4, %v12266_v30  ;;  %v11866_v38 = vld [vmem:[#allocation2 + $0xcc8] sm:$0xf]  ;;  %6990 = vmatpush.bf16.msra.mxu1 %v11387_v43  ;;  %7028 = vmatpush.bf16.msra.mxu3 %v11643_v58 }
 0x283   : > { %v14477_v26 = vld [vmem:[#allocation2 + $0xcd4] sm:$0xf0]  ;;  %v11994_v20 = vld [vmem:[#allocation2 + $0xdc8] sm:$0xf]  ;;  %v16795_v16 = vadd.f32 %v6655_v15, %v6637_v33  ;;  %v6620_v7 = vadd.f32 %v6619_v19, %v6601_v22  ;;  %v12123_v34 = vor.u32 %v14541_v31, %v12122_v49  ;;  %v6638_v35 = vpop.f32.mrf.mxu2 }
 0x284   : > { %v14509_v10 = vld [vmem:[#allocation2 + $0xdd4] sm:$0xf0]  ;;  %v12250_v21 = vld [vmem:[#allocation2 + $0xfc8] sm:$0xf]  ;;  %7078 = vmatpush.bf16.msrb.mxu2 %v12139_v25  ;;  %v11867_v27 = vor.u32 %v14477_v26, %v11866_v38 }
 0x285   : > { %v14573_v42 = vld [vmem:[#allocation2 + $0xfd4] sm:$0xf0]  ;;  %7040 = vmatpush.bf16.msrb.mxu0 %v11883_v60  ;;  %v11995_v11 = vor.u32 %v14509_v10, %v11994_v20  ;;  %v12106_v37 = vld [vmem:[#allocation2 + $0xea8] sm:$0xf]  ;;  %v6639_v58 = vadd.f32 %v6638_v35, %v6620_v7  ;;  %v6669_v59 = vpop.f32.mrf.mxu0 }
 0x286   : > { %7059 = vmatpush.bf16.msrb.mxu1 %v12011_v2  ;;  %7097 = vmatpush.bf16.msrb.mxu3 %v12267_v61  ;;  %v12251_v47 = vor.u32 %v14573_v42, %v12250_v21  ;;  %v14537_v52 = vld [vmem:[#allocation2 + $0xeb4] sm:$0xf0]  ;;  %v11850_v12 = vld [vmem:[#allocation2 + $0xca8] sm:$0xf]  ;;  %v6670_v25 = vadd.f32 %v6669_v59, %v16785_v63 }
 0x287   : > { %v14473_v36 = vld [vmem:[#allocation2 + $0xcb4] sm:$0xf0]  ;;  %v11978_v32 = vld [vmem:[#allocation2 + $0xda8] sm:$0xf]  ;;  %v12107_v60 = vor.u32 %v14537_v52, %v12106_v37 }
 0x288   : > { %7079 = vmatpush.bf16.msrb.mxu2 %v12123_v34  ;;  %v14505_v30 = vld [vmem:[#allocation2 + $0xdb4] sm:$0xf0]  ;;  %v12234_v4 = vld [vmem:[#allocation2 + $0xfa8] sm:$0xf]  ;;  %v11851_v49 = vor.u32 %v14473_v36, %v11850_v12 }
 0x289   : > { %7041 = vmatpush.bf16.msrb.mxu0 %v11867_v27  ;;  %v14569_v43 = vld [vmem:[#allocation2 + $0xfb4] sm:$0xf0]  ;;  %v12090_v31 = vld [vmem:[#allocation2 + $0xe88] sm:$0xf]  ;;  %v11979_v19 = vor.u32 %v14505_v30, %v11978_v32 }
 0x28a   : > { %v6657_v3 = vpop.f32.mrf.mxu3  ;;  %v6688_v15 = vpop.f32.mrf.mxu1  ;;  %7060 = vmatpush.bf16.msrb.mxu1 %v11995_v11  ;;  %7098 = vmatpush.bf16.msrb.mxu3 %v12251_v47  ;;  %v14533_v33 = vld [vmem:[#allocation2 + $0xe94] sm:$0xf0]  ;;  %v12235_v2 = vor.u32 %v14569_v43, %v12234_v4  ;;  %v11834_v61 = vld [vmem:[#allocation2 + $0xc88] sm:$0xf] }
 0x28b   : > { %v16798_v55 = vadd.f32 %v6657_v3, %v6639_v58  ;;  %v14469_v38 = vld [vmem:[#allocation2 + $0xc94] sm:$0xf0]  ;;  %v11962_v26 = vld [vmem:[#allocation2 + $0xd88] sm:$0xf]  ;;  %v6689_v20 = vadd.f32 %v6688_v15, %v6670_v25  ;;  %6972 = vmatmul.bf16.vlgmr.msra.gmra.mxu0 %v16457_v23  ;;  %v12091_v63 = vor.u32 %v14533_v33, %v12090_v31 }
 0x28c   : > { %v14501_v22 = vld [vmem:[#allocation2 + $0xd94] sm:$0xf0]  ;;  %v12218_v10 = vld [vmem:[#allocation2 + $0xf88] sm:$0xf]  ;;  %7080 = vmatpush.bf16.msrb.mxu2 %v12107_v60  ;;  %v11835_v42 = vor.u32 %v14469_v38, %v11834_v61  ;;  %v6707_v12 = vpop.f32.mrf.mxu2 }
 0x28d   : > { %v14565_v21 = vld [vmem:[#allocation2 + $0xf94] sm:$0xf0]  ;;  %7010 = vmatmul.bf16.vlgmr.msra.gmra.mxu2 %v16461_v28  ;;  %7042 = vmatpush.bf16.msrb.mxu0 %v11851_v49  ;;  %v12074_v7 = vld [vmem:[#allocation2 + $0xe68] sm:$0xf]  ;;  %v11963_v27 = vor.u32 %v14501_v22, %v11962_v26  ;;  %v6708_v30 = vadd.f32 %v6707_v12, %v6689_v20  ;;  %v6671_v4 = vpop.f32.mrf.mxu0 }
 0x28e   : > { %v14529_v34 = vld [vmem:[#allocation2 + $0xe74] sm:$0xf0]  ;;  %7061 = vmatpush.bf16.msrb.mxu1 %v11979_v19  ;;  %7099 = vmatpush.bf16.msrb.mxu3 %v12235_v2  ;;  %v12219_v11 = vor.u32 %v14565_v21, %v12218_v10  ;;  %v11818_v47 = vld [vmem:[#allocation2 + $0xc68] sm:$0xf]  ;;  %v6672_v58 = vadd.f32 %v6671_v4, %v16788_v62 }
 0x28f   : > { %6991 = vmatmul.bf16.vlgmr.msra.gmra.mxu1 %v16459_v24  ;;  %v14465_v37 = vld [vmem:[#allocation2 + $0xc74] sm:$0xf0]  ;;  %v11946_v52 = vld [vmem:[#allocation2 + $0xd68] sm:$0xf]  ;;  %v12075_v59 = vor.u32 %v14529_v34, %v12074_v7 }
 0x290   : > { %7029 = vmatmul.bf16.vlgmr.msra.gmra.mxu3 %v16463_v29  ;;  %v14497_v32 = vld [vmem:[#allocation2 + $0xd74] sm:$0xf0]  ;;  %v12202_v35 = vld [vmem:[#allocation2 + $0xf68] sm:$0xf]  ;;  %7081 = vmatpush.bf16.msrb.mxu2 %v12091_v63  ;;  %v11819_v15 = vor.u32 %v14465_v37, %v11818_v47 }
 0x291   : > { %v14561_v3 = vld [vmem:[#allocation2 + $0xf74] sm:$0xf0]  ;;  %7043 = vmatpush.bf16.msrb.mxu0 %v11835_v42  ;;  %v12058_v25 = vld [vmem:[#allocation2 + $0xe48] sm:$0xf]  ;;  %v11947_v31 = vor.u32 %v14497_v32, %v11946_v52 }
 0x292   : > { %v6726_v36 = vpop.f32.mrf.mxu3  ;;  %v6690_v43 = vpop.f32.mrf.mxu1  ;;  %v14525_v60 = vld [vmem:[#allocation2 + $0xe54] sm:$0xf0]  ;;  %7062 = vmatpush.bf16.msrb.mxu1 %v11963_v27  ;;  %7100 = vmatpush.bf16.msrb.mxu3 %v12219_v11  ;;  %v12203_v33 = vor.u32 %v14561_v3, %v12202_v35  ;;  %v11802_v19 = vld [vmem:[#allocation2 + $0xc48] sm:$0xf] }
 0x293   : > { %v16805_v49 = vadd.f32 %v6726_v36, %v6708_v30  ;;  %v14461_v2 = vld [vmem:[#allocation2 + $0xc54] sm:$0xf0]  ;;  %v11930_v61 = vld [vmem:[#allocation2 + $0xd48] sm:$0xf]  ;;  %v6691_v38 = vadd.f32 %v6690_v43, %v6672_v58  ;;  %v12059_v62 = vor.u32 %v14525_v60, %v12058_v25 }
 0x294   : > { %v14493_v26 = vld [vmem:[#allocation2 + $0xd54] sm:$0xf0]  ;;  %v12186_v20 = vld [vmem:[#allocation2 + $0xf48] sm:$0xf]  ;;  %7082 = vmatpush.bf16.msrb.mxu2 %v12075_v59  ;;  %v11803_v10 = vor.u32 %v14461_v2, %v11802_v19  ;;  %v6709_v47 = vpop.f32.mrf.mxu2 }
 0x295   : > { %v14557_v22 = vld [vmem:[#allocation2 + $0xf54] sm:$0xf0]  ;;  %7044 = vmatpush.bf16.msrb.mxu0 %v11819_v15  ;;  %v12042_v21 = vld [vmem:[#allocation2 + $0xe28] sm:$0xf]  ;;  %v11931_v42 = vor.u32 %v14493_v26, %v11930_v61  ;;  %v6710_v32 = vadd.f32 %v6709_v47, %v6691_v38  ;;  %v6674_v35 = vpop.f32.mrf.mxu0 }
 0x296   : > { %v14521_v63 = vld [vmem:[#allocation2 + $0xe34] sm:$0xf0]  ;;  %7063 = vmatpush.bf16.msrb.mxu1 %v11947_v31  ;;  %7101 = vmatpush.bf16.msrb.mxu3 %v12203_v33  ;;  %v12187_v7 = vor.u32 %v14557_v22, %v12186_v20  ;;  %v11786_v34 = vld [vmem:[#allocation2 + $0xc28] sm:$0xf]  ;;  %v6675_v4 = vadd.f32 %v6674_v35, %v16795_v16 }
 0x297   : > { %v14457_v27 = vld [vmem:[#allocation2 + $0xc34] sm:$0xf0]  ;;  %v11914_v11 = vld [vmem:[#allocation2 + $0xd28] sm:$0xf]  ;;  %v12043_v43 = vor.u32 %v14521_v63, %v12042_v21 }
 0x298   : > { %v14489_v52 = vld [vmem:[#allocation2 + $0xd34] sm:$0xf0]  ;;  %v12170_v12 = vld [vmem:[#allocation2 + $0xf28] sm:$0xf]  ;;  %7083 = vmatpush.bf16.msrb.mxu2 %v12059_v62  ;;  %v11787_v58 = vor.u32 %v14457_v27, %v11786_v34 }
 0x299   : > { %v14553_v36 = vld [vmem:[#allocation2 + $0xf34] sm:$0xf0]  ;;  %v12026_v30 = vld [vmem:[#allocation2 + $0xe08] sm:$0xf]  ;;  %7045 = vmatpush.bf16.msrb.mxu0 %v11803_v10  ;;  %v11915_v31 = vor.u32 %v14489_v52, %v11914_v11 }
 0x29a   : > { %v6728_v37 = vpop.f32.mrf.mxu3  ;;  %v14517_v59 = vld [vmem:[#allocation2 + $0xe14] sm:$0xf0]  ;;  %v11770_v15 = vld [vmem:[#allocation2 + $0xc08] sm:$0xf]  ;;  %7064 = vmatpush.bf16.msrb.mxu1 %v11931_v42  ;;  %7102 = vmatpush.bf16.msrb.mxu3 %v12187_v7  ;;  %v12171_v33 = vor.u32 %v14553_v36, %v12170_v12 }
 0x29b   : > { %v14453_v25 = vld [vmem:[#allocation2 + $0xc14] sm:$0xf0]  ;;  %v16808_v60 = vadd.f32 %v6728_v37, %v6710_v32  ;;  %v11898_v19 = vld [vmem:[#allocation2 + $0xd08] sm:$0xf]  ;;  %6977 = vmatmul.bf16.gmra.mxu0 %v16477_v39  ;;  %v12027_v21 = vor.u32 %v14517_v59, %v12026_v30 }
 0x29c   : > { %v6693_v3 = vpop.f32.mrf.mxu1  ;;  %v14485_v2 = vld [vmem:[#allocation2 + $0xd14] sm:$0xf0]  ;;  %v12154_v61 = vld [vmem:[#allocation2 + $0xf08] sm:$0xf]  ;;  %7084 = vmatpush.bf16.msrb.mxu2 %v12043_v43  ;;  %v11771_v63 = vor.u32 %v14453_v25, %v11770_v15 }
 0x29d   : > { %v6694_v38 = vadd.f32 %v6693_v3, %v6675_v4  ;;  %v14549_v16 = vld [vmem:[#allocation2 + $0xf14] sm:$0xf0]  ;;  %v12650_v26 = vld [vmem:[#allocation2 + $0x12e8] sm:$0xf]  ;;  %7015 = vmatmul.bf16.gmra.mxu2 %v16481_v45  ;;  %7046 = vmatpush.bf16.msrb.mxu0 %v11787_v58  ;;  %v11899_v27 = vor.u32 %v14485_v2, %v11898_v19  ;;  %v6712_v47 = vpop.f32.mrf.mxu2  ;;  %v6676_v3 = vpop.f32.mrf.mxu0 }
 0x29e   : > { %v14673_v20 = vld [vmem:[#allocation2 + $0x12f4] sm:$0xf0]  ;;  %v12394_v22 = vld [vmem:[#allocation2 + $0x10e8] sm:$0xf]  ;;  %7065 = vmatpush.bf16.msrb.mxu1 %v11915_v31  ;;  %7103 = vmatpush.bf16.msrb.mxu3 %v12171_v33  ;;  %v12155_v11 = vor.u32 %v14549_v16, %v12154_v61  ;;  %v6677_v25 = vadd.f32 %v6676_v3, %v16798_v55 }
 0x29f   : > { %6996 = vmatmul.bf16.gmra.mxu1 %v16479_v40  ;;  %v14609_v62 = vld [vmem:[#allocation2 + $0x10f4] sm:$0xf0]  ;;  %v12522_v10 = vld [vmem:[#allocation2 + $0x11e8] sm:$0xf]  ;;  %v12651_v52 = vor.u32 %v14673_v20, %v12650_v26  ;;  %v6713_v35 = vadd.f32 %v6712_v47, %v6694_v38 }
 0x2a0   : > { %7034 = vmatmul.bf16.gmra.mxu3 %v16483_v46  ;;  %v14641_v42 = vld [vmem:[#allocation2 + $0x11f4] sm:$0xf0]  ;;  %v12778_v7 = vld [vmem:[#allocation2 + $0x13e8] sm:$0xf]  ;;  %v12395_v12 = vor.u32 %v14609_v62, %v12394_v22  ;;  %7085 = vmatpush.bf16.msrb.mxu2 %v12027_v21 }
 0x2a1   : > { %v14705_v34 = vld [vmem:[#allocation2 + $0x13f4] sm:$0xf0]  ;;  %v12634_v36 = vld [vmem:[#allocation2 + $0x12c8] sm:$0xf]  ;;  %v12523_v43 = vor.u32 %v14641_v42, %v12522_v10  ;;  %7047 = vmatpush.bf16.msrb.mxu0 %v11771_v63 }
 0x2a2   : > { %v14669_v32 = vld [vmem:[#allocation2 + $0x12d4] sm:$0xf0]  ;;  %v12779_v58 = vor.u32 %v14705_v34, %v12778_v7  ;;  %v12378_v30 = vld [vmem:[#allocation2 + $0x10c8] sm:$0xf]  ;;  %7066 = vmatpush.bf16.msrb.mxu1 %v11899_v27  ;;  %7104 = vmatpush.bf16.msrb.mxu3 %v12155_v11 }
 0x2a3   : > { %v6731_v37 = vpop.f32.mrf.mxu3  ;;  %v14605_v59 = vld [vmem:[#allocation2 + $0x10d4] sm:$0xf0]  ;;  %v12506_v15 = vld [vmem:[#allocation2 + $0x11c8] sm:$0xf]  ;;  %v12635_v38 = vor.u32 %v14669_v32, %v12634_v36 }
 0x2a4   : > { %v6695_v4 = vpop.f32.mrf.mxu1  ;;  %v14637_v31 = vld [vmem:[#allocation2 + $0x11d4] sm:$0xf0]  ;;  %v12762_v33 = vld [vmem:[#allocation2 + $0x13c8] sm:$0xf]  ;;  %v16815_v2 = vadd.f32 %v6731_v37, %v6713_v35  ;;  %7154 = vmatpush.bf16.msra.mxu2 %v12651_v52  ;;  %v12379_v16 = vor.u32 %v14605_v59, %v12378_v30 }
 0x2a5   : > { %v14701_v19 = vld [vmem:[#allocation2 + $0x13d4] sm:$0xf0]  ;;  %v6696_v61 = vadd.f32 %v6695_v4, %v6677_v25  ;;  %7116 = vmatpush.bf16.msra.mxu0 %v12395_v12  ;;  %v12507_v26 = vor.u32 %v14637_v31, %v12506_v15  ;;  %v12618_v22 = vld [vmem:[#allocation2 + $0x12a8] sm:$0xf]  ;;  %v6714_v63 = vpop.f32.mrf.mxu2 }
 0x2a6   : > { %7135 = vmatpush.bf16.msra.mxu1 %v12523_v43  ;;  %7173 = vmatpush.bf16.msra.mxu3 %v12779_v58  ;;  %v12763_v20 = vor.u32 %v14701_v19, %v12762_v33  ;;  %v14665_v55 = vld [vmem:[#allocation2 + $0x12b4] sm:$0xf0]  ;;  %v12362_v62 = vld [vmem:[#allocation2 + $0x10a8] sm:$0xf] }
 0x2a7   : > { %v14601_v10 = vld [vmem:[#allocation2 + $0x10b4] sm:$0xf0]  ;;  %v12490_v21 = vld [vmem:[#allocation2 + $0x11a8] sm:$0xf]  ;;  %v6715_v11 = vadd.f32 %v6714_v63, %v6696_v61  ;;  %v6745_v47 = vpop.f32.mrf.mxu0  ;;  %v12619_v12 = vor.u32 %v14665_v55, %v12618_v22 }
 0x2a8   : > { %7155 = vmatpush.bf16.msra.mxu2 %v12635_v38  ;;  %v14633_v7 = vld [vmem:[#allocation2 + $0x11b4] sm:$0xf0]  ;;  %v12746_v34 = vld [vmem:[#allocation2 + $0x13a8] sm:$0xf]  ;;  %v6746_v52 = vadd.f32 %v6745_v47, %v16805_v49  ;;  %v12363_v36 = vor.u32 %v14601_v10, %v12362_v62 }
 0x2a9   : > { %7117 = vmatpush.bf16.msra.mxu0 %v12379_v16  ;;  %v14697_v27 = vld [vmem:[#allocation2 + $0x13b4] sm:$0xf0]  ;;  %v12602_v32 = vld [vmem:[#allocation2 + $0x1288] sm:$0xf]  ;;  %v12491_v4 = vor.u32 %v14633_v7, %v12490_v21 }
 0x2aa   : > { %7136 = vmatpush.bf16.msra.mxu1 %v12507_v26  ;;  %7174 = vmatpush.bf16.msra.mxu3 %v12763_v20  ;;  %v14661_v35 = vld [vmem:[#allocation2 + $0x1294] sm:$0xf0]  ;;  %v12747_v43 = vor.u32 %v14697_v27, %v12746_v34  ;;  %v12346_v58 = vld [vmem:[#allocation2 + $0x1088] sm:$0xf] }
 0x2ab   : > { %v6733_v42 = vpop.f32.mrf.mxu3  ;;  %v14597_v30 = vld [vmem:[#allocation2 + $0x1094] sm:$0xf0]  ;;  %v12474_v59 = vld [vmem:[#allocation2 + $0x1188] sm:$0xf]  ;;  %7048 = vmatmul.bf16.vlgmr.msrb.gmra.mxu0 %v16497_v17  ;;  %v12603_v61 = vor.u32 %v14661_v35, %v12602_v32 }
 0x2ac   : > { %v6764_v37 = vpop.f32.mrf.mxu1  ;;  %v16818_v3 = vadd.f32 %v6733_v42, %v6715_v11  ;;  %v14629_v25 = vld [vmem:[#allocation2 + $0x1194] sm:$0xf0]  ;;  %v12730_v31 = vld [vmem:[#allocation2 + $0x1388] sm:$0xf]  ;;  %7156 = vmatpush.bf16.msra.mxu2 %v12619_v12  ;;  %v12347_v38 = vor.u32 %v14597_v30, %v12346_v58 }
 0x2ad   : > { %v6765_v15 = vadd.f32 %v6764_v37, %v6746_v52  ;;  %v14693_v33 = vld [vmem:[#allocation2 + $0x1394] sm:$0xf0]  ;;  %v17289_v49 = vld [vmem:[#allocation54_spill] sm:$0xff]  ;;  %7118 = vmatpush.bf16.msra.mxu0 %v12363_v36  ;;  %v12475_v20 = vor.u32 %v14629_v25, %v12474_v59 }
 0x2ae   : > { %7086 = vmatmul.bf16.vlgmr.msrb.gmra.mxu2 %v17289_v49  ;;  %v17290_v19 = vld [vmem:[#allocation55_spill] sm:$0xff]  ;;  %v12586_v16 = vld [vmem:[#allocation2 + $0x1268] sm:$0xf]  ;;  %7137 = vmatpush.bf16.msra.mxu1 %v12491_v4  ;;  %v12731_v22 = vor.u32 %v14693_v33, %v12730_v31  ;;  %v6783_v21 = vpop.f32.mrf.mxu2 }
 0x2af   : > { %7067 = vmatmul.bf16.vlgmr.msrb.gmra.mxu1 %v16499_v18  ;;  %v14657_v26 = vld [vmem:[#allocation2 + $0x1274] sm:$0xf0]  ;;  %7175 = vmatpush.bf16.msra.mxu3 %v12747_v43  ;;  %v12330_v55 = vld [vmem:[#allocation2 + $0x1068] sm:$0xf]  ;;  %v6784_v27 = vadd.f32 %v6783_v21, %v6765_v15  ;;  %v6747_v11 = vpop.f32.mrf.mxu0 }
 0x2b0   : > { %7105 = vmatmul.bf16.vlgmr.msrb.gmra.mxu3 %v17290_v19  ;;  %v14593_v62 = vld [vmem:[#allocation2 + $0x1074] sm:$0xf0]  ;;  %v12458_v10 = vld [vmem:[#allocation2 + $0x1168] sm:$0xf]  ;;  %v6748_v37 = vadd.f32 %v6747_v11, %v16808_v60  ;;  %7157 = vmatpush.bf16.msra.mxu2 %v12603_v61  ;;  %v12587_v52 = vor.u32 %v14657_v26, %v12586_v16 }
 0x2b1   : > { %v14625_v42 = vld [vmem:[#allocation2 + $0x1174] sm:$0xf0]  ;;  %v12714_v7 = vld [vmem:[#allocation2 + $0x1368] sm:$0xf]  ;;  %7119 = vmatpush.bf16.msra.mxu0 %v12347_v38  ;;  %v12331_v12 = vor.u32 %v14593_v62, %v12330_v55 }
 0x2b2   : > { %v14689_v34 = vld [vmem:[#allocation2 + $0x1374] sm:$0xf0]  ;;  %v12570_v36 = vld [vmem:[#allocation2 + $0x1248] sm:$0xf]  ;;  %7138 = vmatpush.bf16.msra.mxu1 %v12475_v20  ;;  %v12459_v4 = vor.u32 %v14625_v42, %v12458_v10 }
 0x2b3   : > { %v6802_v63 = vpop.f32.mrf.mxu3  ;;  %v14653_v32 = vld [vmem:[#allocation2 + $0x1254] sm:$0xf0]  ;;  %7176 = vmatpush.bf16.msra.mxu3 %v12731_v22  ;;  %v12715_v43 = vor.u32 %v14689_v34, %v12714_v7  ;;  %v12314_v58 = vld [vmem:[#allocation2 + $0x1048] sm:$0xf] }
 0x2b4   : > { %v6766_v47 = vpop.f32.mrf.mxu1  ;;  %v16825_v35 = vadd.f32 %v6802_v63, %v6784_v27  ;;  %v14589_v30 = vld [vmem:[#allocation2 + $0x1054] sm:$0xf0]  ;;  %v12442_v59 = vld [vmem:[#allocation2 + $0x1148] sm:$0xf]  ;;  %7158 = vmatpush.bf16.msra.mxu2 %v12587_v52  ;;  %v12571_v60 = vor.u32 %v14653_v32, %v12570_v36 }
 0x2b5   : > { %v6767_v15 = vadd.f32 %v6766_v47, %v6748_v37  ;;  %v14621_v25 = vld [vmem:[#allocation2 + $0x1154] sm:$0xf0]  ;;  %v12698_v31 = vld [vmem:[#allocation2 + $0x1348] sm:$0xf]  ;;  %7120 = vmatpush.bf16.msra.mxu0 %v12331_v12  ;;  %v12315_v61 = vor.u32 %v14589_v30, %v12314_v58 }
 0x2b6   : > { %v14685_v33 = vld [vmem:[#allocation2 + $0x1354] sm:$0xf0]  ;;  %v12554_v38 = vld [vmem:[#allocation2 + $0x1228] sm:$0xf]  ;;  %7139 = vmatpush.bf16.msra.mxu1 %v12459_v4  ;;  %v12443_v26 = vor.u32 %v14621_v25, %v12442_v59  ;;  %v6785_v10 = vpop.f32.mrf.mxu2 }
 0x2b7   : > { %v14649_v16 = vld [vmem:[#allocation2 + $0x1234] sm:$0xf0]  ;;  %7177 = vmatpush.bf16.msra.mxu3 %v12715_v43  ;;  %v12699_v20 = vor.u32 %v14685_v33, %v12698_v31  ;;  %v12298_v22 = vld [vmem:[#allocation2 + $0x1028] sm:$0xf]  ;;  %v6786_v34 = vadd.f32 %v6785_v10, %v6767_v15  ;;  %v6750_v27 = vpop.f32.mrf.mxu0 }
 0x2b8   : > { %v14585_v55 = vld [vmem:[#allocation2 + $0x1034] sm:$0xf0]  ;;  %v12426_v62 = vld [vmem:[#allocation2 + $0x1128] sm:$0xf]  ;;  %v6751_v52 = vadd.f32 %v6750_v27, %v16815_v2  ;;  %7159 = vmatpush.bf16.msra.mxu2 %v12571_v60  ;;  %v12555_v12 = vor.u32 %v14649_v16, %v12554_v38  ;;  %v7725_v38 = vmax.f32 %v16825_v35, 0.0 }
 0x2b9   : > { %v14617_v63 = vld [vmem:[#allocation2 + $0x1134] sm:$0xf0]  ;;  %v12682_v42 = vld [vmem:[#allocation2 + $0x1328] sm:$0xf]  ;;  %7121 = vmatpush.bf16.msra.mxu0 %v12315_v61  ;;  %v12299_v36 = vor.u32 %v14585_v55, %v12298_v22 }
 0x2ba   : > { %v14681_v7 = vld [vmem:[#allocation2 + $0x1334] sm:$0xf0]  ;;  %v12538_v47 = vld [vmem:[#allocation2 + $0x1208] sm:$0xf]  ;;  %7140 = vmatpush.bf16.msra.mxu1 %v12443_v26  ;;  %v12427_v30 = vor.u32 %v14617_v63, %v12426_v62 }
 0x2bb   : > { %v6804_v21 = vpop.f32.mrf.mxu3  ;;  %v14645_v37 = vld [vmem:[#allocation2 + $0x1214] sm:$0xf0]  ;;  %v12282_v32 = vld [vmem:[#allocation2 + $0x1008] sm:$0xf]  ;;  %7178 = vmatpush.bf16.msra.mxu3 %v12699_v20  ;;  %v12683_v59 = vor.u32 %v14681_v7, %v12682_v42 }
 0x2bc   : > { %v6769_v11 = vpop.f32.mrf.mxu1  ;;  %v14581_v4 = vld [vmem:[#allocation2 + $0x1014] sm:$0xf0]  ;;  %v12410_v43 = vld [vmem:[#allocation2 + $0x1108] sm:$0xf]  ;;  %v6805_v58 = vadd.f32 %v6804_v21, %v6786_v34  ;;  %7160 = vmatpush.bf16.msra.mxu2 %v12555_v12  ;;  %v12539_v62 = vor.u32 %v14645_v37, %v12538_v47 }
 0x2bd   : > { %v14613_v25 = vld [vmem:[#allocation2 + $0x1114] sm:$0xf0]  ;;  %v12666_v15 = vld [vmem:[#allocation2 + $0x1308] sm:$0xf]  ;;  %v6770_v33 = vadd.f32 %v6769_v11, %v6751_v52  ;;  %7122 = vmatpush.bf16.msra.mxu0 %v12299_v36  ;;  %v12283_v21 = vor.u32 %v14581_v4, %v12282_v32 }
 0x2be   : > { %v14677_v31 = vld [vmem:[#allocation2 + $0x1314] sm:$0xf0]  ;;  %v17292_v19 = vld [vmem:[#allocation57_spill] sm:$0xff]  ;;  %v7729_v16 = vmax.f32 %v6805_v58, 0.0  ;;  %v17293_v22 = vld [vmem:[#allocation58_spill] sm:$0xff]  ;;  %7141 = vmatpush.bf16.msra.mxu1 %v12427_v30  ;;  %v12411_v27 = vor.u32 %v14613_v25, %v12410_v43 }
 0x2bf   : > { %v17291_v10 = vld [vmem:[#allocation56_spill] sm:$0xff]  ;;  %7072 = vmatmul.bf16.gmra.mxu1 %v17292_v19  ;;  %v13162_v2 = vld [vmem:[#allocation2 + $0x16e8] sm:$0xf]  ;;  %7091 = vmatmul.bf16.gmra.mxu2 %v17293_v22  ;;  %v17294_v26 = vld [vmem:[#allocation59_spill] sm:$0xff]  ;;  %v12667_v35 = vor.u32 %v14677_v31, %v12666_v15  ;;  %v6752_v12 = vpop.f32.mrf.mxu0 }
 0x2c0   : > { %7053 = vmatmul.bf16.gmra.mxu0 %v17291_v10  ;;  %v14801_v60 = vld [vmem:[#allocation2 + $0x16f4] sm:$0xf0]  ;;  %v12906_v61 = vld [vmem:[#allocation2 + $0x14e8] sm:$0xf]  ;;  %7110 = vmatmul.bf16.gmra.mxu3 %v17294_v26  ;;  %v16833_v34 = vpack.c.bf16 %v7729_v16, %v7725_v38  ;;  %v6788_v11 = vpop.f32.mrf.mxu2  ;;  %v6753_v38 = vadd.f32 %v6752_v12, %v16818_v3 }
 0x2c1   : > { %v14737_v20 = vld [vmem:[#allocation2 + $0x14f4] sm:$0xf0]  ;;  %v13034_v55 = vld [vmem:[#allocation2 + $0x15e8] sm:$0xf]  ;;  %7179 = vmatpush.bf16.msra.mxu3 %v12683_v59  ;;  %v13163_v58 = vor.u32 %v14801_v60, %v13162_v2  ;;  %v6789_v10 = vadd.f32 %v6788_v11, %v6770_v33  ;;  %7161 = vmatpush.bf16.msra.mxu2 %v12539_v62 }
 0x2c2   : > { %v14769_v63 = vld [vmem:[#allocation2 + $0x15f4] sm:$0xf0]  ;;  %v13290_v42 = vld [vmem:[#allocation2 + $0x17e8] sm:$0xf]  ;;  %17295 = vst [vmem:[#allocation68_spill] sm:$0xff] %v16833_v34  ;;  %v12907_v22 = vor.u32 %v14737_v20, %v12906_v61  ;;  %7123 = vmatpush.bf16.msra.mxu0 %v12283_v21  ;;  %7142 = vmatpush.bf16.msra.mxu1 %v12411_v27 }
 0x2c3   : > { %v14833_v7 = vld [vmem:[#allocation2 + $0x17f4] sm:$0xf0]  ;;  %v6807_v52 = vpop.f32.mrf.mxu3  ;;  %v13146_v26 = vld [vmem:[#allocation2 + $0x16c8] sm:$0xf]  ;;  %v13035_v47 = vor.u32 %v14769_v63, %v13034_v55  ;;  %v15245_v61 = vld [vmem:[#allocation4] sm:$0xf] }
 0x2c4   : > { %v14797_v19 = vld [vmem:[#allocation2 + $0x16d4] sm:$0xf0]  ;;  %v6771_v36 = vpop.f32.mrf.mxu1  ;;  %v13291_v37 = vor.u32 %v14833_v7, %v13290_v42  ;;  %v12890_v32 = vld [vmem:[#allocation2 + $0x14c8] sm:$0xf]  ;;  %v16836_v25 = vadd.f32 %v6807_v52, %v6789_v10  ;;  %v16838_v3 = vperm.slane %v15245_v61, 2 }
 0x2c5   : > { %v14733_v4 = vld [vmem:[#allocation2 + $0x14d4] sm:$0xf0]  ;;  %v13018_v49 = vld [vmem:[#allocation2 + $0x15c8] sm:$0xf]  ;;  %7180 = vmatpush.bf16.msra.mxu3 %v12667_v35  ;;  %v6772_v15 = vadd.f32 %v6771_v36, %v6753_v38  ;;  %7230 = vmatpush.bf16.msrb.mxu2 %v13163_v58  ;;  %v13147_v31 = vor.u32 %v14797_v19, %v13146_v26 }
 0x2c6   : > { %v14765_v43 = vld [vmem:[#allocation2 + $0x15d4] sm:$0xf0]  ;;  %v13274_v30 = vld [vmem:[#allocation2 + $0x17c8] sm:$0xf]  ;;  %7192 = vmatpush.bf16.msrb.mxu0 %v12907_v22  ;;  %v12891_v33 = vor.u32 %v14733_v4, %v12890_v32  ;;  %7211 = vmatpush.bf16.msrb.mxu1 %v13035_v47 }
 0x2c7   : > { %v14829_v59 = vld [vmem:[#allocation2 + $0x17d4] sm:$0xf0]  ;;  %v13019_v2 = vor.u32 %v14765_v43, %v13018_v49  ;;  %v13130_v16 = vld [vmem:[#allocation2 + $0x16a8] sm:$0xf] }
 0x2c8   : > { %v13275_v60 = vor.u32 %v14829_v59, %v13274_v30  ;;  %v14793_v20 = vld [vmem:[#allocation2 + $0x16b4] sm:$0xf0]  ;;  %v12874_v55 = vld [vmem:[#allocation2 + $0x14a8] sm:$0xf]  ;;  %v6790_v21 = vpop.f32.mrf.mxu2  ;;  %v6821_v7 = vpop.f32.mrf.mxu0 }
 0x2c9   : > { %7249 = vmatpush.bf16.msrb.mxu3 %v13291_v37  ;;  %v14729_v62 = vld [vmem:[#allocation2 + $0x14b4] sm:$0xf0]  ;;  %v13002_v10 = vld [vmem:[#allocation2 + $0x15a8] sm:$0xf]  ;;  %7231 = vmatpush.bf16.msrb.mxu2 %v13147_v31  ;;  %v6791_v26 = vadd.f32 %v6790_v21, %v6772_v15  ;;  %v6822_v49 = vadd.f32 %v6821_v7, %v16838_v3  ;;  %v13131_v35 = vor.u32 %v14793_v20, %v13130_v16 }
 0x2ca   : > { %7193 = vmatpush.bf16.msrb.mxu0 %v12891_v33  ;;  %v14761_v42 = vld [vmem:[#allocation2 + $0x15b4] sm:$0xf0]  ;;  %v13258_v22 = vld [vmem:[#allocation2 + $0x17a8] sm:$0xf]  ;;  %7212 = vmatpush.bf16.msrb.mxu1 %v13019_v2  ;;  %v12875_v11 = vor.u32 %v14729_v62, %v12874_v55  ;;  %v7733_v33 = vmax.f32 %v16836_v25, 0.0 }
 0x2cb   : > { %v6809_v63 = vpop.f32.mrf.mxu3  ;;  %v14825_v19 = vld [vmem:[#allocation2 + $0x17b4] sm:$0xf0]  ;;  %v13114_v52 = vld [vmem:[#allocation2 + $0x1688] sm:$0xf]  ;;  %v13003_v36 = vor.u32 %v14761_v42, %v13002_v10 }
 0x2cc   : > { %v6840_v27 = vpop.f32.mrf.mxu1  ;;  %v14789_v58 = vld [vmem:[#allocation2 + $0x1694] sm:$0xf0]  ;;  %v6810_v12 = vadd.f32 %v6809_v63, %v6791_v26  ;;  %v13259_v47 = vor.u32 %v14825_v19, %v13258_v22  ;;  %v12858_v37 = vld [vmem:[#allocation2 + $0x1488] sm:$0xf] }
 0x2cd   : > { %7250 = vmatpush.bf16.msrb.mxu3 %v13275_v60  ;;  %v14725_v32 = vld [vmem:[#allocation2 + $0x1494] sm:$0xf0]  ;;  %v12986_v4 = vld [vmem:[#allocation2 + $0x1588] sm:$0xf]  ;;  %v6841_v38 = vadd.f32 %v6840_v27, %v6822_v49  ;;  %7232 = vmatpush.bf16.msrb.mxu2 %v13131_v35  ;;  %v13115_v16 = vor.u32 %v14789_v58, %v13114_v52 }
 0x2ce   : > { %v17296_v43 = vld [vmem:[#allocation60_spill] sm:$0xff]  ;;  %v17297_v30 = vld [vmem:[#allocation61_spill] sm:$0xff]  ;;  %v7737_v2 = vmax.f32 %v6810_v12, 0.0  ;;  %v17298_v60 = vld [vmem:[#allocation62_spill] sm:$0xff]  ;;  %7194 = vmatpush.bf16.msrb.mxu0 %v12875_v11  ;;  %v12859_v20 = vor.u32 %v14725_v32, %v12858_v37  ;;  %7213 = vmatpush.bf16.msrb.mxu1 %v13003_v36 }
 0x2cf   : > { %7143 = vmatmul.bf16.vlgmr.msra.gmra.mxu1 %v17297_v30  ;;  %v14757_v59 = vld [vmem:[#allocation2 + $0x1594] sm:$0xf0]  ;;  %v13242_v15 = vld [vmem:[#allocation2 + $0x1788] sm:$0xf]  ;;  %7162 = vmatmul.bf16.vlgmr.msra.gmra.mxu2 %v17298_v60 }
 0x2d0   : > { %7124 = vmatmul.bf16.vlgmr.msra.gmra.mxu0 %v17296_v43  ;;  %v14821_v31 = vld [vmem:[#allocation2 + $0x1794] sm:$0xf0]  ;;  %v13098_v55 = vld [vmem:[#allocation2 + $0x1668] sm:$0xf]  ;;  %v12987_v10 = vor.u32 %v14757_v59, %v12986_v4  ;;  %v16846_v19 = vpack.c.bf16 %v7737_v2, %v7733_v33  ;;  %v6859_v25 = vpop.f32.mrf.mxu2  ;;  %v6823_v11 = vpop.f32.mrf.mxu0 }
 0x2d1   : > { %v17299_v61 = vld [vmem:[#allocation63_spill] sm:$0xff]  ;;  %7251 = vmatpush.bf16.msrb.mxu3 %v13259_v47  ;;  %v13243_v21 = vor.u32 %v14821_v31, %v13242_v15  ;;  %v12842_v63 = vld [vmem:[#allocation2 + $0x1468] sm:$0xf]  ;;  %v6860_v35 = vadd.f32 %v6859_v25, %v6841_v38  ;;  %v6824_v58 = vadd.f32 %v6823_v11, %v16838_v3  ;;  %7233 = vmatpush.bf16.msrb.mxu2 %v13115_v16  ;;  %v17301_v34 = vld [vmem:[#allocation64_spill] sm:$0xff] }
 0x2d2   : > { %7181 = vmatmul.bf16.vlgmr.msra.gmra.mxu3 %v17299_v61  ;;  %v14785_v62 = vld [vmem:[#allocation2 + $0x1674] sm:$0xf0]  ;;  %v12970_v22 = vld [vmem:[#allocation2 + $0x1568] sm:$0xf]  ;;  %17300 = vst [vmem:[#allocation78_spill] sm:$0xff] %v16846_v19  ;;  %7195 = vmatpush.bf16.msrb.mxu0 %v12859_v20 }
 0x2d3   : > { %v14721_v42 = vld [vmem:[#allocation2 + $0x1474] sm:$0xf0]  ;;  %v6878_v26 = vpop.f32.mrf.mxu3  ;;  %v13226_v27 = vld [vmem:[#allocation2 + $0x1768] sm:$0xf]  ;;  %v13099_v12 = vor.u32 %v14785_v62, %v13098_v55  ;;  %7214 = vmatpush.bf16.msrb.mxu1 %v12987_v10  ;;  %v14155_v61 = vld [vmem:[#allocation2 + $0x2cc] sm:$0xf] }
 0x2d4   : > { %v14753_v7 = vld [vmem:[#allocation2 + $0x1574] sm:$0xf0]  ;;  %v6842_v52 = vpop.f32.mrf.mxu1  ;;  %v12843_v36 = vor.u32 %v14721_v42, %v12842_v63  ;;  %v13082_v47 = vld [vmem:[#allocation2 + $0x1648] sm:$0xf]  ;;  %v16849_v32 = vadd.f32 %v6878_v26, %v6860_v35 }
 0x2d5   : > { %v14817_v49 = vld [vmem:[#allocation2 + $0x1774] sm:$0xf0]  ;;  %7252 = vmatpush.bf16.msrb.mxu3 %v13243_v21  ;;  %v12971_v4 = vor.u32 %v14753_v7, %v12970_v22  ;;  %v12826_v15 = vld [vmem:[#allocation2 + $0x1448] sm:$0xf]  ;;  %v6843_v38 = vadd.f32 %v6842_v52, %v6824_v58  ;;  %7234 = vmatpush.bf16.msrb.mxu2 %v13099_v12 }
 0x2d6   : > { %v14781_v37 = vld [vmem:[#allocation2 + $0x1654] sm:$0xf0]  ;;  %v13227_v59 = vor.u32 %v14817_v49, %v13226_v27  ;;  %v12954_v33 = vld [vmem:[#allocation2 + $0x1548] sm:$0xf]  ;;  %7196 = vmatpush.bf16.msrb.mxu0 %v12843_v36 }
 0x2d7   : > { %v14717_v31 = vld [vmem:[#allocation2 + $0x1454] sm:$0xf0]  ;;  %v13210_v25 = vld [vmem:[#allocation2 + $0x1748] sm:$0xf]  ;;  %v13083_v16 = vor.u32 %v14781_v37, %v13082_v47  ;;  %7215 = vmatpush.bf16.msrb.mxu1 %v12971_v4 }
 0x2d8   : > { %v14749_v2 = vld [vmem:[#allocation2 + $0x1554] sm:$0xf0]  ;;  %v12827_v20 = vor.u32 %v14717_v31, %v12826_v15  ;;  %v13066_v55 = vld [vmem:[#allocation2 + $0x1628] sm:$0xf]  ;;  %v6861_v26 = vpop.f32.mrf.mxu2  ;;  %v6826_v52 = vpop.f32.mrf.mxu0 }
 0x2d9   : > { %v14813_v19 = vld [vmem:[#allocation2 + $0x1754] sm:$0xf0]  ;;  %7253 = vmatpush.bf16.msrb.mxu3 %v13227_v59  ;;  %v12955_v63 = vor.u32 %v14749_v2, %v12954_v33  ;;  %v12810_v21 = vld [vmem:[#allocation2 + $0x1428] sm:$0xf]  ;;  %v6862_v11 = vadd.f32 %v6861_v26, %v6843_v38  ;;  %v6827_v36 = vadd.f32 %v6826_v52, %v16838_v3  ;;  %7235 = vmatpush.bf16.msrb.mxu2 %v13083_v16 }
 0x2da   : > { %v14777_v62 = vld [vmem:[#allocation2 + $0x1634] sm:$0xf0]  ;;  %v13211_v10 = vor.u32 %v14813_v19, %v13210_v25  ;;  %v12938_v22 = vld [vmem:[#allocation2 + $0x1528] sm:$0xf]  ;;  %7197 = vmatpush.bf16.msrb.mxu0 %v12827_v20  ;;  %v14159_v20 = vld [vmem:[#allocation2 + $0x2ec] sm:$0xf] }
 0x2db   : > { %v14713_v42 = vld [vmem:[#allocation2 + $0x1434] sm:$0xf0]  ;;  %v6880_v7 = vpop.f32.mrf.mxu3  ;;  %v13194_v49 = vld [vmem:[#allocation2 + $0x1728] sm:$0xf]  ;;  %v13067_v47 = vor.u32 %v14777_v62, %v13066_v55  ;;  %7216 = vmatpush.bf16.msrb.mxu1 %v12955_v63  ;;  %v10604_v55 = vld [vmem:[#allocation2 + $0x2f8] sm:$0xf0] }
 0x2dc   : > { %v14745_v27 = vld [vmem:[#allocation2 + $0x1534] sm:$0xf0]  ;;  %v6845_v58 = vpop.f32.mrf.mxu1  ;;  %v13050_v12 = vld [vmem:[#allocation2 + $0x1608] sm:$0xf]  ;;  %v12811_v37 = vor.u32 %v14713_v42, %v12810_v21  ;;  %v16852_v15 = vadd.f32 %v6880_v7, %v6862_v11  ;;  %v14095_v42 = vld [vmem:[#allocation2 + $0xec] sm:$0xf] }
 0x2dd   : > { %v14809_v35 = vld [vmem:[#allocation2 + $0x1734] sm:$0xf0]  ;;  %v12794_v19 = vld [vmem:[#allocation2 + $0x1408] sm:$0xf]  ;;  %7254 = vmatpush.bf16.msrb.mxu3 %v13211_v10  ;;  %v12939_v31 = vor.u32 %v14745_v27, %v12938_v22  ;;  %v6846_v26 = vadd.f32 %v6845_v58, %v6827_v36  ;;  %v10348_v63 = vld [vmem:[#allocation2 + $0xf8] sm:$0xf0]  ;;  %7236 = vmatpush.bf16.msrb.mxu2 %v13067_v47 }
 0x2de   : > { %v14773_v4 = vld [vmem:[#allocation2 + $0x1614] sm:$0xf0]  ;;  %v13195_v33 = vor.u32 %v14809_v35, %v13194_v49  ;;  %v12922_v2 = vld [vmem:[#allocation2 + $0x1508] sm:$0xf]  ;;  %v14127_v10 = vld [vmem:[#allocation2 + $0x1ec] sm:$0xf]  ;;  %7198 = vmatpush.bf16.msrb.mxu0 %v12811_v37 }
 0x2df   : > { %v14709_v59 = vld [vmem:[#allocation2 + $0x1414] sm:$0xf0]  ;;  %v13178_v25 = vld [vmem:[#allocation2 + $0x1708] sm:$0xf]  ;;  %v13051_v22 = vor.u32 %v14773_v4, %v13050_v12  ;;  %v10476_v27 = vld [vmem:[#allocation2 + $0x1f8] sm:$0xf0]  ;;  %7217 = vmatpush.bf16.msrb.mxu1 %v12939_v31 }
 0x2e0   : > { %v14741_v38 = vld [vmem:[#allocation2 + $0x1514] sm:$0xf0]  ;;  %7129 = vmatmul.bf16.gmra.mxu0 %v17301_v34  ;;  %v17302_v52 = vld [vmem:[#allocation65_spill] sm:$0xff]  ;;  %v17303_v62 = vld [vmem:[#allocation66_spill] sm:$0xff]  ;;  %v12795_v7 = vor.u32 %v14709_v59, %v12794_v19  ;;  %v6864_v36 = vpop.f32.mrf.mxu2  ;;  %v10607_v34 = vor.u32 %v14159_v20, %v10604_v55  ;;  %v6828_v30 = vpop.f32.mrf.mxu0  ;;  %v10479_v47 = vor.u32 %v14127_v10, %v10476_v27 }
 0x2e1   : > { %7148 = vmatmul.bf16.gmra.mxu1 %v17302_v52  ;;  %v14805_v16 = vld [vmem:[#allocation2 + $0x1714] sm:$0xf0]  ;;  %7167 = vmatmul.bf16.gmra.mxu2 %v17303_v62  ;;  %v14191_v49 = vld [vmem:[#allocation2 + $0x3ec] sm:$0xf]  ;;  %v10732_v35 = vld [vmem:[#allocation2 + $0x3f8] sm:$0xf0]  ;;  %v12923_v11 = vor.u32 %v14741_v38, %v12922_v2  ;;  %v10351_v62 = vor.u32 %v14095_v42, %v10348_v63  ;;  %v6865_v60 = vadd.f32 %v6864_v36, %v6846_v26 }
 0x2e2   : > { %v17304_v21 = vld [vmem:[#allocation67_spill] sm:$0xff]  ;;  %7255 = vmatpush.bf16.msrb.mxu3 %v13195_v33  ;;  %v13179_v58 = vor.u32 %v14805_v16, %v13178_v25  ;;  %v10735_v37 = vor.u32 %v14191_v49, %v10732_v35  ;;  %v14091_v12 = vld [vmem:[#allocation2 + $0xcc] sm:$0xf]  ;;  %v10332_v4 = vld [vmem:[#allocation2 + $0xd8] sm:$0xf0]  ;;  %v6829_v59 = vadd.f32 %v6828_v30, %v16838_v3  ;;  %7237 = vmatpush.bf16.msrb.mxu2 %v13051_v22 }
 0x2e3   : > { %7186 = vmatmul.bf16.gmra.mxu3 %v17304_v21  ;;  %v6883_v52 = vpop.f32.mrf.mxu3  ;;  %v10588_v21 = vld [vmem:[#allocation2 + $0x2d8] sm:$0xf0]  ;;  %v14123_v19 = vld [vmem:[#allocation2 + $0x1cc] sm:$0xf]  ;;  %7199 = vmatpush.bf16.msrb.mxu0 %v12795_v7  ;;  %v10335_v16 = vor.u32 %v14091_v12, %v10332_v4 }
 0x2e4   : > { %v6847_v43 = vpop.f32.mrf.mxu1  ;;  %v10460_v31 = vld [vmem:[#allocation2 + $0x1d8] sm:$0xf0]  ;;  %v14187_v33 = vld [vmem:[#allocation2 + $0x3cc] sm:$0xf]  ;;  %v16859_v38 = vadd.f32 %v6883_v52, %v6865_v60  ;;  %7218 = vmatpush.bf16.msrb.mxu1 %v12923_v11  ;;  %v10591_v26 = vor.u32 %v14155_v61, %v10588_v21 }
 0x2e5   : > { %v10716_v2 = vld [vmem:[#allocation2 + $0x3d8] sm:$0xf0]  ;;  %v6848_v25 = vadd.f32 %v6847_v43, %v6829_v59  ;;  %v10463_v20 = vor.u32 %v14123_v19, %v10460_v31  ;;  %v14151_v42 = vld [vmem:[#allocation2 + $0x2ac] sm:$0xf]  ;;  %v17305_v59 = vld [vmem:[#allocation69_spill] sm:$0xff] }
 0x2e6   : > { %7256 = vmatpush.bf16.msrb.mxu3 %v13179_v58  ;;  %7306 = vmatpush.bf16.msra.mxu2 %v10607_v34  ;;  %v10719_v55 = vor.u32 %v14187_v33, %v10716_v2  ;;  %v10572_v3 = vld [vmem:[#allocation2 + $0x2b8] sm:$0xf0]  ;;  %v14087_v30 = vld [vmem:[#allocation2 + $0xac] sm:$0xf] }
 0x2e7   : > { %7268 = vmatpush.bf16.msra.mxu0 %v10351_v62  ;;  %v10316_v63 = vld [vmem:[#allocation2 + $0xb8] sm:$0xf0]  ;;  %v14119_v10 = vld [vmem:[#allocation2 + $0x1ac] sm:$0xf]  ;;  %v10575_v27 = vor.u32 %v14151_v42, %v10572_v3 }
 0x2e8   : > { %7287 = vmatpush.bf16.msra.mxu1 %v10479_v47  ;;  %v6866_v22 = vpop.f32.mrf.mxu2  ;;  %v10444_v60 = vld [vmem:[#allocation2 + $0x1b8] sm:$0xf0]  ;;  %v14183_v52 = vld [vmem:[#allocation2 + $0x3ac] sm:$0xf]  ;;  %v6897_v62 = vpop.f32.mrf.mxu0  ;;  %v10319_v49 = vor.u32 %v14087_v30, %v10316_v63 }
 0x2e9   : > { %v10700_v43 = vld [vmem:[#allocation2 + $0x3b8] sm:$0xf0]  ;;  %v6867_v34 = vadd.f32 %v6866_v22, %v6848_v25  ;;  %v6898_v21 = vadd.f32 %v6897_v62, %v16849_v32  ;;  %v14147_v35 = vld [vmem:[#allocation2 + $0x28c] sm:$0xf]  ;;  %v10447_v36 = vor.u32 %v14119_v10, %v10444_v60  ;;  %v17307_v25 = vld [vmem:[#allocation71_spill] sm:$0xff] }
 0x2ea   : > { %7325 = vmatpush.bf16.msra.mxu3 %v10735_v37  ;;  %7307 = vmatpush.bf16.msra.mxu2 %v10591_v26  ;;  %v10556_v11 = vld [vmem:[#allocation2 + $0x298] sm:$0xf0]  ;;  %v10703_v47 = vor.u32 %v14183_v52, %v10700_v43  ;;  %v14083_v37 = vld [vmem:[#allocation2 + $0x8c] sm:$0xf] }
 0x2eb   : > { %v6885_v7 = vpop.f32.mrf.mxu3  ;;  %7269 = vmatpush.bf16.msra.mxu0 %v10335_v16  ;;  %v10300_v12 = vld [vmem:[#allocation2 + $0x98] sm:$0xf0]  ;;  %v14115_v4 = vld [vmem:[#allocation2 + $0x18c] sm:$0xf]  ;;  %v10559_v26 = vor.u32 %v14147_v35, %v10556_v11 }
 0x2ec   : > { %v6916_v61 = vpop.f32.mrf.mxu1  ;;  %7288 = vmatpush.bf16.msra.mxu1 %v10463_v20  ;;  %v16862_v58 = vadd.f32 %v6885_v7, %v6867_v34  ;;  %v10428_v31 = vld [vmem:[#allocation2 + $0x198] sm:$0xf0]  ;;  %v14179_v33 = vld [vmem:[#allocation2 + $0x38c] sm:$0xf]  ;;  %v10303_v16 = vor.u32 %v14083_v37, %v10300_v12 }
 0x2ed   : > { %v6917_v19 = vadd.f32 %v6916_v61, %v6898_v21  ;;  %v10684_v2 = vld [vmem:[#allocation2 + $0x398] sm:$0xf0]  ;;  %v17306_v32 = vld [vmem:[#allocation70_spill] sm:$0xff]  ;;  %v10431_v42 = vor.u32 %v14115_v4, %v10428_v31 }
 0x2ee   : > { %7326 = vmatpush.bf16.msra.mxu3 %v10719_v55  ;;  %7308 = vmatpush.bf16.msra.mxu2 %v10575_v27  ;;  %v14143_v20 = vld [vmem:[#allocation2 + $0x26c] sm:$0xf]  ;;  %v10540_v55 = vld [vmem:[#allocation2 + $0x278] sm:$0xf0]  ;;  %v10687_v3 = vor.u32 %v14179_v33, %v10684_v2 }
 0x2ef   : > { %7270 = vmatpush.bf16.msra.mxu0 %v10319_v49  ;;  %v14079_v30 = vld [vmem:[#allocation2 + $0x6c] sm:$0xf]  ;;  %v10284_v63 = vld [vmem:[#allocation2 + $0x78] sm:$0xf0]  ;;  %v10543_v27 = vor.u32 %v14143_v20, %v10540_v55 }
 0x2f0   : > { %7200 = vmatmul.bf16.vlgmr.msrb.gmra.mxu0 %v17282_v41  ;;  %7289 = vmatpush.bf16.msra.mxu1 %v10447_v36  ;;  %v14111_v10 = vld [vmem:[#allocation2 + $0x16c] sm:$0xf]  ;;  %v6935_v22 = vpop.f32.mrf.mxu2  ;;  %v10412_v60 = vld [vmem:[#allocation2 + $0x178] sm:$0xf0]  ;;  %v6899_v62 = vpop.f32.mrf.mxu0  ;;  %v10287_v49 = vor.u32 %v14079_v30, %v10284_v63 }
 0x2f1   : > { %7219 = vmatmul.bf16.vlgmr.msrb.gmra.mxu1 %v17305_v59  ;;  %7238 = vmatmul.bf16.vlgmr.msrb.gmra.mxu2 %v17306_v32  ;;  %v14175_v52 = vld [vmem:[#allocation2 + $0x36c] sm:$0xf]  ;;  %v10668_v43 = vld [vmem:[#allocation2 + $0x378] sm:$0xf0]  ;;  %v6936_v34 = vadd.f32 %v6935_v22, %v6917_v19  ;;  %v6900_v21 = vadd.f32 %v6899_v62, %v16852_v15 }
 0x2f2   : > { %7327 = vmatpush.bf16.msra.mxu3 %v10703_v47  ;;  %7309 = vmatpush.bf16.msra.mxu2 %v10559_v26  ;;  %v14139_v35 = vld [vmem:[#allocation2 + $0x24c] sm:$0xf]  ;;  %v10524_v11 = vld [vmem:[#allocation2 + $0x258] sm:$0xf0]  ;;  %v10415_v47 = vor.u32 %v14111_v10, %v10412_v60  ;;  %v10671_v37 = vor.u32 %v14175_v52, %v10668_v43 }
 0x2f3   : > { %7257 = vmatmul.bf16.vlgmr.msrb.gmra.mxu3 %v17307_v25  ;;  %v6954_v7 = vpop.f32.mrf.mxu3  ;;  %7271 = vmatpush.bf16.msra.mxu0 %v10303_v16  ;;  %v14075_v12 = vld [vmem:[#allocation2 + $0x4c] sm:$0xf]  ;;  %v10268_v4 = vld [vmem:[#allocation2 + $0x58] sm:$0xf0]  ;;  %v10527_v15 = vor.u32 %v14139_v35, %v10524_v11 }
 0x2f4   : > { %v6918_v61 = vpop.f32.mrf.mxu1  ;;  %v16869_v36 = vadd.f32 %v6954_v7, %v6936_v34  ;;  %7290 = vmatpush.bf16.msra.mxu1 %v10431_v42  ;;  %v14107_v31 = vld [vmem:[#allocation2 + $0x14c] sm:$0xf]  ;;  %v10396_v33 = vld [vmem:[#allocation2 + $0x158] sm:$0xf0]  ;;  %v10271_v26 = vor.u32 %v14075_v12, %v10268_v4 }
 0x2f5   : > { %v6919_v19 = vadd.f32 %v6918_v61, %v6900_v21  ;;  %v14171_v2 = vld [vmem:[#allocation2 + $0x34c] sm:$0xf]  ;;  %v10652_v22 = vld [vmem:[#allocation2 + $0x358] sm:$0xf0]  ;;  %v10399_v55 = vor.u32 %v14107_v31, %v10396_v33 }
 0x2f6   : > { %7328 = vmatpush.bf16.msra.mxu3 %v10687_v3  ;;  %7310 = vmatpush.bf16.msra.mxu2 %v10543_v27  ;;  %v14135_v16 = vld [vmem:[#allocation2 + $0x22c] sm:$0xf]  ;;  %v10508_v20 = vld [vmem:[#allocation2 + $0x238] sm:$0xf0]  ;;  %v10655_v42 = vor.u32 %v14171_v2, %v10652_v22 }
 0x2f7   : > { %7272 = vmatpush.bf16.msra.mxu0 %v10287_v49  ;;  %v14071_v3 = vld [vmem:[#allocation2 + $0x2c] sm:$0xf]  ;;  %v10252_v30 = vld [vmem:[#allocation2 + $0x38] sm:$0xf0]  ;;  %v10511_v49 = vor.u32 %v14135_v16, %v10508_v20 }
 0x2f8   : > { %7291 = vmatpush.bf16.msra.mxu1 %v10415_v47  ;;  %v14103_v63 = vld [vmem:[#allocation2 + $0x12c] sm:$0xf]  ;;  %v6937_v10 = vpop.f32.mrf.mxu2  ;;  %v10380_v60 = vld [vmem:[#allocation2 + $0x138] sm:$0xf0]  ;;  %v6902_v62 = vpop.f32.mrf.mxu0  ;;  %v10255_v35 = vor.u32 %v14071_v3, %v10252_v30  ;;  %v17311_v3 = vld [vmem:[#allocation75_spill] sm:$0xff] }
 0x2f9   : > { %v14167_v52 = vld [vmem:[#allocation2 + $0x32c] sm:$0xf]  ;;  %v10636_v43 = vld [vmem:[#allocation2 + $0x338] sm:$0xf0]  ;;  %v6938_v34 = vadd.f32 %v6937_v10, %v6919_v19  ;;  %v6903_v27 = vadd.f32 %v6902_v62, %v16859_v38  ;;  %v10383_v4 = vor.u32 %v14103_v63, %v10380_v60  ;;  %v17309_v38 = vld [vmem:[#allocation73_spill] sm:$0xff] }
 0x2fa   : > { %7329 = vmatpush.bf16.msra.mxu3 %v10671_v37  ;;  %v14131_v21 = vld [vmem:[#allocation2 + $0x20c] sm:$0xf]  ;;  %7311 = vmatpush.bf16.msra.mxu2 %v10527_v15  ;;  %v10492_v11 = vld [vmem:[#allocation2 + $0x218] sm:$0xf0]  ;;  %v10639_v31 = vor.u32 %v14167_v52, %v10636_v43 }
 0x2fb   : > { %v6956_v7 = vpop.f32.mrf.mxu3  ;;  %7273 = vmatpush.bf16.msra.mxu0 %v10271_v26  ;;  %v14067_v47 = vld [vmem:[#allocation2 + $0xc] sm:$0xf]  ;;  %v10236_v37 = vld [vmem:[#allocation2 + $0x18] sm:$0xf0]  ;;  %v10495_v63 = vor.u32 %v14131_v21, %v10492_v11 }
 0x2fc   : > { %v6921_v61 = vpop.f32.mrf.mxu1  ;;  %v16872_v12 = vadd.f32 %v6956_v7, %v6938_v34  ;;  %7292 = vmatpush.bf16.msra.mxu1 %v10399_v55  ;;  %v14099_v33 = vld [vmem:[#allocation2 + $0x10c] sm:$0xf]  ;;  %v10364_v19 = vld [vmem:[#allocation2 + $0x118] sm:$0xf0]  ;;  %v10239_v7 = vor.u32 %v14067_v47, %v10236_v37 }
 0x2fd   : > { %v14163_v2 = vld [vmem:[#allocation2 + $0x30c] sm:$0xf]  ;;  %v6922_v22 = vadd.f32 %v6921_v61, %v6903_v27  ;;  %v17308_v10 = vld [vmem:[#allocation72_spill] sm:$0xff]  ;;  %v10367_v34 = vor.u32 %v14099_v33, %v10364_v19 }
 0x2fe   : > { %7330 = vmatpush.bf16.msra.mxu3 %v10655_v42  ;;  %v10620_v15 = vld [vmem:[#allocation2 + $0x318] sm:$0xf0]  ;;  %v14287_v26 = vld [vmem:[#allocation2 + $0x6ec] sm:$0xf]  ;;  %7312 = vmatpush.bf16.msra.mxu2 %v10511_v49 }
 0x2ff   : > { %v11116_v16 = vld [vmem:[#allocation2 + $0x6f8] sm:$0xf0]  ;;  %v17310_v20 = vld [vmem:[#allocation74_spill] sm:$0xff]  ;;  %7274 = vmatpush.bf16.msra.mxu0 %v10255_v35  ;;  %v10623_v62 = vor.u32 %v14163_v2, %v10620_v15 }
 0x300   : > { %7205 = vmatmul.bf16.gmra.mxu0 %v17308_v10  ;;  %v14223_v30 = vld [vmem:[#allocation2 + $0x4ec] sm:$0xf]  ;;  %v10860_v55 = vld [vmem:[#allocation2 + $0x4f8] sm:$0xf0]  ;;  %7293 = vmatpush.bf16.msra.mxu1 %v10383_v4  ;;  %v6940_v61 = vpop.f32.mrf.mxu2  ;;  %v6904_v32 = vpop.f32.mrf.mxu0 }
 0x301   : > { %7224 = vmatmul.bf16.gmra.mxu1 %v17309_v38  ;;  %7243 = vmatmul.bf16.gmra.mxu2 %v17310_v20  ;;  %v14255_v42 = vld [vmem:[#allocation2 + $0x5ec] sm:$0xf]  ;;  %v10988_v60 = vld [vmem:[#allocation2 + $0x5f8] sm:$0xf0]  ;;  %v11119_v38 = vor.u32 %v14287_v26, %v11116_v16  ;;  %v10863_v20 = vor.u32 %v14223_v30, %v10860_v55  ;;  %v6941_v25 = vadd.f32 %v6940_v61, %v6922_v22 }
 0x302   : > { %v14319_v52 = vld [vmem:[#allocation2 + $0x7ec] sm:$0xf]  ;;  %v11244_v43 = vld [vmem:[#allocation2 + $0x7f8] sm:$0xf0]  ;;  %7331 = vmatpush.bf16.msra.mxu3 %v10639_v31  ;;  %v10991_v49 = vor.u32 %v14255_v42, %v10988_v60  ;;  %v6905_v37 = vadd.f32 %v6904_v32, %v16862_v58  ;;  %7313 = vmatpush.bf16.msra.mxu2 %v10495_v63 }
 0x303   : > { %7262 = vmatmul.bf16.gmra.mxu3 %v17311_v3  ;;  %v6959_v27 = vpop.f32.mrf.mxu3  ;;  %v14283_v10 = vld [vmem:[#allocation2 + $0x6cc] sm:$0xf]  ;;  %v11100_v3 = vld [vmem:[#allocation2 + $0x6d8] sm:$0xf0]  ;;  %v11247_v35 = vor.u32 %v14319_v52, %v11244_v43  ;;  %7275 = vmatpush.bf16.msra.mxu0 %v10239_v7 }
 0x304   : > { %v6923_v59 = vpop.f32.mrf.mxu1  ;;  %v14219_v21 = vld [vmem:[#allocation2 + $0x4cc] sm:$0xf]  ;;  %v10844_v11 = vld [vmem:[#allocation2 + $0x4d8] sm:$0xf0]  ;;  %v16879_v19 = vadd.f32 %v6959_v27, %v6941_v25  ;;  %7294 = vmatpush.bf16.msra.mxu1 %v10367_v34  ;;  %v11103_v22 = vor.u32 %v14283_v10, %v11100_v3 }
 0x305   : > { %v14251_v47 = vld [vmem:[#allocation2 + $0x5cc] sm:$0xf]  ;;  %v10972_v4 = vld [vmem:[#allocation2 + $0x5d8] sm:$0xf0]  ;;  %v6924_v2 = vadd.f32 %v6923_v59, %v6905_v37  ;;  %v10847_v15 = vor.u32 %v14219_v21, %v10844_v11 }
 0x306   : > { %v14315_v31 = vld [vmem:[#allocation2 + $0x7cc] sm:$0xf]  ;;  %v11228_v33 = vld [vmem:[#allocation2 + $0x7d8] sm:$0xf0]  ;;  %7332 = vmatpush.bf16.msra.mxu3 %v10623_v62  ;;  %7382 = vmatpush.bf16.msrb.mxu2 %v11119_v38  ;;  %v10975_v26 = vor.u32 %v14251_v47, %v10972_v4 }
 0x307   : > { %7344 = vmatpush.bf16.msrb.mxu0 %v10863_v20  ;;  %v11231_v16 = vor.u32 %v14315_v31, %v11228_v33  ;;  %v14279_v30 = vld [vmem:[#allocation2 + $0x6ac] sm:$0xf]  ;;  %v11084_v58 = vld [vmem:[#allocation2 + $0x6b8] sm:$0xf0] }
 0x308   : > { %7363 = vmatpush.bf16.msrb.mxu1 %v10991_v49  ;;  %v14215_v32 = vld [vmem:[#allocation2 + $0x4ac] sm:$0xf]  ;;  %v10828_v55 = vld [vmem:[#allocation2 + $0x4b8] sm:$0xf0]  ;;  %v6942_v63 = vpop.f32.mrf.mxu2  ;;  %v6973_v20 = vpop.f32.mrf.mxu0  ;;  %v11087_v52 = vor.u32 %v14279_v30, %v11084_v58 }
 0x309   : > { %v14247_v42 = vld [vmem:[#allocation2 + $0x5ac] sm:$0xf]  ;;  %v10956_v25 = vld [vmem:[#allocation2 + $0x5b8] sm:$0xf0]  ;;  %v6943_v38 = vadd.f32 %v6942_v63, %v6924_v2  ;;  %v6974_v3 = vadd.f32 %v6973_v20, %v16869_v36  ;;  %v10831_v43 = vor.u32 %v14215_v32, %v10828_v55 }
 0x30a   : > { %7401 = vmatpush.bf16.msrb.mxu3 %v11247_v35  ;;  %7383 = vmatpush.bf16.msrb.mxu2 %v11103_v22  ;;  %v14311_v60 = vld [vmem:[#allocation2 + $0x7ac] sm:$0xf]  ;;  %v11212_v59 = vld [vmem:[#allocation2 + $0x7b8] sm:$0xf0]  ;;  %v10959_v27 = vor.u32 %v14247_v42, %v10956_v25 }
 0x30b   : > { %v6961_v7 = vpop.f32.mrf.mxu3  ;;  %7345 = vmatpush.bf16.msrb.mxu0 %v10847_v15  ;;  %v14275_v34 = vld [vmem:[#allocation2 + $0x68c] sm:$0xf]  ;;  %v11068_v62 = vld [vmem:[#allocation2 + $0x698] sm:$0xf0]  ;;  %v11215_v49 = vor.u32 %v14311_v60, %v11212_v59 }
 0x30c   : > { %v6992_v10 = vpop.f32.mrf.mxu1  ;;  %7364 = vmatpush.bf16.msrb.mxu1 %v10975_v26  ;;  %v16882_v61 = vadd.f32 %v6961_v7, %v6943_v38  ;;  %v14211_v35 = vld [vmem:[#allocation2 + $0x48c] sm:$0xf]  ;;  %v10812_v21 = vld [vmem:[#allocation2 + $0x498] sm:$0xf0]  ;;  %v11071_v36 = vor.u32 %v14275_v34, %v11068_v62 }
 0x30d   : > { %v14243_v11 = vld [vmem:[#allocation2 + $0x58c] sm:$0xf]  ;;  %v6993_v47 = vadd.f32 %v6992_v10, %v6974_v3  ;;  %v10940_v37 = vld [vmem:[#allocation2 + $0x598] sm:$0xf0]  ;;  %v10815_v33 = vor.u32 %v14211_v35, %v10812_v21 }
 0x30e   : > { %7402 = vmatpush.bf16.msrb.mxu3 %v11231_v16  ;;  %v14307_v4 = vld [vmem:[#allocation2 + $0x78c] sm:$0xf]  ;;  %v11196_v31 = vld [vmem:[#allocation2 + $0x798] sm:$0xf0]  ;;  %7384 = vmatpush.bf16.msrb.mxu2 %v11087_v52  ;;  %v10943_v15 = vor.u32 %v14243_v11, %v10940_v37 }
 0x30f   : > { %7346 = vmatpush.bf16.msrb.mxu0 %v10831_v43  ;;  %v14271_v2 = vld [vmem:[#allocation2 + $0x66c] sm:$0xf]  ;;  %v11052_v22 = vld [vmem:[#allocation2 + $0x678] sm:$0xf0]  ;;  %v11199_v26 = vor.u32 %v14307_v4, %v11196_v31 }
 0x310   : > { %7276 = vmatmul.bf16.vlgmr.msra.gmra.mxu0 %v16377_v48  ;;  %7365 = vmatpush.bf16.msrb.mxu1 %v10959_v27  ;;  %v14207_v48 = vld [vmem:[#allocation2 + $0x46c] sm:$0xf]  ;;  %v10796_v16 = vld [vmem:[#allocation2 + $0x478] sm:$0xf0]  ;;  %v7011_v30 = vpop.f32.mrf.mxu2  ;;  %v11055_v25 = vor.u32 %v14271_v2, %v11052_v22 }
 0x311   : > { %7295 = vmatmul.bf16.vlgmr.msra.gmra.mxu1 %v16379_v53  ;;  %7314 = vmatmul.bf16.vlgmr.msra.gmra.mxu2 %v16381_v54  ;;  %v14239_v53 = vld [vmem:[#allocation2 + $0x56c] sm:$0xf]  ;;  %v10924_v32 = vld [vmem:[#allocation2 + $0x578] sm:$0xf0]  ;;  %v7012_v42 = vadd.f32 %v7011_v30, %v6993_v47  ;;  %v10799_v60 = vor.u32 %v14207_v48, %v10796_v16 }
 0x312   : > { %7403 = vmatpush.bf16.msrb.mxu3 %v11215_v49  ;;  %v14303_v55 = vld [vmem:[#allocation2 + $0x76c] sm:$0xf]  ;;  %v11180_v54 = vld [vmem:[#allocation2 + $0x778] sm:$0xf0]  ;;  %7385 = vmatpush.bf16.msrb.mxu2 %v11071_v36  ;;  %v10927_v10 = vor.u32 %v14239_v53, %v10924_v32 }
 0x313   : > { %7333 = vmatmul.bf16.vlgmr.msra.gmra.mxu3 %v16383_v57  ;;  %v7030_v58 = vpop.f32.mrf.mxu3  ;;  %v6975_v57 = vpop.f32.mrf.mxu0  ;;  %7347 = vmatpush.bf16.msrb.mxu0 %v10815_v33  ;;  %v14267_v59 = vld [vmem:[#allocation2 + $0x64c] sm:$0xf]  ;;  %v11036_v38 = vld [vmem:[#allocation2 + $0x658] sm:$0xf0]  ;;  %v11183_v3 = vor.u32 %v14303_v55, %v11180_v54 }
 0x314   : > { %v6994_v63 = vpop.f32.mrf.mxu1  ;;  %v6976_v7 = vadd.f32 %v6975_v57, %v16872_v12  ;;  %v16889_v20 = vadd.f32 %v7030_v58, %v7012_v42  ;;  %7366 = vmatpush.bf16.msrb.mxu1 %v10943_v15  ;;  %v14203_v52 = vld [vmem:[#allocation2 + $0x44c] sm:$0xf]  ;;  %v10780_v43 = vld [vmem:[#allocation2 + $0x458] sm:$0xf0]  ;;  %v11039_v12 = vor.u32 %v14267_v59, %v11036_v38 }
 0x315   : > { %v14235_v34 = vld [vmem:[#allocation2 + $0x54c] sm:$0xf]  ;;  %v10908_v27 = vld [vmem:[#allocation2 + $0x558] sm:$0xf0]  ;;  %v10783_v21 = vor.u32 %v14203_v52, %v10780_v43 }
 0x316   : > { %7404 = vmatpush.bf16.msrb.mxu3 %v11199_v26  ;;  %v6995_v62 = vadd.f32 %v6994_v63, %v6976_v7  ;;  %v14299_v49 = vld [vmem:[#allocation2 + $0x74c] sm:$0xf]  ;;  %v11164_v35 = vld [vmem:[#allocation2 + $0x758] sm:$0xf0]  ;;  %7386 = vmatpush.bf16.msrb.mxu2 %v11055_v25  ;;  %v10911_v37 = vor.u32 %v14235_v34, %v10908_v27 }
 0x317   : > { %7348 = vmatpush.bf16.msrb.mxu0 %v10799_v60  ;;  %v14263_v11 = vld [vmem:[#allocation2 + $0x62c] sm:$0xf]  ;;  %v11020_v47 = vld [vmem:[#allocation2 + $0x638] sm:$0xf0]  ;;  %v11167_v4 = vor.u32 %v14299_v49, %v11164_v35 }
 0x318   : > { %7367 = vmatpush.bf16.msrb.mxu1 %v10927_v10  ;;  %v14199_v31 = vld [vmem:[#allocation2 + $0x42c] sm:$0xf]  ;;  %v10764_v36 = vld [vmem:[#allocation2 + $0x438] sm:$0xf0]  ;;  %v7013_v2 = vpop.f32.mrf.mxu2  ;;  %v11023_v55 = vor.u32 %v14263_v11, %v11020_v47 }
 0x319   : > { %v14231_v33 = vld [vmem:[#allocation2 + $0x52c] sm:$0xf]  ;;  %v10892_v15 = vld [vmem:[#allocation2 + $0x538] sm:$0xf0]  ;;  %v7014_v16 = vadd.f32 %v7013_v2, %v6995_v62  ;;  %v10767_v54 = vor.u32 %v14199_v31, %v10764_v36 }
 0x31a   : > { %7405 = vmatpush.bf16.msrb.mxu3 %v11183_v3  ;;  %v14295_v26 = vld [vmem:[#allocation2 + $0x72c] sm:$0xf]  ;;  %v11148_v48 = vld [vmem:[#allocation2 + $0x738] sm:$0xf0]  ;;  %7387 = vmatpush.bf16.msrb.mxu2 %v11039_v12  ;;  %v10895_v25 = vor.u32 %v14231_v33, %v10892_v15 }
 0x31b   : > { %v7032_v22 = vpop.f32.mrf.mxu3  ;;  %v6978_v53 = vpop.f32.mrf.mxu0  ;;  %v14259_v58 = vld [vmem:[#allocation2 + $0x60c] sm:$0xf]  ;;  %7349 = vmatpush.bf16.msrb.mxu0 %v10783_v21  ;;  %v11004_v42 = vld [vmem:[#allocation2 + $0x618] sm:$0xf0]  ;;  %v11151_v60 = vor.u32 %v14295_v26, %v11148_v48 }
 0x31c   : > { %v6997_v30 = vpop.f32.mrf.mxu1  ;;  %v6979_v32 = vadd.f32 %v6978_v53, %v16879_v19  ;;  %v14195_v57 = vld [vmem:[#allocation2 + $0x40c] sm:$0xf]  ;;  %v10748_v63 = vld [vmem:[#allocation2 + $0x418] sm:$0xf0]  ;;  %v16892_v7 = vadd.f32 %v7032_v22, %v7014_v16  ;;  %7368 = vmatpush.bf16.msrb.mxu1 %v10911_v37  ;;  %v11007_v49 = vor.u32 %v14259_v58, %v11004_v42 }
 0x31d   : > { %v14227_v59 = vld [vmem:[#allocation2 + $0x50c] sm:$0xf]  ;;  %v10876_v38 = vld [vmem:[#allocation2 + $0x518] sm:$0xf0]  ;;  %v10751_v35 = vor.u32 %v14195_v57, %v10748_v63 }
 0x31e   : > { %7406 = vmatpush.bf16.msrb.mxu3 %v11167_v4  ;;  %v14291_v10 = vld [vmem:[#allocation2 + $0x70c] sm:$0xf]  ;;  %v6998_v3 = vadd.f32 %v6997_v30, %v6979_v32  ;;  %v11132_v19 = vld [vmem:[#allocation2 + $0x718] sm:$0xf0]  ;;  %7388 = vmatpush.bf16.msrb.mxu2 %v11023_v55 }
 0x31f   : > { %v14415_v52 = vld [vmem:[#allocation2 + $0xaec] sm:$0xf]  ;;  %v11628_v43 = vld [vmem:[#allocation2 + $0xaf8] sm:$0xf0]  ;;  %7350 = vmatpush.bf16.msrb.mxu0 %v10767_v54 }
 0x320   : > { %7281 = vmatmul.bf16.gmra.mxu0 %v16397_v44  ;;  %v14351_v34 = vld [vmem:[#allocation2 + $0x8ec] sm:$0xf]  ;;  %v11372_v62 = vld [vmem:[#allocation2 + $0x8f8] sm:$0xf0]  ;;  %7369 = vmatpush.bf16.msrb.mxu1 %v10895_v25  ;;  %v10879_v44 = vor.u32 %v14227_v59, %v10876_v38  ;;  %v7016_v47 = vpop.f32.mrf.mxu2  ;;  %v11631_v4 = vor.u32 %v14415_v52, %v11628_v43 }
 0x321   : > { %7300 = vmatmul.bf16.gmra.mxu1 %v16399_v50  ;;  %7319 = vmatmul.bf16.gmra.mxu2 %v16401_v51  ;;  %v14383_v27 = vld [vmem:[#allocation2 + $0x9ec] sm:$0xf]  ;;  %v11500_v12 = vld [vmem:[#allocation2 + $0x9f8] sm:$0xf0]  ;;  %v11135_v50 = vor.u32 %v14291_v10, %v11132_v19  ;;  %v11375_v51 = vor.u32 %v14351_v34, %v11372_v62  ;;  %v7017_v36 = vadd.f32 %v7016_v47, %v6998_v3 }
 0x322   : > { %v14447_v21 = vld [vmem:[#allocation2 + $0xbec] sm:$0xf]  ;;  %v11756_v11 = vld [vmem:[#allocation2 + $0xbf8] sm:$0xf0]  ;;  %7407 = vmatpush.bf16.msrb.mxu3 %v11151_v60  ;;  %v11503_v22 = vor.u32 %v14383_v27, %v11500_v12  ;;  %7389 = vmatpush.bf16.msrb.mxu2 %v11007_v49 }
 0x323   : > { %7338 = vmatmul.bf16.gmra.mxu3 %v16403_v56  ;;  %v7035_v37 = vpop.f32.mrf.mxu3  ;;  %v14411_v31 = vld [vmem:[#allocation2 + $0xacc] sm:$0xf]  ;;  %v11612_v56 = vld [vmem:[#allocation2 + $0xad8] sm:$0xf0]  ;;  %v6980_v33 = vpop.f32.mrf.mxu0  ;;  %v11759_v15 = vor.u32 %v14447_v21, %v11756_v11  ;;  %7351 = vmatpush.bf16.msrb.mxu0 %v10751_v35 }
 0x324   : > { %v6999_v2 = vpop.f32.mrf.mxu1  ;;  %v14347_v26 = vld [vmem:[#allocation2 + $0x8cc] sm:$0xf]  ;;  %v11356_v48 = vld [vmem:[#allocation2 + $0x8d8] sm:$0xf0]  ;;  %v6981_v53 = vadd.f32 %v6980_v33, %v16882_v61  ;;  %v16899_v55 = vadd.f32 %v7035_v37, %v7017_v36  ;;  %7370 = vmatpush.bf16.msrb.mxu1 %v10879_v44  ;;  %v11615_v42 = vor.u32 %v14411_v31, %v11612_v56 }
 0x325   : > { %v14379_v16 = vld [vmem:[#allocation2 + $0x9cc] sm:$0xf]  ;;  %v11484_v30 = vld [vmem:[#allocation2 + $0x9d8] sm:$0xf0]  ;;  %v11359_v57 = vor.u32 %v14347_v26, %v11356_v48 }
 0x326   : > { %v14443_v58 = vld [vmem:[#allocation2 + $0xbcc] sm:$0xf]  ;;  %v11740_v32 = vld [vmem:[#allocation2 + $0xbd8] sm:$0xf0]  ;;  %7408 = vmatpush.bf16.msrb.mxu3 %v11135_v50  ;;  %v7000_v54 = vadd.f32 %v6999_v2, %v6981_v53  ;;  %7458 = vmatpush.bf16.msra.mxu2 %v11631_v4  ;;  %v11487_v63 = vor.u32 %v14379_v16, %v11484_v30 }
 0x327   : > { %7420 = vmatpush.bf16.msra.mxu0 %v11375_v51  ;;  %v11743_v25 = vor.u32 %v14443_v58, %v11740_v32  ;;  %v14407_v60 = vld [vmem:[#allocation2 + $0xaac] sm:$0xf]  ;;  %v11596_v61 = vld [vmem:[#allocation2 + $0xab8] sm:$0xf0] }
 0x328   : > { %7439 = vmatpush.bf16.msra.mxu1 %v11503_v22  ;;  %v14343_v59 = vld [vmem:[#allocation2 + $0x8ac] sm:$0xf]  ;;  %v11340_v38 = vld [vmem:[#allocation2 + $0x8b8] sm:$0xf0]  ;;  %v7018_v3 = vpop.f32.mrf.mxu2  ;;  %v11599_v12 = vor.u32 %v14407_v60, %v11596_v61 }
 0x329   : > { %v14375_v10 = vld [vmem:[#allocation2 + $0x9ac] sm:$0xf]  ;;  %v11468_v52 = vld [vmem:[#allocation2 + $0x9b8] sm:$0xf0]  ;;  %v7019_v62 = vadd.f32 %v7018_v3, %v7000_v54  ;;  %v11343_v21 = vor.u32 %v14343_v59, %v11340_v38 }
 0x32a   : > { %7477 = vmatpush.bf16.msra.mxu3 %v11759_v15  ;;  %7459 = vmatpush.bf16.msra.mxu2 %v11615_v42  ;;  %v14439_v43 = vld [vmem:[#allocation2 + $0xbac] sm:$0xf]  ;;  %v11724_v34 = vld [vmem:[#allocation2 + $0xbb8] sm:$0xf0]  ;;  %v11471_v47 = vor.u32 %v14375_v10, %v11468_v52 }
 0x32b   : > { %v7037_v19 = vpop.f32.mrf.mxu3  ;;  %7421 = vmatpush.bf16.msra.mxu0 %v11359_v57  ;;  %v7049_v27 = vpop.f32.mrf.mxu0  ;;  %v14403_v11 = vld [vmem:[#allocation2 + $0xa8c] sm:$0xf]  ;;  %v11580_v44 = vld [vmem:[#allocation2 + $0xa98] sm:$0xf0]  ;;  %v11727_v37 = vor.u32 %v14439_v43, %v11724_v34 }
 0x32c   : > { %v7068_v49 = vpop.f32.mrf.mxu1  ;;  %7440 = vmatpush.bf16.msra.mxu1 %v11487_v63  ;;  %v7050_v35 = vadd.f32 %v7049_v27, %v16889_v20  ;;  %v16902_v50 = vadd.f32 %v7037_v19, %v7019_v62  ;;  %v14339_v4 = vld [vmem:[#allocation2 + $0x88c] sm:$0xf]  ;;  %v11324_v51 = vld [vmem:[#allocation2 + $0x898] sm:$0xf0]  ;;  %v11583_v20 = vor.u32 %v14403_v11, %v11580_v44 }
 0x32d   : > { %v14371_v31 = vld [vmem:[#allocation2 + $0x98c] sm:$0xf]  ;;  %v11452_v36 = vld [vmem:[#allocation2 + $0x998] sm:$0xf0]  ;;  %v11327_v22 = vor.u32 %v14339_v4, %v11324_v51 }
 0x32e   : > { %7478 = vmatpush.bf16.msra.mxu3 %v11743_v25  ;;  %v7069_v56 = vadd.f32 %v7068_v49, %v7050_v35  ;;  %v14435_v33 = vld [vmem:[#allocation2 + $0xb8c] sm:$0xf]  ;;  %v11708_v2 = vld [vmem:[#allocation2 + $0xb98] sm:$0xf0]  ;;  %7460 = vmatpush.bf16.msra.mxu2 %v11599_v12  ;;  %v11455_v48 = vor.u32 %v14371_v31, %v11452_v36 }
 0x32f   : > { %7422 = vmatpush.bf16.msra.mxu0 %v11343_v21  ;;  %v14399_v15 = vld [vmem:[#allocation2 + $0xa6c] sm:$0xf]  ;;  %v11564_v26 = vld [vmem:[#allocation2 + $0xa78] sm:$0xf0]  ;;  %v11711_v16 = vor.u32 %v14435_v33, %v11708_v2 }
 0x330   : > { %7352 = vmatmul.bf16.vlgmr.msrb.gmra.mxu0 %v16417_v0  ;;  %7441 = vmatpush.bf16.msra.mxu1 %v11471_v47  ;;  %v14335_v0 = vld [vmem:[#allocation2 + $0x86c] sm:$0xf]  ;;  %v11308_v53 = vld [vmem:[#allocation2 + $0x878] sm:$0xf0]  ;;  %v11567_v25 = vor.u32 %v14399_v15, %v11564_v26 }
 0x331   : > { %7371 = vmatmul.bf16.vlgmr.msrb.gmra.mxu1 %v16419_v1  ;;  %7390 = vmatmul.bf16.vlgmr.msrb.gmra.mxu2 %v16421_v5  ;;  %v14367_v1 = vld [vmem:[#allocation2 + $0x96c] sm:$0xf]  ;;  %v7087_v30 = vpop.f32.mrf.mxu2  ;;  %v11436_v32 = vld [vmem:[#allocation2 + $0x978] sm:$0xf0]  ;;  %v11311_v60 = vor.u32 %v14335_v0, %v11308_v53 }
 0x332   : > { %7479 = vmatpush.bf16.msra.mxu3 %v11727_v37  ;;  %v14431_v54 = vld [vmem:[#allocation2 + $0xb6c] sm:$0xf]  ;;  %v11692_v5 = vld [vmem:[#allocation2 + $0xb78] sm:$0xf0]  ;;  %v7088_v42 = vadd.f32 %v7087_v30, %v7069_v56  ;;  %7461 = vmatpush.bf16.msra.mxu2 %v11583_v20  ;;  %v11439_v10 = vor.u32 %v14367_v1, %v11436_v32 }
 0x333   : > { %7409 = vmatmul.bf16.vlgmr.msrb.gmra.mxu3 %v16423_v6  ;;  %v7106_v58 = vpop.f32.mrf.mxu3  ;;  %v7051_v6 = vpop.f32.mrf.mxu0  ;;  %7423 = vmatpush.bf16.msra.mxu0 %v11327_v22  ;;  %v14395_v61 = vld [vmem:[#allocation2 + $0xa4c] sm:$0xf]  ;;  %v11548_v59 = vld [vmem:[#allocation2 + $0xa58] sm:$0xf0]  ;;  %v11695_v3 = vor.u32 %v14431_v54, %v11692_v5 }
 0x334   : > { %v7070_v57 = vpop.f32.mrf.mxu1  ;;  %v7052_v63 = vadd.f32 %v7051_v6, %v16892_v7  ;;  %v16909_v38 = vadd.f32 %v7106_v58, %v7088_v42  ;;  %7442 = vmatpush.bf16.msra.mxu1 %v11455_v48  ;;  %v14331_v19 = vld [vmem:[#allocation2 + $0x84c] sm:$0xf]  ;;  %v11292_v52 = vld [vmem:[#allocation2 + $0x858] sm:$0xf0]  ;;  %v11551_v7 = vor.u32 %v14395_v61, %v11548_v59 }
 0x335   : > { %v14363_v43 = vld [vmem:[#allocation2 + $0x94c] sm:$0xf]  ;;  %v11420_v62 = vld [vmem:[#allocation2 + $0x958] sm:$0xf0]  ;;  %v11295_v35 = vor.u32 %v14331_v19, %v11292_v52 }
 0x336   : > { %7480 = vmatpush.bf16.msra.mxu3 %v11711_v16  ;;  %v7071_v34 = vadd.f32 %v7070_v57, %v7052_v63  ;;  %v14427_v27 = vld [vmem:[#allocation2 + $0xb4c] sm:$0xf]  ;;  %v11676_v49 = vld [vmem:[#allocation2 + $0xb58] sm:$0xf0]  ;;  %7462 = vmatpush.bf16.msra.mxu2 %v11567_v25  ;;  %v11423_v11 = vor.u32 %v14363_v43, %v11420_v62 }
 0x337   : > { %7424 = vmatpush.bf16.msra.mxu0 %v11311_v60  ;;  %v14391_v12 = vld [vmem:[#allocation2 + $0xa2c] sm:$0xf]  ;;  %v11532_v21 = vld [vmem:[#allocation2 + $0xa38] sm:$0xf0]  ;;  %v11679_v44 = vor.u32 %v14427_v27, %v11676_v49 }
 0x338   : > { %7443 = vmatpush.bf16.msra.mxu1 %v11439_v10  ;;  %v14327_v47 = vld [vmem:[#allocation2 + $0x82c] sm:$0xf]  ;;  %v11276_v37 = vld [vmem:[#allocation2 + $0x838] sm:$0xf0]  ;;  %v11535_v48 = vor.u32 %v14391_v12, %v11532_v21 }
 0x339   : > { %v14359_v4 = vld [vmem:[#allocation2 + $0x92c] sm:$0xf]  ;;  %v7089_v51 = vpop.f32.mrf.mxu2  ;;  %v11404_v56 = vld [vmem:[#allocation2 + $0x938] sm:$0xf0]  ;;  %v11279_v16 = vor.u32 %v14327_v47, %v11276_v37 }
 0x33a   : > { %7481 = vmatpush.bf16.msra.mxu3 %v11695_v3  ;;  %v14423_v36 = vld [vmem:[#allocation2 + $0xb2c] sm:$0xf]  ;;  %v11660_v33 = vld [vmem:[#allocation2 + $0xb38] sm:$0xf0]  ;;  %v7090_v2 = vadd.f32 %v7089_v51, %v7071_v34  ;;  %7463 = vmatpush.bf16.msra.mxu2 %v11551_v7  ;;  %v11407_v58 = vor.u32 %v14359_v4, %v11404_v56 }
 0x33b   : > { %v7108_v31 = vpop.f32.mrf.mxu3  ;;  %v14387_v15 = vld [vmem:[#allocation2 + $0xa0c] sm:$0xf]  ;;  %7425 = vmatpush.bf16.msra.mxu0 %v11295_v35  ;;  %v11516_v0 = vld [vmem:[#allocation2 + $0xa18] sm:$0xf0]  ;;  %v11663_v32 = vor.u32 %v14423_v36, %v11660_v33 }
 0x33c   : > { %v7073_v22 = vpop.f32.mrf.mxu1  ;;  %v14323_v53 = vld [vmem:[#allocation2 + $0x80c] sm:$0xf]  ;;  %v11260_v1 = vld [vmem:[#allocation2 + $0x818] sm:$0xf0]  ;;  %v16912_v30 = vadd.f32 %v7108_v31, %v7090_v2  ;;  %7444 = vmatpush.bf16.msra.mxu1 %v11423_v11  ;;  %v11519_v59 = vor.u32 %v14387_v15, %v11516_v0 }
 0x33d   : > { %v7054_v20 = vpop.f32.mrf.mxu0  ;;  %v14355_v54 = vld [vmem:[#allocation2 + $0x90c] sm:$0xf]  ;;  %v11388_v5 = vld [vmem:[#allocation2 + $0x918] sm:$0xf0]  ;;  %v11263_v10 = vor.u32 %v14323_v53, %v11260_v1 }
 0x33e   : > { %v7055_v26 = vadd.f32 %v7054_v20, %v16899_v55  ;;  %7482 = vmatpush.bf16.msra.mxu3 %v11679_v44  ;;  %v14419_v42 = vld [vmem:[#allocation2 + $0xb0c] sm:$0xf]  ;;  %v11644_v55 = vld [vmem:[#allocation2 + $0xb18] sm:$0xf0]  ;;  %7464 = vmatpush.bf16.msra.mxu2 %v11535_v48 }
 0x33f   : > { %v14543_v57 = vld [vmem:[#allocation2 + $0xeec] sm:$0xf]  ;;  %v12140_v63 = vld [vmem:[#allocation2 + $0xef8] sm:$0xf0]  ;;  %7426 = vmatpush.bf16.msra.mxu0 %v11279_v16 }
 0x340   : > { %v7074_v6 = vadd.f32 %v7073_v22, %v7055_v26  ;;  %7357 = vmatmul.bf16.gmra.mxu0 %v16437_v8  ;;  %v14479_v25 = vld [vmem:[#allocation2 + $0xcec] sm:$0xf]  ;;  %v11884_v60 = vld [vmem:[#allocation2 + $0xcf8] sm:$0xf0]  ;;  %7445 = vmatpush.bf16.msra.mxu1 %v11407_v58  ;;  %v11391_v8 = vor.u32 %v14355_v54, %v11388_v5  ;;  %v12143_v62 = vor.u32 %v14543_v57, %v12140_v63 }
 0x341   : > { %7376 = vmatmul.bf16.gmra.mxu1 %v16439_v9  ;;  %7395 = vmatmul.bf16.gmra.mxu2 %v16441_v13  ;;  %v14511_v61 = vld [vmem:[#allocation2 + $0xdec] sm:$0xf]  ;;  %v12012_v3 = vld [vmem:[#allocation2 + $0xdf8] sm:$0xf0]  ;;  %v11647_v9 = vor.u32 %v14419_v42, %v11644_v55  ;;  %v11887_v13 = vor.u32 %v14479_v25, %v11884_v60 }
 0x342   : > { %v14575_v19 = vld [vmem:[#allocation2 + $0xfec] sm:$0xf]  ;;  %v12268_v52 = vld [vmem:[#allocation2 + $0xff8] sm:$0xf0]  ;;  %7483 = vmatpush.bf16.msra.mxu3 %v11663_v32  ;;  %v7092_v43 = vpop.f32.mrf.mxu2  ;;  %v12015_v12 = vor.u32 %v14511_v61, %v12012_v3  ;;  %7465 = vmatpush.bf16.msra.mxu2 %v11519_v59 }
 0x343   : > { %7414 = vmatmul.bf16.gmra.mxu3 %v16443_v14  ;;  %v7111_v34 = vpop.f32.mrf.mxu3  ;;  %v14539_v27 = vld [vmem:[#allocation2 + $0xecc] sm:$0xf]  ;;  %v12124_v14 = vld [vmem:[#allocation2 + $0xed8] sm:$0xf0]  ;;  %v7093_v49 = vadd.f32 %v7092_v43, %v7074_v6  ;;  %v12271_v21 = vor.u32 %v14575_v19, %v12268_v52  ;;  %7427 = vmatpush.bf16.msra.mxu0 %v11263_v10 }
 0x344   : > { %v7075_v35 = vpop.f32.mrf.mxu1  ;;  %v14475_v11 = vld [vmem:[#allocation2 + $0xccc] sm:$0xf]  ;;  %v11868_v44 = vld [vmem:[#allocation2 + $0xcd8] sm:$0xf0]  ;;  %7446 = vmatpush.bf16.msra.mxu1 %v11391_v8  ;;  %v12127_v33 = vor.u32 %v14539_v27, %v12124_v14 }
 0x345   : > { %v7056_v7 = vpop.f32.mrf.mxu0  ;;  %v14507_v47 = vld [vmem:[#allocation2 + $0xdcc] sm:$0xf]  ;;  %v11996_v4 = vld [vmem:[#allocation2 + $0xdd8] sm:$0xf0]  ;;  %v16919_v56 = vadd.f32 %v7111_v34, %v7093_v49  ;;  %v11871_v2 = vor.u32 %v14475_v11, %v11868_v44 }
 0x346   : > { %v7057_v37 = vadd.f32 %v7056_v7, %v16902_v50  ;;  %v14571_v51 = vld [vmem:[#allocation2 + $0xfcc] sm:$0xf]  ;;  %v12252_v31 = vld [vmem:[#allocation2 + $0xfd8] sm:$0xf0]  ;;  %7484 = vmatpush.bf16.msra.mxu3 %v11647_v9  ;;  %7534 = vmatpush.bf16.msrb.mxu2 %v12143_v62  ;;  %v11999_v20 = vor.u32 %v14507_v47, %v11996_v4 }
 0x347   : > { %7496 = vmatpush.bf16.msrb.mxu0 %v11887_v13  ;;  %v12255_v22 = vor.u32 %v14571_v51, %v12252_v31  ;;  %v14535_v15 = vld [vmem:[#allocation2 + $0xeac] sm:$0xf]  ;;  %v12108_v50 = vld [vmem:[#allocation2 + $0xeb8] sm:$0xf0] }
 0x348   : > { %v7076_v36 = vadd.f32 %v7075_v35, %v7057_v37  ;;  %7515 = vmatpush.bf16.msrb.mxu1 %v12015_v12  ;;  %v14471_v26 = vld [vmem:[#allocation2 + $0xcac] sm:$0xf]  ;;  %v11852_v48 = vld [vmem:[#allocation2 + $0xcb8] sm:$0xf0]  ;;  %v12111_v55 = vor.u32 %v14535_v15, %v12108_v50 }
 0x349   : > { %v14503_v16 = vld [vmem:[#allocation2 + $0xdac] sm:$0xf]  ;;  %v11980_v1 = vld [vmem:[#allocation2 + $0xdb8] sm:$0xf0]  ;;  %v11855_v57 = vor.u32 %v14471_v26, %v11852_v48 }
 0x34a   : > { %7553 = vmatpush.bf16.msrb.mxu3 %v12271_v21  ;;  %v7094_v0 = vpop.f32.mrf.mxu2  ;;  %7535 = vmatpush.bf16.msrb.mxu2 %v12127_v33  ;;  %v14567_v58 = vld [vmem:[#allocation2 + $0xfac] sm:$0xf]  ;;  %v12236_v32 = vld [vmem:[#allocation2 + $0xfb8] sm:$0xf0]  ;;  %v11983_v61 = vor.u32 %v14503_v16, %v11980_v1 }
 0x34b   : > { %v7113_v53 = vpop.f32.mrf.mxu3  ;;  %7497 = vmatpush.bf16.msrb.mxu0 %v11871_v2  ;;  %v7095_v54 = vadd.f32 %v7094_v0, %v7076_v36  ;;  %v14531_v63 = vld [vmem:[#allocation2 + $0xe8c] sm:$0xf]  ;;  %v12092_v25 = vld [vmem:[#allocation2 + $0xe98] sm:$0xf0]  ;;  %v12239_v59 = vor.u32 %v14567_v58, %v12236_v32 }
 0x34c   : > { %v7144_v42 = vpop.f32.mrf.mxu1  ;;  %7516 = vmatpush.bf16.msrb.mxu1 %v11999_v20  ;;  %v14467_v10 = vld [vmem:[#allocation2 + $0xc8c] sm:$0xf]  ;;  %v11836_v3 = vld [vmem:[#allocation2 + $0xc98] sm:$0xf0] }
 0x34d   : > { %v7125_v5 = vpop.f32.mrf.mxu0  ;;  %v16922_v60 = vadd.f32 %v7113_v53, %v7095_v54  ;;  %v14499_v19 = vld [vmem:[#allocation2 + $0xd8c] sm:$0xf]  ;;  %v11964_v8 = vld [vmem:[#allocation2 + $0xd98] sm:$0xf0]  ;;  %v11839_v34 = vor.u32 %v14467_v10, %v11836_v3 }
 0x34e   : > { %7554 = vmatpush.bf16.msrb.mxu3 %v12255_v22  ;;  %v7126_v6 = vadd.f32 %v7125_v5, %v16909_v38  ;;  %v14563_v9 = vld [vmem:[#allocation2 + $0xf8c] sm:$0xf]  ;;  %v12220_v43 = vld [vmem:[#allocation2 + $0xf98] sm:$0xf0]  ;;  %7536 = vmatpush.bf16.msrb.mxu2 %v12111_v55  ;;  %v12095_v38 = vor.u32 %v14531_v63, %v12092_v25  ;;  %v11967_v27 = vor.u32 %v14499_v19, %v11964_v8 }
 0x34f   : > { %7498 = vmatpush.bf16.msrb.mxu0 %v11855_v57  ;;  %v14527_v62 = vld [vmem:[#allocation2 + $0xe6c] sm:$0xf]  ;;  %v12076_v13 = vld [vmem:[#allocation2 + $0xe78] sm:$0xf0]  ;;  %v12223_v14 = vor.u32 %v14563_v9, %v12220_v43 }
 0x350   : > { %v7145_v52 = vadd.f32 %v7144_v42, %v7126_v6  ;;  %7428 = vmatmul.bf16.vlgmr.msra.gmra.mxu0 %v16457_v23  ;;  %7517 = vmatpush.bf16.msrb.mxu1 %v11983_v61  ;;  %v14463_v23 = vld [vmem:[#allocation2 + $0xc6c] sm:$0xf]  ;;  %v11820_v49 = vld [vmem:[#allocation2 + $0xc78] sm:$0xf0]  ;;  %v12079_v37 = vor.u32 %v14527_v62, %v12076_v13 }
 0x351   : > { %7447 = vmatmul.bf16.vlgmr.msra.gmra.mxu1 %v16459_v24  ;;  %7466 = vmatmul.bf16.vlgmr.msra.gmra.mxu2 %v16461_v28  ;;  %v14495_v24 = vld [vmem:[#allocation2 + $0xd6c] sm:$0xf]  ;;  %v11948_v12 = vld [vmem:[#allocation2 + $0xd78] sm:$0xf0]  ;;  %v11823_v4 = vor.u32 %v14463_v23, %v11820_v49 }
 0x352   : > { %7555 = vmatpush.bf16.msrb.mxu3 %v12239_v59  ;;  %v7163_v7 = vpop.f32.mrf.mxu2  ;;  %v14559_v21 = vld [vmem:[#allocation2 + $0xf6c] sm:$0xf]  ;;  %v12204_v28 = vld [vmem:[#allocation2 + $0xf78] sm:$0xf0]  ;;  %7537 = vmatpush.bf16.msrb.mxu2 %v12095_v38  ;;  %v11951_v33 = vor.u32 %v14495_v24, %v11948_v12 }
 0x353   : > { %7485 = vmatmul.bf16.vlgmr.msra.gmra.mxu3 %v16463_v29  ;;  %v7164_v11 = vadd.f32 %v7163_v7, %v7145_v52  ;;  %7499 = vmatpush.bf16.msrb.mxu0 %v11839_v34  ;;  %v14523_v51 = vld [vmem:[#allocation2 + $0xe4c] sm:$0xf]  ;;  %v12060_v31 = vld [vmem:[#allocation2 + $0xe58] sm:$0xf0]  ;;  %v12207_v2 = vor.u32 %v14559_v21, %v12204_v28 }
 0x354   : > { %v7146_v44 = vpop.f32.mrf.mxu1  ;;  %7518 = vmatpush.bf16.msrb.mxu1 %v11967_v27  ;;  %v14459_v20 = vld [vmem:[#allocation2 + $0xc4c] sm:$0xf]  ;;  %v11804_v22 = vld [vmem:[#allocation2 + $0xc58] sm:$0xf0] }
 0x355   : > { %v7182_v35 = vpop.f32.mrf.mxu3  ;;  %v7127_v29 = vpop.f32.mrf.mxu0  ;;  %v14491_v15 = vld [vmem:[#allocation2 + $0xd4c] sm:$0xf]  ;;  %v11932_v26 = vld [vmem:[#allocation2 + $0xd58] sm:$0xf0]  ;;  %v11807_v0 = vor.u32 %v14459_v20, %v11804_v22 }
 0x356   : > { %v7128_v47 = vadd.f32 %v7127_v29, %v16912_v30  ;;  %v16929_v36 = vadd.f32 %v7182_v35, %v7164_v11  ;;  %7556 = vmatpush.bf16.msrb.mxu3 %v12223_v14  ;;  %v14555_v48 = vld [vmem:[#allocation2 + $0xf4c] sm:$0xf]  ;;  %v12188_v16 = vld [vmem:[#allocation2 + $0xf58] sm:$0xf0]  ;;  %7538 = vmatpush.bf16.msrb.mxu2 %v12079_v37  ;;  %v12063_v30 = vor.u32 %v14523_v51, %v12060_v31 }
 0x357   : > { %7500 = vmatpush.bf16.msrb.mxu0 %v11823_v4  ;;  %v14519_v53 = vld [vmem:[#allocation2 + $0xe2c] sm:$0xf]  ;;  %v12044_v1 = vld [vmem:[#allocation2 + $0xe38] sm:$0xf0]  ;;  %v11935_v58 = vor.u32 %v14491_v15, %v11932_v26  ;;  %v12191_v32 = vor.u32 %v14555_v48, %v12188_v16 }
 0x358   : > { %v7147_v50 = vadd.f32 %v7146_v44, %v7128_v47  ;;  %7519 = vmatpush.bf16.msrb.mxu1 %v11951_v33  ;;  %v14455_v54 = vld [vmem:[#allocation2 + $0xc2c] sm:$0xf]  ;;  %v11788_v5 = vld [vmem:[#allocation2 + $0xc38] sm:$0xf0]  ;;  %v12047_v52 = vor.u32 %v14519_v53, %v12044_v1 }
 0x359   : > { %v14487_v42 = vld [vmem:[#allocation2 + $0xd2c] sm:$0xf]  ;;  %v11916_v57 = vld [vmem:[#allocation2 + $0xd38] sm:$0xf0]  ;;  %v11791_v8 = vor.u32 %v14455_v54, %v11788_v5 }
 0x35a   : > { %7557 = vmatpush.bf16.msrb.mxu3 %v12207_v2  ;;  %v7165_v6 = vpop.f32.mrf.mxu2  ;;  %v14551_v63 = vld [vmem:[#allocation2 + $0xf2c] sm:$0xf]  ;;  %v12172_v25 = vld [vmem:[#allocation2 + $0xf38] sm:$0xf0]  ;;  %7539 = vmatpush.bf16.msrb.mxu2 %v12063_v30  ;;  %v11919_v62 = vor.u32 %v14487_v42, %v11916_v57 }
 0x35b   : > { %v7166_v61 = vadd.f32 %v7165_v6, %v7147_v50  ;;  %v14515_v3 = vld [vmem:[#allocation2 + $0xe0c] sm:$0xf]  ;;  %7501 = vmatpush.bf16.msrb.mxu0 %v11807_v0  ;;  %v12028_v9 = vld [vmem:[#allocation2 + $0xe18] sm:$0xf0]  ;;  %v12175_v13 = vor.u32 %v14551_v63, %v12172_v25 }
 0x35c   : > { %v14451_v43 = vld [vmem:[#allocation2 + $0xc0c] sm:$0xf]  ;;  %v11772_v38 = vld [vmem:[#allocation2 + $0xc18] sm:$0xf0]  ;;  %7520 = vmatpush.bf16.msrb.mxu1 %v11935_v58  ;;  %v12031_v28 = vor.u32 %v14515_v3, %v12028_v9 }
 0x35d   : > { %v7184_v55 = vpop.f32.mrf.mxu3  ;;  %v7130_v59 = vpop.f32.mrf.mxu0  ;;  %v14483_v27 = vld [vmem:[#allocation2 + $0xd0c] sm:$0xf]  ;;  %v11900_v14 = vld [vmem:[#allocation2 + $0xd18] sm:$0xf0]  ;;  %v11775_v11 = vor.u32 %v14451_v43, %v11772_v38 }
 0x35e   : > { %v7149_v10 = vpop.f32.mrf.mxu1  ;;  %v7131_v19 = vadd.f32 %v7130_v59, %v16919_v56  ;;  %v16932_v34 = vadd.f32 %v7184_v55, %v7166_v61  ;;  %7558 = vmatpush.bf16.msrb.mxu3 %v12191_v32  ;;  %v14547_v23 = vld [vmem:[#allocation2 + $0xf0c] sm:$0xf]  ;;  %v12156_v56 = vld [vmem:[#allocation2 + $0xf18] sm:$0xf0]  ;;  %7540 = vmatpush.bf16.msrb.mxu2 %v12047_v52 }
 0x35f   : > { %v14671_v24 = vld [vmem:[#allocation2 + $0x12ec] sm:$0xf]  ;;  %v12652_v7 = vld [vmem:[#allocation2 + $0x12f8] sm:$0xf0]  ;;  %7502 = vmatpush.bf16.msrb.mxu0 %v11791_v8 }
 0x360   : > { %v7150_v49 = vadd.f32 %v7149_v10, %v7131_v19  ;;  %7433 = vmatmul.bf16.gmra.mxu0 %v16477_v39  ;;  %v14607_v35 = vld [vmem:[#allocation2 + $0x10ec] sm:$0xf]  ;;  %v12396_v12 = vld [vmem:[#allocation2 + $0x10f8] sm:$0xf0]  ;;  %7521 = vmatpush.bf16.msrb.mxu1 %v11919_v62  ;;  %v11903_v39 = vor.u32 %v14483_v27, %v11900_v14  ;;  %v12655_v51 = vor.u32 %v14671_v24, %v12652_v7 }
 0x361   : > { %7452 = vmatmul.bf16.gmra.mxu1 %v16479_v40  ;;  %7471 = vmatmul.bf16.gmra.mxu2 %v16481_v45  ;;  %v14639_v21 = vld [vmem:[#allocation2 + $0x11ec] sm:$0xf]  ;;  %v12524_v29 = vld [vmem:[#allocation2 + $0x11f8] sm:$0xf0]  ;;  %v12159_v40 = vor.u32 %v14547_v23, %v12156_v56  ;;  %v12399_v45 = vor.u32 %v14607_v35, %v12396_v12 }
 0x362   : > { %v14703_v44 = vld [vmem:[#allocation2 + $0x13ec] sm:$0xf]  ;;  %v12780_v47 = vld [vmem:[#allocation2 + $0x13f8] sm:$0xf0]  ;;  %7559 = vmatpush.bf16.msrb.mxu3 %v12175_v13  ;;  %v12527_v22 = vor.u32 %v14639_v21, %v12524_v29  ;;  %7541 = vmatpush.bf16.msrb.mxu2 %v12031_v28  ;;  %v17313_v28 = vld [vmem:[#allocation55_spill] sm:$0xff] }
 0x363   : > { %7490 = vmatmul.bf16.gmra.mxu3 %v16483_v46  ;;  %v14667_v31 = vld [vmem:[#allocation2 + $0x12cc] sm:$0xf]  ;;  %v12636_v46 = vld [vmem:[#allocation2 + $0x12d8] sm:$0xf0]  ;;  %v12783_v15 = vor.u32 %v14703_v44, %v12780_v47  ;;  %7503 = vmatpush.bf16.msrb.mxu0 %v11775_v11 }
 0x364   : > { %v7168_v37 = vpop.f32.mrf.mxu2  ;;  %v14603_v50 = vld [vmem:[#allocation2 + $0x10cc] sm:$0xf]  ;;  %v12380_v26 = vld [vmem:[#allocation2 + $0x10d8] sm:$0xf0]  ;;  %7522 = vmatpush.bf16.msrb.mxu1 %v11903_v39  ;;  %v12639_v32 = vor.u32 %v14667_v31, %v12636_v46 }
 0x365   : > { %v7169_v33 = vadd.f32 %v7168_v37, %v7150_v49  ;;  %v7132_v2 = vpop.f32.mrf.mxu0  ;;  %v14635_v48 = vld [vmem:[#allocation2 + $0x11cc] sm:$0xf]  ;;  %v12508_v30 = vld [vmem:[#allocation2 + $0x11d8] sm:$0xf0]  ;;  %v12383_v54 = vor.u32 %v14603_v50, %v12380_v26 }
 0x366   : > { %v7187_v4 = vpop.f32.mrf.mxu3  ;;  %v7151_v20 = vpop.f32.mrf.mxu1  ;;  %v7133_v16 = vadd.f32 %v7132_v2, %v16922_v60  ;;  %v14699_v0 = vld [vmem:[#allocation2 + $0x13cc] sm:$0xf]  ;;  %v12764_v53 = vld [vmem:[#allocation2 + $0x13d8] sm:$0xf0]  ;;  %7560 = vmatpush.bf16.msrb.mxu3 %v12159_v40  ;;  %7610 = vmatpush.bf16.msra.mxu2 %v12655_v51  ;;  %v12511_v5 = vor.u32 %v14635_v48, %v12508_v30 }
 0x367   : > { %v16939_v1 = vadd.f32 %v7187_v4, %v7169_v33  ;;  %7572 = vmatpush.bf16.msra.mxu0 %v12399_v45  ;;  %v12767_v42 = vor.u32 %v14699_v0, %v12764_v53  ;;  %v14663_v6 = vld [vmem:[#allocation2 + $0x12ac] sm:$0xf]  ;;  %v12620_v60 = vld [vmem:[#allocation2 + $0x12b8] sm:$0xf0] }
 0x368   : > { %v7152_v58 = vadd.f32 %v7151_v20, %v7133_v16  ;;  %7591 = vmatpush.bf16.msra.mxu1 %v12527_v22  ;;  %v14599_v55 = vld [vmem:[#allocation2 + $0x10ac] sm:$0xf]  ;;  %v12364_v57 = vld [vmem:[#allocation2 + $0x10b8] sm:$0xf0]  ;;  %v12623_v43 = vor.u32 %v14663_v6, %v12620_v60 }
 0x369   : > { %v14631_v63 = vld [vmem:[#allocation2 + $0x11ac] sm:$0xf]  ;;  %v12492_v59 = vld [vmem:[#allocation2 + $0x11b8] sm:$0xf0]  ;;  %v12367_v38 = vor.u32 %v14599_v55, %v12364_v57 }
 0x36a   : > { %7629 = vmatpush.bf16.msra.mxu3 %v12783_v15  ;;  %7611 = vmatpush.bf16.msra.mxu2 %v12639_v32  ;;  %v14695_v10 = vld [vmem:[#allocation2 + $0x13ac] sm:$0xf]  ;;  %v12748_v3 = vld [vmem:[#allocation2 + $0x13b8] sm:$0xf0]  ;;  %v12495_v14 = vor.u32 %v14631_v63, %v12492_v59 }
 0x36b   : > { %7573 = vmatpush.bf16.msra.mxu0 %v12383_v54  ;;  %v14659_v62 = vld [vmem:[#allocation2 + $0x128c] sm:$0xf]  ;;  %v12604_v13 = vld [vmem:[#allocation2 + $0x1298] sm:$0xf0]  ;;  %v12751_v23 = vor.u32 %v14695_v10, %v12748_v3 }
 0x36c   : > { %v7170_v25 = vpop.f32.mrf.mxu2  ;;  %7592 = vmatpush.bf16.msra.mxu1 %v12511_v5  ;;  %v14595_v49 = vld [vmem:[#allocation2 + $0x108c] sm:$0xf]  ;;  %v12348_v56 = vld [vmem:[#allocation2 + $0x1098] sm:$0xf0]  ;;  %v12607_v11 = vor.u32 %v14659_v62, %v12604_v13 }
 0x36d   : > { %v7171_v19 = vadd.f32 %v7170_v25, %v7152_v58  ;;  %v7201_v52 = vpop.f32.mrf.mxu0  ;;  %v14627_v24 = vld [vmem:[#allocation2 + $0x118c] sm:$0xf]  ;;  %v12476_v35 = vld [vmem:[#allocation2 + $0x1198] sm:$0xf0]  ;;  %v12351_v29 = vor.u32 %v14595_v49, %v12348_v56 }
 0x36e   : > { %v7189_v61 = vpop.f32.mrf.mxu3  ;;  %v7220_v8 = vpop.f32.mrf.mxu1  ;;  %7630 = vmatpush.bf16.msra.mxu3 %v12767_v42  ;;  %v7202_v9 = vadd.f32 %v7201_v52, %v16929_v36  ;;  %v14691_v12 = vld [vmem:[#allocation2 + $0x138c] sm:$0xf]  ;;  %v12732_v21 = vld [vmem:[#allocation2 + $0x1398] sm:$0xf0]  ;;  %7612 = vmatpush.bf16.msra.mxu2 %v12623_v43  ;;  %v12479_v39 = vor.u32 %v14627_v24, %v12476_v35 }
 0x36f   : > { %v16942_v27 = vadd.f32 %v7189_v61, %v7171_v19  ;;  %v17312_v36 = vld [vmem:[#allocation54_spill] sm:$0xff]  ;;  %7574 = vmatpush.bf16.msra.mxu0 %v12367_v38  ;;  %v12588_v47 = vld [vmem:[#allocation2 + $0x1278] sm:$0xf0]  ;;  %v12735_v40 = vor.u32 %v14691_v12, %v12732_v21 }
 0x370   : > { %v7221_v7 = vadd.f32 %v7220_v8, %v7202_v9  ;;  %7504 = vmatmul.bf16.vlgmr.msrb.gmra.mxu0 %v16497_v17  ;;  %v14655_v44 = vld [vmem:[#allocation2 + $0x126c] sm:$0xf]  ;;  %7593 = vmatpush.bf16.msra.mxu1 %v12495_v14  ;;  %v12332_v37 = vld [vmem:[#allocation2 + $0x1078] sm:$0xf0] }
 0x371   : > { %7523 = vmatmul.bf16.vlgmr.msrb.gmra.mxu1 %v16499_v18  ;;  %7542 = vmatmul.bf16.vlgmr.msrb.gmra.mxu2 %v17312_v36  ;;  %v14591_v17 = vld [vmem:[#allocation2 + $0x106c] sm:$0xf]  ;;  %v12460_v45 = vld [vmem:[#allocation2 + $0x1178] sm:$0xf0]  ;;  %v12591_v15 = vor.u32 %v14655_v44, %v12588_v47 }
 0x372   : > { %7631 = vmatpush.bf16.msra.mxu3 %v12751_v23  ;;  %v14623_v18 = vld [vmem:[#allocation2 + $0x116c] sm:$0xf]  ;;  %v12716_v46 = vld [vmem:[#allocation2 + $0x1378] sm:$0xf0]  ;;  %7613 = vmatpush.bf16.msra.mxu2 %v12607_v11  ;;  %v12335_v50 = vor.u32 %v14591_v17, %v12332_v37 }
 0x373   : > { %7561 = vmatmul.bf16.vlgmr.msrb.gmra.mxu3 %v17313_v28  ;;  %v14687_v31 = vld [vmem:[#allocation2 + $0x136c] sm:$0xf]  ;;  %7575 = vmatpush.bf16.msra.mxu0 %v12351_v29  ;;  %v12572_v48 = vld [vmem:[#allocation2 + $0x1258] sm:$0xf0]  ;;  %v12463_v30 = vor.u32 %v14623_v18, %v12460_v45 }
 0x374   : > { %v7239_v4 = vpop.f32.mrf.mxu2  ;;  %v14651_v26 = vld [vmem:[#allocation2 + $0x124c] sm:$0xf]  ;;  %7594 = vmatpush.bf16.msra.mxu1 %v12479_v39  ;;  %v12719_v0 = vor.u32 %v14687_v31, %v12716_v46  ;;  %v12316_v58 = vld [vmem:[#allocation2 + $0x1058] sm:$0xf0]  ;;  %v17315_v39 = vld [vmem:[#allocation57_spill] sm:$0xff] }
 0x375   : > { %v7240_v33 = vadd.f32 %v7239_v4, %v7221_v7  ;;  %v7203_v2 = vpop.f32.mrf.mxu0  ;;  %v14587_v53 = vld [vmem:[#allocation2 + $0x104c] sm:$0xf]  ;;  %v12444_v5 = vld [vmem:[#allocation2 + $0x1158] sm:$0xf0] }
 0x376   : > { %v7258_v51 = vpop.f32.mrf.mxu3  ;;  %v7222_v20 = vpop.f32.mrf.mxu1  ;;  %v7204_v22 = vadd.f32 %v7203_v2, %v16932_v34  ;;  %7632 = vmatpush.bf16.msra.mxu3 %v12735_v40  ;;  %v14619_v32 = vld [vmem:[#allocation2 + $0x114c] sm:$0xf]  ;;  %v12700_v6 = vld [vmem:[#allocation2 + $0x1358] sm:$0xf0]  ;;  %7614 = vmatpush.bf16.msra.mxu2 %v12591_v15  ;;  %v12575_v34 = vor.u32 %v14651_v26, %v12572_v48  ;;  %v12319_v60 = vor.u32 %v14587_v53, %v12316_v58 }
 0x377   : > { %v16949_v16 = vadd.f32 %v7258_v51, %v7240_v33  ;;  %v14683_v42 = vld [vmem:[#allocation2 + $0x134c] sm:$0xf]  ;;  %7576 = vmatpush.bf16.msra.mxu0 %v12335_v50  ;;  %v12556_v57 = vld [vmem:[#allocation2 + $0x1238] sm:$0xf0]  ;;  %v12447_v63 = vor.u32 %v14619_v32, %v12444_v5  ;;  %v17317_v51 = vld [vmem:[#allocation59_spill] sm:$0xff] }
 0x378   : > { %v7223_v54 = vadd.f32 %v7222_v20, %v7204_v22  ;;  %v14647_v55 = vld [vmem:[#allocation2 + $0x122c] sm:$0xf]  ;;  %7595 = vmatpush.bf16.msra.mxu1 %v12463_v30  ;;  %v12703_v25 = vor.u32 %v14683_v42, %v12700_v6  ;;  %v12300_v59 = vld [vmem:[#allocation2 + $0x1038] sm:$0xf0] }
 0x379   : > { %v14583_v61 = vld [vmem:[#allocation2 + $0x102c] sm:$0xf]  ;;  %v12428_v52 = vld [vmem:[#allocation2 + $0x1138] sm:$0xf0]  ;;  %v12559_v49 = vor.u32 %v14647_v55, %v12556_v57  ;;  %v7726_v37 = vmax.f32 %v16949_v16, 0.0 }
 0x37a   : > { %7633 = vmatpush.bf16.msra.mxu3 %v12719_v0  ;;  %v14615_v10 = vld [vmem:[#allocation2 + $0x112c] sm:$0xf]  ;;  %v12684_v9 = vld [vmem:[#allocation2 + $0x1338] sm:$0xf0]  ;;  %7615 = vmatpush.bf16.msra.mxu2 %v12575_v34  ;;  %v12303_v56 = vor.u32 %v14583_v61, %v12300_v59 }
 0x37b   : > { %v14679_v8 = vld [vmem:[#allocation2 + $0x132c] sm:$0xf]  ;;  %v12540_v14 = vld [vmem:[#allocation2 + $0x1218] sm:$0xf0]  ;;  %7577 = vmatpush.bf16.msra.mxu0 %v12319_v60  ;;  %v12431_v21 = vor.u32 %v14615_v10, %v12428_v52 }
 0x37c   : > { %v7241_v3 = vpop.f32.mrf.mxu2  ;;  %v14643_v13 = vld [vmem:[#allocation2 + $0x120c] sm:$0xf]  ;;  %v12284_v7 = vld [vmem:[#allocation2 + $0x1018] sm:$0xf0]  ;;  %7596 = vmatpush.bf16.msra.mxu1 %v12447_v63  ;;  %v12687_v36 = vor.u32 %v14679_v8, %v12684_v9  ;;  %v15246_v9 = vld [vmem:[#allocation4] sm:$0xf] }
 0x37d   : > { %v7242_v43 = vadd.f32 %v7241_v3, %v7223_v54  ;;  %v7206_v38 = vpop.f32.mrf.mxu0  ;;  %v14579_v24 = vld [vmem:[#allocation2 + $0x100c] sm:$0xf]  ;;  %v12412_v28 = vld [vmem:[#allocation2 + $0x1118] sm:$0xf0]  ;;  %v12543_v46 = vor.u32 %v14643_v13, %v12540_v14 }
 0x37e   : > { %v7260_v19 = vpop.f32.mrf.mxu3  ;;  %v7225_v62 = vpop.f32.mrf.mxu1  ;;  %v7207_v23 = vadd.f32 %v7206_v38, %v16939_v1  ;;  %v14611_v35 = vld [vmem:[#allocation2 + $0x110c] sm:$0xf]  ;;  %7634 = vmatpush.bf16.msra.mxu3 %v12703_v25  ;;  %v12668_v29 = vld [vmem:[#allocation2 + $0x1318] sm:$0xf0]  ;;  %7616 = vmatpush.bf16.msra.mxu2 %v12559_v49  ;;  %v12287_v33 = vor.u32 %v14579_v24, %v12284_v7 }
 0x37f   : > { %v7261_v12 = vadd.f32 %v7260_v19, %v7242_v43  ;;  %v14675_v11 = vld [vmem:[#allocation2 + $0x130c] sm:$0xf]  ;;  %v17314_v47 = vld [vmem:[#allocation56_spill] sm:$0xff]  ;;  %7578 = vmatpush.bf16.msra.mxu0 %v12303_v56  ;;  %v12415_v50 = vor.u32 %v14611_v35, %v12412_v28 }
 0x380   : > { %v7226_v44 = vadd.f32 %v7225_v62, %v7207_v23  ;;  %7509 = vmatmul.bf16.gmra.mxu0 %v17314_v47  ;;  %v14799_v1 = vld [vmem:[#allocation2 + $0x16ec] sm:$0xf]  ;;  %v13164_v40 = vld [vmem:[#allocation2 + $0x16f8] sm:$0xf0]  ;;  %7597 = vmatpush.bf16.msra.mxu1 %v12431_v21  ;;  %v12671_v26 = vor.u32 %v14675_v11, %v12668_v29 }
 0x381   : > { %7528 = vmatmul.bf16.gmra.mxu1 %v17315_v39  ;;  %v14735_v17 = vld [vmem:[#allocation2 + $0x14ec] sm:$0xf]  ;;  %v7730_v18 = vmax.f32 %v7261_v12, 0.0  ;;  %v12908_v45 = vld [vmem:[#allocation2 + $0x14f8] sm:$0xf0]  ;;  %v13167_v30 = vor.u32 %v14799_v1, %v13164_v40 }
 0x382   : > { %v17316_v4 = vld [vmem:[#allocation58_spill] sm:$0xff]  ;;  %v13036_v2 = vld [vmem:[#allocation2 + $0x15f8] sm:$0xf0]  ;;  %7635 = vmatpush.bf16.msra.mxu3 %v12687_v36  ;;  %v12911_v0 = vor.u32 %v14735_v17, %v12908_v45  ;;  %7617 = vmatpush.bf16.msra.mxu2 %v12543_v46 }
 0x383   : > { %7547 = vmatmul.bf16.gmra.mxu2 %v17316_v4  ;;  %7566 = vmatmul.bf16.gmra.mxu3 %v17317_v51  ;;  %v14767_v31 = vld [vmem:[#allocation2 + $0x15ec] sm:$0xf]  ;;  %v13292_v22 = vld [vmem:[#allocation2 + $0x17f8] sm:$0xf0]  ;;  %v16957_v15 = vpack.c.bf16 %v7730_v18, %v7726_v37  ;;  %v17319_v51 = vld [vmem:[#allocation61_spill] sm:$0xff] }
 0x384   : > { %v14831_v20 = vld [vmem:[#allocation2 + $0x17ec] sm:$0xf]  ;;  %v7244_v48 = vpop.f32.mrf.mxu2  ;;  %v13148_v58 = vld [vmem:[#allocation2 + $0x16d8] sm:$0xf0]  ;;  %v13039_v42 = vor.u32 %v14767_v31, %v13036_v2  ;;  %7579 = vmatpush.bf16.msra.mxu0 %v12287_v33  ;;  %7598 = vmatpush.bf16.msra.mxu1 %v12415_v50 }
 0x385   : > { %v14795_v53 = vld [vmem:[#allocation2 + $0x16cc] sm:$0xf]  ;;  %v7245_v32 = vadd.f32 %v7244_v48, %v7226_v44  ;;  %v7208_v54 = vpop.f32.mrf.mxu0  ;;  %v13295_v6 = vor.u32 %v14831_v20, %v13292_v22  ;;  %v12892_v60 = vld [vmem:[#allocation2 + $0x14d8] sm:$0xf0]  ;;  %v17321_v22 = vld [vmem:[#allocation63_spill] sm:$0xff] }
 0x386   : > { %v7263_v16 = vpop.f32.mrf.mxu3  ;;  %v7227_v5 = vpop.f32.mrf.mxu1  ;;  %v14731_v34 = vld [vmem:[#allocation2 + $0x14cc] sm:$0xf]  ;;  %v7209_v57 = vadd.f32 %v7208_v54, %v16942_v27  ;;  %v13020_v63 = vld [vmem:[#allocation2 + $0x15d8] sm:$0xf0]  ;;  %7636 = vmatpush.bf16.msra.mxu3 %v12671_v26  ;;  %7686 = vmatpush.bf16.msrb.mxu2 %v13167_v30  ;;  %v13151_v3 = vor.u32 %v14795_v53, %v13148_v58  ;;  %v16962_v27 = vperm.slane %v15246_v9, 3 }
 0x387   : > { %v14763_v55 = vld [vmem:[#allocation2 + $0x15cc] sm:$0xf]  ;;  %v13276_v61 = vld [vmem:[#allocation2 + $0x17d8] sm:$0xf0]  ;;  %v16960_v59 = vadd.f32 %v7263_v16, %v7245_v32  ;;  %v12895_v19 = vor.u32 %v14731_v34, %v12892_v60 }
 0x388   : > { %v14827_v25 = vld [vmem:[#allocation2 + $0x17cc] sm:$0xf]  ;;  %v7228_v10 = vadd.f32 %v7227_v5, %v7209_v57  ;;  %7648 = vmatpush.bf16.msrb.mxu0 %v12911_v0  ;;  %7667 = vmatpush.bf16.msrb.mxu1 %v13039_v42  ;;  %v13023_v52 = vor.u32 %v14763_v55, %v13020_v63  ;;  %v13132_v38 = vld [vmem:[#allocation2 + $0x16b8] sm:$0xf0] }
 0x389   : > { %v13279_v8 = vor.u32 %v14827_v25, %v13276_v61  ;;  %v14791_v43 = vld [vmem:[#allocation2 + $0x16ac] sm:$0xf]  ;;  %v12876_v13 = vld [vmem:[#allocation2 + $0x14b8] sm:$0xf0]  ;;  %v7734_v33 = vmax.f32 %v16960_v59, 0.0 }
 0x38a   : > { %7705 = vmatpush.bf16.msrb.mxu3 %v13295_v6  ;;  %v14727_v62 = vld [vmem:[#allocation2 + $0x14ac] sm:$0xf]  ;;  %7687 = vmatpush.bf16.msrb.mxu2 %v13151_v3  ;;  %v13004_v56 = vld [vmem:[#allocation2 + $0x15b8] sm:$0xf0]  ;;  %v13135_v28 = vor.u32 %v14791_v43, %v13132_v38 }
 0x38b   : > { %v14759_v14 = vld [vmem:[#allocation2 + $0x15ac] sm:$0xf]  ;;  %v13260_v7 = vld [vmem:[#allocation2 + $0x17b8] sm:$0xf0]  ;;  %v12879_v11 = vor.u32 %v14727_v62, %v12876_v13 }
 0x38c   : > { %v7246_v23 = vpop.f32.mrf.mxu2  ;;  %7649 = vmatpush.bf16.msrb.mxu0 %v12895_v19  ;;  %v14823_v24 = vld [vmem:[#allocation2 + $0x17ac] sm:$0xf]  ;;  %7668 = vmatpush.bf16.msrb.mxu1 %v13023_v52  ;;  %v13116_v44 = vld [vmem:[#allocation2 + $0x1698] sm:$0xf0]  ;;  %v13007_v39 = vor.u32 %v14759_v14, %v13004_v56 }
 0x38d   : > { %v7247_v35 = vadd.f32 %v7246_v23, %v7228_v10  ;;  %v7277_v12 = vpop.f32.mrf.mxu0  ;;  %v14787_v29 = vld [vmem:[#allocation2 + $0x168c] sm:$0xf]  ;;  %v13263_v1 = vor.u32 %v14823_v24, %v13260_v7  ;;  %v12860_v17 = vld [vmem:[#allocation2 + $0x1498] sm:$0xf0] }
 0x38e   : > { %v7265_v49 = vpop.f32.mrf.mxu3  ;;  %v7296_v21 = vpop.f32.mrf.mxu1  ;;  %7706 = vmatpush.bf16.msrb.mxu3 %v13279_v8  ;;  %v7278_v36 = vadd.f32 %v7277_v12, %v16962_v27  ;;  %v14723_v40 = vld [vmem:[#allocation2 + $0x148c] sm:$0xf]  ;;  %v17318_v4 = vld [vmem:[#allocation60_spill] sm:$0xff]  ;;  %7688 = vmatpush.bf16.msrb.mxu2 %v13135_v28  ;;  %v13119_v50 = vor.u32 %v14787_v29, %v13116_v44 }
 0x38f   : > { %v7266_v47 = vadd.f32 %v7265_v49, %v7247_v35  ;;  %v14755_v37 = vld [vmem:[#allocation2 + $0x158c] sm:$0xf]  ;;  %v12988_v45 = vld [vmem:[#allocation2 + $0x1598] sm:$0xf0]  ;;  %v12863_v26 = vor.u32 %v14723_v40, %v12860_v17 }
 0x390   : > { %v7297_v18 = vadd.f32 %v7296_v21, %v7278_v36  ;;  %7580 = vmatmul.bf16.vlgmr.msra.gmra.mxu0 %v17318_v4  ;;  %v14819_v31 = vld [vmem:[#allocation2 + $0x178c] sm:$0xf]  ;;  %v13244_v46 = vld [vmem:[#allocation2 + $0x1798] sm:$0xf0]  ;;  %7669 = vmatpush.bf16.msrb.mxu1 %v13007_v39  ;;  %v12991_v30 = vor.u32 %v14755_v37, %v12988_v45 }
 0x391   : > { %7599 = vmatmul.bf16.vlgmr.msra.gmra.mxu1 %v17319_v51  ;;  %v7738_v2 = vmax.f32 %v7266_v47, 0.0  ;;  %v17320_v20 = vld [vmem:[#allocation62_spill] sm:$0xff]  ;;  %7650 = vmatpush.bf16.msrb.mxu0 %v12879_v11  ;;  %v13100_v16 = vld [vmem:[#allocation2 + $0x1678] sm:$0xf0]  ;;  %v13247_v0 = vor.u32 %v14819_v31, %v13244_v46 }
 0x392   : > { %v14783_v48 = vld [vmem:[#allocation2 + $0x166c] sm:$0xf]  ;;  %7707 = vmatpush.bf16.msrb.mxu3 %v13263_v1  ;;  %v12844_v58 = vld [vmem:[#allocation2 + $0x1478] sm:$0xf0]  ;;  %7689 = vmatpush.bf16.msrb.mxu2 %v13119_v50 }
 0x393   : > { %7618 = vmatmul.bf16.vlgmr.msra.gmra.mxu2 %v17320_v20  ;;  %7637 = vmatmul.bf16.vlgmr.msra.gmra.mxu3 %v17321_v22  ;;  %v14719_v53 = vld [vmem:[#allocation2 + $0x146c] sm:$0xf]  ;;  %v16970_v54 = vpack.c.bf16 %v7738_v2, %v7734_v33  ;;  %v12972_v6 = vld [vmem:[#allocation2 + $0x1578] sm:$0xf0]  ;;  %v13103_v61 = vor.u32 %v14783_v48, %v13100_v16  ;;  %v17323_v48 = vld [vmem:[#allocation65_spill] sm:$0xff] }
 0x394   : > { %v14751_v32 = vld [vmem:[#allocation2 + $0x156c] sm:$0xf]  ;;  %v7315_v5 = vpop.f32.mrf.mxu2  ;;  %v13228_v60 = vld [vmem:[#allocation2 + $0x1778] sm:$0xf0]  ;;  %v12847_v59 = vor.u32 %v14719_v53, %v12844_v58  ;;  %7670 = vmatpush.bf16.msrb.mxu1 %v12991_v30  ;;  %v17325_v58 = vld [vmem:[#allocation67_spill] sm:$0xff] }
 0x395   : > { %v14815_v34 = vld [vmem:[#allocation2 + $0x176c] sm:$0xf]  ;;  %v7316_v55 = vadd.f32 %v7315_v5, %v7297_v18  ;;  %v7279_v57 = vpop.f32.mrf.mxu0  ;;  %7651 = vmatpush.bf16.msrb.mxu0 %v12863_v26  ;;  %v13084_v3 = vld [vmem:[#allocation2 + $0x1658] sm:$0xf0]  ;;  %v12975_v52 = vor.u32 %v14751_v32, %v12972_v6  ;;  %v13418_v5 = vld [vmem:[#allocation6 + $0xf0] sm:$0xf] }
 0x396   : > { %v7334_v42 = vpop.f32.mrf.mxu3  ;;  %v7298_v63 = vpop.f32.mrf.mxu1  ;;  %v7280_v25 = vadd.f32 %v7279_v57, %v16962_v27  ;;  %v14779_v10 = vld [vmem:[#allocation2 + $0x164c] sm:$0xf]  ;;  %7708 = vmatpush.bf16.msrb.mxu3 %v13247_v0  ;;  %v13231_v8 = vor.u32 %v14815_v34, %v13228_v60  ;;  %v12828_v43 = vld [vmem:[#allocation2 + $0x1458] sm:$0xf0]  ;;  %7690 = vmatpush.bf16.msrb.mxu2 %v13103_v61  ;;  %v13354_v0 = vld [vmem:[#allocation6 + $0x70] sm:$0xf] }
 0x397   : > { %v16973_v19 = vadd.f32 %v7334_v42, %v7316_v55  ;;  %v14715_v9 = vld [vmem:[#allocation2 + $0x144c] sm:$0xf]  ;;  %v12956_v13 = vld [vmem:[#allocation2 + $0x1558] sm:$0xf0]  ;;  %v13087_v49 = vor.u32 %v14779_v10, %v13084_v3  ;;  %v13482_v60 = vld [vmem:[#allocation6 + $0x170] sm:$0xf] }
 0x398   : > { %v14747_v38 = vld [vmem:[#allocation2 + $0x154c] sm:$0xf]  ;;  %v7299_v62 = vadd.f32 %v7298_v63, %v7280_v25  ;;  %v13212_v23 = vld [vmem:[#allocation2 + $0x1758] sm:$0xf0]  ;;  %v12831_v56 = vor.u32 %v14715_v9, %v12828_v43  ;;  %7671 = vmatpush.bf16.msrb.mxu1 %v12975_v52  ;;  %v13346_v3 = vld [vmem:[#allocation6 + $0x60] sm:$0xf] }
 0x399   : > { %v14811_v14 = vld [vmem:[#allocation2 + $0x174c] sm:$0xf]  ;;  %7652 = vmatpush.bf16.msrb.mxu0 %v12847_v59  ;;  %v13068_v7 = vld [vmem:[#allocation2 + $0x1638] sm:$0xf0]  ;;  %v12959_v35 = vor.u32 %v14747_v38, %v12956_v13 }
 0x39a   : > { %v14775_v24 = vld [vmem:[#allocation2 + $0x162c] sm:$0xf]  ;;  %7709 = vmatpush.bf16.msrb.mxu3 %v13231_v8  ;;  %v13215_v12 = vor.u32 %v14811_v14, %v13212_v23  ;;  %v12812_v36 = vld [vmem:[#allocation2 + $0x1438] sm:$0xf0]  ;;  %7691 = vmatpush.bf16.msrb.mxu2 %v13087_v49  ;;  %v13474_v23 = vld [vmem:[#allocation6 + $0x160] sm:$0xf] }
 0x39b   : > { %v14711_v21 = vld [vmem:[#allocation2 + $0x142c] sm:$0xf]  ;;  %v12940_v44 = vld [vmem:[#allocation2 + $0x1538] sm:$0xf0]  ;;  %v13071_v18 = vor.u32 %v14775_v24, %v13068_v7 }
 0x39c   : > { %v14743_v28 = vld [vmem:[#allocation2 + $0x152c] sm:$0xf]  ;;  %v7317_v11 = vpop.f32.mrf.mxu2  ;;  %v13196_v39 = vld [vmem:[#allocation2 + $0x1738] sm:$0xf0]  ;;  %v12815_v4 = vor.u32 %v14711_v21, %v12812_v36  ;;  %7672 = vmatpush.bf16.msrb.mxu1 %v12959_v35  ;;  %v13338_v21 = vld [vmem:[#allocation6 + $0x50] sm:$0xf] }
 0x39d   : > { %v14807_v47 = vld [vmem:[#allocation2 + $0x172c] sm:$0xf]  ;;  %v16977_v1 = vadd.f32 %v7317_v11, %v7299_v62  ;;  %v7282_v40 = vpop.f32.mrf.mxu0  ;;  %7653 = vmatpush.bf16.msrb.mxu0 %v12831_v56  ;;  %v13052_v45 = vld [vmem:[#allocation2 + $0x1618] sm:$0xf0]  ;;  %v12943_v46 = vor.u32 %v14743_v28, %v12940_v44  ;;  %v13410_v62 = vld [vmem:[#allocation6 + $0xe0] sm:$0xf] }
 0x39e   : > { %v16975_v29 = vpop.f32.mrf.mxu3  ;;  %v7301_v17 = vpop.f32.mrf.mxu1  ;;  %v7283_v37 = vadd.f32 %v7282_v40, %v16962_v27  ;;  %v14771_v51 = vld [vmem:[#allocation2 + $0x160c] sm:$0xf]  ;;  %7710 = vmatpush.bf16.msrb.mxu3 %v13215_v12  ;;  %v13199_v33 = vor.u32 %v14807_v47, %v13196_v39  ;;  %v12796_v2 = vld [vmem:[#allocation2 + $0x1418] sm:$0xf0]  ;;  %7692 = vmatpush.bf16.msrb.mxu2 %v13071_v18  ;;  %v13402_v28 = vld [vmem:[#allocation6 + $0xd0] sm:$0xf] }
 0x39f   : > { %v14707_v31 = vld [vmem:[#allocation2 + $0x140c] sm:$0xf]  ;;  %v12924_v22 = vld [vmem:[#allocation2 + $0x1518] sm:$0xf0]  ;;  %v13055_v6 = vor.u32 %v14771_v51, %v13052_v45  ;;  %v13466_v47 = vld [vmem:[#allocation6 + $0x150] sm:$0xf] }
 0x3a0   : > { %v14739_v20 = vld [vmem:[#allocation2 + $0x150c] sm:$0xf]  ;;  %v7302_v50 = vadd.f32 %v7301_v17, %v7283_v37  ;;  %v17322_v26 = vld [vmem:[#allocation64_spill] sm:$0xff]  ;;  %v12799_v34 = vor.u32 %v14707_v31, %v12796_v2  ;;  %7673 = vmatpush.bf16.msrb.mxu1 %v12943_v46  ;;  %v13330_v45 = vld [vmem:[#allocation6 + $0x40] sm:$0xf] }
 0x3a1   : > { %7585 = vmatmul.bf16.gmra.mxu0 %v17322_v26  ;;  %7604 = vmatmul.bf16.gmra.mxu1 %v17323_v48  ;;  %v14803_v16 = vld [vmem:[#allocation2 + $0x170c] sm:$0xf]  ;;  %v13180_v30 = vld [vmem:[#allocation2 + $0x1718] sm:$0xf0]  ;;  %v12927_v57 = vor.u32 %v14739_v20, %v12924_v22  ;;  %v17326_v22 = vld [vmem:[#allocation69_spill] sm:$0xff] }
 0x3a2   : > { %v17324_v53 = vld [vmem:[#allocation66_spill] sm:$0xff]  ;;  %v14849_v32 = vld [vmem:[#allocation6 + $0x74] sm:$0xf0]  ;;  %7654 = vmatpush.bf16.msrb.mxu0 %v12815_v4  ;;  %7711 = vmatpush.bf16.msrb.mxu3 %v13199_v33  ;;  %v13183_v63 = vor.u32 %v14803_v16, %v13180_v30  ;;  %v13394_v33 = vld [vmem:[#allocation6 + $0xc0] sm:$0xf] }
 0x3a3   : > { %7623 = vmatmul.bf16.gmra.mxu2 %v17324_v53  ;;  %7642 = vmatmul.bf16.gmra.mxu3 %v17325_v58  ;;  %v14865_v42 = vld [vmem:[#allocation6 + $0xf4] sm:$0xf0]  ;;  %v13355_v59 = vor.u32 %v14849_v32, %v13354_v0  ;;  %v14847_v38 = vld [vmem:[#allocation6 + $0x64] sm:$0xf0]  ;;  %v17328_v16 = vld [vmem:[#allocation71_spill] sm:$0xff] }
 0x3a4   : > { %v14881_v55 = vld [vmem:[#allocation6 + $0x174] sm:$0xf0]  ;;  %v7320_v25 = vpop.f32.mrf.mxu2  ;;  %v13419_v10 = vor.u32 %v14865_v42, %v13418_v5  ;;  %v14863_v13 = vld [vmem:[#allocation6 + $0xe4] sm:$0xf0]  ;;  %7693 = vmatpush.bf16.msrb.mxu2 %v13055_v6  ;;  %7674 = vmatpush.bf16.msrb.mxu1 %v12927_v57  ;;  %v13347_v7 = vor.u32 %v14847_v38, %v13346_v3  ;;  %v13322_v0 = vld [vmem:[#allocation6 + $0x30] sm:$0xf] }
 0x3a5   : > { %v7321_v52 = vadd.f32 %v7320_v25, %v7302_v50  ;;  %v7284_v8 = vpop.f32.mrf.mxu0  ;;  %v13483_v43 = vor.u32 %v14881_v55, %v13482_v60  ;;  %v14879_v49 = vld [vmem:[#allocation6 + $0x164] sm:$0xf0]  ;;  %v13411_v35 = vor.u32 %v14863_v13, %v13410_v62  ;;  %v14845_v36 = vld [vmem:[#allocation6 + $0x54] sm:$0xf0]  ;;  %v13458_v50 = vld [vmem:[#allocation6 + $0x140] sm:$0xf] }
 0x3a6   : > { %v7339_v61 = vpop.f32.mrf.mxu3  ;;  %v7303_v9 = vpop.f32.mrf.mxu1  ;;  %v7285_v14 = vadd.f32 %v7284_v8, %v16962_v27  ;;  %7655 = vmatpush.bf16.msrb.mxu0 %v12799_v34  ;;  %7712 = vmatpush.bf16.msrb.mxu3 %v13183_v63  ;;  %v13475_v12 = vor.u32 %v14879_v49, %v13474_v23  ;;  %v14861_v11 = vld [vmem:[#allocation6 + $0xd4] sm:$0xf0]  ;;  %v13339_v4 = vor.u32 %v14845_v36, %v13338_v21  ;;  %v14843_v46 = vld [vmem:[#allocation6 + $0x44] sm:$0xf0]  ;;  %v13386_v32 = vld [vmem:[#allocation6 + $0xb0] sm:$0xf] }
 0x3a7   : > { %v16985_v56 = vadd.f32 %v7339_v61, %v7321_v52  ;;  %v14877_v39 = vld [vmem:[#allocation6 + $0x154] sm:$0xf0]  ;;  %v13403_v51 = vor.u32 %v14861_v11, %v13402_v28  ;;  %v14859_v2 = vld [vmem:[#allocation6 + $0xc4] sm:$0xf0]  ;;  %v13450_v34 = vld [vmem:[#allocation6 + $0x130] sm:$0xf] }
 0x3a8   : > { %v7304_v24 = vadd.f32 %v7303_v9, %v7285_v14  ;;  %8157 = vmatpush.bf16.msra.mxu1 %v13419_v10  ;;  %8176 = vmatpush.bf16.msra.mxu2 %v13483_v43  ;;  %v13467_v31 = vor.u32 %v14877_v39, %v13466_v47  ;;  %v14875_v26 = vld [vmem:[#allocation6 + $0x144] sm:$0xf0]  ;;  %v13395_v30 = vor.u32 %v14859_v2, %v13394_v33  ;;  %v14841_v58 = vld [vmem:[#allocation6 + $0x34] sm:$0xf0]  ;;  %v13314_v10 = vld [vmem:[#allocation6 + $0x20] sm:$0xf] }
 0x3a9   : > { %v17327_v48 = vld [vmem:[#allocation70_spill] sm:$0xff]  ;;  %v13459_v53 = vor.u32 %v14875_v26, %v13458_v50  ;;  %v14857_v5 = vld [vmem:[#allocation6 + $0xb4] sm:$0xf0]  ;;  %v13323_v61 = vor.u32 %v14841_v58, %v13322_v0  ;;  %v13378_v9 = vld [vmem:[#allocation6 + $0xa0] sm:$0xf] }
 0x3aa   : > { %8138 = vmatpush.bf16.msra.mxu0 %v13355_v59  ;;  %v14873_v60 = vld [vmem:[#allocation6 + $0x134] sm:$0xf0]  ;;  %v13387_v59 = vor.u32 %v14857_v5, %v13386_v32  ;;  %v14839_v8 = vld [vmem:[#allocation6 + $0x24] sm:$0xf0]  ;;  %v13442_v43 = vld [vmem:[#allocation6 + $0x120] sm:$0xf] }
 0x3ab   : > { %v13451_v52 = vor.u32 %v14873_v60, %v13450_v34  ;;  %v14871_v38 = vld [vmem:[#allocation6 + $0x124] sm:$0xf0]  ;;  %v13315_v62 = vor.u32 %v14839_v8, %v13314_v10  ;;  %v13306_v14 = vld [vmem:[#allocation6 + $0x10] sm:$0xf]  ;;  %v14837_v49 = vld [vmem:[#allocation6 + $0x14] sm:$0xf0] }
 0x3ac   : > { %v7322_v27 = vpop.f32.mrf.mxu2  ;;  %8158 = vmatpush.bf16.msra.mxu1 %v13411_v35  ;;  %8177 = vmatpush.bf16.msra.mxu2 %v13475_v12  ;;  %v13443_v23 = vor.u32 %v14871_v38, %v13442_v43  ;;  %v13434_v21 = vld [vmem:[#allocation6 + $0x110] sm:$0xf]  ;;  %v14869_v36 = vld [vmem:[#allocation6 + $0x114] sm:$0xf0]  ;;  %v13307_v39 = vor.u32 %v14837_v49, %v13306_v14  ;;  %v13356_v50 = vld [vmem:[#allocation6 + $0x78] sm:$0xf0] }
 0x3ad   : > { %v16989_v40 = vadd.f32 %v7322_v27, %v7304_v24  ;;  %v7353_v17 = vpop.f32.mrf.mxu0  ;;  %v13370_v24 = vld [vmem:[#allocation6 + $0x90] sm:$0xf]  ;;  %v17329_v2 = vld [vmem:[#allocation72_spill] sm:$0xff]  ;;  %v17331_v26 = vld [vmem:[#allocation74_spill] sm:$0xff] }
 0x3ae   : > { %v16987_v44 = vpop.f32.mrf.mxu3  ;;  %8139 = vmatpush.bf16.msra.mxu0 %v13347_v7  ;;  %v7372_v37 = vpop.f32.mrf.mxu1  ;;  %v7354_v18 = vadd.f32 %v7353_v17, %v16973_v19  ;;  %v13331_v19 = vor.u32 %v14843_v46, %v13330_v45  ;;  %v14853_v7 = vld [vmem:[#allocation6 + $0x94] sm:$0xf0]  ;;  %v14851_v45 = vld [vmem:[#allocation6 + $0x84] sm:$0xf0]  ;;  %v14846_v60 = vld [vmem:[#allocation6 + $0x64] sm:$0xf] }
 0x3af   : > { %v13371_v17 = vor.u32 %v14853_v7, %v13370_v24  ;;  %v14867_v46 = vld [vmem:[#allocation6 + $0x104] sm:$0xf0]  ;;  %v7342_v5 = vadd.f32 %v16987_v44, %v16989_v40  ;;  %v14878_v10 = vld [vmem:[#allocation6 + $0x164] sm:$0xf]  ;;  %v14844_v43 = vld [vmem:[#allocation6 + $0x54] sm:$0xf] }
 0x3b0   : > { %v7373_v20 = vadd.f32 %v7372_v37, %v7354_v18  ;;  %8159 = vmatpush.bf16.msra.mxu1 %v13403_v51  ;;  %8178 = vmatpush.bf16.msra.mxu2 %v13467_v31  ;;  %v13298_v37 = vld [vmem:[#allocation6] sm:$0xf]  ;;  %v14835_v18 = vld [vmem:[#allocation6 + $0x4] sm:$0xf0]  ;;  %v13435_v51 = vor.u32 %v14869_v36, %v13434_v21  ;;  %v13340_v38 = vld [vmem:[#allocation6 + $0x58] sm:$0xf0] }
 0x3b1   : > { %7656 = vmatmul.bf16.vlgmr.msrb.gmra.mxu0 %v17282_v41  ;;  %7675 = vmatmul.bf16.vlgmr.msrb.gmra.mxu1 %v17326_v22  ;;  %v7337_v41 = vadd.f32 %v16975_v29, %v16977_v1  ;;  %v14855_v29 = vld [vmem:[#allocation6 + $0xa4] sm:$0xf0]  ;;  %v13426_v31 = vld [vmem:[#allocation6 + $0x100] sm:$0xf]  ;;  %v14848_v22 = vld [vmem:[#allocation6 + $0x74] sm:$0xf]  ;;  %v13299_v0 = vor.u32 %v14835_v18, %v13298_v37  ;;  %v13343_v14 = vor.u32 %v14844_v43, %v13340_v38 }
 0x3b2   : > { %8140 = vmatpush.bf16.msra.mxu0 %v13339_v4  ;;  %v13379_v13 = vor.u32 %v14855_v29, %v13378_v9  ;;  %v13362_v4 = vld [vmem:[#allocation6 + $0x80] sm:$0xf]  ;;  %v13427_v58 = vor.u32 %v14867_v46, %v13426_v31  ;;  %v13359_v32 = vor.u32 %v14848_v22, %v13356_v50  ;;  %v13468_v49 = vld [vmem:[#allocation6 + $0x158] sm:$0xf0]  ;;  %v13332_v21 = vld [vmem:[#allocation6 + $0x48] sm:$0xf0] }
 0x3b3   : > { %7694 = vmatmul.bf16.vlgmr.msrb.gmra.mxu2 %v17327_v48  ;;  %7713 = vmatmul.bf16.vlgmr.msrb.gmra.mxu3 %v17328_v16  ;;  %v17332_v48 = vld [vmem:[#allocation75_spill] sm:$0xff]  ;;  %v13420_v16 = vld [vmem:[#allocation6 + $0xf8] sm:$0xf0]  ;;  %v14858_v37 = vld [vmem:[#allocation6 + $0xc4] sm:$0xf] }
 0x3b4   : > { %v7391_v42 = vpop.f32.mrf.mxu2  ;;  %8160 = vmatpush.bf16.msra.mxu1 %v13395_v30  ;;  %8179 = vmatpush.bf16.msra.mxu2 %v13459_v53  ;;  %v13484_v30 = vld [vmem:[#allocation6 + $0x178] sm:$0xf0]  ;;  %v13363_v53 = vor.u32 %v14851_v45, %v13362_v4  ;;  %v13396_v18 = vld [vmem:[#allocation6 + $0xc8] sm:$0xf0]  ;;  %v14856_v50 = vld [vmem:[#allocation6 + $0xb4] sm:$0xf] }
 0x3b5   : > { %v7392_v55 = vadd.f32 %v7391_v42, %v7373_v20  ;;  %v7355_v57 = vpop.f32.mrf.mxu0  ;;  %v17330_v20 = vld [vmem:[#allocation73_spill] sm:$0xff]  ;;  %v13460_v45 = vld [vmem:[#allocation6 + $0x148] sm:$0xf0]  ;;  %v17333_v46 = vld [vmem:[#allocation76_spill] sm:$0xff]  ;;  %v13399_v22 = vor.u32 %v14858_v37, %v13396_v18 }
 0x3b6   : > { %v7410_v6 = vpop.f32.mrf.mxu3  ;;  %v7374_v63 = vpop.f32.mrf.mxu1  ;;  %v7356_v25 = vadd.f32 %v7355_v57, %v7337_v41  ;;  %8141 = vmatpush.bf16.msra.mxu0 %v13331_v19  ;;  %v14880_v19 = vld [vmem:[#allocation6 + $0x174] sm:$0xf]  ;;  %v14862_v57 = vld [vmem:[#allocation6 + $0xe4] sm:$0xf] }
 0x3b7   : > { %v16998_v3 = vadd.f32 %v7410_v6, %v7392_v55  ;;  %v13487_v34 = vor.u32 %v14880_v19, %v13484_v30  ;;  %v13348_v55 = vld [vmem:[#allocation6 + $0x68] sm:$0xf0]  ;;  %v14834_v38 = vld [vmem:[#allocation6 + $0x4] sm:$0xf] }
 0x3b8   : > { %v7375_v1 = vadd.f32 %v7374_v63, %v7356_v25  ;;  %8161 = vmatpush.bf16.msra.mxu1 %v13387_v59  ;;  %8180 = vmatpush.bf16.msra.mxu2 %v13451_v52  ;;  %v13412_v59 = vld [vmem:[#allocation6 + $0xe8] sm:$0xf0]  ;;  %v13351_v44 = vor.u32 %v14846_v60, %v13348_v55 }
 0x3b9   : > { %v13476_v52 = vld [vmem:[#allocation6 + $0x168] sm:$0xf0]  ;;  %v13415_v29 = vor.u32 %v14862_v57, %v13412_v59  ;;  %v14870_v57 = vld [vmem:[#allocation6 + $0x124] sm:$0xf] }
 0x3ba   : > { %8142 = vmatpush.bf16.msra.mxu0 %v13323_v61  ;;  %v17336_v37 = vld [vmem:[#allocation78_spill] sm:$0xff] }
 0x3bc   : > { %v7393_v35 = vpop.f32.mrf.mxu2  ;;  %8162 = vmatpush.bf16.msra.mxu1 %v13379_v13  ;;  %8181 = vmatpush.bf16.msra.mxu2 %v13443_v23  ;;  %v13404_v13 = vld [vmem:[#allocation6 + $0xd8] sm:$0xf0]  ;;  %v14876_v23 = vld [vmem:[#allocation6 + $0x154] sm:$0xf] }
 0x3bd   : > { %v17002_v28 = vadd.f32 %v7393_v35, %v7375_v1  ;;  %v7358_v11 = vpop.f32.mrf.mxu0  ;;  %v13479_v1 = vor.u32 %v14878_v10, %v13476_v52  ;;  %v14842_v35 = vld [vmem:[#allocation6 + $0x44] sm:$0xf]  ;;  %v14852_v52 = vld [vmem:[#allocation6 + $0x94] sm:$0xf] }
 0x3be   : > { %v17000_v12 = vpop.f32.mrf.mxu3  ;;  %v7377_v27 = vpop.f32.mrf.mxu1  ;;  %v7359_v47 = vadd.f32 %v7358_v11, %v16985_v56  ;;  %8143 = vmatpush.bf16.msra.mxu0 %v13315_v62  ;;  %v14864_v56 = vld [vmem:[#allocation6 + $0xf4] sm:$0xf]  ;;  %v13335_v4 = vor.u32 %v14842_v35, %v13332_v21  ;;  %v14850_v35 = vld [vmem:[#allocation6 + $0x84] sm:$0xf]  ;;  %v13364_v21 = vld [vmem:[#allocation6 + $0x88] sm:$0xf0] }
 0x3bf   : > { %v13423_v6 = vor.u32 %v14864_v56, %v13420_v16  ;;  %v14860_v62 = vld [vmem:[#allocation6 + $0xd4] sm:$0xf]  ;;  %v13388_v56 = vld [vmem:[#allocation6 + $0xb8] sm:$0xf0]  ;;  %v13367_v18 = vor.u32 %v14850_v35, %v13364_v21 }
 0x3c0   : > { %v7378_v33 = vadd.f32 %v7377_v27, %v7359_v47  ;;  %8163 = vmatpush.bf16.msra.mxu1 %v13371_v17  ;;  %8182 = vmatpush.bf16.msra.mxu2 %v13435_v51  ;;  %v13407_v47 = vor.u32 %v14860_v62, %v13404_v13  ;;  %v13471_v17 = vor.u32 %v14876_v23, %v13468_v49  ;;  %v14874_v51 = vld [vmem:[#allocation6 + $0x144] sm:$0xf]  ;;  %v13452_v16 = vld [vmem:[#allocation6 + $0x138] sm:$0xf0]  ;;  %v13300_v62 = vld [vmem:[#allocation6 + $0x8] sm:$0xf0] }
 0x3c1   : > { %7661 = vmatmul.bf16.gmra.mxu0 %v17329_v2  ;;  %7680 = vmatmul.bf16.gmra.mxu1 %v17330_v20  ;;  %v14840_v2 = vld [vmem:[#allocation6 + $0x34] sm:$0xf]  ;;  %v13324_v20 = vld [vmem:[#allocation6 + $0x38] sm:$0xf0] }
 0x3c2   : > { %8144 = vmatpush.bf16.msra.mxu0 %v13307_v39 }
 0x3c3   : > { %7699 = vmatmul.bf16.gmra.mxu2 %v17331_v26  ;;  %7718 = vmatmul.bf16.gmra.mxu3 %v17332_v48  ;;  %v13327_v26 = vor.u32 %v14840_v2, %v13324_v20  ;;  %v14872_v48 = vld [vmem:[#allocation6 + $0x134] sm:$0xf] }
 0x3c4   : > { %v7396_v41 = vpop.f32.mrf.mxu2  ;;  %8164 = vmatpush.bf16.msra.mxu1 %v13363_v53  ;;  %8183 = vmatpush.bf16.msra.mxu2 %v13427_v58  ;;  %v13316_v53 = vld [vmem:[#allocation6 + $0x28] sm:$0xf0] }
 0x3c5   : > { %v7397_v63 = vadd.f32 %v7396_v41, %v7378_v33  ;;  %v7360_v25 = vpop.f32.mrf.mxu0  ;;  %v17334_v33 = vld [vmem:[#allocation68_spill] sm:$0xff]  ;;  %v13391_v41 = vor.u32 %v14856_v50, %v13388_v56 }
 0x3c6   : > { %v7415_v42 = vpop.f32.mrf.mxu3  ;;  %v7379_v61 = vpop.f32.mrf.mxu1  ;;  %v7361_v8 = vadd.f32 %v7360_v25, %v7342_v5  ;;  %8145 = vmatpush.bf16.msra.mxu0 %v13299_v0  ;;  %v14838_v0 = vld [vmem:[#allocation6 + $0x24] sm:$0xf]  ;;  %v14836_v25 = vld [vmem:[#allocation6 + $0x14] sm:$0xf] }
 0x3c7   : > { %v17011_v9 = vadd.f32 %v7415_v42, %v7397_v63  ;;  %v13455_v42 = vor.u32 %v14872_v48, %v13452_v16  ;;  %v13319_v55 = vor.u32 %v14838_v0, %v13316_v53  ;;  %v13444_v63 = vld [vmem:[#allocation6 + $0x128] sm:$0xf0] }
 0x3c8   : > { %v7380_v40 = vadd.f32 %v7379_v61, %v7361_v8  ;;  %8233 = vmatpush.bf16.msrb.mxu1 %v13423_v6  ;;  %8252 = vmatpush.bf16.msrb.mxu2 %v13487_v34  ;;  %v14854_v6 = vld [vmem:[#allocation6 + $0xa4] sm:$0xf]  ;;  %v13380_v34 = vld [vmem:[#allocation6 + $0xa8] sm:$0xf0]  ;;  %v13308_v61 = vld [vmem:[#allocation6 + $0x18] sm:$0xf0]  ;;  %v13447_v10 = vor.u32 %v14870_v57, %v13444_v63 }
 0x3c9   : > { %v13383_v59 = vor.u32 %v14854_v6, %v13380_v34  ;;  %v13372_v8 = vld [vmem:[#allocation6 + $0x98] sm:$0xf0]  ;;  %v14895_v57 = vld [vmem:[#allocation6 + $0x1e4] sm:$0xf0] }
 0x3ca   : > { %8214 = vmatpush.bf16.msrb.mxu0 %v13359_v32  ;;  %v13375_v23 = vor.u32 %v14852_v52, %v13372_v8 }
 0x3cc   : > { %v7398_v24 = vpop.f32.mrf.mxu2  ;;  %8234 = vmatpush.bf16.msrb.mxu1 %v13415_v29  ;;  %8253 = vmatpush.bf16.msrb.mxu2 %v13479_v1  ;;  %v13436_v29 = vld [vmem:[#allocation6 + $0x118] sm:$0xf0] }
 0x3cd   : > { %v17015_v36 = vadd.f32 %v7398_v24, %v7380_v40  ;;  %v7429_v11 = vpop.f32.mrf.mxu0  ;;  %v14868_v40 = vld [vmem:[#allocation6 + $0x114] sm:$0xf] }
 0x3ce   : > { %8215 = vmatpush.bf16.msrb.mxu0 %v13351_v44  ;;  %v17013_v7 = vpop.f32.mrf.mxu3  ;;  %v7448_v27 = vpop.f32.mrf.mxu1  ;;  %v7430_v39 = vadd.f32 %v7429_v11, %v16998_v3  ;;  %v13463_v3 = vor.u32 %v14874_v51, %v13460_v45  ;;  %v13311_v44 = vor.u32 %v14836_v25, %v13308_v61  ;;  %v13439_v24 = vor.u32 %v14868_v40, %v13436_v29  ;;  %v13530_v25 = vld [vmem:[#allocation6 + $0x1d0] sm:$0xf]  ;;  %v14893_v61 = vld [vmem:[#allocation6 + $0x1d4] sm:$0xf0]  ;;  %v14891_v40 = vld [vmem:[#allocation6 + $0x1c4] sm:$0xf0] }
 0x3cf   : > { %v13303_v11 = vor.u32 %v14834_v38, %v13300_v62  ;;  %v7413_v38 = vadd.f32 %v17000_v12, %v17002_v28  ;;  %v13498_v28 = vld [vmem:[#allocation6 + $0x190] sm:$0xf] }
 0x3d0   : > { %v7449_v31 = vadd.f32 %v7448_v27, %v7430_v39  ;;  %8235 = vmatpush.bf16.msrb.mxu1 %v13407_v47  ;;  %8254 = vmatpush.bf16.msrb.mxu2 %v13471_v17  ;;  %v14866_v27 = vld [vmem:[#allocation6 + $0x104] sm:$0xf]  ;;  %v13428_v47 = vld [vmem:[#allocation6 + $0x108] sm:$0xf0] }
 0x3d1   : > { %8146 = vmatmul.bf16.vlgmr.msra.gmra.mxu0 %v17333_v46  ;;  %8165 = vmatmul.bf16.vlgmr.msra.gmra.mxu1 %v17334_v33  ;;  %v17335_v17 = vld [vmem:[#allocation77_spill] sm:$0xff] }
 0x3d2   : > { %8216 = vmatpush.bf16.msrb.mxu0 %v13343_v14 }
 0x3d3   : > { %8184 = vmatmul.bf16.vlgmr.msra.gmra.mxu2 %v16957_v15 }
 0x3d4   : > { %v7467_v19 = vpop.f32.mrf.mxu2  ;;  %8236 = vmatpush.bf16.msrb.mxu1 %v13399_v22  ;;  %8255 = vmatpush.bf16.msrb.mxu2 %v13463_v3 }
 0x3d5   : > { %v7468_v58 = vadd.f32 %v7467_v19, %v7449_v31  ;;  %v17021_v32 = vpop.f32.mrf.mxu0 }
 0x3d6   : > { %8217 = vmatpush.bf16.msrb.mxu0 %v13335_v4  ;;  %v7486_v30 = vpop.f32.mrf.mxu3  ;;  %v17023_v5 = vpop.f32.mrf.mxu1  ;;  %v13431_v4 = vor.u32 %v14866_v27, %v13428_v47  ;;  %v7432_v62 = vadd.f32 %v17021_v32, %v7413_v38  ;;  %v13506_v27 = vld [vmem:[#allocation6 + $0x1a0] sm:$0xf]  ;;  %v14887_v47 = vld [vmem:[#allocation6 + $0x1a4] sm:$0xf0]  ;;  %v14885_v32 = vld [vmem:[#allocation6 + $0x194] sm:$0xf0] }
 0x3d7   : > { %v17025_v60 = vadd.f32 %v7486_v30, %v7468_v58 }
 0x3d8   : > { %8237 = vmatpush.bf16.msrb.mxu1 %v13391_v41  ;;  %8256 = vmatpush.bf16.msrb.mxu2 %v13455_v42 }
 0x3da   : > { %8218 = vmatpush.bf16.msrb.mxu0 %v13327_v26 }
 0x3dc   : > { %v17027_v1 = vpop.f32.mrf.mxu2  ;;  %8238 = vmatpush.bf16.msrb.mxu1 %v13383_v59  ;;  %8257 = vmatpush.bf16.msrb.mxu2 %v13447_v10  ;;  %v13531_v10 = vor.u32 %v14893_v61, %v13530_v25 }
 0x3dd   : > { %v7434_v13 = vpop.f32.mrf.mxu0 }
 0x3de   : > { %8219 = vmatpush.bf16.msrb.mxu0 %v13319_v55  ;;  %v17029_v43 = vpop.f32.mrf.mxu3  ;;  %v7453_v14 = vpop.f32.mrf.mxu1  ;;  %v7435_v49 = vadd.f32 %v7434_v13, %v17011_v9  ;;  %v13538_v55 = vld [vmem:[#allocation6 + $0x1e0] sm:$0xf]  ;;  %v13514_v13 = vld [vmem:[#allocation6 + $0x1b0] sm:$0xf] }
 0x3df   : > { %v13539_v63 = vor.u32 %v14895_v57, %v13538_v55  ;;  %v14896_v57 = vld [vmem:[#allocation6 + $0x1f4] sm:$0xf] }
 0x3e0   : > { %v7454_v39 = vadd.f32 %v7453_v14, %v7435_v49  ;;  %8239 = vmatpush.bf16.msrb.mxu1 %v13375_v23  ;;  %8258 = vmatpush.bf16.msrb.mxu2 %v13439_v24  ;;  %v14889_v14 = vld [vmem:[#allocation6 + $0x1b4] sm:$0xf0] }
 0x3e1   : > { %8151 = vmatmul.bf16.gmra.mxu0 %v17335_v17  ;;  %8170 = vmatmul.bf16.gmra.mxu1 %v17336_v37  ;;  %v13515_v24 = vor.u32 %v14889_v14, %v13514_v13  ;;  %v14892_v13 = vld [vmem:[#allocation6 + $0x1d4] sm:$0xf]  ;;  %v13532_v14 = vld [vmem:[#allocation6 + $0x1d8] sm:$0xf0] }
 0x3e2   : > { %8220 = vmatpush.bf16.msrb.mxu0 %v13311_v44  ;;  %v13522_v44 = vld [vmem:[#allocation6 + $0x1c0] sm:$0xf] }
 0x3e3   : > { %8189 = vmatmul.bf16.gmra.mxu2 %v16970_v54  ;;  %v13523_v29 = vor.u32 %v14891_v40, %v13522_v44 }
 0x3e4   : > { %v7472_v9 = vpop.f32.mrf.mxu2  ;;  %8240 = vmatpush.bf16.msrb.mxu1 %v13367_v18  ;;  %8259 = vmatpush.bf16.msrb.mxu2 %v13431_v4  ;;  %v13499_v4 = vor.u32 %v14885_v32, %v13498_v28  ;;  %v14888_v32 = vld [vmem:[#allocation6 + $0x1b4] sm:$0xf] }
 0x3e5   : > { %v7473_v45 = vadd.f32 %v7472_v9, %v7454_v39  ;;  %v17035_v31 = vpop.f32.mrf.mxu0  ;;  %v13507_v39 = vor.u32 %v14887_v47, %v13506_v27 }
 0x3e6   : > { %8221 = vmatpush.bf16.msrb.mxu0 %v13303_v11  ;;  %v7491_v51 = vpop.f32.mrf.mxu3  ;;  %v17037_v2 = vpop.f32.mrf.mxu1  ;;  %v7451_v11 = vadd.f32 %v17023_v5, %v7432_v62 }
 0x3e7   : > { %v17039_v20 = vadd.f32 %v7491_v51, %v7473_v45 }
 0x3ec   : > { %v17041_v22 = vpop.f32.mrf.mxu2 }
 0x3ed   : > { %v7505_v50 = vpop.f32.mrf.mxu0 }
 0x3ee   : > { %v17043_v3 = vpop.f32.mrf.mxu3  ;;  %v17045_v56 = vpop.f32.mrf.mxu1  ;;  %v7506_v12 = vadd.f32 %v7505_v50, %v17025_v60  ;;  %v7418_v60 = vadd.f32 %v17013_v7, %v17015_v36 }
 0x3f0   : > { %v7525_v5 = vadd.f32 %v17045_v56, %v7506_v12  ;;  %v7437_v55 = vadd.f32 %v17035_v31, %v7418_v60 }
 0x3f1   : > { %8222 = vmatmul.bf16.vlgmr.msrb.gmra.mxu0 %v17333_v46  ;;  %8241 = vmatmul.bf16.vlgmr.msrb.gmra.mxu1 %v17334_v33  ;;  %v14897_v46 = vld [vmem:[#allocation6 + $0x1f4] sm:$0xf0] }
 0x3f2   : > { %v7456_v36 = vadd.f32 %v17037_v2, %v7437_v55  ;;  %v13535_v2 = vor.u32 %v14892_v13, %v13532_v14 }
 0x3f3   : > { %8260 = vmatmul.bf16.vlgmr.msrb.gmra.mxu2 %v16957_v15  ;;  %v13546_v15 = vld [vmem:[#allocation6 + $0x1f0] sm:$0xf] }
 0x3f4   : > { %v17050_v26 = vpop.f32.mrf.mxu2  ;;  %v13547_v42 = vor.u32 %v14897_v46, %v13546_v15  ;;  %v14883_v46 = vld [vmem:[#allocation6 + $0x184] sm:$0xf0] }
 0x3f5   : > { %v7507_v16 = vpop.f32.mrf.mxu0  ;;  %v7544_v50 = vadd.f32 %v17050_v26, %v7525_v5  ;;  %v14894_v26 = vld [vmem:[#allocation6 + $0x1e4] sm:$0xf] }
 0x3f6   : > { %v17052_v48 = vpop.f32.mrf.mxu3  ;;  %v17054_v19 = vpop.f32.mrf.mxu1  ;;  %8195 = vmatpush.bf16.msra.mxu3 %v13547_v42 }
 0x3fa   : > { %8196 = vmatpush.bf16.msra.mxu3 %v13539_v63  ;;  %v13548_v63 = vld [vmem:[#allocation6 + $0x1f8] sm:$0xf0] }
 0x3fb   : > { %v13551_v56 = vor.u32 %v14896_v57, %v13548_v63  ;;  %v14884_v57 = vld [vmem:[#allocation6 + $0x194] sm:$0xf] }
 0x3fc   : > { %v17056_v30 = vpop.f32.mrf.mxu2 }
 0x3fd   : > { %v17060_v53 = vpop.f32.mrf.mxu0 }
 0x3fe   : > { %v17058_v0 = vpop.f32.mrf.mxu3  ;;  %v17062_v58 = vpop.f32.mrf.mxu1  ;;  %8197 = vmatpush.bf16.msra.mxu3 %v13531_v10 }
 0x401   : > { %8227 = vmatmul.bf16.gmra.mxu0 %v17335_v17  ;;  %8246 = vmatmul.bf16.gmra.mxu1 %v17336_v37  ;;  %v7470_v17 = vadd.f32 %v17027_v1, %v7451_v11  ;;  %v13490_v1 = vld [vmem:[#allocation6 + $0x180] sm:$0xf] }
 0x402   : > { %8198 = vmatpush.bf16.msra.mxu3 %v13523_v29  ;;  %v13491_v42 = vor.u32 %v14883_v46, %v13490_v1  ;;  %v7475_v29 = vadd.f32 %v17041_v22, %v7456_v36 }
 0x403   : > { %8265 = vmatmul.bf16.gmra.mxu2 %v16970_v54  ;;  %v7489_v9 = vadd.f32 %v17029_v43, %v7470_v17 }
 0x405   : > { %v17071_v6 = vpop.f32.mrf.mxu0  ;;  %v7508_v15 = vadd.f32 %v7507_v16, %v7489_v9  ;;  %v7563_v16 = vadd.f32 %v17052_v48, %v7544_v50  ;;  %v7511_v48 = vadd.f32 %v17060_v53, %v17039_v20  ;;  %v14890_v20 = vld [vmem:[#allocation6 + $0x1c4] sm:$0xf]  ;;  %v13524_v53 = vld [vmem:[#allocation6 + $0x1c8] sm:$0xf0] }
 0x406   : > { %v17067_v33 = vpop.f32.mrf.mxu2  ;;  %v17069_v41 = vpop.f32.mrf.mxu3  ;;  %8199 = vmatpush.bf16.msra.mxu3 %v13515_v24 }
 0x407   : > { %v17073_v34 = vpop.f32.mrf.mxu1  ;;  %v7527_v43 = vadd.f32 %v17054_v19, %v7508_v15  ;;  %v13540_v19 = vld [vmem:[#allocation6 + $0x1e8] sm:$0xf0]  ;;  %v7530_v22 = vadd.f32 %v17062_v58, %v7511_v48 }
 0x408   : > { %v13543_v40 = vor.u32 %v14894_v26, %v13540_v19  ;;  %v14882_v19 = vld [vmem:[#allocation6 + $0x184] sm:$0xf] }
 0x409   : > { %v7546_v10 = vadd.f32 %v17056_v30, %v7527_v43 }
 0x40a   : > { %8200 = vmatpush.bf16.msra.mxu3 %v13507_v39 }
 0x40b   : > { %v7565_v38 = vadd.f32 %v17058_v0, %v7546_v10 }
 0x40d   : > { %v7581_v52 = vpop.f32.mrf.mxu0 }
 0x40e   : > { %v17075_v59 = vpop.f32.mrf.mxu2  ;;  %v17077_v54 = vpop.f32.mrf.mxu3  ;;  %8201 = vmatpush.bf16.msra.mxu3 %v13499_v4  ;;  %v7582_v31 = vadd.f32 %v7581_v52, %v7563_v16  ;;  %v7494_v52 = vadd.f32 %v17043_v3, %v7475_v29  ;;  %v13516_v4 = vld [vmem:[#allocation6 + $0x1b8] sm:$0xf0] }
 0x40f   : > { %v7600_v8 = vpop.f32.mrf.mxu1  ;;  %v13519_v58 = vor.u32 %v14888_v32, %v13516_v4  ;;  %v14900_v32 = vld [vmem:[#allocation9 + $0x10] sm:$0xff]  ;;  %v14899_v4 = vld [vmem:[#allocation9 + $0x8] sm:$0xff] }
 0x410   : > { %v7601_v62 = vadd.f32 %v7600_v8, %v7582_v31  ;;  %v7513_v0 = vadd.f32 %v17071_v6, %v7494_v52  ;;  %v13527_v8 = vor.u32 %v14890_v20, %v13524_v53 }
 0x412   : > { %8202 = vmatpush.bf16.msra.mxu3 %v13491_v42  ;;  %v7532_v3 = vadd.f32 %v17073_v34, %v7513_v0  ;;  %v14886_v34 = vld [vmem:[#allocation6 + $0x1a4] sm:$0xf]  ;;  %v13508_v42 = vld [vmem:[#allocation6 + $0x1a8] sm:$0xf0] }
 0x413   : > { %v13511_v60 = vor.u32 %v14886_v34, %v13508_v42  ;;  %v14910_v34 = vld [vmem:[#allocation9 + $0x60] sm:$0xff] }
 0x415   : > { %v7583_v35 = vpop.f32.mrf.mxu0 }
 0x416   : > { %v7619_v23 = vpop.f32.mrf.mxu2  ;;  %v17082_v49 = vpop.f32.mrf.mxu3  ;;  %8271 = vmatpush.bf16.msrb.mxu3 %v13551_v56  ;;  %v7584_v30 = vadd.f32 %v7583_v35, %v7565_v38  ;;  %v7549_v35 = vadd.f32 %v17067_v33, %v7530_v22 }
 0x417   : > { %v7602_v21 = vpop.f32.mrf.mxu1  ;;  %v7620_v27 = vadd.f32 %v7619_v23, %v7601_v62 }
 0x418   : > { %v7603_v17 = vadd.f32 %v7602_v21, %v7584_v30  ;;  %v7568_v6 = vadd.f32 %v17069_v41, %v7549_v35  ;;  %v7551_v21 = vadd.f32 %v17075_v59, %v7532_v3  ;;  %v14902_v3 = vld [vmem:[#allocation9 + $0x20] sm:$0xff] }
 0x419   : > { %v7639_v12 = vadd.f32 %v17082_v49, %v7620_v27 }
 0x41a   : > { %8272 = vmatpush.bf16.msrb.mxu3 %v13543_v40  ;;  %v7570_v50 = vadd.f32 %v17077_v54, %v7551_v21  ;;  %v13492_v40 = vld [vmem:[#allocation6 + $0x188] sm:$0xf0]  ;;  %v14913_v21 = vld [vmem:[#allocation9 + $0x78] sm:$0xff] }
 0x41b   : > { %8453 = vmatpush.bf16.msra.mxu1 %v14913_v21 }
 0x41e   : > { %v7621_v37 = vpop.f32.mrf.mxu2  ;;  %v17087_v18 = vpop.f32.mrf.mxu3  ;;  %8273 = vmatpush.bf16.msrb.mxu3 %v13535_v2 }
 0x41f   : > { %v17090_v51 = vpop.f32.mrf.mxu0  ;;  %v17092_v45 = vpop.f32.mrf.mxu1  ;;  %v7622_v28 = vadd.f32 %v7621_v37, %v7603_v17 }
 0x420   : > { %v7587_v49 = vadd.f32 %v17090_v51, %v7568_v6 }
 0x421   : > { %v7641_v15 = vadd.f32 %v17087_v18, %v7622_v28  ;;  %v13500_v18 = vld [vmem:[#allocation6 + $0x198] sm:$0xf0]  ;;  %v14903_v28 = vld [vmem:[#allocation9 + $0x28] sm:$0xff] }
 0x422   : > { %8274 = vmatpush.bf16.msrb.mxu3 %v13527_v8  ;;  %v7606_v41 = vadd.f32 %v17092_v45, %v7587_v49  ;;  %v13503_v16 = vor.u32 %v14884_v57, %v13500_v18  ;;  %v13495_v45 = vor.u32 %v14882_v19, %v13492_v40  ;;  %v14908_v18 = vld [vmem:[#allocation9 + $0x50] sm:$0xff]  ;;  %v14906_v19 = vld [vmem:[#allocation9 + $0x40] sm:$0xff] }
 0x426   : > { %v17100_v25 = vpop.f32.mrf.mxu2  ;;  %v17102_v61 = vpop.f32.mrf.mxu3  ;;  %8275 = vmatpush.bf16.msrb.mxu3 %v13519_v58 }
 0x427   : > { %v7588_v44 = vpop.f32.mrf.mxu0  ;;  %v17106_v7 = vpop.f32.mrf.mxu1  ;;  %v7625_v51 = vadd.f32 %v17100_v25, %v7606_v41 }
 0x428   : > { %v7589_v43 = vadd.f32 %v7588_v44, %v7570_v50  ;;  %v14909_v50 = vld [vmem:[#allocation9 + $0x58] sm:$0xff] }
 0x429   : > { %v7644_v44 = vadd.f32 %v17102_v61, %v7625_v51 }
 0x42a   : > { %8276 = vmatpush.bf16.msrb.mxu3 %v13511_v60  ;;  %v7608_v26 = vadd.f32 %v17106_v7, %v7589_v43 }
 0x42e   : > { %v7626_v24 = vpop.f32.mrf.mxu2  ;;  %v17113_v11 = vpop.f32.mrf.mxu3  ;;  %8277 = vmatpush.bf16.msrb.mxu3 %v13503_v16 }
 0x42f   : > { %v7657_v47 = vpop.f32.mrf.mxu0  ;;  %v7676_v39 = vpop.f32.mrf.mxu1  ;;  %v7627_v38 = vadd.f32 %v7626_v24, %v7608_v26 }
 0x430   : > { %v7658_v23 = vadd.f32 %v7657_v47, %v7639_v12  ;;  %v14905_v12 = vld [vmem:[#allocation9 + $0x38] sm:$0xff] }
 0x431   : > { %v7646_v2 = vadd.f32 %v17113_v11, %v7627_v38  ;;  %8434 = vmatpush.bf16.msra.mxu0 %v14905_v12  ;;  %v14904_v11 = vld [vmem:[#allocation9 + $0x30] sm:$0xff] }
 0x432   : > { %v7677_v37 = vadd.f32 %v7676_v39, %v7658_v23  ;;  %8278 = vmatpush.bf16.msrb.mxu3 %v13495_v45  ;;  %v14901_v23 = vld [vmem:[#allocation9 + $0x18] sm:$0xff] }
 0x435   : > { %8435 = vmatpush.bf16.msra.mxu0 %v14904_v11 }
 0x436   : > { %v7695_v9 = vpop.f32.mrf.mxu2  ;;  %v7714_v5 = vpop.f32.mrf.mxu3 }
 0x437   : > { %v7659_v1 = vpop.f32.mrf.mxu0  ;;  %v7678_v33 = vpop.f32.mrf.mxu1  ;;  %v7696_v55 = vadd.f32 %v7695_v9, %v7677_v37  ;;  %v7812_v37 = vld [vmem:[#allocation7] sm:$0x3] }
 0x438   : > { %v7660_v46 = vadd.f32 %v7659_v1, %v7641_v15  ;;  %v14912_v1 = vld [vmem:[#allocation9 + $0x70] sm:$0xff]  ;;  %v7814_v42 = vperm.slane %v7812_v37, 0 }
 0x439   : > { %v7715_v10 = vadd.f32 %v7714_v5, %v7696_v55  ;;  %8436 = vmatpush.bf16.msra.mxu0 %v14903_v28  ;;  %v14898_v5 = vld [vmem:[#allocation9] sm:$0xff]  ;;  %8454 = vmatpush.bf16.msra.mxu1 %v14912_v1 }
 0x43a   : > { %v7679_v59 = vadd.f32 %v7678_v33, %v7660_v46  ;;  %v14911_v33 = vld [vmem:[#allocation9 + $0x68] sm:$0xff] }
 0x43b   : > { %v7727_v48 = vmax.f32 %v7715_v10, 0.0 }
 0x43d   : > { %8437 = vmatpush.bf16.msra.mxu0 %v14902_v3  ;;  %8455 = vmatpush.bf16.msra.mxu1 %v14911_v33 }
 0x43e   : > { %v7697_v63 = vpop.f32.mrf.mxu2  ;;  %v7716_v56 = vpop.f32.mrf.mxu3 }
 0x43f   : > { %v7698_v36 = vadd.f32 %v7697_v63, %v7679_v59  ;;  %v7662_v31 = vpop.f32.mrf.mxu0  ;;  %v7681_v29 = vpop.f32.mrf.mxu1 }
 0x440   : > { %v7663_v13 = vadd.f32 %v7662_v31, %v7644_v44 }
 0x441   : > { %v7717_v54 = vadd.f32 %v7716_v56, %v7698_v36  ;;  %8438 = vmatpush.bf16.msra.mxu0 %v14901_v23  ;;  %8456 = vmatpush.bf16.msra.mxu1 %v14910_v34  ;;  %v14907_v56 = vld [vmem:[#allocation9 + $0x48] sm:$0xff] }
 0x442   : > { %v7682_v7 = vadd.f32 %v7681_v29, %v7663_v13 }
 0x443   : > { %v7731_v62 = vmax.f32 %v7717_v54, 0.0 }
 0x445   : > { %v7743_v30 = vpack.c.bf16 %v7731_v62, %v7727_v48  ;;  %8439 = vmatpush.bf16.msra.mxu0 %v14900_v32  ;;  %8457 = vmatpush.bf16.msra.mxu1 %v14909_v50 }
 0x446   : > { %v7700_v25 = vpop.f32.mrf.mxu2  ;;  %v7719_v14 = vpop.f32.mrf.mxu3 }
 0x447   : > { %8203 = vmatmul.bf16.vlgmr.msra.gmra.mxu3 %v7743_v30  ;;  %v7664_v52 = vpop.f32.mrf.mxu0  ;;  %v7701_v47 = vadd.f32 %v7700_v25, %v7682_v7  ;;  %v7683_v39 = vpop.f32.mrf.mxu1 }
 0x448   : > { %v7665_v27 = vadd.f32 %v7664_v52, %v7646_v2 }
 0x449   : > { %v7720_v17 = vadd.f32 %v7719_v14, %v7701_v47  ;;  %8440 = vmatpush.bf16.msra.mxu0 %v14899_v4  ;;  %8458 = vmatpush.bf16.msra.mxu1 %v14908_v18 }
 0x44a   : > { %v7684_v22 = vadd.f32 %v7683_v39, %v7665_v27 }
 0x44b   : > { %v7735_v53 = vmax.f32 %v7720_v17, 0.0  ;;  %v7815_v17 = vperm.slane %v7812_v37, 1 }
 0x44d   : > { %8441 = vmatpush.bf16.msra.mxu0 %v14898_v5  ;;  %8459 = vmatpush.bf16.msra.mxu1 %v14907_v56 }
 0x44e   : > { %v7702_v0 = vpop.f32.mrf.mxu2  ;;  %v7721_v24 = vpop.f32.mrf.mxu3 }
 0x44f   : > { %v7703_v61 = vadd.f32 %v7702_v0, %v7684_v22  ;;  %v8147_v9 = vpop.f32.mrf.mxu0  ;;  %v8166_v58 = vpop.f32.mrf.mxu1 }
 0x450   : > { %v8148_v55 = vadd.f32 %v8147_v9, %v7814_v42 }
 0x451   : > { %v7722_v20 = vadd.f32 %v7721_v24, %v7703_v61  ;;  %8460 = vmatpush.bf16.msra.mxu1 %v14906_v19  ;;  %v14915_v19 = vld [vmem:[#allocation15 + $0x8] sm:$0xff] }
 0x452   : > { %v8167_v63 = vadd.f32 %v8166_v58, %v8148_v55 }
 0x453   : > { %v7739_v8 = vmax.f32 %v7722_v20, 0.0 }
 0x455   : > { %v7747_v35 = vpack.c.bf16 %v7739_v8, %v7735_v53 }
 0x456   : > { %v8185_v6 = vpop.f32.mrf.mxu2 }
 0x457   : > { %8208 = vmatmul.bf16.gmra.mxu3 %v7747_v35  ;;  %v8149_v15 = vpop.f32.mrf.mxu0  ;;  %v8168_v49 = vpop.f32.mrf.mxu1  ;;  %v8186_v16 = vadd.f32 %v8185_v6, %v8167_v63 }
 0x458   : > { %v8150_v43 = vadd.f32 %v8149_v15, %v7814_v42 }
 0x45a   : > { %v8169_v51 = vadd.f32 %v8168_v49, %v8150_v43 }
 0x45e   : > { %v8187_v46 = vpop.f32.mrf.mxu2 }
 0x45f   : > { %v8152_v60 = vpop.f32.mrf.mxu0  ;;  %v8171_v59 = vpop.f32.mrf.mxu1  ;;  %v8188_v36 = vadd.f32 %v8187_v46, %v8169_v51  ;;  %v14921_v51 = vld [vmem:[#allocation15 + $0x38] sm:$0xff] }
 0x460   : > { %v8153_v48 = vadd.f32 %v8152_v60, %v7814_v42  ;;  %8566 = vmatpush.bf16.msra.mxu2 %v14921_v51 }
 0x462   : > { %v8172_v25 = vadd.f32 %v8171_v59, %v8153_v48 }
 0x466   : > { %v8190_v57 = vpop.f32.mrf.mxu2 }
 0x467   : > { %8279 = vmatmul.bf16.vlgmr.msrb.gmra.mxu3 %v7743_v30  ;;  %v8154_v10 = vpop.f32.mrf.mxu0  ;;  %v8173_v40 = vpop.f32.mrf.mxu1  ;;  %v8191_v14 = vadd.f32 %v8190_v57, %v8172_v25  ;;  %v14929_v25 = vld [vmem:[#allocation21 + $0x38] sm:$0xff] }
 0x468   : > { %v8155_v13 = vadd.f32 %v8154_v10, %v7814_v42  ;;  %v14920_v10 = vld [vmem:[#allocation15 + $0x30] sm:$0xff]  ;;  %8679 = vmatpush.bf16.msra.mxu3 %v14929_v25 }
 0x469   : > { %8567 = vmatpush.bf16.msra.mxu2 %v14920_v10  ;;  %v14935_v10 = vld [vmem:[#allocation27 + $0x28] sm:$0xff] }
 0x46a   : > { %v8174_v2 = vadd.f32 %v8173_v40, %v8155_v13  ;;  %v14914_v40 = vld [vmem:[#allocation15] sm:$0xff]  ;;  %v15222_v13 = vld [vmem:[#allocation12] ss:$0 sm:$0xff] }
 0x46e   : > { %v8192_v44 = vpop.f32.mrf.mxu2 }
 0x46f   : > { %v8223_v62 = vpop.f32.mrf.mxu0  ;;  %v8242_v52 = vpop.f32.mrf.mxu1  ;;  %v8193_v27 = vadd.f32 %v8192_v44, %v8174_v2  ;;  %v14928_v2 = vld [vmem:[#allocation21 + $0x30] sm:$0xff] }
 0x470   : > { %v8224_v53 = vadd.f32 %v8223_v62, %v7815_v17  ;;  %8680 = vmatpush.bf16.msra.mxu3 %v14928_v2 }
 0x472   : > { %v8243_v28 = vadd.f32 %v8242_v52, %v8224_v53 }
 0x476   : > { %v8261_v7 = vpop.f32.mrf.mxu2 }
 0x477   : > { %8284 = vmatmul.bf16.gmra.mxu3 %v7747_v35  ;;  %v8225_v0 = vpop.f32.mrf.mxu0  ;;  %v8244_v8 = vpop.f32.mrf.mxu1  ;;  %v8262_v23 = vadd.f32 %v8261_v7, %v8243_v28 }
 0x478   : > { %v8226_v11 = vadd.f32 %v8225_v0, %v7815_v17  ;;  %v14927_v0 = vld [vmem:[#allocation21 + $0x28] sm:$0xff] }
 0x479   : > { %8681 = vmatpush.bf16.msra.mxu3 %v14927_v0  ;;  %v14930_v0 = vld [vmem:[#allocation27] sm:$0xff] }
 0x47a   : > { %v8245_v32 = vadd.f32 %v8244_v8, %v8226_v11 }
 0x47e   : > { %v8263_v35 = vpop.f32.mrf.mxu2 }
 0x47f   : > { %v8228_v3 = vpop.f32.mrf.mxu0  ;;  %v8264_v4 = vadd.f32 %v8263_v35, %v8245_v32  ;;  %v8247_v6 = vpop.f32.mrf.mxu1 }
 0x480   : > { %v8229_v37 = vadd.f32 %v8228_v3, %v7815_v17 }
 0x482   : > { %v8248_v42 = vadd.f32 %v8247_v6, %v8229_v37  ;;  %v14925_v37 = vld [vmem:[#allocation21 + $0x18] sm:$0xff] }
 0x486   : > { %v8266_v21 = vpop.f32.mrf.mxu2 }
 0x487   : > { %v8230_v49 = vpop.f32.mrf.mxu0  ;;  %v8249_v60 = vpop.f32.mrf.mxu1  ;;  %v8267_v55 = vadd.f32 %v8266_v21, %v8248_v42  ;;  %v14922_v42 = vld [vmem:[#allocation21] sm:$0xff] }
 0x488   : > { %v8231_v34 = vadd.f32 %v8230_v49, %v7815_v17  ;;  %v14926_v49 = vld [vmem:[#allocation21 + $0x20] sm:$0xff] }
 0x489   : > { %8682 = vmatpush.bf16.msra.mxu3 %v14926_v49  ;;  %v14941_v49 = vld [vmem:[#allocation30 + $0x18] sm:$0xff] }
 0x48d   : > { %8683 = vmatpush.bf16.msra.mxu3 %v14925_v37 }
 0x48e   : > { %v8268_v50 = vpop.f32.mrf.mxu2 }
 0x4ca   : > { %v8204_v41 = vpop.f32.mrf.mxu3 }
 0x4cb   : > { %v8205_v31 = vadd.f32 %v8204_v41, %v8186_v16  ;;  %v8250_v41 = vadd.f32 %v8249_v60, %v8231_v34  ;;  %v14923_v34 = vld [vmem:[#allocation21 + $0x8] sm:$0xff]  ;;  %v15224_v60 = vld [vmem:[#allocation16] ss:$0 sm:$0xff] }
 0x4cd   : > { %v8290_v29 = vmax.f32 %v8205_v31, 0.0  ;;  %v8269_v43 = vadd.f32 %v8268_v50, %v8250_v41  ;;  %v14918_v31 = vld [vmem:[#allocation15 + $0x20] sm:$0xff] }
 0x4d2   : > { %v8206_v26 = vpop.f32.mrf.mxu3 }
 0x4d3   : > { %v8207_v54 = vadd.f32 %v8206_v26, %v8188_v36  ;;  %v14919_v36 = vld [vmem:[#allocation15 + $0x28] sm:$0xff]  ;;  %v14917_v26 = vld [vmem:[#allocation15 + $0x18] sm:$0xff] }
 0x4d4   : > { %8568 = vmatpush.bf16.msra.mxu2 %v14919_v36 }
 0x4d5   : > { %v8292_v45 = vmax.f32 %v8207_v54, 0.0  ;;  %v14916_v54 = vld [vmem:[#allocation15 + $0x10] sm:$0xff] }
 0x4d7   : > { %v8298_v38 = vpack.c.bf16 %v8292_v45, %v8290_v29  ;;  %v15221_v45 = vld [vmem:[#allocation10] ss:$0 sm:$0xff] }
 0x4d8   : > { %8569 = vmatpush.bf16.msra.mxu2 %v14918_v31 }
 0x4d9   : > { %8442 = vmatmul.bf16.vlgmr.msra.gmra.mxu0 %v8298_v38 }
 0x4da   : > { %v8209_v30 = vpop.f32.mrf.mxu3 }
 0x4db   : > { %v8210_v47 = vadd.f32 %v8209_v30, %v8191_v14 }
 0x4dc   : > { %8570 = vmatpush.bf16.msra.mxu2 %v14917_v26 }
 0x4dd   : > { %v8294_v61 = vmax.f32 %v8210_v47, 0.0 }
 0x4e0   : > { %8571 = vmatpush.bf16.msra.mxu2 %v14916_v54 }
 0x4e2   : > { %v8211_v39 = vpop.f32.mrf.mxu3 }
 0x4e3   : > { %v8212_v22 = vadd.f32 %v8211_v39, %v8193_v27  ;;  %v15223_v27 = vld [vmem:[#allocation13] ss:$0 sm:$0xff] }
 0x4e4   : > { %8572 = vmatpush.bf16.msra.mxu2 %v14915_v19 }
 0x4e5   : > { %v8296_v24 = vmax.f32 %v8212_v22, 0.0 }
 0x4e7   : > { %v8300_v20 = vpack.c.bf16 %v8296_v24, %v8294_v61 }
 0x4e8   : > { %8573 = vmatpush.bf16.msra.mxu2 %v14914_v40 }
 0x4e9   : > { %8447 = vmatmul.bf16.gmra.mxu0 %v8300_v20 }
 0x4ea   : > { %v8280_v12 = vpop.f32.mrf.mxu3 }
 0x4eb   : > { %v8281_v9 = vadd.f32 %v8280_v12, %v8262_v23 }
 0x4ed   : > { %v8291_v15 = vmax.f32 %v8281_v9, 0.0 }
 0x4f2   : > { %v8282_v5 = vpop.f32.mrf.mxu3 }
 0x4f3   : > { %v8283_v58 = vadd.f32 %v8282_v5, %v8264_v4 }
 0x4f5   : > { %v8293_v1 = vmax.f32 %v8283_v58, 0.0 }
 0x4f7   : > { %v8299_v33 = vpack.c.bf16 %v8293_v1, %v8291_v15 }
 0x4f9   : > { %8461 = vmatmul.bf16.vlgmr.msra.gmra.mxu1 %v8299_v33 }
 0x4fa   : > { %v8285_v46 = vpop.f32.mrf.mxu3 }
 0x4fb   : > { %v8286_v59 = vadd.f32 %v8285_v46, %v8267_v55  ;;  %v14924_v46 = vld [vmem:[#allocation21 + $0x10] sm:$0xff] }
 0x4fc   : > { %8684 = vmatpush.bf16.msra.mxu3 %v14924_v46 }
 0x4fd   : > { %v8295_v63 = vmax.f32 %v8286_v59, 0.0  ;;  %v14937_v59 = vld [vmem:[#allocation27 + $0x38] sm:$0xff] }
 0x4fe   : > { %8792 = vmatpush.bf16.msrb.mxu0 %v14937_v59 }
 0x500   : > { %8685 = vmatpush.bf16.msra.mxu3 %v14923_v34 }
 0x502   : > { %v8287_v57 = vpop.f32.mrf.mxu3 }
 0x503   : > { %v8288_v18 = vadd.f32 %v8287_v57, %v8269_v43  ;;  %v15225_v43 = vld [vmem:[#allocation18] ss:$0 sm:$0xff] }
 0x504   : > { %8686 = vmatpush.bf16.msra.mxu3 %v14922_v42  ;;  %v14936_v57 = vld [vmem:[#allocation27 + $0x30] sm:$0xff] }
 0x505   : > { %v8297_v56 = vmax.f32 %v8288_v18, 0.0  ;;  %8793 = vmatpush.bf16.msrb.mxu0 %v14936_v57 }
 0x507   : > { %v8301_v16 = vpack.c.bf16 %v8297_v56, %v8295_v63  ;;  %v15226_v56 = vld [vmem:[#allocation19] ss:$0 sm:$0xff] }
 0x509   : > { %8466 = vmatmul.bf16.gmra.mxu1 %v8301_v16  ;;  %8794 = vmatpush.bf16.msrb.mxu0 %v14935_v10  ;;  %v14952_v10 = vld [vmem:[#allocation30 + $0x70] sm:$0xff] }
 0x556   : > { %v8443_v29 = vpop.f32.mrf.mxu0 }
 0x557   : > { %v8444_v44 = vadd.f32 %v15221_v45, %v8443_v29 }
 0x55e   : > { %v8445_v38 = vpop.f32.mrf.mxu0 }
 0x55f   : > { %v8446_v14 = vadd.f32 %v15221_v45, %v8445_v38 }
 0x566   : > { %v8448_v39 = vpop.f32.mrf.mxu0 }
 0x567   : > { %v8449_v24 = vadd.f32 %v15221_v45, %v8448_v39  ;;  %v14932_v39 = vld [vmem:[#allocation27 + $0x10] sm:$0xff] }
 0x56e   : > { %v8450_v28 = vpop.f32.mrf.mxu0 }
 0x56f   : > { %v8451_v23 = vadd.f32 %v15221_v45, %v8450_v28  ;;  %v15229_v28 = vld [vmem:[#allocation25] ss:$0 sm:$0xff] }
 0x576   : > { %v8462_v48 = vpop.f32.mrf.mxu1 }
 0x577   : > { %v8463_v62 = vadd.f32 %v8462_v48, %v8444_v44 }
 0x579   : > { %v8472_v30 = vmax.f32 %v8463_v62, 0.0 }
 0x57b   : > { %v8480_v7 = vmul.f32 %v15222_v13, %v8472_v30 }
 0x57d   : > { %v8488_v17 = vadd.f32 %v15223_v27, %v8480_v7 }
 0x57e   : > { %v8464_v52 = vpop.f32.mrf.mxu1 }
 0x57f   : > { %v8465_v47 = vadd.f32 %v8464_v52, %v8446_v14  ;;  %v8492_v8 = vmax.f32 %v8488_v17, 0.0  ;;  %v15227_v17 = vld [vmem:[#allocation22] ss:$0 sm:$0xff] }
 0x581   : > { %v8473_v22 = vmax.f32 %v8465_v47, 0.0  ;;  %v14933_v47 = vld [vmem:[#allocation27 + $0x18] sm:$0xff] }
 0x583   : > { %v8481_v61 = vmul.f32 %v15222_v13, %v8473_v22  ;;  %v14931_v22 = vld [vmem:[#allocation27 + $0x8] sm:$0xff] }
 0x585   : > { %v8489_v20 = vadd.f32 %v15223_v27, %v8481_v61 }
 0x586   : > { %v8467_v53 = vpop.f32.mrf.mxu1 }
 0x587   : > { %v8493_v35 = vmax.f32 %v8489_v20, 0.0  ;;  %v8468_v12 = vadd.f32 %v8467_v53, %v8449_v24  ;;  %v15228_v53 = vld [vmem:[#allocation24] ss:$0 sm:$0xff] }
 0x589   : > { %v8496_v11 = vpack.c.bf16 %v8493_v35, %v8492_v8  ;;  %v8474_v3 = vmax.f32 %v8468_v12, 0.0  ;;  %v14945_v8 = vld [vmem:[#allocation30 + $0x38] sm:$0xff]  ;;  %v14944_v35 = vld [vmem:[#allocation30 + $0x30] sm:$0xff] }
 0x58a   : > { %8885 = vmatpush.bf16.msrb.mxu1 %v14945_v8 }
 0x58b   : > { %8574 = vmatmul.bf16.vlgmr.msra.gmra.mxu2 %v8496_v11  ;;  %v8482_v4 = vmul.f32 %v15222_v13, %v8474_v3 }
 0x58d   : > { %v8490_v58 = vadd.f32 %v15223_v27, %v8482_v4 }
 0x58e   : > { %v8469_v32 = vpop.f32.mrf.mxu1  ;;  %8886 = vmatpush.bf16.msrb.mxu1 %v14944_v35 }
 0x58f   : > { %v8470_v9 = vadd.f32 %v8469_v32, %v8451_v23  ;;  %v8494_v15 = vmax.f32 %v8490_v58, 0.0  ;;  %v14943_v32 = vld [vmem:[#allocation30 + $0x28] sm:$0xff]  ;;  %v14942_v58 = vld [vmem:[#allocation30 + $0x20] sm:$0xff] }
 0x591   : > { %v8475_v5 = vmax.f32 %v8470_v9, 0.0 }
 0x592   : > { %8887 = vmatpush.bf16.msrb.mxu1 %v14943_v32 }
 0x593   : > { %v8483_v6 = vmul.f32 %v15222_v13, %v8475_v5 }
 0x595   : > { %v8491_v21 = vadd.f32 %v15223_v27, %v8483_v6  ;;  %v14934_v27 = vld [vmem:[#allocation27 + $0x20] sm:$0xff] }
 0x596   : > { %8795 = vmatpush.bf16.msrb.mxu0 %v14934_v27  ;;  %8888 = vmatpush.bf16.msrb.mxu1 %v14942_v58  ;;  %v14946_v27 = vld [vmem:[#allocation30 + $0x40] sm:$0xff]  ;;  %v14956_v58 = vld [vmem:[#allocation30 + $0x90] sm:$0xff] }
 0x597   : > { %v8495_v1 = vmax.f32 %v8491_v21, 0.0 }
 0x599   : > { %v8497_v33 = vpack.c.bf16 %v8495_v1, %v8494_v15 }
 0x59a   : > { %8796 = vmatpush.bf16.msrb.mxu0 %v14933_v47  ;;  %8889 = vmatpush.bf16.msrb.mxu1 %v14941_v49  ;;  %v14961_v47 = vld [vmem:[#allocation30 + $0xb8] sm:$0xff]  ;;  %v15232_v49 = vld [vmem:[#allocation31 + $0x1] ss:$0 sm:$0xff] }
 0x59b   : > { %8579 = vmatmul.bf16.gmra.mxu2 %v8497_v33  ;;  %9075 = vmatpush.bf16.msrb.mxu3 %v14961_v47 }
 0x59e   : > { %8797 = vmatpush.bf16.msrb.mxu0 %v14932_v39 }
 0x5a2   : > { %8798 = vmatpush.bf16.msrb.mxu0 %v14931_v22  ;;  %v14960_v22 = vld [vmem:[#allocation30 + $0xb0] sm:$0xff] }
 0x5a3   : > { %9076 = vmatpush.bf16.msrb.mxu3 %v14960_v22  ;;  %v14972_v22 = vld [vmem:[#allocation30 + $0x110] sm:$0xff] }
 0x5a6   : > { %8799 = vmatpush.bf16.msrb.mxu0 %v14930_v0  ;;  %v15231_v0 = vld [vmem:[#allocation31] ss:$0 sm:$0xff] }
 0x60e   : > { %v8575_v50 = vpop.f32.mrf.mxu2 }
 0x60f   : > { %v8576_v55 = vadd.f32 %v15224_v60, %v8575_v50 }
 0x611   : > { %v8585_v41 = vmax.f32 %v8576_v55, 0.0 }
 0x613   : > { %v8593_v63 = vmul.f32 %v15225_v43, %v8585_v41 }
 0x615   : > { %v8601_v36 = vadd.f32 %v15226_v56, %v8593_v63  ;;  %v14939_v63 = vld [vmem:[#allocation30 + $0x8] sm:$0xff] }
 0x616   : > { %v8577_v18 = vpop.f32.mrf.mxu2 }
 0x617   : > { %v8578_v16 = vadd.f32 %v15224_v60, %v8577_v18  ;;  %v8605_v19 = vmax.f32 %v8601_v36, 0.0  ;;  %v14940_v18 = vld [vmem:[#allocation30 + $0x10] sm:$0xff]  ;;  %v15230_v36 = vld [vmem:[#allocation28] ss:$0 sm:$0xff] }
 0x618   : > { %8890 = vmatpush.bf16.msrb.mxu1 %v14940_v18 }
 0x619   : > { %v8586_v51 = vmax.f32 %v8578_v16, 0.0  ;;  %v14953_v16 = vld [vmem:[#allocation30 + $0x78] sm:$0xff] }
 0x61a   : > { %8980 = vmatpush.bf16.msrb.mxu2 %v14953_v16 }
 0x61b   : > { %v8594_v31 = vmul.f32 %v15225_v43, %v8586_v51 }
 0x61c   : > { %8891 = vmatpush.bf16.msrb.mxu1 %v14939_v63 }
 0x61d   : > { %v8602_v26 = vadd.f32 %v15226_v56, %v8594_v31  ;;  %v14951_v31 = vld [vmem:[#allocation30 + $0x68] sm:$0xff] }
 0x61e   : > { %v8580_v54 = vpop.f32.mrf.mxu2  ;;  %8981 = vmatpush.bf16.msrb.mxu2 %v14952_v10  ;;  %v14964_v10 = vld [vmem:[#allocation30 + $0xd0] sm:$0xff] }
 0x61f   : > { %v8606_v40 = vmax.f32 %v8602_v26, 0.0  ;;  %v8581_v29 = vadd.f32 %v15224_v60, %v8580_v54 }
 0x621   : > { %v8609_v45 = vpack.c.bf16 %v8606_v40, %v8605_v19  ;;  %v8587_v44 = vmax.f32 %v8581_v29, 0.0  ;;  %v14950_v40 = vld [vmem:[#allocation30 + $0x60] sm:$0xff] }
 0x622   : > { %8982 = vmatpush.bf16.msrb.mxu2 %v14951_v31  ;;  %v14962_v31 = vld [vmem:[#allocation30 + $0xc0] sm:$0xff] }
 0x623   : > { %8687 = vmatmul.bf16.vlgmr.msra.gmra.mxu3 %v8609_v45  ;;  %v8595_v48 = vmul.f32 %v15225_v43, %v8587_v44 }
 0x625   : > { %v8603_v13 = vadd.f32 %v15226_v56, %v8595_v48 }
 0x626   : > { %v8582_v38 = vpop.f32.mrf.mxu2  ;;  %8983 = vmatpush.bf16.msrb.mxu2 %v14950_v40  ;;  %v15233_v40 = vld [vmem:[#allocation31 + $0x2] ss:$0 sm:$0xff] }
 0x627   : > { %v8583_v62 = vadd.f32 %v15224_v60, %v8582_v38  ;;  %v8607_v2 = vmax.f32 %v8603_v13, 0.0  ;;  %v14949_v38 = vld [vmem:[#allocation30 + $0x58] sm:$0xff] }
 0x629   : > { %v8588_v30 = vmax.f32 %v8583_v62, 0.0 }
 0x62a   : > { %8984 = vmatpush.bf16.msrb.mxu2 %v14949_v38 }
 0x62b   : > { %v8596_v25 = vmul.f32 %v15225_v43, %v8588_v30 }
 0x62d   : > { %v8604_v14 = vadd.f32 %v15226_v56, %v8596_v25  ;;  %v14938_v56 = vld [vmem:[#allocation30] sm:$0xff] }
 0x62e   : > { %8892 = vmatpush.bf16.msrb.mxu1 %v14938_v56 }
 0x62f   : > { %v8608_v52 = vmax.f32 %v8604_v14, 0.0 }
 0x631   : > { %v8610_v7 = vpack.c.bf16 %v8608_v52, %v8607_v2  ;;  %v14948_v52 = vld [vmem:[#allocation30 + $0x50] sm:$0xff] }
 0x632   : > { %8985 = vmatpush.bf16.msrb.mxu2 %v14948_v52 }
 0x633   : > { %8692 = vmatmul.bf16.gmra.mxu3 %v8610_v7  ;;  %v14947_v7 = vld [vmem:[#allocation30 + $0x48] sm:$0xff] }
 0x636   : > { %8986 = vmatpush.bf16.msrb.mxu2 %v14947_v7 }
 0x63a   : > { %8987 = vmatpush.bf16.msrb.mxu2 %v14946_v27 }
 0x6a6   : > { %v8688_v61 = vpop.f32.mrf.mxu3 }
 0x6a7   : > { %v8689_v24 = vadd.f32 %v15227_v17, %v8688_v61 }
 0x6a9   : > { %v8698_v20 = vmax.f32 %v8689_v24, 0.0 }
 0x6ab   : > { %v8706_v11 = vmul.f32 %v15228_v53, %v8698_v20 }
 0x6ad   : > { %v8714_v4 = vadd.f32 %v15229_v28, %v8706_v11  ;;  %v14957_v11 = vld [vmem:[#allocation30 + $0x98] sm:$0xff] }
 0x6ae   : > { %v8690_v12 = vpop.f32.mrf.mxu3 }
 0x6af   : > { %v8691_v3 = vadd.f32 %v15227_v17, %v8690_v12  ;;  %v8718_v21 = vmax.f32 %v8714_v4, 0.0 }
 0x6b1   : > { %v8699_v23 = vmax.f32 %v8691_v3, 0.0 }
 0x6b3   : > { %v8707_v9 = vmul.f32 %v15228_v53, %v8699_v23 }
 0x6b5   : > { %v8715_v5 = vadd.f32 %v15229_v28, %v8707_v9 }
 0x6b6   : > { %v8693_v6 = vpop.f32.mrf.mxu3 }
 0x6b7   : > { %v8719_v15 = vmax.f32 %v8715_v5, 0.0  ;;  %v8694_v1 = vadd.f32 %v15227_v17, %v8693_v6  ;;  %v14955_v6 = vld [vmem:[#allocation30 + $0x88] sm:$0xff] }
 0x6b9   : > { %v8722_v33 = vpack.c.bf16 %v8719_v15, %v8718_v21  ;;  %v8700_v37 = vmax.f32 %v8694_v1, 0.0  ;;  %v14954_v21 = vld [vmem:[#allocation30 + $0x80] sm:$0xff]  ;;  %v14969_v15 = vld [vmem:[#allocation30 + $0xf8] sm:$0xff] }
 0x6ba   : > { %9170 = vmatpush.bf16.msra.mxu0 %v14969_v15 }
 0x6bb   : > { %8800 = vmatmul.bf16.vlgmr.msrb.gmra.mxu0 %v8722_v33  ;;  %v8708_v34 = vmul.f32 %v15228_v53, %v8700_v37  ;;  %v14968_v33 = vld [vmem:[#allocation30 + $0xf0] sm:$0xff]  ;;  %v14967_v37 = vld [vmem:[#allocation30 + $0xe8] sm:$0xff] }
 0x6bd   : > { %v8716_v50 = vadd.f32 %v15229_v28, %v8708_v34 }
 0x6be   : > { %v8695_v46 = vpop.f32.mrf.mxu3  ;;  %9171 = vmatpush.bf16.msra.mxu0 %v14968_v33  ;;  %v14980_v33 = vld [vmem:[#allocation30 + $0x150] sm:$0xff] }
 0x6bf   : > { %v8696_v42 = vadd.f32 %v15227_v17, %v8695_v46  ;;  %v8720_v43 = vmax.f32 %v8716_v50, 0.0  ;;  %v14959_v17 = vld [vmem:[#allocation30 + $0xa8] sm:$0xff] }
 0x6c0   : > { %9077 = vmatpush.bf16.msrb.mxu3 %v14959_v17  ;;  %v14970_v17 = vld [vmem:[#allocation30 + $0x100] sm:$0xff] }
 0x6c1   : > { %v8701_v60 = vmax.f32 %v8696_v42, 0.0 }
 0x6c2   : > { %9172 = vmatpush.bf16.msra.mxu0 %v14967_v37  ;;  %v14978_v37 = vld [vmem:[#allocation30 + $0x140] sm:$0xff] }
 0x6c3   : > { %v8709_v55 = vmul.f32 %v15228_v53, %v8701_v60  ;;  %v14958_v53 = vld [vmem:[#allocation30 + $0xa0] sm:$0xff] }
 0x6c4   : > { %9078 = vmatpush.bf16.msrb.mxu3 %v14958_v53  ;;  %v14966_v60 = vld [vmem:[#allocation30 + $0xe0] sm:$0xff] }
 0x6c5   : > { %v8717_v41 = vadd.f32 %v15229_v28, %v8709_v55  ;;  %v15234_v53 = vld [vmem:[#allocation31 + $0x3] ss:$0 sm:$0xff] }
 0x6c6   : > { %9173 = vmatpush.bf16.msra.mxu0 %v14966_v60  ;;  %v15235_v60 = vld [vmem:[#allocation31 + $0x4] ss:$0 sm:$0xff] }
 0x6c7   : > { %v8721_v59 = vmax.f32 %v8717_v41, 0.0 }
 0x6c8   : > { %9079 = vmatpush.bf16.msrb.mxu3 %v14957_v11 }
 0x6c9   : > { %v8723_v57 = vpack.c.bf16 %v8721_v59, %v8720_v43  ;;  %v14965_v43 = vld [vmem:[#allocation30 + $0xd8] sm:$0xff] }
 0x6ca   : > { %9174 = vmatpush.bf16.msra.mxu0 %v14965_v43 }
 0x6cb   : > { %8805 = vmatmul.bf16.gmra.mxu0 %v8723_v57 }
 0x6cc   : > { %9080 = vmatpush.bf16.msrb.mxu3 %v14956_v58 }
 0x6ce   : > { %9175 = vmatpush.bf16.msra.mxu0 %v14964_v10 }
 0x6d0   : > { %9081 = vmatpush.bf16.msrb.mxu3 %v14955_v6 }
 0x6d4   : > { %9082 = vmatpush.bf16.msrb.mxu3 %v14954_v21 }
 0x738   : > { %v8801_v51 = vpop.f32.mrf.mxu0 }
 0x739   : > { %v8802_v26 = vadd.f32 %v15230_v36, %v8801_v51 }
 0x73b   : > { %v8811_v29 = vmax.f32 %v8802_v26, 0.0  ;;  %v14977_v26 = vld [vmem:[#allocation30 + $0x138] sm:$0xff] }
 0x73c   : > { %9265 = vmatpush.bf16.msra.mxu1 %v14977_v26 }
 0x740   : > { %v8803_v54 = vpop.f32.mrf.mxu0 }
 0x741   : > { %v8804_v19 = vadd.f32 %v15230_v36, %v8803_v54 }
 0x743   : > { %v8812_v45 = vmax.f32 %v8804_v19, 0.0  ;;  %v14976_v19 = vld [vmem:[#allocation30 + $0x130] sm:$0xff] }
 0x744   : > { %9266 = vmatpush.bf16.msra.mxu1 %v14976_v19  ;;  %v14988_v19 = vld [vmem:[#allocation30 + $0x190] sm:$0xff] }
 0x745   : > { %v8815_v44 = vpack.c.bf16 %v8812_v45, %v8811_v29  ;;  %v14975_v29 = vld [vmem:[#allocation30 + $0x128] sm:$0xff] }
 0x747   : > { %8893 = vmatmul.bf16.vlgmr.msrb.gmra.mxu1 %v8815_v44 }
 0x748   : > { %v8806_v48 = vpop.f32.mrf.mxu0  ;;  %9267 = vmatpush.bf16.msra.mxu1 %v14975_v29  ;;  %v14986_v29 = vld [vmem:[#allocation30 + $0x180] sm:$0xff] }
 0x749   : > { %v8807_v62 = vadd.f32 %v15230_v36, %v8806_v48  ;;  %v14974_v48 = vld [vmem:[#allocation30 + $0x120] sm:$0xff] }
 0x74b   : > { %v8813_v25 = vmax.f32 %v8807_v62, 0.0 }
 0x74c   : > { %9268 = vmatpush.bf16.msra.mxu1 %v14974_v48  ;;  %v15236_v48 = vld [vmem:[#allocation31 + $0x5] ss:$0 sm:$0xff] }
 0x750   : > { %v8808_v30 = vpop.f32.mrf.mxu0 }
 0x751   : > { %v8809_v13 = vadd.f32 %v15230_v36, %v8808_v30  ;;  %v14963_v36 = vld [vmem:[#allocation30 + $0xc8] sm:$0xff] }
 0x752   : > { %9176 = vmatpush.bf16.msra.mxu0 %v14963_v36 }
 0x753   : > { %v8814_v14 = vmax.f32 %v8809_v13, 0.0 }
 0x755   : > { %v8816_v2 = vpack.c.bf16 %v8814_v14, %v8813_v25  ;;  %v14973_v25 = vld [vmem:[#allocation30 + $0x118] sm:$0xff] }
 0x756   : > { %9177 = vmatpush.bf16.msra.mxu0 %v14962_v31  ;;  %9269 = vmatpush.bf16.msra.mxu1 %v14973_v25 }
 0x757   : > { %8898 = vmatmul.bf16.gmra.mxu1 %v8816_v2 }
 0x75a   : > { %9270 = vmatpush.bf16.msra.mxu1 %v14972_v22 }
 0x7c4   : > { %v8894_v39 = vpop.f32.mrf.mxu1 }
 0x7c5   : > { %v8895_v61 = vadd.f32 %v15231_v0, %v8894_v39 }
 0x7c7   : > { %v8904_v8 = vmax.f32 %v8895_v61, 0.0  ;;  %v14985_v61 = vld [vmem:[#allocation30 + $0x178] sm:$0xff] }
 0x7c8   : > { %9360 = vmatpush.bf16.msra.mxu2 %v14985_v61 }
 0x7cc   : > { %v8896_v24 = vpop.f32.mrf.mxu1 }
 0x7cd   : > { %v8897_v20 = vadd.f32 %v15231_v0, %v8896_v24 }
 0x7cf   : > { %v8905_v35 = vmax.f32 %v8897_v20, 0.0  ;;  %v14984_v20 = vld [vmem:[#allocation30 + $0x170] sm:$0xff] }
 0x7d0   : > { %9361 = vmatpush.bf16.msra.mxu2 %v14984_v20  ;;  %v14996_v20 = vld [vmem:[#allocation30 + $0x1d0] sm:$0xff] }
 0x7d1   : > { %v8908_v12 = vpack.c.bf16 %v8905_v35, %v8904_v8  ;;  %v14983_v8 = vld [vmem:[#allocation30 + $0x168] sm:$0xff] }
 0x7d3   : > { %8988 = vmatmul.bf16.vlgmr.msrb.gmra.mxu2 %v8908_v12 }
 0x7d4   : > { %v8899_v28 = vpop.f32.mrf.mxu1  ;;  %9362 = vmatpush.bf16.msra.mxu2 %v14983_v8  ;;  %v14994_v8 = vld [vmem:[#allocation30 + $0x1c0] sm:$0xff] }
 0x7d5   : > { %v8900_v3 = vadd.f32 %v15231_v0, %v8899_v28  ;;  %v14982_v28 = vld [vmem:[#allocation30 + $0x160] sm:$0xff] }
 0x7d7   : > { %v8906_v4 = vmax.f32 %v8900_v3, 0.0 }
 0x7d8   : > { %9363 = vmatpush.bf16.msra.mxu2 %v14982_v28  ;;  %v15237_v28 = vld [vmem:[#allocation31 + $0x6] ss:$0 sm:$0xff] }
 0x7dc   : > { %v8901_v23 = vpop.f32.mrf.mxu1 }
 0x7dd   : > { %v8902_v32 = vadd.f32 %v15231_v0, %v8901_v23  ;;  %v14971_v0 = vld [vmem:[#allocation30 + $0x108] sm:$0xff] }
 0x7de   : > { %9271 = vmatpush.bf16.msra.mxu1 %v14971_v0 }
 0x7df   : > { %v8907_v9 = vmax.f32 %v8902_v32, 0.0 }
 0x7e1   : > { %v8909_v5 = vpack.c.bf16 %v8907_v9, %v8906_v4  ;;  %v14981_v4 = vld [vmem:[#allocation30 + $0x158] sm:$0xff] }
 0x7e2   : > { %9272 = vmatpush.bf16.msra.mxu1 %v14970_v17  ;;  %9364 = vmatpush.bf16.msra.mxu2 %v14981_v4 }
 0x7e3   : > { %8993 = vmatmul.bf16.gmra.mxu2 %v8909_v5 }
 0x7e6   : > { %9365 = vmatpush.bf16.msra.mxu2 %v14980_v33 }
 0x856   : > { %v8989_v1 = vpop.f32.mrf.mxu2 }
 0x857   : > { %v8990_v46 = vadd.f32 %v15232_v49, %v8989_v1 }
 0x859   : > { %v8999_v50 = vmax.f32 %v8990_v46, 0.0  ;;  %v14993_v46 = vld [vmem:[#allocation30 + $0x1b8] sm:$0xff] }
 0x85a   : > { %9455 = vmatpush.bf16.msra.mxu3 %v14993_v46 }
 0x85e   : > { %v8991_v34 = vpop.f32.mrf.mxu2 }
 0x85f   : > { %v8992_v42 = vadd.f32 %v15232_v49, %v8991_v34 }
 0x861   : > { %v9000_v55 = vmax.f32 %v8992_v42, 0.0  ;;  %v14992_v42 = vld [vmem:[#allocation30 + $0x1b0] sm:$0xff] }
 0x862   : > { %9456 = vmatpush.bf16.msra.mxu3 %v14992_v42  ;;  %v15004_v42 = vld [vmem:[#allocation30 + $0x210] sm:$0xff] }
 0x863   : > { %v9003_v41 = vpack.c.bf16 %v9000_v55, %v8999_v50  ;;  %v14991_v50 = vld [vmem:[#allocation30 + $0x1a8] sm:$0xff] }
 0x865   : > { %9083 = vmatmul.bf16.vlgmr.msrb.gmra.mxu3 %v9003_v41 }
 0x866   : > { %v8994_v59 = vpop.f32.mrf.mxu2  ;;  %9457 = vmatpush.bf16.msra.mxu3 %v14991_v50  ;;  %v15002_v50 = vld [vmem:[#allocation30 + $0x200] sm:$0xff] }
 0x867   : > { %v8995_v57 = vadd.f32 %v15232_v49, %v8994_v59  ;;  %v14990_v59 = vld [vmem:[#allocation30 + $0x1a0] sm:$0xff] }
 0x869   : > { %v9001_v56 = vmax.f32 %v8995_v57, 0.0 }
 0x86a   : > { %9458 = vmatpush.bf16.msra.mxu3 %v14990_v59  ;;  %v15238_v59 = vld [vmem:[#allocation31 + $0x7] ss:$0 sm:$0xff] }
 0x86e   : > { %v8996_v18 = vpop.f32.mrf.mxu2 }
 0x86f   : > { %v8997_v63 = vadd.f32 %v15232_v49, %v8996_v18  ;;  %v14979_v49 = vld [vmem:[#allocation30 + $0x148] sm:$0xff] }
 0x870   : > { %9366 = vmatpush.bf16.msra.mxu2 %v14979_v49 }
 0x871   : > { %v9002_v16 = vmax.f32 %v8997_v63, 0.0 }
 0x873   : > { %v9004_v51 = vpack.c.bf16 %v9002_v16, %v9001_v56  ;;  %v14989_v56 = vld [vmem:[#allocation30 + $0x198] sm:$0xff] }
 0x874   : > { %9367 = vmatpush.bf16.msra.mxu2 %v14978_v37  ;;  %9459 = vmatpush.bf16.msra.mxu3 %v14989_v56 }
 0x875   : > { %9088 = vmatmul.bf16.gmra.mxu3 %v9004_v51 }
 0x878   : > { %9460 = vmatpush.bf16.msra.mxu3 %v14988_v19 }
 0x8e8   : > { %v9084_v54 = vpop.f32.mrf.mxu3 }
 0x8e9   : > { %v9085_v45 = vadd.f32 %v15233_v40, %v9084_v54 }
 0x8eb   : > { %v9094_v62 = vmax.f32 %v9085_v45, 0.0  ;;  %v15001_v45 = vld [vmem:[#allocation30 + $0x1f8] sm:$0xff] }
 0x8ec   : > { %9550 = vmatpush.bf16.msrb.mxu0 %v15001_v45 }
 0x8f0   : > { %v9086_v44 = vpop.f32.mrf.mxu3 }
 0x8f1   : > { %v9087_v38 = vadd.f32 %v15233_v40, %v9086_v44 }
 0x8f3   : > { %v9095_v30 = vmax.f32 %v9087_v38, 0.0  ;;  %v15000_v38 = vld [vmem:[#allocation30 + $0x1f0] sm:$0xff] }
 0x8f4   : > { %9551 = vmatpush.bf16.msrb.mxu0 %v15000_v38  ;;  %v15012_v38 = vld [vmem:[#allocation30 + $0x250] sm:$0xff] }
 0x8f5   : > { %v9098_v13 = vpack.c.bf16 %v9095_v30, %v9094_v62  ;;  %v14999_v62 = vld [vmem:[#allocation30 + $0x1e8] sm:$0xff] }
 0x8f7   : > { %9178 = vmatmul.bf16.vlgmr.msra.gmra.mxu0 %v9098_v13 }
 0x8f8   : > { %v9089_v14 = vpop.f32.mrf.mxu3  ;;  %9552 = vmatpush.bf16.msrb.mxu0 %v14999_v62  ;;  %v15010_v62 = vld [vmem:[#allocation30 + $0x240] sm:$0xff] }
 0x8f9   : > { %v9090_v2 = vadd.f32 %v15233_v40, %v9089_v14  ;;  %v14998_v14 = vld [vmem:[#allocation30 + $0x1e0] sm:$0xff] }
 0x8fb   : > { %v9096_v27 = vmax.f32 %v9090_v2, 0.0 }
 0x8fc   : > { %9553 = vmatpush.bf16.msrb.mxu0 %v14998_v14  ;;  %v15239_v14 = vld [vmem:[#allocation31 + $0x8] ss:$0 sm:$0xff] }
 0x900   : > { %v9091_v52 = vpop.f32.mrf.mxu3 }
 0x901   : > { %v9092_v7 = vadd.f32 %v15233_v40, %v9091_v52  ;;  %v14987_v40 = vld [vmem:[#allocation30 + $0x188] sm:$0xff] }
 0x902   : > { %9461 = vmatpush.bf16.msra.mxu3 %v14987_v40 }
 0x903   : > { %v9097_v47 = vmax.f32 %v9092_v7, 0.0 }
 0x905   : > { %v9099_v39 = vpack.c.bf16 %v9097_v47, %v9096_v27  ;;  %v14997_v27 = vld [vmem:[#allocation30 + $0x1d8] sm:$0xff] }
 0x906   : > { %9462 = vmatpush.bf16.msra.mxu3 %v14986_v29  ;;  %9554 = vmatpush.bf16.msrb.mxu0 %v14997_v27 }
 0x907   : > { %9183 = vmatmul.bf16.gmra.mxu0 %v9099_v39 }
 0x90a   : > { %9555 = vmatpush.bf16.msrb.mxu0 %v14996_v20 }
 0x974   : > { %v9179_v24 = vpop.f32.mrf.mxu0 }
 0x975   : > { %v9180_v35 = vadd.f32 %v15234_v53, %v9179_v24 }
 0x977   : > { %v9189_v3 = vmax.f32 %v9180_v35, 0.0  ;;  %v15009_v35 = vld [vmem:[#allocation30 + $0x238] sm:$0xff] }
 0x978   : > { %9645 = vmatpush.bf16.msrb.mxu1 %v15009_v35  ;;  %v15022_v35 = vld [vmem:[#allocation36 + $0x20] sm:$0xff] }
 0x97c   : > { %v9181_v12 = vpop.f32.mrf.mxu0 }
 0x97d   : > { %v9182_v11 = vadd.f32 %v15234_v53, %v9181_v12 }
 0x97f   : > { %v9190_v23 = vmax.f32 %v9182_v11, 0.0  ;;  %v15008_v11 = vld [vmem:[#allocation30 + $0x230] sm:$0xff] }
 0x980   : > { %9646 = vmatpush.bf16.msrb.mxu1 %v15008_v11  ;;  %v15020_v11 = vld [vmem:[#allocation36 + $0x10] sm:$0xff] }
 0x981   : > { %v9193_v32 = vpack.c.bf16 %v9190_v23, %v9189_v3  ;;  %v15007_v3 = vld [vmem:[#allocation30 + $0x228] sm:$0xff] }
 0x983   : > { %9273 = vmatmul.bf16.vlgmr.msra.gmra.mxu1 %v9193_v32 }
 0x984   : > { %v9184_v9 = vpop.f32.mrf.mxu0  ;;  %9647 = vmatpush.bf16.msrb.mxu1 %v15007_v3  ;;  %v15018_v3 = vld [vmem:[#allocation36] sm:$0xff] }
 0x985   : > { %v9185_v5 = vadd.f32 %v15234_v53, %v9184_v9  ;;  %v15006_v9 = vld [vmem:[#allocation30 + $0x220] sm:$0xff] }
 0x987   : > { %v9191_v21 = vmax.f32 %v9185_v5, 0.0 }
 0x988   : > { %9648 = vmatpush.bf16.msrb.mxu1 %v15006_v9 }
 0x98c   : > { %v9186_v58 = vpop.f32.mrf.mxu0 }
 0x98d   : > { %v9187_v6 = vadd.f32 %v15234_v53, %v9186_v58  ;;  %v14995_v53 = vld [vmem:[#allocation30 + $0x1c8] sm:$0xff] }
 0x98e   : > { %9556 = vmatpush.bf16.msrb.mxu0 %v14995_v53 }
 0x98f   : > { %v9192_v15 = vmax.f32 %v9187_v6, 0.0 }
 0x991   : > { %v9194_v1 = vpack.c.bf16 %v9192_v15, %v9191_v21  ;;  %v15005_v21 = vld [vmem:[#allocation30 + $0x218] sm:$0xff] }
 0x992   : > { %9557 = vmatpush.bf16.msrb.mxu0 %v14994_v8  ;;  %9649 = vmatpush.bf16.msrb.mxu1 %v15005_v21  ;;  %v15242_v21 = vld [vmem:[#allocation34] ss:$0 sm:$0xff] }
 0x993   : > { %9278 = vmatmul.bf16.gmra.mxu1 %v9194_v1 }
 0x996   : > { %9650 = vmatpush.bf16.msrb.mxu1 %v15004_v42 }
 0xa00   : > { %v9274_v34 = vpop.f32.mrf.mxu1 }
 0xa01   : > { %v9275_v55 = vadd.f32 %v15235_v60, %v9274_v34 }
 0xa03   : > { %v9284_v57 = vmax.f32 %v9275_v55, 0.0  ;;  %v15017_v55 = vld [vmem:[#allocation30 + $0x278] sm:$0xff] }
 0xa04   : > { %9740 = vmatpush.bf16.msrb.mxu2 %v15017_v55 }
 0xa08   : > { %v9276_v41 = vpop.f32.mrf.mxu1 }
 0xa09   : > { %v9277_v43 = vadd.f32 %v15235_v60, %v9276_v41 }
 0xa0b   : > { %v9285_v18 = vmax.f32 %v9277_v43, 0.0  ;;  %v15016_v43 = vld [vmem:[#allocation30 + $0x270] sm:$0xff] }
 0xa0c   : > { %9741 = vmatpush.bf16.msrb.mxu2 %v15016_v43 }
 0xa0d   : > { %v9288_v63 = vpack.c.bf16 %v9285_v18, %v9284_v57  ;;  %v15015_v57 = vld [vmem:[#allocation30 + $0x268] sm:$0xff] }
 0xa0f   : > { %9368 = vmatmul.bf16.vlgmr.msra.gmra.mxu2 %v9288_v63 }
 0xa10   : > { %v9279_v16 = vpop.f32.mrf.mxu1  ;;  %9742 = vmatpush.bf16.msrb.mxu2 %v15015_v57 }
 0xa11   : > { %v9280_v51 = vadd.f32 %v15235_v60, %v9279_v16  ;;  %v15014_v16 = vld [vmem:[#allocation30 + $0x260] sm:$0xff] }
 0xa13   : > { %v9286_v31 = vmax.f32 %v9280_v51, 0.0 }
 0xa14   : > { %9743 = vmatpush.bf16.msrb.mxu2 %v15014_v16 }
 0xa18   : > { %v9281_v10 = vpop.f32.mrf.mxu1 }
 0xa19   : > { %v9282_v36 = vadd.f32 %v15235_v60, %v9281_v10  ;;  %v15003_v60 = vld [vmem:[#allocation30 + $0x208] sm:$0xff] }
 0xa1a   : > { %9651 = vmatpush.bf16.msrb.mxu1 %v15003_v60 }
 0xa1b   : > { %v9287_v26 = vmax.f32 %v9282_v36, 0.0 }
 0xa1d   : > { %v9289_v54 = vpack.c.bf16 %v9287_v26, %v9286_v31  ;;  %v15013_v31 = vld [vmem:[#allocation30 + $0x258] sm:$0xff] }
 0xa1e   : > { %9652 = vmatpush.bf16.msrb.mxu1 %v15002_v50  ;;  %9744 = vmatpush.bf16.msrb.mxu2 %v15013_v31  ;;  %v15243_v31 = vld [vmem:[#allocation37] ss:$0 sm:$0xff] }
 0xa1f   : > { %9373 = vmatmul.bf16.gmra.mxu2 %v9289_v54 }
 0xa22   : > { %9745 = vmatpush.bf16.msrb.mxu2 %v15012_v38 }
 0xa92   : > { %v9369_v44 = vpop.f32.mrf.mxu2 }
 0xa93   : > { %v9370_v30 = vadd.f32 %v15236_v48, %v9369_v44 }
 0xa95   : > { %v9379_v2 = vmax.f32 %v9370_v30, 0.0  ;;  %v15025_v30 = vld [vmem:[#allocation36 + $0x38] sm:$0xff] }
 0xa96   : > { %9853 = vmatpush.bf16.msrb.mxu3 %v15025_v30 }
 0xa9a   : > { %v9371_v13 = vpop.f32.mrf.mxu2 }
 0xa9b   : > { %v9372_v25 = vadd.f32 %v15236_v48, %v9371_v13 }
 0xa9d   : > { %v9380_v52 = vmax.f32 %v9372_v25, 0.0  ;;  %v15024_v25 = vld [vmem:[#allocation36 + $0x30] sm:$0xff] }
 0xa9e   : > { %9854 = vmatpush.bf16.msrb.mxu3 %v15024_v25 }
 0xa9f   : > { %v9383_v7 = vpack.c.bf16 %v9380_v52, %v9379_v2  ;;  %v15023_v2 = vld [vmem:[#allocation36 + $0x28] sm:$0xff] }
 0xaa1   : > { %9463 = vmatmul.bf16.vlgmr.msra.gmra.mxu3 %v9383_v7 }
 0xaa2   : > { %v9374_v47 = vpop.f32.mrf.mxu2  ;;  %9855 = vmatpush.bf16.msrb.mxu3 %v15023_v2 }
 0xaa3   : > { %v9375_v39 = vadd.f32 %v15236_v48, %v9374_v47 }
 0xaa5   : > { %v9381_v17 = vmax.f32 %v9375_v39, 0.0 }
 0xaa6   : > { %9856 = vmatpush.bf16.msrb.mxu3 %v15022_v35 }
 0xaaa   : > { %v9376_v22 = vpop.f32.mrf.mxu2 }
 0xaab   : > { %v9377_v0 = vadd.f32 %v15236_v48, %v9376_v22  ;;  %v15011_v48 = vld [vmem:[#allocation30 + $0x248] sm:$0xff] }
 0xaac   : > { %9746 = vmatpush.bf16.msrb.mxu2 %v15011_v48 }
 0xaad   : > { %v9382_v61 = vmax.f32 %v9377_v0, 0.0 }
 0xaaf   : > { %v9384_v24 = vpack.c.bf16 %v9382_v61, %v9381_v17 }
 0xab0   : > { %9747 = vmatpush.bf16.msrb.mxu2 %v15010_v62 }
 0xab1   : > { %9468 = vmatmul.bf16.gmra.mxu3 %v9384_v24 }
 0xb24   : > { %v9464_v12 = vpop.f32.mrf.mxu3 }
 0xb25   : > { %v9465_v23 = vadd.f32 %v15237_v28, %v9464_v12  ;;  %v15021_v12 = vld [vmem:[#allocation36 + $0x18] sm:$0xff] }
 0xb26   : > { %9857 = vmatpush.bf16.msrb.mxu3 %v15021_v12 }
 0xb27   : > { %v9474_v5 = vmax.f32 %v9465_v23, 0.0  ;;  %v15240_v23 = vld [vmem:[#allocation31 + $0x9] ss:$0 sm:$0xff] }
 0xb2a   : > { %9858 = vmatpush.bf16.msrb.mxu3 %v15020_v11 }
 0xb2c   : > { %v9466_v32 = vpop.f32.mrf.mxu3 }
 0xb2d   : > { %v9467_v4 = vadd.f32 %v15237_v28, %v9466_v32 }
 0xb2f   : > { %v9475_v58 = vmax.f32 %v9467_v4, 0.0 }
 0xb31   : > { %v9478_v6 = vpack.c.bf16 %v9475_v58, %v9474_v5  ;;  %v15241_v5 = vld [vmem:[#allocation33] ss:$0 sm:$0xff] }
 0xb33   : > { %9558 = vmatmul.bf16.vlgmr.msrb.gmra.mxu0 %v9478_v6 }
 0xb34   : > { %v9469_v15 = vpop.f32.mrf.mxu3 }
 0xb35   : > { %v9470_v1 = vadd.f32 %v15237_v28, %v9469_v15 }
 0xb37   : > { %v9476_v37 = vmax.f32 %v9470_v1, 0.0 }
 0xb3c   : > { %v9471_v33 = vpop.f32.mrf.mxu3 }
 0xb3d   : > { %v9472_v49 = vadd.f32 %v15237_v28, %v9471_v33  ;;  %v15019_v28 = vld [vmem:[#allocation36 + $0x8] sm:$0xff] }
 0xb3e   : > { %9859 = vmatpush.bf16.msrb.mxu3 %v15019_v28 }
 0xb3f   : > { %v9477_v46 = vmax.f32 %v9472_v49, 0.0 }
 0xb41   : > { %v9479_v34 = vpack.c.bf16 %v9477_v46, %v9476_v37 }
 0xb42   : > { %9860 = vmatpush.bf16.msrb.mxu3 %v15018_v3 }
 0xb43   : > { %9563 = vmatmul.bf16.gmra.mxu0 %v9479_v34 }
 0xbb0   : > { %v9559_v41 = vpop.f32.mrf.mxu0 }
 0xbb1   : > { %v9560_v18 = vadd.f32 %v15238_v59, %v9559_v41 }
 0xbb3   : > { %v9569_v51 = vmax.f32 %v9560_v18, 0.0 }
 0xbb8   : > { %v9561_v63 = vpop.f32.mrf.mxu0 }
 0xbb9   : > { %v9562_v56 = vadd.f32 %v15238_v59, %v9561_v63 }
 0xbbb   : > { %v9570_v10 = vmax.f32 %v9562_v56, 0.0 }
 0xbbd   : > { %v9573_v36 = vpack.c.bf16 %v9570_v10, %v9569_v51 }
 0xbbf   : > { %9653 = vmatmul.bf16.vlgmr.msrb.gmra.mxu1 %v9573_v36 }
 0xbc0   : > { %v9564_v26 = vpop.f32.mrf.mxu0 }
 0xbc1   : > { %v9565_v54 = vadd.f32 %v15238_v59, %v9564_v26 }
 0xbc3   : > { %v9571_v29 = vmax.f32 %v9565_v54, 0.0 }
 0xbc8   : > { %v9566_v19 = vpop.f32.mrf.mxu0 }
 0xbc9   : > { %v9567_v40 = vadd.f32 %v15238_v59, %v9566_v19 }
 0xbcb   : > { %v9572_v45 = vmax.f32 %v9567_v40, 0.0 }
 0xbcd   : > { %v9574_v44 = vpack.c.bf16 %v9572_v45, %v9571_v29 }
 0xbcf   : > { %9658 = vmatmul.bf16.gmra.mxu1 %v9574_v44 }
 0xc3c   : > { %v9654_v13 = vpop.f32.mrf.mxu1 }
 0xc3d   : > { %v9655_v52 = vadd.f32 %v15239_v14, %v9654_v13 }
 0xc3f   : > { %v9664_v47 = vmax.f32 %v9655_v52, 0.0 }
 0xc44   : > { %v9656_v7 = vpop.f32.mrf.mxu1 }
 0xc45   : > { %v9657_v27 = vadd.f32 %v15239_v14, %v9656_v7 }
 0xc47   : > { %v9665_v39 = vmax.f32 %v9657_v27, 0.0 }
 0xc49   : > { %v9668_v22 = vpack.c.bf16 %v9665_v39, %v9664_v47 }
 0xc4b   : > { %9748 = vmatmul.bf16.vlgmr.msrb.gmra.mxu2 %v9668_v22 }
 0xc4c   : > { %v9659_v0 = vpop.f32.mrf.mxu1 }
 0xc4d   : > { %v9660_v17 = vadd.f32 %v15239_v14, %v9659_v0 }
 0xc4f   : > { %v9666_v20 = vmax.f32 %v9660_v17, 0.0 }
 0xc54   : > { %v9661_v61 = vpop.f32.mrf.mxu1 }
 0xc55   : > { %v9662_v24 = vadd.f32 %v15239_v14, %v9661_v61 }
 0xc57   : > { %v9667_v53 = vmax.f32 %v9662_v24, 0.0 }
 0xc59   : > { %v9669_v8 = vpack.c.bf16 %v9667_v53, %v9666_v20 }
 0xc5b   : > { %9753 = vmatmul.bf16.gmra.mxu2 %v9669_v8 }
 0xcce   : > { %v9749_v32 = vpop.f32.mrf.mxu2 }
 0xccf   : > { %v9750_v4 = vadd.f32 %v15240_v23, %v9749_v32 }
 0xcd1   : > { %v9759_v9 = vmax.f32 %v9750_v4, 0.0 }
 0xcd3   : > { %v9767_v6 = vmul.f32 %v15241_v5, %v9759_v9 }
 0xcd5   : > { %v9775_v33 = vadd.f32 %v15242_v21, %v9767_v6 }
 0xcd6   : > { %v9751_v58 = vpop.f32.mrf.mxu2 }
 0xcd7   : > { %v9752_v15 = vadd.f32 %v15240_v23, %v9751_v58  ;;  %v9779_v34 = vmax.f32 %v9775_v33, 0.0 }
 0xcd9   : > { %v9760_v1 = vmax.f32 %v9752_v15, 0.0 }
 0xcdb   : > { %v9768_v49 = vmul.f32 %v15241_v5, %v9760_v1 }
 0xcdd   : > { %v9776_v37 = vadd.f32 %v15242_v21, %v9768_v49 }
 0xcde   : > { %v9754_v46 = vpop.f32.mrf.mxu2 }
 0xcdf   : > { %v9780_v42 = vmax.f32 %v9776_v37, 0.0  ;;  %v9755_v60 = vadd.f32 %v15240_v23, %v9754_v46 }
 0xce1   : > { %v9783_v50 = vpack.c.bf16 %v9780_v42, %v9779_v34  ;;  %v9761_v55 = vmax.f32 %v9755_v60, 0.0 }
 0xce3   : > { %9861 = vmatmul.bf16.vlgmr.msrb.gmra.mxu3 %v9783_v50  ;;  %v9769_v43 = vmul.f32 %v15241_v5, %v9761_v55 }
 0xce5   : > { %v9777_v18 = vadd.f32 %v15242_v21, %v9769_v43 }
 0xce6   : > { %v9756_v41 = vpop.f32.mrf.mxu2 }
 0xce7   : > { %v9757_v59 = vadd.f32 %v15240_v23, %v9756_v41  ;;  %v9781_v16 = vmax.f32 %v9777_v18, 0.0 }
 0xce9   : > { %v9762_v57 = vmax.f32 %v9757_v59, 0.0 }
 0xceb   : > { %v9770_v63 = vmul.f32 %v15241_v5, %v9762_v57 }
 0xced   : > { %v9778_v56 = vadd.f32 %v15242_v21, %v9770_v63 }
 0xcef   : > { %v9782_v51 = vmax.f32 %v9778_v56, 0.0 }
 0xcf1   : > { %v9784_v10 = vpack.c.bf16 %v9782_v51, %v9781_v16 }
 0xcf3   : > { %9866 = vmatmul.bf16.gmra.mxu3 %v9784_v10 }
 0xd66   : > { %v9862_v36 = vpop.f32.mrf.mxu3 }
 0xd67   : > { %v9863_v54 = vadd.f32 %v15243_v31, %v9862_v36 }
 0xd6e   : > { %v9864_v26 = vpop.f32.mrf.mxu3 }
 0xd6f   : > { %v9865_v19 = vadd.f32 %v15243_v31, %v9864_v26 }
 0xd71   : > { %v15029_v40 = vpack.c.bf16 %v9865_v19, %v9863_v54 }
 0xd73   : > { %15030 = vst [vmem:[%s1136_s10] sm:$0xff] %v15029_v40  }
 0xd76   : > { %v9867_v29 = vpop.f32.mrf.mxu3 }
 0xd77   : > { %v9868_v44 = vadd.f32 %v15243_v31, %v9867_v29 }
 0xd7e   : > { %v9869_v45 = vpop.f32.mrf.mxu3 }
 0xd7f   : > { %v9870_v38 = vadd.f32 %v15243_v31, %v9869_v45 }
 0xd81   : > { %v15034_v48 = vpack.c.bf16 %v9870_v38, %v9868_v44 }
 0xd83   : > { %15036 = vst [vmem:[%s1136_s10 + $0x8] sm:$0xff] %v15034_v48  }
 0xd84 PF: > { %s17338_s12 = sld [smem:[#allocation52_spill]] }
 0xd8a   : > { %s48_s29 = sadd.s32 1, %s17338_s12  }
 0xd8b   : > { %p45_p6 = scmp.ge.s32.totalorder %s48_s29, 4  }
 0xd8d   :  { %47 = sbr.rel (!%p45_p6) target bundleno = 27 (0x1b), region = 265 }
 0xd92   :  { %9902 = vsyncpa [#allocation3], 1 }
 0xd93   :  { %9904 = vsyncpa [#allocation3 + $0x1], 1 }
 0xd94   :  { %9905 = vsyncpa [#allocation5], 1 }
 0xd95   :  { %9906 = vsyncpa [#allocation8], 1 }
 0xd96   :  { %9907 = vsyncpa [#allocation11], 1 }
 0xd97   :  { %9908 = vsyncpa [#allocation14], 1 }
 0xd98   :  { %9909 = vsyncpa [#allocation17], 1 }
 0xd99   :  { %9910 = vsyncpa [#allocation20], 1 }
 0xd9a   :  { %9911 = vsyncpa [#allocation23], 1 }
 0xd9b   :  { %9912 = vsyncpa [#allocation26], 1 }
 0xd9c   :  { %9913 = vsyncpa [#allocation29], 1 }
 0xd9d   :  { %9914 = vsyncpa [#allocation32], 1 }
 0xd9e   :  { %9915 = vsyncpa [#allocation35], 1 }
 0xd9f   :  { %9916 = vsyncpa [#allocation38], 1 }

</bundles_post_ra>
